<compile_context>
chip_gen: v5e
topology: v5e:2x2
jax: 0.10.0
libtpu: 0.0.40
codegen_flags: <defaults>
</compile_context>

<pallas_src>
import jax
import jax.numpy as jnp
from jax.experimental import pallas as pl
from jax.experimental.pallas import tpu as pltpu


# ----------------------------------------------------------------------------
# Fused kernel
# ----------------------------------------------------------------------------
def make_down_block_kernel(H, W, groups, eps, layer_sizes, samples_per_step,
                           c_max):
    """layer_sizes[i] = number of parameter refs of resnet layer i
    (8, or 10 when the layer has a 1x1 conv shortcut)."""
    HW = H * W
    num_layers = len(layer_sizes)
    taps = [(ky, kx) for ky in range(3) for kx in range(3)]

    def kernel(*refs):
        x_ref, tproj_ref, tapmask_ref, ssel_ref = refs[:4]
        pos = 4
        layer_refs = []
        for nl in layer_sizes:
            layer_refs.append(refs[pos:pos + nl])
            pos += nl
        dsw_ref, dsb_ref = refs[pos], refs[pos + 1]
        out_refs = refs[pos + 2:pos + 2 + num_layers + 1]
        stack_ref = refs[-1]                 # VMEM (9*c_max, HW) im2col K-stack

        def silu(v):
            return v * jax.nn.sigmoid(v)

        # Even-channel indicator, hoisted (computed once per grid step); used
        # by the Cg==2 GroupNorm pair aggregation.
        evenf = (jax.lax.broadcasted_iota(jnp.int32, (c_max, 1), 0) % 2
                 == 0).astype(jnp.float32)

        # GroupNorm (affine, biased variance, centered two-pass) + SiLU on a
        # channels-first (C, HW) activation.  Group aggregation stays off the
        # MXU for the exercised configs.
        def gn_silu(h, g_ref, b_ref):
            C = h.shape[0]
            Cg = C // groups
            inv_cnt = 1.0 / float(Cg * HW)

            def gsum(v):                       # (C, HW) -> (C, 1) group sums
                if Cg == 1:                    # each channel is its own group
                    return jnp.sum(v, axis=1, keepdims=True)
                if Cg == 2:                    # pair-swap on the sublane axis
                    ef = evenf[0:C]
                    partner = (ef * pltpu.roll(v, shift=C - 1, axis=0)
                               + (1.0 - ef) * pltpu.roll(v, shift=1, axis=0))
                    return jnp.sum(v + partner, axis=1, keepdims=True)
                # Generic fallback (not exercised here): tiny same-group matmul.
                r = jax.lax.broadcasted_iota(jnp.int32, (C, C), 0) // Cg
                c = jax.lax.broadcasted_iota(jnp.int32, (C, C), 1) // Cg
                agg = (r == c).astype(jnp.float32)
                return jnp.dot(agg, jnp.sum(v, axis=1, keepdims=True),
                               preferred_element_type=jnp.float32)

            mean = gsum(h) * inv_cnt
            d = h - mean
            var = gsum(d * d) * inv_cnt
            y = d * (jax.lax.rsqrt(var + eps) * g_ref[...]) + b_ref[...]
            return silu(y)

        # 3x3 conv, stride 1, 'same' zero padding, channels-first.
        # The 9 shifted taps are produced in-register with lane rolls
        # (pltpu.roll == jnp.roll semantics) + precomputed wrap masks, stacked
        # into (9*Cin, HW), and the conv is ONE matmul (Cout,9*Cin)@(9*Cin,HW).
        def conv3x3(h, w_ref, b_ref):
            C = h.shape[0]
            for t, (ky, kx) in enumerate(taps):
                off = (ky - 1) * W + (kx - 1)
                if off == 0:
                    tap = h                     # center tap: no shift, no mask
                else:
                    tap = pltpu.roll(h, shift=(-off) % HW, axis=1)
                    tap = tap * tapmask_ref[t]  # kill row/col wrap-around
                stack_ref[t * C:(t + 1) * C, :] = tap
            return (jnp.dot(w_ref[...], stack_ref[0:9 * C, :],
                            preferred_element_type=jnp.float32) + b_ref[...])

        # DualResnetBlock chain + downsample, per batch element in this block.
        # time_embedding_norm='default', dropout=0.0, output_scale_factor=1.
        for smp in range(samples_per_step):
            h = x_ref[smp]                                   # (Cin, HW)
            for li in range(num_layers):
                prm = layer_refs[li]
                n1g, n1b, c1w, c1b, n2g, n2b, c2w, c2b = prm[:8]
                hh = gn_silu(h, n1g, n1b)
                hh = conv3x3(hh, c1w, c1b)
                hh = hh + tproj_ref[smp, li]                 # (Cout, 1) bcast
                hh = gn_silu(hh, n2g, n2b)
                # dropout(p=0.0) -> identity
                hh = conv3x3(hh, c2w, c2b)
                if len(prm) == 10:                           # 1x1 conv shortcut
                    sc = (jnp.dot(prm[8][...], h,
                                  preferred_element_type=jnp.float32)
                          + prm[9][...])
                else:
                    sc = h
                h = sc + hh                                  # / scale (=1)
                out_refs[li][smp] = h

            # Downsample: conv 3x3, stride 2, padding 1 == full stride-1 conv
            # followed by one even-row / even-col selection matmul.
            full = conv3x3(h, dsw_ref, dsb_ref)
            out_refs[num_layers][smp] = jnp.dot(
                full, ssel_ref[...], preferred_element_type=jnp.float32)

    return kernel


def _default_samples_per_step(N):
    """One batch element per grid step only where it buys a second TensorCore
    (v7x); on single-TC chips (v5e/v6e) fold the whole batch into one grid
    step to avoid paying the fixed per-step cost / pipeline prologue twice."""
    try:
        kind = jax.devices()[0].device_kind.lower()
    except Exception:
        kind = ""
    if "v7" in kind or "7x" in kind:
        return 1
    return N


# ----------------------------------------------------------------------------
# Python wrapper (single pallas_call)
# ----------------------------------------------------------------------------
def separable_attn_down_block_forward(hidden_states, temb, params, *, groups,
                                      eps=1e-6, samples_per_step=None):
    """SeparableAttnDownBlock.forward (add_attention=False, downsample='conv').

    hidden_states: (N, C_in, H, W) NCHW; temb: (N, temb_channels).
    Returns (hidden_states, output_states) like the PyTorch module.
    """
    N, Cin, H, W = hidden_states.shape
    resnets = params["resnets"]
    num_layers = len(resnets)
    Cout = resnets[0]["conv1_w"].shape[1]
    Cmax = max(Cin, Cout)
    HW = H * W
    Hd, Wd = H // 2, W // 2
    HWd = Hd * Wd

    nb = _default_samples_per_step(N) if samples_per_step is None \
        else samples_per_step
    if N % nb != 0:
        nb = 1
    steps = N // nb

    # NCHW is already channels-first: only free reshapes, no transposes.
    x = hidden_states.reshape(N, Cin, HW).astype(jnp.float32)

    # Time embedding: SiLU + per-layer Linear precomputed with one tiny XLA
    # matmul (the in-kernel (Cout,T)x(T,1) dots were pure MXU drain latency).
    tact = temb.astype(jnp.float32)
    tact = tact * jax.nn.sigmoid(tact)
    tw = jnp.stack([p["time_w"] for p in resnets])            # (L, Cout, T)
    tb = jnp.stack([p["time_b"][:, 0] for p in resnets])      # (L, Cout)
    tproj = (jnp.einsum("nt,lct->nlc", tact, tw) + tb[None]
             ).reshape(N, num_layers, Cout, 1)

    # Per-tap wrap-around masks for the rolled windows (row and column edges),
    # and the stride-2 even-row / even-col selection matrix.
    yy = jnp.arange(HW, dtype=jnp.int32) // W
    xx = jnp.arange(HW, dtype=jnp.int32) % W
    masks = []
    for ky in range(3):
        for kx in range(3):
            dy, dx = ky - 1, kx - 1
            ok = ((yy + dy >= 0) & (yy + dy <= H - 1)
                  & (xx + dx >= 0) & (xx + dx <= W - 1))
            masks.append(ok.astype(jnp.float32))
    tapmask = jnp.stack(masks, axis=0).reshape(9, 1, HW)

    rows = jnp.arange(HW, dtype=jnp.int32)[:, None]
    cols = jnp.arange(HWd, dtype=jnp.int32)[None, :]
    ssel = (rows == (cols // Wd) * 2 * W + (cols % Wd) * 2).astype(jnp.float32)

    def conv_flat(w9):   # (9, Cout, Cin) -> (Cout, 9*Cin), K index = t*Cin+ci
        k, co, ci = w9.shape
        return jnp.transpose(w9, (1, 0, 2)).reshape(co, k * ci)

    def layer_args(p):
        args = [p["norm1_gamma"], p["norm1_beta"],
                conv_flat(p["conv1_w"]), p["conv1_b"],
                p["norm2_gamma"], p["norm2_beta"],
                conv_flat(p["conv2_w"]), p["conv2_b"]]
        if "sc_w" in p:
            args += [p["sc_w"], p["sc_b"]]
        return args

    per_layer = [layer_args(p) for p in resnets]
    layer_sizes = [len(a) for a in per_layer]
    inputs = [x, tproj, tapmask, ssel]
    for a in per_layer:
        inputs += a
    inputs += [conv_flat(params["downsample"]["w"]), params["downsample"]["b"]]

    def const_spec(shape):
        zeros = (0,) * len(shape)
        return pl.BlockSpec(shape, lambda n, _z=zeros: _z)

    in_specs = ([pl.BlockSpec((nb, Cin, HW), lambda n: (n, 0, 0)),
                 pl.BlockSpec((nb, num_layers, Cout, 1),
                              lambda n: (n, 0, 0, 0))]
                + [const_spec(a.shape) for a in inputs[2:]])

    out_shape = tuple([jax.ShapeDtypeStruct((N, Cout, HW), jnp.float32)
                       for _ in range(num_layers)]
                      + [jax.ShapeDtypeStruct((N, Cout, HWd), jnp.float32)])
    out_specs = tuple([pl.BlockSpec((nb, Cout, HW), lambda n: (n, 0, 0))
                       for _ in range(num_layers)]
                      + [pl.BlockSpec((nb, Cout, HWd), lambda n: (n, 0, 0))])

    kernel = make_down_block_kernel(H, W, groups, eps, layer_sizes, nb, Cmax)

    # VMEM budget (all values + the (9*Cmax, HW) tap stack) is well under
    # 1 MiB at this configuration on every TPU generation; re-derive (raise
    # vmem_limit_bytes or split along HW) before reusing at diffusion-scale
    # shapes, especially on v7x's smaller 64 MiB physical VMEM.
    outs = pl.pallas_call(
        kernel,
        out_shape=out_shape,
        grid=(steps,),
        in_specs=in_specs,
        out_specs=out_specs,
        scratch_shapes=[pltpu.VMEM((9 * Cmax, HW), jnp.float32)],
        compiler_params=pltpu.CompilerParams(
            dimension_semantics=(("parallel",) if steps > 1
                                 else ("arbitrary",))),
    )(*inputs)

    output_states = tuple(o.reshape(N, Cout, H, W) for o in outs[:num_layers])
    hidden_out = outs[num_layers].reshape(N, Cout, Hd, Wd)
    output_states = output_states + (hidden_out,)
    return hidden_out, output_states


# ----------------------------------------------------------------------------
# Deterministic parameter initialization
# ----------------------------------------------------------------------------
def init_params(key, *, in_channels, out_channels, temb_channels, num_layers=2):
    keys = iter(jax.random.split(key, 64))

    def nrm(shape, scale=0.1):
        return scale * jax.random.normal(next(keys), shape, jnp.float32)

    def resnet_params(cin, cout):
        # Conv weights are stored as (kh*kw, Cout, Cin) with tap t = ky*3+kx;
        # a PyTorch (Cout, Cin, kh, kw) weight maps via
        # w.permute(2, 3, 0, 1).reshape(9, Cout, Cin).
        # time_w keeps torch.nn.Linear's (out_features, in_features) layout.
        p = dict(
            norm1_gamma=1.0 + nrm((cin, 1)),
            norm1_beta=nrm((cin, 1)),
            conv1_w=nrm((9, cout, cin)),
            conv1_b=nrm((cout, 1)),
            time_w=nrm((cout, temb_channels)),
            time_b=nrm((cout, 1)),
            norm2_gamma=1.0 + nrm((cout, 1)),
            norm2_beta=nrm((cout, 1)),
            conv2_w=nrm((9, cout, cout)),
            conv2_b=nrm((cout, 1)),
        )
        if cin != cout:                          # use_in_shortcut -> 1x1 conv
            p["sc_w"] = nrm((cout, cin))
            p["sc_b"] = nrm((cout, 1))
        return p

    resnets = [resnet_params(in_channels if i == 0 else out_channels,
                             out_channels) for i in range(num_layers)]
    downsample = dict(w=nrm((9, out_channels, out_channels)),
                      b=nrm((out_channels, 1)))
    return dict(resnets=resnets, downsample=downsample)


# ----------------------------------------------------------------------------
# Pure-JAX reference (same math as the PyTorch module) for a sanity check
# ----------------------------------------------------------------------------
def reference_forward(hidden_states, temb, params, *, groups, eps=1e-6):
    def silu(v):
        return v * jax.nn.sigmoid(v)

    def group_norm(h, gamma, beta):
        n, c, hh, ww = h.shape
        hr = h.reshape(n, groups, c // groups, hh, ww)
        mean = jnp.mean(hr, axis=(2, 3, 4), keepdims=True)
        var = jnp.mean((hr - mean) ** 2, axis=(2, 3, 4), keepdims=True)
        hn = ((hr - mean) * jax.lax.rsqrt(var + eps)).reshape(n, c, hh, ww)
        return hn * gamma.reshape(1, -1, 1, 1) + beta.reshape(1, -1, 1, 1)

    def conv3x3(h, w9, b, stride=1):
        k, co, ci = w9.shape
        w = jnp.transpose(w9.reshape(3, 3, co, ci), (2, 3, 0, 1))   # OIHW
        out = jax.lax.conv_general_dilated(
            h, w, (stride, stride), ((1, 1), (1, 1)),
            dimension_numbers=("NCHW", "OIHW", "NCHW"))
        return out + b.reshape(1, -1, 1, 1)

    tact = silu(temb)
    hs = hidden_states
    outs = ()
    for p in params["resnets"]:
        h = silu(group_norm(hs, p["norm1_gamma"], p["norm1_beta"]))
        h = conv3x3(h, p["conv1_w"], p["conv1_b"])
        tp = tact @ p["time_w"].T + p["time_b"][:, 0]
        h = h + tp[:, :, None, None]
        h = silu(group_norm(h, p["norm2_gamma"], p["norm2_beta"]))
        h = conv3x3(h, p["conv2_w"], p["conv2_b"])
        if "sc_w" in p:
            sc = (jnp.einsum("oc,nchw->nohw", p["sc_w"], hs)
                  + p["sc_b"].reshape(1, -1, 1, 1))
        else:
            sc = hs
        hs = sc + h
        outs = outs + (hs,)
    hs = conv3x3(hs, params["downsample"]["w"], params["downsample"]["b"],
                 stride=2)
    outs = outs + (hs,)
    return hs, outs


# ----------------------------------------------------------------------------
# Demo
# ----------------------------------------------------------------------------
if __name__ == "__main__":
    N = 2
    in_channels = 4
    out_channels = 8
    temb_channels = 32
    resnet_groups = 4
    num_layers = 2
    H = W = 16

    root = jax.random.PRNGKey(0)
    kp, kx, kt = jax.random.split(root, 3)

    params = init_params(kp, in_channels=in_channels,
                         out_channels=out_channels,
                         temb_channels=temb_channels, num_layers=num_layers)
    hidden_states = jax.random.normal(kx, (N, in_channels, H, W), jnp.float32)
    temb = jax.random.normal(kt, (N, temb_channels), jnp.float32)

    hidden_out, output_states = separable_attn_down_block_forward(
        hidden_states, temb, params, groups=resnet_groups, eps=1e-6)
    hidden_out = jax.block_until_ready(hidden_out)

    assert hidden_out.shape == (N, out_channels, H // 2, W // 2)
    assert output_states[0].shape == (N, out_channels, H, W)
    assert output_states[1].shape == (N, out_channels, H, W)
    assert output_states[2].shape == (N, out_channels, H // 2, W // 2)
    for o in (hidden_out,) + tuple(output_states):
        assert bool(jnp.all(jnp.isfinite(o)))

    # Sanity check vs. a pure-JAX reference (tolerance covers the MXU's
    # reduced-precision f32 matmul passes; real bugs produce O(1) errors).
    ref_hidden, ref_outputs = reference_forward(
        hidden_states, temb, params, groups=resnet_groups, eps=1e-6)
    for got, want in zip(output_states, ref_outputs):
        err = float(jnp.max(jnp.abs(got - want)))
        assert err < 1e-1, f"max abs err {err}"
    assert float(jnp.max(jnp.abs(hidden_out - ref_hidden))) < 1e-1

    print("KERNEL_OK")
</pallas_src>

<mosaic_0001>
module attributes {stable_mosaic.version = 11 : i64} {
  func.func @kernel(%arg0: i32, %arg1: memref<2x4x256xf32, #tpu.memory_space<vmem>>, %arg2: memref<2x2x8x1xf32, #tpu.memory_space<vmem>>, %arg3: memref<9x1x256xf32, #tpu.memory_space<vmem>>, %arg4: memref<256x64xf32, #tpu.memory_space<vmem>>, %arg5: memref<4x1xf32, #tpu.memory_space<vmem>>, %arg6: memref<4x1xf32, #tpu.memory_space<vmem>>, %arg7: memref<8x36xf32, #tpu.memory_space<vmem>>, %arg8: memref<8x1xf32, #tpu.memory_space<vmem>>, %arg9: memref<8x1xf32, #tpu.memory_space<vmem>>, %arg10: memref<8x1xf32, #tpu.memory_space<vmem>>, %arg11: memref<8x72xf32, #tpu.memory_space<vmem>>, %arg12: memref<8x1xf32, #tpu.memory_space<vmem>>, %arg13: memref<8x4xf32, #tpu.memory_space<vmem>>, %arg14: memref<8x1xf32, #tpu.memory_space<vmem>>, %arg15: memref<8x1xf32, #tpu.memory_space<vmem>>, %arg16: memref<8x1xf32, #tpu.memory_space<vmem>>, %arg17: memref<8x72xf32, #tpu.memory_space<vmem>>, %arg18: memref<8x1xf32, #tpu.memory_space<vmem>>, %arg19: memref<8x1xf32, #tpu.memory_space<vmem>>, %arg20: memref<8x1xf32, #tpu.memory_space<vmem>>, %arg21: memref<8x72xf32, #tpu.memory_space<vmem>>, %arg22: memref<8x1xf32, #tpu.memory_space<vmem>>, %arg23: memref<8x72xf32, #tpu.memory_space<vmem>>, %arg24: memref<8x1xf32, #tpu.memory_space<vmem>>, %arg25: memref<2x8x256xf32, #tpu.memory_space<vmem>>, %arg26: memref<2x8x256xf32, #tpu.memory_space<vmem>>, %arg27: memref<2x8x64xf32, #tpu.memory_space<vmem>>, %arg28: memref<72x256xf32, #tpu.memory_space<vmem>>) attributes {dimension_semantics = [#tpu.dimension_semantics<arbitrary>], iteration_bounds = array<i64: 1>, scalar_prefetch = 0 : i64, scratch_operands = 1 : i64, tpu.core_type = #tpu.core_type<tc>, window_params = [{transform_indices = @transform_0, window_bounds = array<i64: 2, 4, 256>}, {transform_indices = @transform_1, window_bounds = array<i64: 2, 2, 8, 1>}, {pipeline_mode = #tpu.pipeline_mode<synchronous>, transform_indices = @transform_2, window_bounds = array<i64: 9, 1, 256>}, {pipeline_mode = #tpu.pipeline_mode<synchronous>, transform_indices = @transform_3, window_bounds = array<i64: 256, 64>}, {pipeline_mode = #tpu.pipeline_mode<synchronous>, transform_indices = @transform_4, window_bounds = array<i64: 4, 1>}, {pipeline_mode = #tpu.pipeline_mode<synchronous>, transform_indices = @transform_5, window_bounds = array<i64: 4, 1>}, {pipeline_mode = #tpu.pipeline_mode<synchronous>, transform_indices = @transform_6, window_bounds = array<i64: 8, 36>}, {pipeline_mode = #tpu.pipeline_mode<synchronous>, transform_indices = @transform_7, window_bounds = array<i64: 8, 1>}, {pipeline_mode = #tpu.pipeline_mode<synchronous>, transform_indices = @transform_8, window_bounds = array<i64: 8, 1>}, {pipeline_mode = #tpu.pipeline_mode<synchronous>, transform_indices = @transform_9, window_bounds = array<i64: 8, 1>}, {pipeline_mode = #tpu.pipeline_mode<synchronous>, transform_indices = @transform_10, window_bounds = array<i64: 8, 72>}, {pipeline_mode = #tpu.pipeline_mode<synchronous>, transform_indices = @transform_11, window_bounds = array<i64: 8, 1>}, {pipeline_mode = #tpu.pipeline_mode<synchronous>, transform_indices = @transform_12, window_bounds = array<i64: 8, 4>}, {pipeline_mode = #tpu.pipeline_mode<synchronous>, transform_indices = @transform_13, window_bounds = array<i64: 8, 1>}, {pipeline_mode = #tpu.pipeline_mode<synchronous>, transform_indices = @transform_14, window_bounds = array<i64: 8, 1>}, {pipeline_mode = #tpu.pipeline_mode<synchronous>, transform_indices = @transform_15, window_bounds = array<i64: 8, 1>}, {pipeline_mode = #tpu.pipeline_mode<synchronous>, transform_indices = @transform_16, window_bounds = array<i64: 8, 72>}, {pipeline_mode = #tpu.pipeline_mode<synchronous>, transform_indices = @transform_17, window_bounds = array<i64: 8, 1>}, {pipeline_mode = #tpu.pipeline_mode<synchronous>, transform_indices = @transform_18, window_bounds = array<i64: 8, 1>}, {pipeline_mode = #tpu.pipeline_mode<synchronous>, transform_indices = @transform_19, window_bounds = array<i64: 8, 1>}, {pipeline_mode = #tpu.pipeline_mode<synchronous>, transform_indices = @transform_20, window_bounds = array<i64: 8, 72>}, {pipeline_mode = #tpu.pipeline_mode<synchronous>, transform_indices = @transform_21, window_bounds = array<i64: 8, 1>}, {pipeline_mode = #tpu.pipeline_mode<synchronous>, transform_indices = @transform_22, window_bounds = array<i64: 8, 72>}, {pipeline_mode = #tpu.pipeline_mode<synchronous>, transform_indices = @transform_23, window_bounds = array<i64: 8, 1>}, {transform_indices = @transform_24, window_bounds = array<i64: 2, 8, 256>}, {transform_indices = @transform_25, window_bounds = array<i64: 2, 8, 256>}, {transform_indices = @transform_26, window_bounds = array<i64: 2, 8, 64>}]} {
    %0 = tpu.iota {dimensions = array<i32: 0>} : vector<8x1xi32>
    %c2_i32 = arith.constant 2 : i32
    %c0_i32 = arith.constant 0 : i32
    %1 = arith.cmpi eq, %c2_i32, %c0_i32 : i32
    %c1_i32 = arith.constant 1 : i32
    %2 = arith.select %1, %c1_i32, %c2_i32 : i32
    %3 = vector.broadcast %2 : i32 to vector<8x1xi32>
    %4 = arith.remsi %0, %3 : vector<8x1xi32>
    %c0_i32_0 = arith.constant 0 : i32
    %5 = vector.broadcast %c0_i32_0 : i32 to vector<8x1xi32>
    %6 = arith.cmpi ne, %4, %5 : vector<8x1xi32>
    %c0_i32_1 = arith.constant 0 : i32
    %7 = vector.broadcast %c0_i32_1 : i32 to vector<8x1xi32>
    %8 = arith.cmpi slt, %4, %7 : vector<8x1xi32>
    %c0_i32_2 = arith.constant 0 : i32
    %9 = arith.cmpi slt, %2, %c0_i32_2 : i32
    %10 = vector.broadcast %9 : i1 to vector<8x1xi1>
    %11 = vector.broadcast %10 : vector<8x1xi1> to vector<8x1xi1>
    %12 = arith.xori %8, %11 : vector<8x1xi1>
    %13 = arith.andi %12, %6 : vector<8x1xi1>
    %14 = vector.broadcast %2 : i32 to vector<8x1xi32>
    %15 = arith.addi %4, %14 : vector<8x1xi32>
    %16 = arith.select %13, %15, %4 : vector<8x1xi1>, vector<8x1xi32>
    %c0_i32_3 = arith.constant 0 : i32
    %17 = vector.broadcast %c0_i32_3 : i32 to vector<8x1xi32>
    %18 = arith.cmpi eq, %16, %17 : vector<8x1xi32>
    %19 = arith.extui %18 : vector<8x1xi1> to vector<8x1xi32>
    %20 = arith.sitofp %19 : vector<8x1xi32> to vector<8x1xf32>
    %c0 = arith.constant 0 : index
    %c0_4 = arith.constant 0 : index
    %c0_5 = arith.constant 0 : index
    %21 = vector.load %arg1[%c0, %c0_4, %c0_5] : memref<2x4x256xf32, #tpu.memory_space<vmem>>, vector<1x4x256xf32>
    %22 = vector.shape_cast %21 : vector<1x4x256xf32> to vector<4x256xf32>
    %cst = arith.constant dense<0.000000e+00> : vector<4xf32>
    %23 = vector.multi_reduction <add>, %22, %cst [1] : vector<4x256xf32> to vector<4xf32>
    %24 = vector.shape_cast %23 : vector<4xf32> to vector<4x1xf32>
    %cst_6 = arith.constant 3.906250e-03 : f32
    %25 = vector.broadcast %cst_6 : f32 to vector<4x1xf32>
    %26 = arith.mulf %24, %25 : vector<4x1xf32>
    %27 = vector.broadcast %26 : vector<4x1xf32> to vector<4x256xf32>
    %28 = arith.subf %22, %27 : vector<4x256xf32>
    %29 = arith.mulf %28, %28 : vector<4x256xf32>
    %cst_7 = arith.constant dense<0.000000e+00> : vector<4xf32>
    %30 = vector.multi_reduction <add>, %29, %cst_7 [1] : vector<4x256xf32> to vector<4xf32>
    %31 = vector.shape_cast %30 : vector<4xf32> to vector<4x1xf32>
    %cst_8 = arith.constant 3.906250e-03 : f32
    %32 = vector.broadcast %cst_8 : f32 to vector<4x1xf32>
    %33 = arith.mulf %31, %32 : vector<4x1xf32>
    %cst_9 = arith.constant 9.99999997E-7 : f32
    %34 = vector.broadcast %cst_9 : f32 to vector<4x1xf32>
    %35 = arith.addf %33, %34 : vector<4x1xf32>
    %36 = math.rsqrt %35 : vector<4x1xf32>
    %c0_10 = arith.constant 0 : index
    %c0_11 = arith.constant 0 : index
    %37 = vector.load %arg5[%c0_10, %c0_11] : memref<4x1xf32, #tpu.memory_space<vmem>>, vector<4x1xf32>
    %38 = arith.mulf %36, %37 : vector<4x1xf32>
    %39 = vector.broadcast %38 : vector<4x1xf32> to vector<4x256xf32>
    %40 = arith.mulf %28, %39 : vector<4x256xf32>
    %c0_12 = arith.constant 0 : index
    %c0_13 = arith.constant 0 : index
    %41 = vector.load %arg6[%c0_12, %c0_13] : memref<4x1xf32, #tpu.memory_space<vmem>>, vector<4x1xf32>
    %42 = vector.broadcast %41 : vector<4x1xf32> to vector<4x256xf32>
    %43 = arith.addf %40, %42 : vector<4x256xf32>
    %44 = arith.negf %43 : vector<4x256xf32>
    %45 = math.exp %44 : vector<4x256xf32>
    %cst_14 = arith.constant 1.000000e+00 : f32
    %46 = vector.broadcast %cst_14 : f32 to vector<4x256xf32>
    %47 = arith.addf %46, %45 : vector<4x256xf32>
    %48 = arith.divf %46, %47 : vector<4x256xf32>
    %49 = arith.mulf %43, %48 : vector<4x256xf32>
    %c17_i32 = arith.constant 17 : i32
    %50 = tpu.dynamic_rotate %49 by %c17_i32 dim 1 : vector<4x256xf32>, i32 -> vector<4x256xf32>
    %c0_15 = arith.constant 0 : index
    %c0_16 = arith.constant 0 : index
    %c0_17 = arith.constant 0 : index
    %51 = vector.load %arg3[%c0_15, %c0_16, %c0_17] : memref<9x1x256xf32, #tpu.memory_space<vmem>>, vector<1x1x256xf32>
    %52 = vector.shape_cast %51 : vector<1x1x256xf32> to vector<1x256xf32>
    %53 = vector.broadcast %52 : vector<1x256xf32> to vector<4x256xf32>
    %54 = arith.mulf %50, %53 : vector<4x256xf32>
    %c0_18 = arith.constant 0 : index
    %c0_19 = arith.constant 0 : index
    %55 = vector.load %arg28[%c0_18, %c0_19] : memref<72x256xf32, #tpu.memory_space<vmem>>, vector<4x256xf32>
    tpu.vector_store %arg28[%c0_18, %c0_19], %54 {strides = array<i32>} : memref<72x256xf32, #tpu.memory_space<vmem>>, vector<4x256xf32>,
    %c16_i32 = arith.constant 16 : i32
    %56 = tpu.dynamic_rotate %49 by %c16_i32 dim 1 : vector<4x256xf32>, i32 -> vector<4x256xf32>
    %c1 = arith.constant 1 : index
    %c0_20 = arith.constant 0 : index
    %c0_21 = arith.constant 0 : index
    %57 = vector.load %arg3[%c1, %c0_20, %c0_21] : memref<9x1x256xf32, #tpu.memory_space<vmem>>, vector<1x1x256xf32>
    %58 = vector.shape_cast %57 : vector<1x1x256xf32> to vector<1x256xf32>
    %59 = vector.broadcast %58 : vector<1x256xf32> to vector<4x256xf32>
    %60 = arith.mulf %56, %59 : vector<4x256xf32>
    %c4 = arith.constant 4 : index
    %c0_22 = arith.constant 0 : index
    %61 = vector.load %arg28[%c4, %c0_22] : memref<72x256xf32, #tpu.memory_space<vmem>>, vector<4x256xf32>
    tpu.vector_store %arg28[%c4, %c0_22], %60 {strides = array<i32>} : memref<72x256xf32, #tpu.memory_space<vmem>>, vector<4x256xf32>,
    %c15_i32 = arith.constant 15 : i32
    %62 = tpu.dynamic_rotate %49 by %c15_i32 dim 1 : vector<4x256xf32>, i32 -> vector<4x256xf32>
    %c2 = arith.constant 2 : index
    %c0_23 = arith.constant 0 : index
    %c0_24 = arith.constant 0 : index
    %63 = vector.load %arg3[%c2, %c0_23, %c0_24] : memref<9x1x256xf32, #tpu.memory_space<vmem>>, vector<1x1x256xf32>
    %64 = vector.shape_cast %63 : vector<1x1x256xf32> to vector<1x256xf32>
    %65 = vector.broadcast %64 : vector<1x256xf32> to vector<4x256xf32>
    %66 = arith.mulf %62, %65 : vector<4x256xf32>
    %c8 = arith.constant 8 : index
    %c0_25 = arith.constant 0 : index
    %67 = vector.load %arg28[%c8, %c0_25] : memref<72x256xf32, #tpu.memory_space<vmem>>, vector<4x256xf32>
    tpu.vector_store %arg28[%c8, %c0_25], %66 {strides = array<i32>} : memref<72x256xf32, #tpu.memory_space<vmem>>, vector<4x256xf32>,
    %c1_i32_26 = arith.constant 1 : i32
    %68 = tpu.dynamic_rotate %49 by %c1_i32_26 dim 1 : vector<4x256xf32>, i32 -> vector<4x256xf32>
    %c3 = arith.constant 3 : index
    %c0_27 = arith.constant 0 : index
    %c0_28 = arith.constant 0 : index
    %69 = vector.load %arg3[%c3, %c0_27, %c0_28] : memref<9x1x256xf32, #tpu.memory_space<vmem>>, vector<1x1x256xf32>
    %70 = vector.shape_cast %69 : vector<1x1x256xf32> to vector<1x256xf32>
    %71 = vector.broadcast %70 : vector<1x256xf32> to vector<4x256xf32>
    %72 = arith.mulf %68, %71 : vector<4x256xf32>
    %c12 = arith.constant 12 : index
    %c0_29 = arith.constant 0 : index
    %73 = vector.load %arg28[%c12, %c0_29] : memref<72x256xf32, #tpu.memory_space<vmem>>, vector<4x256xf32>
    tpu.vector_store %arg28[%c12, %c0_29], %72 {strides = array<i32>} : memref<72x256xf32, #tpu.memory_space<vmem>>, vector<4x256xf32>,
    %c16 = arith.constant 16 : index
    %c0_30 = arith.constant 0 : index
    %74 = vector.load %arg28[%c16, %c0_30] : memref<72x256xf32, #tpu.memory_space<vmem>>, vector<4x256xf32>
    tpu.vector_store %arg28[%c16, %c0_30], %49 {strides = array<i32>} : memref<72x256xf32, #tpu.memory_space<vmem>>, vector<4x256xf32>,
    %c255_i32 = arith.constant 255 : i32
    %75 = tpu.dynamic_rotate %49 by %c255_i32 dim 1 : vector<4x256xf32>, i32 -> vector<4x256xf32>
    %c5 = arith.constant 5 : index
    %c0_31 = arith.constant 0 : index
    %c0_32 = arith.constant 0 : index
    %76 = vector.load %arg3[%c5, %c0_31, %c0_32] : memref<9x1x256xf32, #tpu.memory_space<vmem>>, vector<1x1x256xf32>
    %77 = vector.shape_cast %76 : vector<1x1x256xf32> to vector<1x256xf32>
    %78 = vector.broadcast %77 : vector<1x256xf32> to vector<4x256xf32>
    %79 = arith.mulf %75, %78 : vector<4x256xf32>
    %c20 = arith.constant 20 : index
    %c0_33 = arith.constant 0 : index
    %80 = vector.load %arg28[%c20, %c0_33] : memref<72x256xf32, #tpu.memory_space<vmem>>, vector<4x256xf32>
    tpu.vector_store %arg28[%c20, %c0_33], %79 {strides = array<i32>} : memref<72x256xf32, #tpu.memory_space<vmem>>, vector<4x256xf32>,
    %c241_i32 = arith.constant 241 : i32
    %81 = tpu.dynamic_rotate %49 by %c241_i32 dim 1 : vector<4x256xf32>, i32 -> vector<4x256xf32>
    %c6 = arith.constant 6 : index
    %c0_34 = arith.constant 0 : index
    %c0_35 = arith.constant 0 : index
    %82 = vector.load %arg3[%c6, %c0_34, %c0_35] : memref<9x1x256xf32, #tpu.memory_space<vmem>>, vector<1x1x256xf32>
    %83 = vector.shape_cast %82 : vector<1x1x256xf32> to vector<1x256xf32>
    %84 = vector.broadcast %83 : vector<1x256xf32> to vector<4x256xf32>
    %85 = arith.mulf %81, %84 : vector<4x256xf32>
    %c24 = arith.constant 24 : index
    %c0_36 = arith.constant 0 : index
    %86 = vector.load %arg28[%c24, %c0_36] : memref<72x256xf32, #tpu.memory_space<vmem>>, vector<4x256xf32>
    tpu.vector_store %arg28[%c24, %c0_36], %85 {strides = array<i32>} : memref<72x256xf32, #tpu.memory_space<vmem>>, vector<4x256xf32>,
    %c240_i32 = arith.constant 240 : i32
    %87 = tpu.dynamic_rotate %49 by %c240_i32 dim 1 : vector<4x256xf32>, i32 -> vector<4x256xf32>
    %c7 = arith.constant 7 : index
    %c0_37 = arith.constant 0 : index
    %c0_38 = arith.constant 0 : index
    %88 = vector.load %arg3[%c7, %c0_37, %c0_38] : memref<9x1x256xf32, #tpu.memory_space<vmem>>, vector<1x1x256xf32>
    %89 = vector.shape_cast %88 : vector<1x1x256xf32> to vector<1x256xf32>
    %90 = vector.broadcast %89 : vector<1x256xf32> to vector<4x256xf32>
    %91 = arith.mulf %87, %90 : vector<4x256xf32>
    %c28 = arith.constant 28 : index
    %c0_39 = arith.constant 0 : index
    %92 = vector.load %arg28[%c28, %c0_39] : memref<72x256xf32, #tpu.memory_space<vmem>>, vector<4x256xf32>
    tpu.vector_store %arg28[%c28, %c0_39], %91 {strides = array<i32>} : memref<72x256xf32, #tpu.memory_space<vmem>>, vector<4x256xf32>,
    %c239_i32 = arith.constant 239 : i32
    %93 = tpu.dynamic_rotate %49 by %c239_i32 dim 1 : vector<4x256xf32>, i32 -> vector<4x256xf32>
    %c8_40 = arith.constant 8 : index
    %c0_41 = arith.constant 0 : index
    %c0_42 = arith.constant 0 : index
    %94 = vector.load %arg3[%c8_40, %c0_41, %c0_42] : memref<9x1x256xf32, #tpu.memory_space<vmem>>, vector<1x1x256xf32>
    %95 = vector.shape_cast %94 : vector<1x1x256xf32> to vector<1x256xf32>
    %96 = vector.broadcast %95 : vector<1x256xf32> to vector<4x256xf32>
    %97 = arith.mulf %93, %96 : vector<4x256xf32>
    %c32 = arith.constant 32 : index
    %c0_43 = arith.constant 0 : index
    %98 = vector.load %arg28[%c32, %c0_43] : memref<72x256xf32, #tpu.memory_space<vmem>>, vector<4x256xf32>
    tpu.vector_store %arg28[%c32, %c0_43], %97 {strides = array<i32>} : memref<72x256xf32, #tpu.memory_space<vmem>>, vector<4x256xf32>,
    %c0_44 = arith.constant 0 : index
    %c0_45 = arith.constant 0 : index
    %99 = vector.load %arg7[%c0_44, %c0_45] : memref<8x36xf32, #tpu.memory_space<vmem>>, vector<8x36xf32>
    %c0_46 = arith.constant 0 : index
    %c0_47 = arith.constant 0 : index
    %100 = vector.load %arg28[%c0_46, %c0_47] : memref<72x256xf32, #tpu.memory_space<vmem>>, vector<36x256xf32>
    %cst_48 = arith.constant dense<0.000000e+00> : vector<8x256xf32>
    %101 = tpu.matmul %99, %100, %cst_48 {dimension_numbers = #tpu.dot_dimension_numbers<[1], [0], [0], [1], [0, 0, 1, 1], [], []>} : vector<8x36xf32>, vector<36x256xf32>, vector<8x256xf32> -> vector<8x256xf32>
    %c0_49 = arith.constant 0 : index
    %c0_50 = arith.constant 0 : index
    %102 = vector.load %arg8[%c0_49, %c0_50] : memref<8x1xf32, #tpu.memory_space<vmem>>, vector<8x1xf32>
    %103 = vector.broadcast %102 : vector<8x1xf32> to vector<8x256xf32>
    %104 = arith.addf %101, %103 : vector<8x256xf32>
    %c0_51 = arith.constant 0 : index
    %c0_52 = arith.constant 0 : index
    %c0_53 = arith.constant 0 : index
    %c0_54 = arith.constant 0 : index
    %105 = vector.load %arg2[%c0_51, %c0_52, %c0_53, %c0_54] : memref<2x2x8x1xf32, #tpu.memory_space<vmem>>, vector<1x1x8x1xf32>
    %106 = vector.shape_cast %105 : vector<1x1x8x1xf32> to vector<8x1xf32>
    %107 = vector.broadcast %106 : vector<8x1xf32> to vector<8x256xf32>
    %108 = arith.addf %104, %107 : vector<8x256xf32>
    %c7_i32 = arith.constant 7 : i32
    %109 = tpu.dynamic_rotate %108 by %c7_i32 dim 0 : vector<8x256xf32>, i32 -> vector<8x256xf32>
    %110 = vector.broadcast %20 : vector<8x1xf32> to vector<8x256xf32>
    %111 = arith.mulf %110, %109 : vector<8x256xf32>
    %cst_55 = arith.constant 1.000000e+00 : f32
    %112 = vector.broadcast %cst_55 : f32 to vector<8x1xf32>
    %113 = arith.subf %112, %20 : vector<8x1xf32>
    %c1_i32_56 = arith.constant 1 : i32
    %114 = tpu.dynamic_rotate %108 by %c1_i32_56 dim 0 : vector<8x256xf32>, i32 -> vector<8x256xf32>
    %115 = vector.broadcast %113 : vector<8x1xf32> to vector<8x256xf32>
    %116 = arith.mulf %115, %114 : vector<8x256xf32>
    %117 = arith.addf %111, %116 : vector<8x256xf32>
    %118 = arith.addf %108, %117 : vector<8x256xf32>
    %cst_57 = arith.constant dense<0.000000e+00> : vector<8xf32>
    %119 = vector.multi_reduction <add>, %118, %cst_57 [1] : vector<8x256xf32> to vector<8xf32>
    %120 = vector.shape_cast %119 : vector<8xf32> to vector<8x1xf32>
    %cst_58 = arith.constant 0.001953125 : f32
    %121 = vector.broadcast %cst_58 : f32 to vector<8x1xf32>
    %122 = arith.mulf %120, %121 : vector<8x1xf32>
    %123 = vector.broadcast %122 : vector<8x1xf32> to vector<8x256xf32>
    %124 = arith.subf %108, %123 : vector<8x256xf32>
    %125 = arith.mulf %124, %124 : vector<8x256xf32>
    %c7_i32_59 = arith.constant 7 : i32
    %126 = tpu.dynamic_rotate %125 by %c7_i32_59 dim 0 : vector<8x256xf32>, i32 -> vector<8x256xf32>
    %127 = vector.broadcast %20 : vector<8x1xf32> to vector<8x256xf32>
    %128 = arith.mulf %127, %126 : vector<8x256xf32>
    %cst_60 = arith.constant 1.000000e+00 : f32
    %129 = vector.broadcast %cst_60 : f32 to vector<8x1xf32>
    %130 = arith.subf %129, %20 : vector<8x1xf32>
    %c1_i32_61 = arith.constant 1 : i32
    %131 = tpu.dynamic_rotate %125 by %c1_i32_61 dim 0 : vector<8x256xf32>, i32 -> vector<8x256xf32>
    %132 = vector.broadcast %130 : vector<8x1xf32> to vector<8x256xf32>
    %133 = arith.mulf %132, %131 : vector<8x256xf32>
    %134 = arith.addf %128, %133 : vector<8x256xf32>
    %135 = arith.addf %125, %134 : vector<8x256xf32>
    %cst_62 = arith.constant dense<0.000000e+00> : vector<8xf32>
    %136 = vector.multi_reduction <add>, %135, %cst_62 [1] : vector<8x256xf32> to vector<8xf32>
    %137 = vector.shape_cast %136 : vector<8xf32> to vector<8x1xf32>
    %cst_63 = arith.constant 0.001953125 : f32
    %138 = vector.broadcast %cst_63 : f32 to vector<8x1xf32>
    %139 = arith.mulf %137, %138 : vector<8x1xf32>
    %cst_64 = arith.constant 9.99999997E-7 : f32
    %140 = vector.broadcast %cst_64 : f32 to vector<8x1xf32>
    %141 = arith.addf %139, %140 : vector<8x1xf32>
    %142 = math.rsqrt %141 : vector<8x1xf32>
    %c0_65 = arith.constant 0 : index
    %c0_66 = arith.constant 0 : index
    %143 = vector.load %arg9[%c0_65, %c0_66] : memref<8x1xf32, #tpu.memory_space<vmem>>, vector<8x1xf32>
    %144 = arith.mulf %142, %143 : vector<8x1xf32>
    %145 = vector.broadcast %144 : vector<8x1xf32> to vector<8x256xf32>
    %146 = arith.mulf %124, %145 : vector<8x256xf32>
    %c0_67 = arith.constant 0 : index
    %c0_68 = arith.constant 0 : index
    %147 = vector.load %arg10[%c0_67, %c0_68] : memref<8x1xf32, #tpu.memory_space<vmem>>, vector<8x1xf32>
    %148 = vector.broadcast %147 : vector<8x1xf32> to vector<8x256xf32>
    %149 = arith.addf %146, %148 : vector<8x256xf32>
    %150 = arith.negf %149 : vector<8x256xf32>
    %151 = math.exp %150 : vector<8x256xf32>
    %cst_69 = arith.constant 1.000000e+00 : f32
    %152 = vector.broadcast %cst_69 : f32 to vector<8x256xf32>
    %153 = arith.addf %152, %151 : vector<8x256xf32>
    %154 = arith.divf %152, %153 : vector<8x256xf32>
    %155 = arith.mulf %149, %154 : vector<8x256xf32>
    %c17_i32_70 = arith.constant 17 : i32
    %156 = tpu.dynamic_rotate %155 by %c17_i32_70 dim 1 : vector<8x256xf32>, i32 -> vector<8x256xf32>
    %c0_71 = arith.constant 0 : index
    %c0_72 = arith.constant 0 : index
    %c0_73 = arith.constant 0 : index
    %157 = vector.load %arg3[%c0_71, %c0_72, %c0_73] : memref<9x1x256xf32, #tpu.memory_space<vmem>>, vector<1x1x256xf32>
    %158 = vector.shape_cast %157 : vector<1x1x256xf32> to vector<1x256xf32>
    %159 = vector.broadcast %158 : vector<1x256xf32> to vector<8x256xf32>
    %160 = arith.mulf %156, %159 : vector<8x256xf32>
    %c0_74 = arith.constant 0 : index
    %c0_75 = arith.constant 0 : index
    %161 = vector.load %arg28[%c0_74, %c0_75] : memref<72x256xf32, #tpu.memory_space<vmem>>, vector<8x256xf32>
    tpu.vector_store %arg28[%c0_74, %c0_75], %160 {strides = array<i32>} : memref<72x256xf32, #tpu.memory_space<vmem>>, vector<8x256xf32>,
    %c16_i32_76 = arith.constant 16 : i32
    %162 = tpu.dynamic_rotate %155 by %c16_i32_76 dim 1 : vector<8x256xf32>, i32 -> vector<8x256xf32>
    %c1_77 = arith.constant 1 : index
    %c0_78 = arith.constant 0 : index
    %c0_79 = arith.constant 0 : index
    %163 = vector.load %arg3[%c1_77, %c0_78, %c0_79] : memref<9x1x256xf32, #tpu.memory_space<vmem>>, vector<1x1x256xf32>
    %164 = vector.shape_cast %163 : vector<1x1x256xf32> to vector<1x256xf32>
    %165 = vector.broadcast %164 : vector<1x256xf32> to vector<8x256xf32>
    %166 = arith.mulf %162, %165 : vector<8x256xf32>
    %c8_80 = arith.constant 8 : index
    %c0_81 = arith.constant 0 : index
    %167 = vector.load %arg28[%c8_80, %c0_81] : memref<72x256xf32, #tpu.memory_space<vmem>>, vector<8x256xf32>
    tpu.vector_store %arg28[%c8_80, %c0_81], %166 {strides = array<i32>} : memref<72x256xf32, #tpu.memory_space<vmem>>, vector<8x256xf32>,
    %c15_i32_82 = arith.constant 15 : i32
    %168 = tpu.dynamic_rotate %155 by %c15_i32_82 dim 1 : vector<8x256xf32>, i32 -> vector<8x256xf32>
    %c2_83 = arith.constant 2 : index
    %c0_84 = arith.constant 0 : index
    %c0_85 = arith.constant 0 : index
    %169 = vector.load %arg3[%c2_83, %c0_84, %c0_85] : memref<9x1x256xf32, #tpu.memory_space<vmem>>, vector<1x1x256xf32>
    %170 = vector.shape_cast %169 : vector<1x1x256xf32> to vector<1x256xf32>
    %171 = vector.broadcast %170 : vector<1x256xf32> to vector<8x256xf32>
    %172 = arith.mulf %168, %171 : vector<8x256xf32>
    %c16_86 = arith.constant 16 : index
    %c0_87 = arith.constant 0 : index
    %173 = vector.load %arg28[%c16_86, %c0_87] : memref<72x256xf32, #tpu.memory_space<vmem>>, vector<8x256xf32>
    tpu.vector_store %arg28[%c16_86, %c0_87], %172 {strides = array<i32>} : memref<72x256xf32, #tpu.memory_space<vmem>>, vector<8x256xf32>,
    %c1_i32_88 = arith.constant 1 : i32
    %174 = tpu.dynamic_rotate %155 by %c1_i32_88 dim 1 : vector<8x256xf32>, i32 -> vector<8x256xf32>
    %c3_89 = arith.constant 3 : index
    %c0_90 = arith.constant 0 : index
    %c0_91 = arith.constant 0 : index
    %175 = vector.load %arg3[%c3_89, %c0_90, %c0_91] : memref<9x1x256xf32, #tpu.memory_space<vmem>>, vector<1x1x256xf32>
    %176 = vector.shape_cast %175 : vector<1x1x256xf32> to vector<1x256xf32>
    %177 = vector.broadcast %176 : vector<1x256xf32> to vector<8x256xf32>
    %178 = arith.mulf %174, %177 : vector<8x256xf32>
    %c24_92 = arith.constant 24 : index
    %c0_93 = arith.constant 0 : index
    %179 = vector.load %arg28[%c24_92, %c0_93] : memref<72x256xf32, #tpu.memory_space<vmem>>, vector<8x256xf32>
    tpu.vector_store %arg28[%c24_92, %c0_93], %178 {strides = array<i32>} : memref<72x256xf32, #tpu.memory_space<vmem>>, vector<8x256xf32>,
    %c32_94 = arith.constant 32 : index
    %c0_95 = arith.constant 0 : index
    %180 = vector.load %arg28[%c32_94, %c0_95] : memref<72x256xf32, #tpu.memory_space<vmem>>, vector<8x256xf32>
    tpu.vector_store %arg28[%c32_94, %c0_95], %155 {strides = array<i32>} : memref<72x256xf32, #tpu.memory_space<vmem>>, vector<8x256xf32>,
    %c255_i32_96 = arith.constant 255 : i32
    %181 = tpu.dynamic_rotate %155 by %c255_i32_96 dim 1 : vector<8x256xf32>, i32 -> vector<8x256xf32>
    %c5_97 = arith.constant 5 : index
    %c0_98 = arith.constant 0 : index
    %c0_99 = arith.constant 0 : index
    %182 = vector.load %arg3[%c5_97, %c0_98, %c0_99] : memref<9x1x256xf32, #tpu.memory_space<vmem>>, vector<1x1x256xf32>
    %183 = vector.shape_cast %182 : vector<1x1x256xf32> to vector<1x256xf32>
    %184 = vector.broadcast %183 : vector<1x256xf32> to vector<8x256xf32>
    %185 = arith.mulf %181, %184 : vector<8x256xf32>
    %c40 = arith.constant 40 : index
    %c0_100 = arith.constant 0 : index
    %186 = vector.load %arg28[%c40, %c0_100] : memref<72x256xf32, #tpu.memory_space<vmem>>, vector<8x256xf32>
    tpu.vector_store %arg28[%c40, %c0_100], %185 {strides = array<i32>} : memref<72x256xf32, #tpu.memory_space<vmem>>, vector<8x256xf32>,
    %c241_i32_101 = arith.constant 241 : i32
    %187 = tpu.dynamic_rotate %155 by %c241_i32_101 dim 1 : vector<8x256xf32>, i32 -> vector<8x256xf32>
    %c6_102 = arith.constant 6 : index
    %c0_103 = arith.constant 0 : index
    %c0_104 = arith.constant 0 : index
    %188 = vector.load %arg3[%c6_102, %c0_103, %c0_104] : memref<9x1x256xf32, #tpu.memory_space<vmem>>, vector<1x1x256xf32>
    %189 = vector.shape_cast %188 : vector<1x1x256xf32> to vector<1x256xf32>
    %190 = vector.broadcast %189 : vector<1x256xf32> to vector<8x256xf32>
    %191 = arith.mulf %187, %190 : vector<8x256xf32>
    %c48 = arith.constant 48 : index
    %c0_105 = arith.constant 0 : index
    %192 = vector.load %arg28[%c48, %c0_105] : memref<72x256xf32, #tpu.memory_space<vmem>>, vector<8x256xf32>
    tpu.vector_store %arg28[%c48, %c0_105], %191 {strides = array<i32>} : memref<72x256xf32, #tpu.memory_space<vmem>>, vector<8x256xf32>,
    %c240_i32_106 = arith.constant 240 : i32
    %193 = tpu.dynamic_rotate %155 by %c240_i32_106 dim 1 : vector<8x256xf32>, i32 -> vector<8x256xf32>
    %c7_107 = arith.constant 7 : index
    %c0_108 = arith.constant 0 : index
    %c0_109 = arith.constant 0 : index
    %194 = vector.load %arg3[%c7_107, %c0_108, %c0_109] : memref<9x1x256xf32, #tpu.memory_space<vmem>>, vector<1x1x256xf32>
    %195 = vector.shape_cast %194 : vector<1x1x256xf32> to vector<1x256xf32>
    %196 = vector.broadcast %195 : vector<1x256xf32> to vector<8x256xf32>
    %197 = arith.mulf %193, %196 : vector<8x256xf32>
    %c56 = arith.constant 56 : index
    %c0_110 = arith.constant 0 : index
    %198 = vector.load %arg28[%c56, %c0_110] : memref<72x256xf32, #tpu.memory_space<vmem>>, vector<8x256xf32>
    tpu.vector_store %arg28[%c56, %c0_110], %197 {strides = array<i32>} : memref<72x256xf32, #tpu.memory_space<vmem>>, vector<8x256xf32>,
    %c239_i32_111 = arith.constant 239 : i32
    %199 = tpu.dynamic_rotate %155 by %c239_i32_111 dim 1 : vector<8x256xf32>, i32 -> vector<8x256xf32>
    %c8_112 = arith.constant 8 : index
    %c0_113 = arith.constant 0 : index
    %c0_114 = arith.constant 0 : index
    %200 = vector.load %arg3[%c8_112, %c0_113, %c0_114] : memref<9x1x256xf32, #tpu.memory_space<vmem>>, vector<1x1x256xf32>
    %201 = vector.shape_cast %200 : vector<1x1x256xf32> to vector<1x256xf32>
    %202 = vector.broadcast %201 : vector<1x256xf32> to vector<8x256xf32>
    %203 = arith.mulf %199, %202 : vector<8x256xf32>
    %c64 = arith.constant 64 : index
    %c0_115 = arith.constant 0 : index
    %204 = vector.load %arg28[%c64, %c0_115] : memref<72x256xf32, #tpu.memory_space<vmem>>, vector<8x256xf32>
    tpu.vector_store %arg28[%c64, %c0_115], %203 {strides = array<i32>} : memref<72x256xf32, #tpu.memory_space<vmem>>, vector<8x256xf32>,
    %c0_116 = arith.constant 0 : index
    %c0_117 = arith.constant 0 : index
    %205 = vector.load %arg11[%c0_116, %c0_117] : memref<8x72xf32, #tpu.memory_space<vmem>>, vector<8x72xf32>
    %c0_118 = arith.constant 0 : index
    %c0_119 = arith.constant 0 : index
    %206 = vector.load %arg28[%c0_118, %c0_119] : memref<72x256xf32, #tpu.memory_space<vmem>>, vector<72x256xf32>
    %cst_120 = arith.constant dense<0.000000e+00> : vector<8x256xf32>
    %207 = tpu.matmul %205, %206, %cst_120 {dimension_numbers = #tpu.dot_dimension_numbers<[1], [0], [0], [1], [0, 0, 1, 1], [], []>} : vector<8x72xf32>, vector<72x256xf32>, vector<8x256xf32> -> vector<8x256xf32>
    %c0_121 = arith.constant 0 : index
    %c0_122 = arith.constant 0 : index
    %208 = vector.load %arg12[%c0_121, %c0_122] : memref<8x1xf32, #tpu.memory_space<vmem>>, vector<8x1xf32>
    %209 = vector.broadcast %208 : vector<8x1xf32> to vector<8x256xf32>
    %210 = arith.addf %207, %209 : vector<8x256xf32>
    %c0_123 = arith.constant 0 : index
    %c0_124 = arith.constant 0 : index
    %211 = vector.load %arg13[%c0_123, %c0_124] : memref<8x4xf32, #tpu.memory_space<vmem>>, vector<8x4xf32>
    %cst_125 = arith.constant dense<0.000000e+00> : vector<8x256xf32>
    %212 = tpu.matmul %211, %22, %cst_125 {dimension_numbers = #tpu.dot_dimension_numbers<[1], [0], [0], [1], [0, 0, 1, 1], [], []>} : vector<8x4xf32>, vector<4x256xf32>, vector<8x256xf32> -> vector<8x256xf32>
    %c0_126 = arith.constant 0 : index
    %c0_127 = arith.constant 0 : index
    %213 = vector.load %arg14[%c0_126, %c0_127] : memref<8x1xf32, #tpu.memory_space<vmem>>, vector<8x1xf32>
    %214 = vector.broadcast %213 : vector<8x1xf32> to vector<8x256xf32>
    %215 = arith.addf %212, %214 : vector<8x256xf32>
    %216 = arith.addf %215, %210 : vector<8x256xf32>
    %c0_128 = arith.constant 0 : index
    %c0_129 = arith.constant 0 : index
    %c0_130 = arith.constant 0 : index
    %217 = vector.load %arg25[%c0_128, %c0_129, %c0_130] : memref<2x8x256xf32, #tpu.memory_space<vmem>>, vector<1x8x256xf32>
    %218 = vector.shape_cast %217 : vector<1x8x256xf32> to vector<8x256xf32>
    %219 = vector.shape_cast %216 : vector<8x256xf32> to vector<1x8x256xf32>
    tpu.vector_store %arg25[%c0_128, %c0_129, %c0_130], %219 {strides = array<i32>} : memref<2x8x256xf32, #tpu.memory_space<vmem>>, vector<1x8x256xf32>,
    %c7_i32_131 = arith.constant 7 : i32
    %220 = tpu.dynamic_rotate %216 by %c7_i32_131 dim 0 : vector<8x256xf32>, i32 -> vector<8x256xf32>
    %221 = vector.broadcast %20 : vector<8x1xf32> to vector<8x256xf32>
    %222 = arith.mulf %221, %220 : vector<8x256xf32>
    %cst_132 = arith.constant 1.000000e+00 : f32
    %223 = vector.broadcast %cst_132 : f32 to vector<8x1xf32>
    %224 = arith.subf %223, %20 : vector<8x1xf32>
    %c1_i32_133 = arith.constant 1 : i32
    %225 = tpu.dynamic_rotate %216 by %c1_i32_133 dim 0 : vector<8x256xf32>, i32 -> vector<8x256xf32>
    %226 = vector.broadcast %224 : vector<8x1xf32> to vector<8x256xf32>
    %227 = arith.mulf %226, %225 : vector<8x256xf32>
    %228 = arith.addf %222, %227 : vector<8x256xf32>
    %229 = arith.addf %216, %228 : vector<8x256xf32>
    %cst_134 = arith.constant dense<0.000000e+00> : vector<8xf32>
    %230 = vector.multi_reduction <add>, %229, %cst_134 [1] : vector<8x256xf32> to vector<8xf32>
    %231 = vector.shape_cast %230 : vector<8xf32> to vector<8x1xf32>
    %cst_135 = arith.constant 0.001953125 : f32
    %232 = vector.broadcast %cst_135 : f32 to vector<8x1xf32>
    %233 = arith.mulf %231, %232 : vector<8x1xf32>
    %234 = vector.broadcast %233 : vector<8x1xf32> to vector<8x256xf32>
    %235 = arith.subf %216, %234 : vector<8x256xf32>
    %236 = arith.mulf %235, %235 : vector<8x256xf32>
    %c7_i32_136 = arith.constant 7 : i32
    %237 = tpu.dynamic_rotate %236 by %c7_i32_136 dim 0 : vector<8x256xf32>, i32 -> vector<8x256xf32>
    %238 = vector.broadcast %20 : vector<8x1xf32> to vector<8x256xf32>
    %239 = arith.mulf %238, %237 : vector<8x256xf32>
    %cst_137 = arith.constant 1.000000e+00 : f32
    %240 = vector.broadcast %cst_137 : f32 to vector<8x1xf32>
    %241 = arith.subf %240, %20 : vector<8x1xf32>
    %c1_i32_138 = arith.constant 1 : i32
    %242 = tpu.dynamic_rotate %236 by %c1_i32_138 dim 0 : vector<8x256xf32>, i32 -> vector<8x256xf32>
    %243 = vector.broadcast %241 : vector<8x1xf32> to vector<8x256xf32>
    %244 = arith.mulf %243, %242 : vector<8x256xf32>
    %245 = arith.addf %239, %244 : vector<8x256xf32>
    %246 = arith.addf %236, %245 : vector<8x256xf32>
    %cst_139 = arith.constant dense<0.000000e+00> : vector<8xf32>
    %247 = vector.multi_reduction <add>, %246, %cst_139 [1] : vector<8x256xf32> to vector<8xf32>
    %248 = vector.shape_cast %247 : vector<8xf32> to vector<8x1xf32>
    %cst_140 = arith.constant 0.001953125 : f32
    %249 = vector.broadcast %cst_140 : f32 to vector<8x1xf32>
    %250 = arith.mulf %248, %249 : vector<8x1xf32>
    %cst_141 = arith.constant 9.99999997E-7 : f32
    %251 = vector.broadcast %cst_141 : f32 to vector<8x1xf32>
    %252 = arith.addf %250, %251 : vector<8x1xf32>
    %253 = math.rsqrt %252 : vector<8x1xf32>
    %c0_142 = arith.constant 0 : index
    %c0_143 = arith.constant 0 : index
    %254 = vector.load %arg15[%c0_142, %c0_143] : memref<8x1xf32, #tpu.memory_space<vmem>>, vector<8x1xf32>
    %255 = arith.mulf %253, %254 : vector<8x1xf32>
    %256 = vector.broadcast %255 : vector<8x1xf32> to vector<8x256xf32>
    %257 = arith.mulf %235, %256 : vector<8x256xf32>
    %c0_144 = arith.constant 0 : index
    %c0_145 = arith.constant 0 : index
    %258 = vector.load %arg16[%c0_144, %c0_145] : memref<8x1xf32, #tpu.memory_space<vmem>>, vector<8x1xf32>
    %259 = vector.broadcast %258 : vector<8x1xf32> to vector<8x256xf32>
    %260 = arith.addf %257, %259 : vector<8x256xf32>
    %261 = arith.negf %260 : vector<8x256xf32>
    %262 = math.exp %261 : vector<8x256xf32>
    %cst_146 = arith.constant 1.000000e+00 : f32
    %263 = vector.broadcast %cst_146 : f32 to vector<8x256xf32>
    %264 = arith.addf %263, %262 : vector<8x256xf32>
    %265 = arith.divf %263, %264 : vector<8x256xf32>
    %266 = arith.mulf %260, %265 : vector<8x256xf32>
    %c17_i32_147 = arith.constant 17 : i32
    %267 = tpu.dynamic_rotate %266 by %c17_i32_147 dim 1 : vector<8x256xf32>, i32 -> vector<8x256xf32>
    %c0_148 = arith.constant 0 : index
    %c0_149 = arith.constant 0 : index
    %c0_150 = arith.constant 0 : index
    %268 = vector.load %arg3[%c0_148, %c0_149, %c0_150] : memref<9x1x256xf32, #tpu.memory_space<vmem>>, vector<1x1x256xf32>
    %269 = vector.shape_cast %268 : vector<1x1x256xf32> to vector<1x256xf32>
    %270 = vector.broadcast %269 : vector<1x256xf32> to vector<8x256xf32>
    %271 = arith.mulf %267, %270 : vector<8x256xf32>
    %c0_151 = arith.constant 0 : index
    %c0_152 = arith.constant 0 : index
    %272 = vector.load %arg28[%c0_151, %c0_152] : memref<72x256xf32, #tpu.memory_space<vmem>>, vector<8x256xf32>
    tpu.vector_store %arg28[%c0_151, %c0_152], %271 {strides = array<i32>} : memref<72x256xf32, #tpu.memory_space<vmem>>, vector<8x256xf32>,
    %c16_i32_153 = arith.constant 16 : i32
    %273 = tpu.dynamic_rotate %266 by %c16_i32_153 dim 1 : vector<8x256xf32>, i32 -> vector<8x256xf32>
    %c1_154 = arith.constant 1 : index
    %c0_155 = arith.constant 0 : index
    %c0_156 = arith.constant 0 : index
    %274 = vector.load %arg3[%c1_154, %c0_155, %c0_156] : memref<9x1x256xf32, #tpu.memory_space<vmem>>, vector<1x1x256xf32>
    %275 = vector.shape_cast %274 : vector<1x1x256xf32> to vector<1x256xf32>
    %276 = vector.broadcast %275 : vector<1x256xf32> to vector<8x256xf32>
    %277 = arith.mulf %273, %276 : vector<8x256xf32>
    %c8_157 = arith.constant 8 : index
    %c0_158 = arith.constant 0 : index
    %278 = vector.load %arg28[%c8_157, %c0_158] : memref<72x256xf32, #tpu.memory_space<vmem>>, vector<8x256xf32>
    tpu.vector_store %arg28[%c8_157, %c0_158], %277 {strides = array<i32>} : memref<72x256xf32, #tpu.memory_space<vmem>>, vector<8x256xf32>,
    %c15_i32_159 = arith.constant 15 : i32
    %279 = tpu.dynamic_rotate %266 by %c15_i32_159 dim 1 : vector<8x256xf32>, i32 -> vector<8x256xf32>
    %c2_160 = arith.constant 2 : index
    %c0_161 = arith.constant 0 : index
    %c0_162 = arith.constant 0 : index
    %280 = vector.load %arg3[%c2_160, %c0_161, %c0_162] : memref<9x1x256xf32, #tpu.memory_space<vmem>>, vector<1x1x256xf32>
    %281 = vector.shape_cast %280 : vector<1x1x256xf32> to vector<1x256xf32>
    %282 = vector.broadcast %281 : vector<1x256xf32> to vector<8x256xf32>
    %283 = arith.mulf %279, %282 : vector<8x256xf32>
    %c16_163 = arith.constant 16 : index
    %c0_164 = arith.constant 0 : index
    %284 = vector.load %arg28[%c16_163, %c0_164] : memref<72x256xf32, #tpu.memory_space<vmem>>, vector<8x256xf32>
    tpu.vector_store %arg28[%c16_163, %c0_164], %283 {strides = array<i32>} : memref<72x256xf32, #tpu.memory_space<vmem>>, vector<8x256xf32>,
    %c1_i32_165 = arith.constant 1 : i32
    %285 = tpu.dynamic_rotate %266 by %c1_i32_165 dim 1 : vector<8x256xf32>, i32 -> vector<8x256xf32>
    %c3_166 = arith.constant 3 : index
    %c0_167 = arith.constant 0 : index
    %c0_168 = arith.constant 0 : index
    %286 = vector.load %arg3[%c3_166, %c0_167, %c0_168] : memref<9x1x256xf32, #tpu.memory_space<vmem>>, vector<1x1x256xf32>
    %287 = vector.shape_cast %286 : vector<1x1x256xf32> to vector<1x256xf32>
    %288 = vector.broadcast %287 : vector<1x256xf32> to vector<8x256xf32>
    %289 = arith.mulf %285, %288 : vector<8x256xf32>
    %c24_169 = arith.constant 24 : index
    %c0_170 = arith.constant 0 : index
    %290 = vector.load %arg28[%c24_169, %c0_170] : memref<72x256xf32, #tpu.memory_space<vmem>>, vector<8x256xf32>
    tpu.vector_store %arg28[%c24_169, %c0_170], %289 {strides = array<i32>} : memref<72x256xf32, #tpu.memory_space<vmem>>, vector<8x256xf32>,
    %c32_171 = arith.constant 32 : index
    %c0_172 = arith.constant 0 : index
    %291 = vector.load %arg28[%c32_171, %c0_172] : memref<72x256xf32, #tpu.memory_space<vmem>>, vector<8x256xf32>
    tpu.vector_store %arg28[%c32_171, %c0_172], %266 {strides = array<i32>} : memref<72x256xf32, #tpu.memory_space<vmem>>, vector<8x256xf32>,
    %c255_i32_173 = arith.constant 255 : i32
    %292 = tpu.dynamic_rotate %266 by %c255_i32_173 dim 1 : vector<8x256xf32>, i32 -> vector<8x256xf32>
    %c5_174 = arith.constant 5 : index
    %c0_175 = arith.constant 0 : index
    %c0_176 = arith.constant 0 : index
    %293 = vector.load %arg3[%c5_174, %c0_175, %c0_176] : memref<9x1x256xf32, #tpu.memory_space<vmem>>, vector<1x1x256xf32>
    %294 = vector.shape_cast %293 : vector<1x1x256xf32> to vector<1x256xf32>
    %295 = vector.broadcast %294 : vector<1x256xf32> to vector<8x256xf32>
    %296 = arith.mulf %292, %295 : vector<8x256xf32>
    %c40_177 = arith.constant 40 : index
    %c0_178 = arith.constant 0 : index
    %297 = vector.load %arg28[%c40_177, %c0_178] : memref<72x256xf32, #tpu.memory_space<vmem>>, vector<8x256xf32>
    tpu.vector_store %arg28[%c40_177, %c0_178], %296 {strides = array<i32>} : memref<72x256xf32, #tpu.memory_space<vmem>>, vector<8x256xf32>,
    %c241_i32_179 = arith.constant 241 : i32
    %298 = tpu.dynamic_rotate %266 by %c241_i32_179 dim 1 : vector<8x256xf32>, i32 -> vector<8x256xf32>
    %c6_180 = arith.constant 6 : index
    %c0_181 = arith.constant 0 : index
    %c0_182 = arith.constant 0 : index
    %299 = vector.load %arg3[%c6_180, %c0_181, %c0_182] : memref<9x1x256xf32, #tpu.memory_space<vmem>>, vector<1x1x256xf32>
    %300 = vector.shape_cast %299 : vector<1x1x256xf32> to vector<1x256xf32>
    %301 = vector.broadcast %300 : vector<1x256xf32> to vector<8x256xf32>
    %302 = arith.mulf %298, %301 : vector<8x256xf32>
    %c48_183 = arith.constant 48 : index
    %c0_184 = arith.constant 0 : index
    %303 = vector.load %arg28[%c48_183, %c0_184] : memref<72x256xf32, #tpu.memory_space<vmem>>, vector<8x256xf32>
    tpu.vector_store %arg28[%c48_183, %c0_184], %302 {strides = array<i32>} : memref<72x256xf32, #tpu.memory_space<vmem>>, vector<8x256xf32>,
    %c240_i32_185 = arith.constant 240 : i32
    %304 = tpu.dynamic_rotate %266 by %c240_i32_185 dim 1 : vector<8x256xf32>, i32 -> vector<8x256xf32>
    %c7_186 = arith.constant 7 : index
    %c0_187 = arith.constant 0 : index
    %c0_188 = arith.constant 0 : index
    %305 = vector.load %arg3[%c7_186, %c0_187, %c0_188] : memref<9x1x256xf32, #tpu.memory_space<vmem>>, vector<1x1x256xf32>
    %306 = vector.shape_cast %305 : vector<1x1x256xf32> to vector<1x256xf32>
    %307 = vector.broadcast %306 : vector<1x256xf32> to vector<8x256xf32>
    %308 = arith.mulf %304, %307 : vector<8x256xf32>
    %c56_189 = arith.constant 56 : index
    %c0_190 = arith.constant 0 : index
    %309 = vector.load %arg28[%c56_189, %c0_190] : memref<72x256xf32, #tpu.memory_space<vmem>>, vector<8x256xf32>
    tpu.vector_store %arg28[%c56_189, %c0_190], %308 {strides = array<i32>} : memref<72x256xf32, #tpu.memory_space<vmem>>, vector<8x256xf32>,
    %c239_i32_191 = arith.constant 239 : i32
    %310 = tpu.dynamic_rotate %266 by %c239_i32_191 dim 1 : vector<8x256xf32>, i32 -> vector<8x256xf32>
    %c8_192 = arith.constant 8 : index
    %c0_193 = arith.constant 0 : index
    %c0_194 = arith.constant 0 : index
    %311 = vector.load %arg3[%c8_192, %c0_193, %c0_194] : memref<9x1x256xf32, #tpu.memory_space<vmem>>, vector<1x1x256xf32>
    %312 = vector.shape_cast %311 : vector<1x1x256xf32> to vector<1x256xf32>
    %313 = vector.broadcast %312 : vector<1x256xf32> to vector<8x256xf32>
    %314 = arith.mulf %310, %313 : vector<8x256xf32>
    %c64_195 = arith.constant 64 : index
    %c0_196 = arith.constant 0 : index
    %315 = vector.load %arg28[%c64_195, %c0_196] : memref<72x256xf32, #tpu.memory_space<vmem>>, vector<8x256xf32>
    tpu.vector_store %arg28[%c64_195, %c0_196], %314 {strides = array<i32>} : memref<72x256xf32, #tpu.memory_space<vmem>>, vector<8x256xf32>,
    %c0_197 = arith.constant 0 : index
    %c0_198 = arith.constant 0 : index
    %316 = vector.load %arg17[%c0_197, %c0_198] : memref<8x72xf32, #tpu.memory_space<vmem>>, vector<8x72xf32>
    %c0_199 = arith.constant 0 : index
    %c0_200 = arith.constant 0 : index
    %317 = vector.load %arg28[%c0_199, %c0_200] : memref<72x256xf32, #tpu.memory_space<vmem>>, vector<72x256xf32>
    %cst_201 = arith.constant dense<0.000000e+00> : vector<8x256xf32>
    %318 = tpu.matmul %316, %317, %cst_201 {dimension_numbers = #tpu.dot_dimension_numbers<[1], [0], [0], [1], [0, 0, 1, 1], [], []>} : vector<8x72xf32>, vector<72x256xf32>, vector<8x256xf32> -> vector<8x256xf32>
    %c0_202 = arith.constant 0 : index
    %c0_203 = arith.constant 0 : index
    %319 = vector.load %arg18[%c0_202, %c0_203] : memref<8x1xf32, #tpu.memory_space<vmem>>, vector<8x1xf32>
    %320 = vector.broadcast %319 : vector<8x1xf32> to vector<8x256xf32>
    %321 = arith.addf %318, %320 : vector<8x256xf32>
    %c0_204 = arith.constant 0 : index
    %c1_205 = arith.constant 1 : index
    %c0_206 = arith.constant 0 : index
    %c0_207 = arith.constant 0 : index
    %322 = vector.load %arg2[%c0_204, %c1_205, %c0_206, %c0_207] : memref<2x2x8x1xf32, #tpu.memory_space<vmem>>, vector<1x1x8x1xf32>
    %323 = vector.shape_cast %322 : vector<1x1x8x1xf32> to vector<8x1xf32>
    %324 = vector.broadcast %323 : vector<8x1xf32> to vector<8x256xf32>
    %325 = arith.addf %321, %324 : vector<8x256xf32>
    %c7_i32_208 = arith.constant 7 : i32
    %326 = tpu.dynamic_rotate %325 by %c7_i32_208 dim 0 : vector<8x256xf32>, i32 -> vector<8x256xf32>
    %327 = vector.broadcast %20 : vector<8x1xf32> to vector<8x256xf32>
    %328 = arith.mulf %327, %326 : vector<8x256xf32>
    %cst_209 = arith.constant 1.000000e+00 : f32
    %329 = vector.broadcast %cst_209 : f32 to vector<8x1xf32>
    %330 = arith.subf %329, %20 : vector<8x1xf32>
    %c1_i32_210 = arith.constant 1 : i32
    %331 = tpu.dynamic_rotate %325 by %c1_i32_210 dim 0 : vector<8x256xf32>, i32 -> vector<8x256xf32>
    %332 = vector.broadcast %330 : vector<8x1xf32> to vector<8x256xf32>
    %333 = arith.mulf %332, %331 : vector<8x256xf32>
    %334 = arith.addf %328, %333 : vector<8x256xf32>
    %335 = arith.addf %325, %334 : vector<8x256xf32>
    %cst_211 = arith.constant dense<0.000000e+00> : vector<8xf32>
    %336 = vector.multi_reduction <add>, %335, %cst_211 [1] : vector<8x256xf32> to vector<8xf32>
    %337 = vector.shape_cast %336 : vector<8xf32> to vector<8x1xf32>
    %cst_212 = arith.constant 0.001953125 : f32
    %338 = vector.broadcast %cst_212 : f32 to vector<8x1xf32>
    %339 = arith.mulf %337, %338 : vector<8x1xf32>
    %340 = vector.broadcast %339 : vector<8x1xf32> to vector<8x256xf32>
    %341 = arith.subf %325, %340 : vector<8x256xf32>
    %342 = arith.mulf %341, %341 : vector<8x256xf32>
    %c7_i32_213 = arith.constant 7 : i32
    %343 = tpu.dynamic_rotate %342 by %c7_i32_213 dim 0 : vector<8x256xf32>, i32 -> vector<8x256xf32>
    %344 = vector.broadcast %20 : vector<8x1xf32> to vector<8x256xf32>
    %345 = arith.mulf %344, %343 : vector<8x256xf32>
    %cst_214 = arith.constant 1.000000e+00 : f32
    %346 = vector.broadcast %cst_214 : f32 to vector<8x1xf32>
    %347 = arith.subf %346, %20 : vector<8x1xf32>
    %c1_i32_215 = arith.constant 1 : i32
    %348 = tpu.dynamic_rotate %342 by %c1_i32_215 dim 0 : vector<8x256xf32>, i32 -> vector<8x256xf32>
    %349 = vector.broadcast %347 : vector<8x1xf32> to vector<8x256xf32>
    %350 = arith.mulf %349, %348 : vector<8x256xf32>
    %351 = arith.addf %345, %350 : vector<8x256xf32>
    %352 = arith.addf %342, %351 : vector<8x256xf32>
    %cst_216 = arith.constant dense<0.000000e+00> : vector<8xf32>
    %353 = vector.multi_reduction <add>, %352, %cst_216 [1] : vector<8x256xf32> to vector<8xf32>
    %354 = vector.shape_cast %353 : vector<8xf32> to vector<8x1xf32>
    %cst_217 = arith.constant 0.001953125 : f32
    %355 = vector.broadcast %cst_217 : f32 to vector<8x1xf32>
    %356 = arith.mulf %354, %355 : vector<8x1xf32>
    %cst_218 = arith.constant 9.99999997E-7 : f32
    %357 = vector.broadcast %cst_218 : f32 to vector<8x1xf32>
    %358 = arith.addf %356, %357 : vector<8x1xf32>
    %359 = math.rsqrt %358 : vector<8x1xf32>
    %c0_219 = arith.constant 0 : index
    %c0_220 = arith.constant 0 : index
    %360 = vector.load %arg19[%c0_219, %c0_220] : memref<8x1xf32, #tpu.memory_space<vmem>>, vector<8x1xf32>
    %361 = arith.mulf %359, %360 : vector<8x1xf32>
    %362 = vector.broadcast %361 : vector<8x1xf32> to vector<8x256xf32>
    %363 = arith.mulf %341, %362 : vector<8x256xf32>
    %c0_221 = arith.constant 0 : index
    %c0_222 = arith.constant 0 : index
    %364 = vector.load %arg20[%c0_221, %c0_222] : memref<8x1xf32, #tpu.memory_space<vmem>>, vector<8x1xf32>
    %365 = vector.broadcast %364 : vector<8x1xf32> to vector<8x256xf32>
    %366 = arith.addf %363, %365 : vector<8x256xf32>
    %367 = arith.negf %366 : vector<8x256xf32>
    %368 = math.exp %367 : vector<8x256xf32>
    %cst_223 = arith.constant 1.000000e+00 : f32
    %369 = vector.broadcast %cst_223 : f32 to vector<8x256xf32>
    %370 = arith.addf %369, %368 : vector<8x256xf32>
    %371 = arith.divf %369, %370 : vector<8x256xf32>
    %372 = arith.mulf %366, %371 : vector<8x256xf32>
    %c17_i32_224 = arith.constant 17 : i32
    %373 = tpu.dynamic_rotate %372 by %c17_i32_224 dim 1 : vector<8x256xf32>, i32 -> vector<8x256xf32>
    %c0_225 = arith.constant 0 : index
    %c0_226 = arith.constant 0 : index
    %c0_227 = arith.constant 0 : index
    %374 = vector.load %arg3[%c0_225, %c0_226, %c0_227] : memref<9x1x256xf32, #tpu.memory_space<vmem>>, vector<1x1x256xf32>
    %375 = vector.shape_cast %374 : vector<1x1x256xf32> to vector<1x256xf32>
    %376 = vector.broadcast %375 : vector<1x256xf32> to vector<8x256xf32>
    %377 = arith.mulf %373, %376 : vector<8x256xf32>
    %c0_228 = arith.constant 0 : index
    %c0_229 = arith.constant 0 : index
    %378 = vector.load %arg28[%c0_228, %c0_229] : memref<72x256xf32, #tpu.memory_space<vmem>>, vector<8x256xf32>
    tpu.vector_store %arg28[%c0_228, %c0_229], %377 {strides = array<i32>} : memref<72x256xf32, #tpu.memory_space<vmem>>, vector<8x256xf32>,
    %c16_i32_230 = arith.constant 16 : i32
    %379 = tpu.dynamic_rotate %372 by %c16_i32_230 dim 1 : vector<8x256xf32>, i32 -> vector<8x256xf32>
    %c1_231 = arith.constant 1 : index
    %c0_232 = arith.constant 0 : index
    %c0_233 = arith.constant 0 : index
    %380 = vector.load %arg3[%c1_231, %c0_232, %c0_233] : memref<9x1x256xf32, #tpu.memory_space<vmem>>, vector<1x1x256xf32>
    %381 = vector.shape_cast %380 : vector<1x1x256xf32> to vector<1x256xf32>
    %382 = vector.broadcast %381 : vector<1x256xf32> to vector<8x256xf32>
    %383 = arith.mulf %379, %382 : vector<8x256xf32>
    %c8_234 = arith.constant 8 : index
    %c0_235 = arith.constant 0 : index
    %384 = vector.load %arg28[%c8_234, %c0_235] : memref<72x256xf32, #tpu.memory_space<vmem>>, vector<8x256xf32>
    tpu.vector_store %arg28[%c8_234, %c0_235], %383 {strides = array<i32>} : memref<72x256xf32, #tpu.memory_space<vmem>>, vector<8x256xf32>,
    %c15_i32_236 = arith.constant 15 : i32
    %385 = tpu.dynamic_rotate %372 by %c15_i32_236 dim 1 : vector<8x256xf32>, i32 -> vector<8x256xf32>
    %c2_237 = arith.constant 2 : index
    %c0_238 = arith.constant 0 : index
    %c0_239 = arith.constant 0 : index
    %386 = vector.load %arg3[%c2_237, %c0_238, %c0_239] : memref<9x1x256xf32, #tpu.memory_space<vmem>>, vector<1x1x256xf32>
    %387 = vector.shape_cast %386 : vector<1x1x256xf32> to vector<1x256xf32>
    %388 = vector.broadcast %387 : vector<1x256xf32> to vector<8x256xf32>
    %389 = arith.mulf %385, %388 : vector<8x256xf32>
    %c16_240 = arith.constant 16 : index
    %c0_241 = arith.constant 0 : index
    %390 = vector.load %arg28[%c16_240, %c0_241] : memref<72x256xf32, #tpu.memory_space<vmem>>, vector<8x256xf32>
    tpu.vector_store %arg28[%c16_240, %c0_241], %389 {strides = array<i32>} : memref<72x256xf32, #tpu.memory_space<vmem>>, vector<8x256xf32>,
    %c1_i32_242 = arith.constant 1 : i32
    %391 = tpu.dynamic_rotate %372 by %c1_i32_242 dim 1 : vector<8x256xf32>, i32 -> vector<8x256xf32>
    %c3_243 = arith.constant 3 : index
    %c0_244 = arith.constant 0 : index
    %c0_245 = arith.constant 0 : index
    %392 = vector.load %arg3[%c3_243, %c0_244, %c0_245] : memref<9x1x256xf32, #tpu.memory_space<vmem>>, vector<1x1x256xf32>
    %393 = vector.shape_cast %392 : vector<1x1x256xf32> to vector<1x256xf32>
    %394 = vector.broadcast %393 : vector<1x256xf32> to vector<8x256xf32>
    %395 = arith.mulf %391, %394 : vector<8x256xf32>
    %c24_246 = arith.constant 24 : index
    %c0_247 = arith.constant 0 : index
    %396 = vector.load %arg28[%c24_246, %c0_247] : memref<72x256xf32, #tpu.memory_space<vmem>>, vector<8x256xf32>
    tpu.vector_store %arg28[%c24_246, %c0_247], %395 {strides = array<i32>} : memref<72x256xf32, #tpu.memory_space<vmem>>, vector<8x256xf32>,
    %c32_248 = arith.constant 32 : index
    %c0_249 = arith.constant 0 : index
    %397 = vector.load %arg28[%c32_248, %c0_249] : memref<72x256xf32, #tpu.memory_space<vmem>>, vector<8x256xf32>
    tpu.vector_store %arg28[%c32_248, %c0_249], %372 {strides = array<i32>} : memref<72x256xf32, #tpu.memory_space<vmem>>, vector<8x256xf32>,
    %c255_i32_250 = arith.constant 255 : i32
    %398 = tpu.dynamic_rotate %372 by %c255_i32_250 dim 1 : vector<8x256xf32>, i32 -> vector<8x256xf32>
    %c5_251 = arith.constant 5 : index
    %c0_252 = arith.constant 0 : index
    %c0_253 = arith.constant 0 : index
    %399 = vector.load %arg3[%c5_251, %c0_252, %c0_253] : memref<9x1x256xf32, #tpu.memory_space<vmem>>, vector<1x1x256xf32>
    %400 = vector.shape_cast %399 : vector<1x1x256xf32> to vector<1x256xf32>
    %401 = vector.broadcast %400 : vector<1x256xf32> to vector<8x256xf32>
    %402 = arith.mulf %398, %401 : vector<8x256xf32>
    %c40_254 = arith.constant 40 : index
    %c0_255 = arith.constant 0 : index
    %403 = vector.load %arg28[%c40_254, %c0_255] : memref<72x256xf32, #tpu.memory_space<vmem>>, vector<8x256xf32>
    tpu.vector_store %arg28[%c40_254, %c0_255], %402 {strides = array<i32>} : memref<72x256xf32, #tpu.memory_space<vmem>>, vector<8x256xf32>,
    %c241_i32_256 = arith.constant 241 : i32
    %404 = tpu.dynamic_rotate %372 by %c241_i32_256 dim 1 : vector<8x256xf32>, i32 -> vector<8x256xf32>
    %c6_257 = arith.constant 6 : index
    %c0_258 = arith.constant 0 : index
    %c0_259 = arith.constant 0 : index
    %405 = vector.load %arg3[%c6_257, %c0_258, %c0_259] : memref<9x1x256xf32, #tpu.memory_space<vmem>>, vector<1x1x256xf32>
    %406 = vector.shape_cast %405 : vector<1x1x256xf32> to vector<1x256xf32>
    %407 = vector.broadcast %406 : vector<1x256xf32> to vector<8x256xf32>
    %408 = arith.mulf %404, %407 : vector<8x256xf32>
    %c48_260 = arith.constant 48 : index
    %c0_261 = arith.constant 0 : index
    %409 = vector.load %arg28[%c48_260, %c0_261] : memref<72x256xf32, #tpu.memory_space<vmem>>, vector<8x256xf32>
    tpu.vector_store %arg28[%c48_260, %c0_261], %408 {strides = array<i32>} : memref<72x256xf32, #tpu.memory_space<vmem>>, vector<8x256xf32>,
    %c240_i32_262 = arith.constant 240 : i32
    %410 = tpu.dynamic_rotate %372 by %c240_i32_262 dim 1 : vector<8x256xf32>, i32 -> vector<8x256xf32>
    %c7_263 = arith.constant 7 : index
    %c0_264 = arith.constant 0 : index
    %c0_265 = arith.constant 0 : index
    %411 = vector.load %arg3[%c7_263, %c0_264, %c0_265] : memref<9x1x256xf32, #tpu.memory_space<vmem>>, vector<1x1x256xf32>
    %412 = vector.shape_cast %411 : vector<1x1x256xf32> to vector<1x256xf32>
    %413 = vector.broadcast %412 : vector<1x256xf32> to vector<8x256xf32>
    %414 = arith.mulf %410, %413 : vector<8x256xf32>
    %c56_266 = arith.constant 56 : index
    %c0_267 = arith.constant 0 : index
    %415 = vector.load %arg28[%c56_266, %c0_267] : memref<72x256xf32, #tpu.memory_space<vmem>>, vector<8x256xf32>
    tpu.vector_store %arg28[%c56_266, %c0_267], %414 {strides = array<i32>} : memref<72x256xf32, #tpu.memory_space<vmem>>, vector<8x256xf32>,
    %c239_i32_268 = arith.constant 239 : i32
    %416 = tpu.dynamic_rotate %372 by %c239_i32_268 dim 1 : vector<8x256xf32>, i32 -> vector<8x256xf32>
    %c8_269 = arith.constant 8 : index
    %c0_270 = arith.constant 0 : index
    %c0_271 = arith.constant 0 : index
    %417 = vector.load %arg3[%c8_269, %c0_270, %c0_271] : memref<9x1x256xf32, #tpu.memory_space<vmem>>, vector<1x1x256xf32>
    %418 = vector.shape_cast %417 : vector<1x1x256xf32> to vector<1x256xf32>
    %419 = vector.broadcast %418 : vector<1x256xf32> to vector<8x256xf32>
    %420 = arith.mulf %416, %419 : vector<8x256xf32>
    %c64_272 = arith.constant 64 : index
    %c0_273 = arith.constant 0 : index
    %421 = vector.load %arg28[%c64_272, %c0_273] : memref<72x256xf32, #tpu.memory_space<vmem>>, vector<8x256xf32>
    tpu.vector_store %arg28[%c64_272, %c0_273], %420 {strides = array<i32>} : memref<72x256xf32, #tpu.memory_space<vmem>>, vector<8x256xf32>,
    %c0_274 = arith.constant 0 : index
    %c0_275 = arith.constant 0 : index
    %422 = vector.load %arg21[%c0_274, %c0_275] : memref<8x72xf32, #tpu.memory_space<vmem>>, vector<8x72xf32>
    %c0_276 = arith.constant 0 : index
    %c0_277 = arith.constant 0 : index
    %423 = vector.load %arg28[%c0_276, %c0_277] : memref<72x256xf32, #tpu.memory_space<vmem>>, vector<72x256xf32>
    %cst_278 = arith.constant dense<0.000000e+00> : vector<8x256xf32>
    %424 = tpu.matmul %422, %423, %cst_278 {dimension_numbers = #tpu.dot_dimension_numbers<[1], [0], [0], [1], [0, 0, 1, 1], [], []>} : vector<8x72xf32>, vector<72x256xf32>, vector<8x256xf32> -> vector<8x256xf32>
    %c0_279 = arith.constant 0 : index
    %c0_280 = arith.constant 0 : index
    %425 = vector.load %arg22[%c0_279, %c0_280] : memref<8x1xf32, #tpu.memory_space<vmem>>, vector<8x1xf32>
    %426 = vector.broadcast %425 : vector<8x1xf32> to vector<8x256xf32>
    %427 = arith.addf %424, %426 : vector<8x256xf32>
    %428 = arith.addf %216, %427 : vector<8x256xf32>
    %c0_281 = arith.constant 0 : index
    %c0_282 = arith.constant 0 : index
    %c0_283 = arith.constant 0 : index
    %429 = vector.load %arg26[%c0_281, %c0_282, %c0_283] : memref<2x8x256xf32, #tpu.memory_space<vmem>>, vector<1x8x256xf32>
    %430 = vector.shape_cast %429 : vector<1x8x256xf32> to vector<8x256xf32>
    %431 = vector.shape_cast %428 : vector<8x256xf32> to vector<1x8x256xf32>
    tpu.vector_store %arg26[%c0_281, %c0_282, %c0_283], %431 {strides = array<i32>} : memref<2x8x256xf32, #tpu.memory_space<vmem>>, vector<1x8x256xf32>,
    %c17_i32_284 = arith.constant 17 : i32
    %432 = tpu.dynamic_rotate %428 by %c17_i32_284 dim 1 : vector<8x256xf32>, i32 -> vector<8x256xf32>
    %c0_285 = arith.constant 0 : index
    %c0_286 = arith.constant 0 : index
    %c0_287 = arith.constant 0 : index
    %433 = vector.load %arg3[%c0_285, %c0_286, %c0_287] : memref<9x1x256xf32, #tpu.memory_space<vmem>>, vector<1x1x256xf32>
    %434 = vector.shape_cast %433 : vector<1x1x256xf32> to vector<1x256xf32>
    %435 = vector.broadcast %434 : vector<1x256xf32> to vector<8x256xf32>
    %436 = arith.mulf %432, %435 : vector<8x256xf32>
    %c0_288 = arith.constant 0 : index
    %c0_289 = arith.constant 0 : index
    %437 = vector.load %arg28[%c0_288, %c0_289] : memref<72x256xf32, #tpu.memory_space<vmem>>, vector<8x256xf32>
    tpu.vector_store %arg28[%c0_288, %c0_289], %436 {strides = array<i32>} : memref<72x256xf32, #tpu.memory_space<vmem>>, vector<8x256xf32>,
    %c16_i32_290 = arith.constant 16 : i32
    %438 = tpu.dynamic_rotate %428 by %c16_i32_290 dim 1 : vector<8x256xf32>, i32 -> vector<8x256xf32>
    %c1_291 = arith.constant 1 : index
    %c0_292 = arith.constant 0 : index
    %c0_293 = arith.constant 0 : index
    %439 = vector.load %arg3[%c1_291, %c0_292, %c0_293] : memref<9x1x256xf32, #tpu.memory_space<vmem>>, vector<1x1x256xf32>
    %440 = vector.shape_cast %439 : vector<1x1x256xf32> to vector<1x256xf32>
    %441 = vector.broadcast %440 : vector<1x256xf32> to vector<8x256xf32>
    %442 = arith.mulf %438, %441 : vector<8x256xf32>
    %c8_294 = arith.constant 8 : index
    %c0_295 = arith.constant 0 : index
    %443 = vector.load %arg28[%c8_294, %c0_295] : memref<72x256xf32, #tpu.memory_space<vmem>>, vector<8x256xf32>
    tpu.vector_store %arg28[%c8_294, %c0_295], %442 {strides = array<i32>} : memref<72x256xf32, #tpu.memory_space<vmem>>, vector<8x256xf32>,
    %c15_i32_296 = arith.constant 15 : i32
    %444 = tpu.dynamic_rotate %428 by %c15_i32_296 dim 1 : vector<8x256xf32>, i32 -> vector<8x256xf32>
    %c2_297 = arith.constant 2 : index
    %c0_298 = arith.constant 0 : index
    %c0_299 = arith.constant 0 : index
    %445 = vector.load %arg3[%c2_297, %c0_298, %c0_299] : memref<9x1x256xf32, #tpu.memory_space<vmem>>, vector<1x1x256xf32>
    %446 = vector.shape_cast %445 : vector<1x1x256xf32> to vector<1x256xf32>
    %447 = vector.broadcast %446 : vector<1x256xf32> to vector<8x256xf32>
    %448 = arith.mulf %444, %447 : vector<8x256xf32>
    %c16_300 = arith.constant 16 : index
    %c0_301 = arith.constant 0 : index
    %449 = vector.load %arg28[%c16_300, %c0_301] : memref<72x256xf32, #tpu.memory_space<vmem>>, vector<8x256xf32>
    tpu.vector_store %arg28[%c16_300, %c0_301], %448 {strides = array<i32>} : memref<72x256xf32, #tpu.memory_space<vmem>>, vector<8x256xf32>,
    %c1_i32_302 = arith.constant 1 : i32
    %450 = tpu.dynamic_rotate %428 by %c1_i32_302 dim 1 : vector<8x256xf32>, i32 -> vector<8x256xf32>
    %c3_303 = arith.constant 3 : index
    %c0_304 = arith.constant 0 : index
    %c0_305 = arith.constant 0 : index
    %451 = vector.load %arg3[%c3_303, %c0_304, %c0_305] : memref<9x1x256xf32, #tpu.memory_space<vmem>>, vector<1x1x256xf32>
    %452 = vector.shape_cast %451 : vector<1x1x256xf32> to vector<1x256xf32>
    %453 = vector.broadcast %452 : vector<1x256xf32> to vector<8x256xf32>
    %454 = arith.mulf %450, %453 : vector<8x256xf32>
    %c24_306 = arith.constant 24 : index
    %c0_307 = arith.constant 0 : index
    %455 = vector.load %arg28[%c24_306, %c0_307] : memref<72x256xf32, #tpu.memory_space<vmem>>, vector<8x256xf32>
    tpu.vector_store %arg28[%c24_306, %c0_307], %454 {strides = array<i32>} : memref<72x256xf32, #tpu.memory_space<vmem>>, vector<8x256xf32>,
    %c32_308 = arith.constant 32 : index
    %c0_309 = arith.constant 0 : index
    %456 = vector.load %arg28[%c32_308, %c0_309] : memref<72x256xf32, #tpu.memory_space<vmem>>, vector<8x256xf32>
    tpu.vector_store %arg28[%c32_308, %c0_309], %428 {strides = array<i32>} : memref<72x256xf32, #tpu.memory_space<vmem>>, vector<8x256xf32>,
    %c255_i32_310 = arith.constant 255 : i32
    %457 = tpu.dynamic_rotate %428 by %c255_i32_310 dim 1 : vector<8x256xf32>, i32 -> vector<8x256xf32>
    %c5_311 = arith.constant 5 : index
    %c0_312 = arith.constant 0 : index
    %c0_313 = arith.constant 0 : index
    %458 = vector.load %arg3[%c5_311, %c0_312, %c0_313] : memref<9x1x256xf32, #tpu.memory_space<vmem>>, vector<1x1x256xf32>
    %459 = vector.shape_cast %458 : vector<1x1x256xf32> to vector<1x256xf32>
    %460 = vector.broadcast %459 : vector<1x256xf32> to vector<8x256xf32>
    %461 = arith.mulf %457, %460 : vector<8x256xf32>
    %c40_314 = arith.constant 40 : index
    %c0_315 = arith.constant 0 : index
    %462 = vector.load %arg28[%c40_314, %c0_315] : memref<72x256xf32, #tpu.memory_space<vmem>>, vector<8x256xf32>
    tpu.vector_store %arg28[%c40_314, %c0_315], %461 {strides = array<i32>} : memref<72x256xf32, #tpu.memory_space<vmem>>, vector<8x256xf32>,
    %c241_i32_316 = arith.constant 241 : i32
    %463 = tpu.dynamic_rotate %428 by %c241_i32_316 dim 1 : vector<8x256xf32>, i32 -> vector<8x256xf32>
    %c6_317 = arith.constant 6 : index
    %c0_318 = arith.constant 0 : index
    %c0_319 = arith.constant 0 : index
    %464 = vector.load %arg3[%c6_317, %c0_318, %c0_319] : memref<9x1x256xf32, #tpu.memory_space<vmem>>, vector<1x1x256xf32>
    %465 = vector.shape_cast %464 : vector<1x1x256xf32> to vector<1x256xf32>
    %466 = vector.broadcast %465 : vector<1x256xf32> to vector<8x256xf32>
    %467 = arith.mulf %463, %466 : vector<8x256xf32>
    %c48_320 = arith.constant 48 : index
    %c0_321 = arith.constant 0 : index
    %468 = vector.load %arg28[%c48_320, %c0_321] : memref<72x256xf32, #tpu.memory_space<vmem>>, vector<8x256xf32>
    tpu.vector_store %arg28[%c48_320, %c0_321], %467 {strides = array<i32>} : memref<72x256xf32, #tpu.memory_space<vmem>>, vector<8x256xf32>,
    %c240_i32_322 = arith.constant 240 : i32
    %469 = tpu.dynamic_rotate %428 by %c240_i32_322 dim 1 : vector<8x256xf32>, i32 -> vector<8x256xf32>
    %c7_323 = arith.constant 7 : index
    %c0_324 = arith.constant 0 : index
    %c0_325 = arith.constant 0 : index
    %470 = vector.load %arg3[%c7_323, %c0_324, %c0_325] : memref<9x1x256xf32, #tpu.memory_space<vmem>>, vector<1x1x256xf32>
    %471 = vector.shape_cast %470 : vector<1x1x256xf32> to vector<1x256xf32>
    %472 = vector.broadcast %471 : vector<1x256xf32> to vector<8x256xf32>
    %473 = arith.mulf %469, %472 : vector<8x256xf32>
    %c56_326 = arith.constant 56 : index
    %c0_327 = arith.constant 0 : index
    %474 = vector.load %arg28[%c56_326, %c0_327] : memref<72x256xf32, #tpu.memory_space<vmem>>, vector<8x256xf32>
    tpu.vector_store %arg28[%c56_326, %c0_327], %473 {strides = array<i32>} : memref<72x256xf32, #tpu.memory_space<vmem>>, vector<8x256xf32>,
    %c239_i32_328 = arith.constant 239 : i32
    %475 = tpu.dynamic_rotate %428 by %c239_i32_328 dim 1 : vector<8x256xf32>, i32 -> vector<8x256xf32>
    %c8_329 = arith.constant 8 : index
    %c0_330 = arith.constant 0 : index
    %c0_331 = arith.constant 0 : index
    %476 = vector.load %arg3[%c8_329, %c0_330, %c0_331] : memref<9x1x256xf32, #tpu.memory_space<vmem>>, vector<1x1x256xf32>
    %477 = vector.shape_cast %476 : vector<1x1x256xf32> to vector<1x256xf32>
    %478 = vector.broadcast %477 : vector<1x256xf32> to vector<8x256xf32>
    %479 = arith.mulf %475, %478 : vector<8x256xf32>
    %c64_332 = arith.constant 64 : index
    %c0_333 = arith.constant 0 : index
    %480 = vector.load %arg28[%c64_332, %c0_333] : memref<72x256xf32, #tpu.memory_space<vmem>>, vector<8x256xf32>
    tpu.vector_store %arg28[%c64_332, %c0_333], %479 {strides = array<i32>} : memref<72x256xf32, #tpu.memory_space<vmem>>, vector<8x256xf32>,
    %c0_334 = arith.constant 0 : index
    %c0_335 = arith.constant 0 : index
    %481 = vector.load %arg23[%c0_334, %c0_335] : memref<8x72xf32, #tpu.memory_space<vmem>>, vector<8x72xf32>
    %c0_336 = arith.constant 0 : index
    %c0_337 = arith.constant 0 : index
    %482 = vector.load %arg28[%c0_336, %c0_337] : memref<72x256xf32, #tpu.memory_space<vmem>>, vector<72x256xf32>
    %cst_338 = arith.constant dense<0.000000e+00> : vector<8x256xf32>
    %483 = tpu.matmul %481, %482, %cst_338 {dimension_numbers = #tpu.dot_dimension_numbers<[1], [0], [0], [1], [0, 0, 1, 1], [], []>} : vector<8x72xf32>, vector<72x256xf32>, vector<8x256xf32> -> vector<8x256xf32>
    %c0_339 = arith.constant 0 : index
    %c0_340 = arith.constant 0 : index
    %484 = vector.load %arg24[%c0_339, %c0_340] : memref<8x1xf32, #tpu.memory_space<vmem>>, vector<8x1xf32>
    %485 = vector.broadcast %484 : vector<8x1xf32> to vector<8x256xf32>
    %486 = arith.addf %483, %485 : vector<8x256xf32>
    %c0_341 = arith.constant 0 : index
    %c0_342 = arith.constant 0 : index
    %487 = vector.load %arg4[%c0_341, %c0_342] : memref<256x64xf32, #tpu.memory_space<vmem>>, vector<256x64xf32>
    %cst_343 = arith.constant dense<0.000000e+00> : vector<8x64xf32>
    %488 = tpu.matmul %486, %487, %cst_343 {dimension_numbers = #tpu.dot_dimension_numbers<[1], [0], [0], [1], [0, 0, 1, 1], [], []>} : vector<8x256xf32>, vector<256x64xf32>, vector<8x64xf32> -> vector<8x64xf32>
    %c0_344 = arith.constant 0 : index
    %c0_345 = arith.constant 0 : index
    %c0_346 = arith.constant 0 : index
    %489 = vector.load %arg27[%c0_344, %c0_345, %c0_346] : memref<2x8x64xf32, #tpu.memory_space<vmem>>, vector<1x8x64xf32>
    %490 = vector.shape_cast %489 : vector<1x8x64xf32> to vector<8x64xf32>
    %491 = vector.shape_cast %488 : vector<8x64xf32> to vector<1x8x64xf32>
    tpu.vector_store %arg27[%c0_344, %c0_345, %c0_346], %491 {strides = array<i32>} : memref<2x8x64xf32, #tpu.memory_space<vmem>>, vector<1x8x64xf32>,
    %c1_347 = arith.constant 1 : index
    %c0_348 = arith.constant 0 : index
    %c0_349 = arith.constant 0 : index
    %492 = vector.load %arg1[%c1_347, %c0_348, %c0_349] : memref<2x4x256xf32, #tpu.memory_space<vmem>>, vector<1x4x256xf32>
    %493 = vector.shape_cast %492 : vector<1x4x256xf32> to vector<4x256xf32>
    %cst_350 = arith.constant dense<0.000000e+00> : vector<4xf32>
    %494 = vector.multi_reduction <add>, %493, %cst_350 [1] : vector<4x256xf32> to vector<4xf32>
    %495 = vector.shape_cast %494 : vector<4xf32> to vector<4x1xf32>
    %cst_351 = arith.constant 3.906250e-03 : f32
    %496 = vector.broadcast %cst_351 : f32 to vector<4x1xf32>
    %497 = arith.mulf %495, %496 : vector<4x1xf32>
    %498 = vector.broadcast %497 : vector<4x1xf32> to vector<4x256xf32>
    %499 = arith.subf %493, %498 : vector<4x256xf32>
    %500 = arith.mulf %499, %499 : vector<4x256xf32>
    %cst_352 = arith.constant dense<0.000000e+00> : vector<4xf32>
    %501 = vector.multi_reduction <add>, %500, %cst_352 [1] : vector<4x256xf32> to vector<4xf32>
    %502 = vector.shape_cast %501 : vector<4xf32> to vector<4x1xf32>
    %cst_353 = arith.constant 3.906250e-03 : f32
    %503 = vector.broadcast %cst_353 : f32 to vector<4x1xf32>
    %504 = arith.mulf %502, %503 : vector<4x1xf32>
    %cst_354 = arith.constant 9.99999997E-7 : f32
    %505 = vector.broadcast %cst_354 : f32 to vector<4x1xf32>
    %506 = arith.addf %504, %505 : vector<4x1xf32>
    %507 = math.rsqrt %506 : vector<4x1xf32>
    %c0_355 = arith.constant 0 : index
    %c0_356 = arith.constant 0 : index
    %508 = vector.load %arg5[%c0_355, %c0_356] : memref<4x1xf32, #tpu.memory_space<vmem>>, vector<4x1xf32>
    %509 = arith.mulf %507, %508 : vector<4x1xf32>
    %510 = vector.broadcast %509 : vector<4x1xf32> to vector<4x256xf32>
    %511 = arith.mulf %499, %510 : vector<4x256xf32>
    %c0_357 = arith.constant 0 : index
    %c0_358 = arith.constant 0 : index
    %512 = vector.load %arg6[%c0_357, %c0_358] : memref<4x1xf32, #tpu.memory_space<vmem>>, vector<4x1xf32>
    %513 = vector.broadcast %512 : vector<4x1xf32> to vector<4x256xf32>
    %514 = arith.addf %511, %513 : vector<4x256xf32>
    %515 = arith.negf %514 : vector<4x256xf32>
    %516 = math.exp %515 : vector<4x256xf32>
    %cst_359 = arith.constant 1.000000e+00 : f32
    %517 = vector.broadcast %cst_359 : f32 to vector<4x256xf32>
    %518 = arith.addf %517, %516 : vector<4x256xf32>
    %519 = arith.divf %517, %518 : vector<4x256xf32>
    %520 = arith.mulf %514, %519 : vector<4x256xf32>
    %c17_i32_360 = arith.constant 17 : i32
    %521 = tpu.dynamic_rotate %520 by %c17_i32_360 dim 1 : vector<4x256xf32>, i32 -> vector<4x256xf32>
    %c0_361 = arith.constant 0 : index
    %c0_362 = arith.constant 0 : index
    %c0_363 = arith.constant 0 : index
    %522 = vector.load %arg3[%c0_361, %c0_362, %c0_363] : memref<9x1x256xf32, #tpu.memory_space<vmem>>, vector<1x1x256xf32>
    %523 = vector.shape_cast %522 : vector<1x1x256xf32> to vector<1x256xf32>
    %524 = vector.broadcast %523 : vector<1x256xf32> to vector<4x256xf32>
    %525 = arith.mulf %521, %524 : vector<4x256xf32>
    %c0_364 = arith.constant 0 : index
    %c0_365 = arith.constant 0 : index
    %526 = vector.load %arg28[%c0_364, %c0_365] : memref<72x256xf32, #tpu.memory_space<vmem>>, vector<4x256xf32>
    tpu.vector_store %arg28[%c0_364, %c0_365], %525 {strides = array<i32>} : memref<72x256xf32, #tpu.memory_space<vmem>>, vector<4x256xf32>,
    %c16_i32_366 = arith.constant 16 : i32
    %527 = tpu.dynamic_rotate %520 by %c16_i32_366 dim 1 : vector<4x256xf32>, i32 -> vector<4x256xf32>
    %c1_367 = arith.constant 1 : index
    %c0_368 = arith.constant 0 : index
    %c0_369 = arith.constant 0 : index
    %528 = vector.load %arg3[%c1_367, %c0_368, %c0_369] : memref<9x1x256xf32, #tpu.memory_space<vmem>>, vector<1x1x256xf32>
    %529 = vector.shape_cast %528 : vector<1x1x256xf32> to vector<1x256xf32>
    %530 = vector.broadcast %529 : vector<1x256xf32> to vector<4x256xf32>
    %531 = arith.mulf %527, %530 : vector<4x256xf32>
    %c4_370 = arith.constant 4 : index
    %c0_371 = arith.constant 0 : index
    %532 = vector.load %arg28[%c4_370, %c0_371] : memref<72x256xf32, #tpu.memory_space<vmem>>, vector<4x256xf32>
    tpu.vector_store %arg28[%c4_370, %c0_371], %531 {strides = array<i32>} : memref<72x256xf32, #tpu.memory_space<vmem>>, vector<4x256xf32>,
    %c15_i32_372 = arith.constant 15 : i32
    %533 = tpu.dynamic_rotate %520 by %c15_i32_372 dim 1 : vector<4x256xf32>, i32 -> vector<4x256xf32>
    %c2_373 = arith.constant 2 : index
    %c0_374 = arith.constant 0 : index
    %c0_375 = arith.constant 0 : index
    %534 = vector.load %arg3[%c2_373, %c0_374, %c0_375] : memref<9x1x256xf32, #tpu.memory_space<vmem>>, vector<1x1x256xf32>
    %535 = vector.shape_cast %534 : vector<1x1x256xf32> to vector<1x256xf32>
    %536 = vector.broadcast %535 : vector<1x256xf32> to vector<4x256xf32>
    %537 = arith.mulf %533, %536 : vector<4x256xf32>
    %c8_376 = arith.constant 8 : index
    %c0_377 = arith.constant 0 : index
    %538 = vector.load %arg28[%c8_376, %c0_377] : memref<72x256xf32, #tpu.memory_space<vmem>>, vector<4x256xf32>
    tpu.vector_store %arg28[%c8_376, %c0_377], %537 {strides = array<i32>} : memref<72x256xf32, #tpu.memory_space<vmem>>, vector<4x256xf32>,
    %c1_i32_378 = arith.constant 1 : i32
    %539 = tpu.dynamic_rotate %520 by %c1_i32_378 dim 1 : vector<4x256xf32>, i32 -> vector<4x256xf32>
    %c3_379 = arith.constant 3 : index
    %c0_380 = arith.constant 0 : index
    %c0_381 = arith.constant 0 : index
    %540 = vector.load %arg3[%c3_379, %c0_380, %c0_381] : memref<9x1x256xf32, #tpu.memory_space<vmem>>, vector<1x1x256xf32>
    %541 = vector.shape_cast %540 : vector<1x1x256xf32> to vector<1x256xf32>
    %542 = vector.broadcast %541 : vector<1x256xf32> to vector<4x256xf32>
    %543 = arith.mulf %539, %542 : vector<4x256xf32>
    %c12_382 = arith.constant 12 : index
    %c0_383 = arith.constant 0 : index
    %544 = vector.load %arg28[%c12_382, %c0_383] : memref<72x256xf32, #tpu.memory_space<vmem>>, vector<4x256xf32>
    tpu.vector_store %arg28[%c12_382, %c0_383], %543 {strides = array<i32>} : memref<72x256xf32, #tpu.memory_space<vmem>>, vector<4x256xf32>,
    %c16_384 = arith.constant 16 : index
    %c0_385 = arith.constant 0 : index
    %545 = vector.load %arg28[%c16_384, %c0_385] : memref<72x256xf32, #tpu.memory_space<vmem>>, vector<4x256xf32>
    tpu.vector_store %arg28[%c16_384, %c0_385], %520 {strides = array<i32>} : memref<72x256xf32, #tpu.memory_space<vmem>>, vector<4x256xf32>,
    %c255_i32_386 = arith.constant 255 : i32
    %546 = tpu.dynamic_rotate %520 by %c255_i32_386 dim 1 : vector<4x256xf32>, i32 -> vector<4x256xf32>
    %c5_387 = arith.constant 5 : index
    %c0_388 = arith.constant 0 : index
    %c0_389 = arith.constant 0 : index
    %547 = vector.load %arg3[%c5_387, %c0_388, %c0_389] : memref<9x1x256xf32, #tpu.memory_space<vmem>>, vector<1x1x256xf32>
    %548 = vector.shape_cast %547 : vector<1x1x256xf32> to vector<1x256xf32>
    %549 = vector.broadcast %548 : vector<1x256xf32> to vector<4x256xf32>
    %550 = arith.mulf %546, %549 : vector<4x256xf32>
    %c20_390 = arith.constant 20 : index
    %c0_391 = arith.constant 0 : index
    %551 = vector.load %arg28[%c20_390, %c0_391] : memref<72x256xf32, #tpu.memory_space<vmem>>, vector<4x256xf32>
    tpu.vector_store %arg28[%c20_390, %c0_391], %550 {strides = array<i32>} : memref<72x256xf32, #tpu.memory_space<vmem>>, vector<4x256xf32>,
    %c241_i32_392 = arith.constant 241 : i32
    %552 = tpu.dynamic_rotate %520 by %c241_i32_392 dim 1 : vector<4x256xf32>, i32 -> vector<4x256xf32>
    %c6_393 = arith.constant 6 : index
    %c0_394 = arith.constant 0 : index
    %c0_395 = arith.constant 0 : index
    %553 = vector.load %arg3[%c6_393, %c0_394, %c0_395] : memref<9x1x256xf32, #tpu.memory_space<vmem>>, vector<1x1x256xf32>
    %554 = vector.shape_cast %553 : vector<1x1x256xf32> to vector<1x256xf32>
    %555 = vector.broadcast %554 : vector<1x256xf32> to vector<4x256xf32>
    %556 = arith.mulf %552, %555 : vector<4x256xf32>
    %c24_396 = arith.constant 24 : index
    %c0_397 = arith.constant 0 : index
    %557 = vector.load %arg28[%c24_396, %c0_397] : memref<72x256xf32, #tpu.memory_space<vmem>>, vector<4x256xf32>
    tpu.vector_store %arg28[%c24_396, %c0_397], %556 {strides = array<i32>} : memref<72x256xf32, #tpu.memory_space<vmem>>, vector<4x256xf32>,
    %c240_i32_398 = arith.constant 240 : i32
    %558 = tpu.dynamic_rotate %520 by %c240_i32_398 dim 1 : vector<4x256xf32>, i32 -> vector<4x256xf32>
    %c7_399 = arith.constant 7 : index
    %c0_400 = arith.constant 0 : index
    %c0_401 = arith.constant 0 : index
    %559 = vector.load %arg3[%c7_399, %c0_400, %c0_401] : memref<9x1x256xf32, #tpu.memory_space<vmem>>, vector<1x1x256xf32>
    %560 = vector.shape_cast %559 : vector<1x1x256xf32> to vector<1x256xf32>
    %561 = vector.broadcast %560 : vector<1x256xf32> to vector<4x256xf32>
    %562 = arith.mulf %558, %561 : vector<4x256xf32>
    %c28_402 = arith.constant 28 : index
    %c0_403 = arith.constant 0 : index
    %563 = vector.load %arg28[%c28_402, %c0_403] : memref<72x256xf32, #tpu.memory_space<vmem>>, vector<4x256xf32>
    tpu.vector_store %arg28[%c28_402, %c0_403], %562 {strides = array<i32>} : memref<72x256xf32, #tpu.memory_space<vmem>>, vector<4x256xf32>,
    %c239_i32_404 = arith.constant 239 : i32
    %564 = tpu.dynamic_rotate %520 by %c239_i32_404 dim 1 : vector<4x256xf32>, i32 -> vector<4x256xf32>
    %c8_405 = arith.constant 8 : index
    %c0_406 = arith.constant 0 : index
    %c0_407 = arith.constant 0 : index
    %565 = vector.load %arg3[%c8_405, %c0_406, %c0_407] : memref<9x1x256xf32, #tpu.memory_space<vmem>>, vector<1x1x256xf32>
    %566 = vector.shape_cast %565 : vector<1x1x256xf32> to vector<1x256xf32>
    %567 = vector.broadcast %566 : vector<1x256xf32> to vector<4x256xf32>
    %568 = arith.mulf %564, %567 : vector<4x256xf32>
    %c32_408 = arith.constant 32 : index
    %c0_409 = arith.constant 0 : index
    %569 = vector.load %arg28[%c32_408, %c0_409] : memref<72x256xf32, #tpu.memory_space<vmem>>, vector<4x256xf32>
    tpu.vector_store %arg28[%c32_408, %c0_409], %568 {strides = array<i32>} : memref<72x256xf32, #tpu.memory_space<vmem>>, vector<4x256xf32>,
    %c0_410 = arith.constant 0 : index
    %c0_411 = arith.constant 0 : index
    %570 = vector.load %arg7[%c0_410, %c0_411] : memref<8x36xf32, #tpu.memory_space<vmem>>, vector<8x36xf32>
    %c0_412 = arith.constant 0 : index
    %c0_413 = arith.constant 0 : index
    %571 = vector.load %arg28[%c0_412, %c0_413] : memref<72x256xf32, #tpu.memory_space<vmem>>, vector<36x256xf32>
    %cst_414 = arith.constant dense<0.000000e+00> : vector<8x256xf32>
    %572 = tpu.matmul %570, %571, %cst_414 {dimension_numbers = #tpu.dot_dimension_numbers<[1], [0], [0], [1], [0, 0, 1, 1], [], []>} : vector<8x36xf32>, vector<36x256xf32>, vector<8x256xf32> -> vector<8x256xf32>
    %c0_415 = arith.constant 0 : index
    %c0_416 = arith.constant 0 : index
    %573 = vector.load %arg8[%c0_415, %c0_416] : memref<8x1xf32, #tpu.memory_space<vmem>>, vector<8x1xf32>
    %574 = vector.broadcast %573 : vector<8x1xf32> to vector<8x256xf32>
    %575 = arith.addf %572, %574 : vector<8x256xf32>
    %c1_417 = arith.constant 1 : index
    %c0_418 = arith.constant 0 : index
    %c0_419 = arith.constant 0 : index
    %c0_420 = arith.constant 0 : index
    %576 = vector.load %arg2[%c1_417, %c0_418, %c0_419, %c0_420] : memref<2x2x8x1xf32, #tpu.memory_space<vmem>>, vector<1x1x8x1xf32>
    %577 = vector.shape_cast %576 : vector<1x1x8x1xf32> to vector<8x1xf32>
    %578 = vector.broadcast %577 : vector<8x1xf32> to vector<8x256xf32>
    %579 = arith.addf %575, %578 : vector<8x256xf32>
    %c7_i32_421 = arith.constant 7 : i32
    %580 = tpu.dynamic_rotate %579 by %c7_i32_421 dim 0 : vector<8x256xf32>, i32 -> vector<8x256xf32>
    %581 = vector.broadcast %20 : vector<8x1xf32> to vector<8x256xf32>
    %582 = arith.mulf %581, %580 : vector<8x256xf32>
    %cst_422 = arith.constant 1.000000e+00 : f32
    %583 = vector.broadcast %cst_422 : f32 to vector<8x1xf32>
    %584 = arith.subf %583, %20 : vector<8x1xf32>
    %c1_i32_423 = arith.constant 1 : i32
    %585 = tpu.dynamic_rotate %579 by %c1_i32_423 dim 0 : vector<8x256xf32>, i32 -> vector<8x256xf32>
    %586 = vector.broadcast %584 : vector<8x1xf32> to vector<8x256xf32>
    %587 = arith.mulf %586, %585 : vector<8x256xf32>
    %588 = arith.addf %582, %587 : vector<8x256xf32>
    %589 = arith.addf %579, %588 : vector<8x256xf32>
    %cst_424 = arith.constant dense<0.000000e+00> : vector<8xf32>
    %590 = vector.multi_reduction <add>, %589, %cst_424 [1] : vector<8x256xf32> to vector<8xf32>
    %591 = vector.shape_cast %590 : vector<8xf32> to vector<8x1xf32>
    %cst_425 = arith.constant 0.001953125 : f32
    %592 = vector.broadcast %cst_425 : f32 to vector<8x1xf32>
    %593 = arith.mulf %591, %592 : vector<8x1xf32>
    %594 = vector.broadcast %593 : vector<8x1xf32> to vector<8x256xf32>
    %595 = arith.subf %579, %594 : vector<8x256xf32>
    %596 = arith.mulf %595, %595 : vector<8x256xf32>
    %c7_i32_426 = arith.constant 7 : i32
    %597 = tpu.dynamic_rotate %596 by %c7_i32_426 dim 0 : vector<8x256xf32>, i32 -> vector<8x256xf32>
    %598 = vector.broadcast %20 : vector<8x1xf32> to vector<8x256xf32>
    %599 = arith.mulf %598, %597 : vector<8x256xf32>
    %cst_427 = arith.constant 1.000000e+00 : f32
    %600 = vector.broadcast %cst_427 : f32 to vector<8x1xf32>
    %601 = arith.subf %600, %20 : vector<8x1xf32>
    %c1_i32_428 = arith.constant 1 : i32
    %602 = tpu.dynamic_rotate %596 by %c1_i32_428 dim 0 : vector<8x256xf32>, i32 -> vector<8x256xf32>
    %603 = vector.broadcast %601 : vector<8x1xf32> to vector<8x256xf32>
    %604 = arith.mulf %603, %602 : vector<8x256xf32>
    %605 = arith.addf %599, %604 : vector<8x256xf32>
    %606 = arith.addf %596, %605 : vector<8x256xf32>
    %cst_429 = arith.constant dense<0.000000e+00> : vector<8xf32>
    %607 = vector.multi_reduction <add>, %606, %cst_429 [1] : vector<8x256xf32> to vector<8xf32>
    %608 = vector.shape_cast %607 : vector<8xf32> to vector<8x1xf32>
    %cst_430 = arith.constant 0.001953125 : f32
    %609 = vector.broadcast %cst_430 : f32 to vector<8x1xf32>
    %610 = arith.mulf %608, %609 : vector<8x1xf32>
    %cst_431 = arith.constant 9.99999997E-7 : f32
    %611 = vector.broadcast %cst_431 : f32 to vector<8x1xf32>
    %612 = arith.addf %610, %611 : vector<8x1xf32>
    %613 = math.rsqrt %612 : vector<8x1xf32>
    %c0_432 = arith.constant 0 : index
    %c0_433 = arith.constant 0 : index
    %614 = vector.load %arg9[%c0_432, %c0_433] : memref<8x1xf32, #tpu.memory_space<vmem>>, vector<8x1xf32>
    %615 = arith.mulf %613, %614 : vector<8x1xf32>
    %616 = vector.broadcast %615 : vector<8x1xf32> to vector<8x256xf32>
    %617 = arith.mulf %595, %616 : vector<8x256xf32>
    %c0_434 = arith.constant 0 : index
    %c0_435 = arith.constant 0 : index
    %618 = vector.load %arg10[%c0_434, %c0_435] : memref<8x1xf32, #tpu.memory_space<vmem>>, vector<8x1xf32>
    %619 = vector.broadcast %618 : vector<8x1xf32> to vector<8x256xf32>
    %620 = arith.addf %617, %619 : vector<8x256xf32>
    %621 = arith.negf %620 : vector<8x256xf32>
    %622 = math.exp %621 : vector<8x256xf32>
    %cst_436 = arith.constant 1.000000e+00 : f32
    %623 = vector.broadcast %cst_436 : f32 to vector<8x256xf32>
    %624 = arith.addf %623, %622 : vector<8x256xf32>
    %625 = arith.divf %623, %624 : vector<8x256xf32>
    %626 = arith.mulf %620, %625 : vector<8x256xf32>
    %c17_i32_437 = arith.constant 17 : i32
    %627 = tpu.dynamic_rotate %626 by %c17_i32_437 dim 1 : vector<8x256xf32>, i32 -> vector<8x256xf32>
    %c0_438 = arith.constant 0 : index
    %c0_439 = arith.constant 0 : index
    %c0_440 = arith.constant 0 : index
    %628 = vector.load %arg3[%c0_438, %c0_439, %c0_440] : memref<9x1x256xf32, #tpu.memory_space<vmem>>, vector<1x1x256xf32>
    %629 = vector.shape_cast %628 : vector<1x1x256xf32> to vector<1x256xf32>
    %630 = vector.broadcast %629 : vector<1x256xf32> to vector<8x256xf32>
    %631 = arith.mulf %627, %630 : vector<8x256xf32>
    %c0_441 = arith.constant 0 : index
    %c0_442 = arith.constant 0 : index
    %632 = vector.load %arg28[%c0_441, %c0_442] : memref<72x256xf32, #tpu.memory_space<vmem>>, vector<8x256xf32>
    tpu.vector_store %arg28[%c0_441, %c0_442], %631 {strides = array<i32>} : memref<72x256xf32, #tpu.memory_space<vmem>>, vector<8x256xf32>,
    %c16_i32_443 = arith.constant 16 : i32
    %633 = tpu.dynamic_rotate %626 by %c16_i32_443 dim 1 : vector<8x256xf32>, i32 -> vector<8x256xf32>
    %c1_444 = arith.constant 1 : index
    %c0_445 = arith.constant 0 : index
    %c0_446 = arith.constant 0 : index
    %634 = vector.load %arg3[%c1_444, %c0_445, %c0_446] : memref<9x1x256xf32, #tpu.memory_space<vmem>>, vector<1x1x256xf32>
    %635 = vector.shape_cast %634 : vector<1x1x256xf32> to vector<1x256xf32>
    %636 = vector.broadcast %635 : vector<1x256xf32> to vector<8x256xf32>
    %637 = arith.mulf %633, %636 : vector<8x256xf32>
    %c8_447 = arith.constant 8 : index
    %c0_448 = arith.constant 0 : index
    %638 = vector.load %arg28[%c8_447, %c0_448] : memref<72x256xf32, #tpu.memory_space<vmem>>, vector<8x256xf32>
    tpu.vector_store %arg28[%c8_447, %c0_448], %637 {strides = array<i32>} : memref<72x256xf32, #tpu.memory_space<vmem>>, vector<8x256xf32>,
    %c15_i32_449 = arith.constant 15 : i32
    %639 = tpu.dynamic_rotate %626 by %c15_i32_449 dim 1 : vector<8x256xf32>, i32 -> vector<8x256xf32>
    %c2_450 = arith.constant 2 : index
    %c0_451 = arith.constant 0 : index
    %c0_452 = arith.constant 0 : index
    %640 = vector.load %arg3[%c2_450, %c0_451, %c0_452] : memref<9x1x256xf32, #tpu.memory_space<vmem>>, vector<1x1x256xf32>
    %641 = vector.shape_cast %640 : vector<1x1x256xf32> to vector<1x256xf32>
    %642 = vector.broadcast %641 : vector<1x256xf32> to vector<8x256xf32>
    %643 = arith.mulf %639, %642 : vector<8x256xf32>
    %c16_453 = arith.constant 16 : index
    %c0_454 = arith.constant 0 : index
    %644 = vector.load %arg28[%c16_453, %c0_454] : memref<72x256xf32, #tpu.memory_space<vmem>>, vector<8x256xf32>
    tpu.vector_store %arg28[%c16_453, %c0_454], %643 {strides = array<i32>} : memref<72x256xf32, #tpu.memory_space<vmem>>, vector<8x256xf32>,
    %c1_i32_455 = arith.constant 1 : i32
    %645 = tpu.dynamic_rotate %626 by %c1_i32_455 dim 1 : vector<8x256xf32>, i32 -> vector<8x256xf32>
    %c3_456 = arith.constant 3 : index
    %c0_457 = arith.constant 0 : index
    %c0_458 = arith.constant 0 : index
    %646 = vector.load %arg3[%c3_456, %c0_457, %c0_458] : memref<9x1x256xf32, #tpu.memory_space<vmem>>, vector<1x1x256xf32>
    %647 = vector.shape_cast %646 : vector<1x1x256xf32> to vector<1x256xf32>
    %648 = vector.broadcast %647 : vector<1x256xf32> to vector<8x256xf32>
    %649 = arith.mulf %645, %648 : vector<8x256xf32>
    %c24_459 = arith.constant 24 : index
    %c0_460 = arith.constant 0 : index
    %650 = vector.load %arg28[%c24_459, %c0_460] : memref<72x256xf32, #tpu.memory_space<vmem>>, vector<8x256xf32>
    tpu.vector_store %arg28[%c24_459, %c0_460], %649 {strides = array<i32>} : memref<72x256xf32, #tpu.memory_space<vmem>>, vector<8x256xf32>,
    %c32_461 = arith.constant 32 : index
    %c0_462 = arith.constant 0 : index
    %651 = vector.load %arg28[%c32_461, %c0_462] : memref<72x256xf32, #tpu.memory_space<vmem>>, vector<8x256xf32>
    tpu.vector_store %arg28[%c32_461, %c0_462], %626 {strides = array<i32>} : memref<72x256xf32, #tpu.memory_space<vmem>>, vector<8x256xf32>,
    %c255_i32_463 = arith.constant 255 : i32
    %652 = tpu.dynamic_rotate %626 by %c255_i32_463 dim 1 : vector<8x256xf32>, i32 -> vector<8x256xf32>
    %c5_464 = arith.constant 5 : index
    %c0_465 = arith.constant 0 : index
    %c0_466 = arith.constant 0 : index
    %653 = vector.load %arg3[%c5_464, %c0_465, %c0_466] : memref<9x1x256xf32, #tpu.memory_space<vmem>>, vector<1x1x256xf32>
    %654 = vector.shape_cast %653 : vector<1x1x256xf32> to vector<1x256xf32>
    %655 = vector.broadcast %654 : vector<1x256xf32> to vector<8x256xf32>
    %656 = arith.mulf %652, %655 : vector<8x256xf32>
    %c40_467 = arith.constant 40 : index
    %c0_468 = arith.constant 0 : index
    %657 = vector.load %arg28[%c40_467, %c0_468] : memref<72x256xf32, #tpu.memory_space<vmem>>, vector<8x256xf32>
    tpu.vector_store %arg28[%c40_467, %c0_468], %656 {strides = array<i32>} : memref<72x256xf32, #tpu.memory_space<vmem>>, vector<8x256xf32>,
    %c241_i32_469 = arith.constant 241 : i32
    %658 = tpu.dynamic_rotate %626 by %c241_i32_469 dim 1 : vector<8x256xf32>, i32 -> vector<8x256xf32>
    %c6_470 = arith.constant 6 : index
    %c0_471 = arith.constant 0 : index
    %c0_472 = arith.constant 0 : index
    %659 = vector.load %arg3[%c6_470, %c0_471, %c0_472] : memref<9x1x256xf32, #tpu.memory_space<vmem>>, vector<1x1x256xf32>
    %660 = vector.shape_cast %659 : vector<1x1x256xf32> to vector<1x256xf32>
    %661 = vector.broadcast %660 : vector<1x256xf32> to vector<8x256xf32>
    %662 = arith.mulf %658, %661 : vector<8x256xf32>
    %c48_473 = arith.constant 48 : index
    %c0_474 = arith.constant 0 : index
    %663 = vector.load %arg28[%c48_473, %c0_474] : memref<72x256xf32, #tpu.memory_space<vmem>>, vector<8x256xf32>
    tpu.vector_store %arg28[%c48_473, %c0_474], %662 {strides = array<i32>} : memref<72x256xf32, #tpu.memory_space<vmem>>, vector<8x256xf32>,
    %c240_i32_475 = arith.constant 240 : i32
    %664 = tpu.dynamic_rotate %626 by %c240_i32_475 dim 1 : vector<8x256xf32>, i32 -> vector<8x256xf32>
    %c7_476 = arith.constant 7 : index
    %c0_477 = arith.constant 0 : index
    %c0_478 = arith.constant 0 : index
    %665 = vector.load %arg3[%c7_476, %c0_477, %c0_478] : memref<9x1x256xf32, #tpu.memory_space<vmem>>, vector<1x1x256xf32>
    %666 = vector.shape_cast %665 : vector<1x1x256xf32> to vector<1x256xf32>
    %667 = vector.broadcast %666 : vector<1x256xf32> to vector<8x256xf32>
    %668 = arith.mulf %664, %667 : vector<8x256xf32>
    %c56_479 = arith.constant 56 : index
    %c0_480 = arith.constant 0 : index
    %669 = vector.load %arg28[%c56_479, %c0_480] : memref<72x256xf32, #tpu.memory_space<vmem>>, vector<8x256xf32>
    tpu.vector_store %arg28[%c56_479, %c0_480], %668 {strides = array<i32>} : memref<72x256xf32, #tpu.memory_space<vmem>>, vector<8x256xf32>,
    %c239_i32_481 = arith.constant 239 : i32
    %670 = tpu.dynamic_rotate %626 by %c239_i32_481 dim 1 : vector<8x256xf32>, i32 -> vector<8x256xf32>
    %c8_482 = arith.constant 8 : index
    %c0_483 = arith.constant 0 : index
    %c0_484 = arith.constant 0 : index
    %671 = vector.load %arg3[%c8_482, %c0_483, %c0_484] : memref<9x1x256xf32, #tpu.memory_space<vmem>>, vector<1x1x256xf32>
    %672 = vector.shape_cast %671 : vector<1x1x256xf32> to vector<1x256xf32>
    %673 = vector.broadcast %672 : vector<1x256xf32> to vector<8x256xf32>
    %674 = arith.mulf %670, %673 : vector<8x256xf32>
    %c64_485 = arith.constant 64 : index
    %c0_486 = arith.constant 0 : index
    %675 = vector.load %arg28[%c64_485, %c0_486] : memref<72x256xf32, #tpu.memory_space<vmem>>, vector<8x256xf32>
    tpu.vector_store %arg28[%c64_485, %c0_486], %674 {strides = array<i32>} : memref<72x256xf32, #tpu.memory_space<vmem>>, vector<8x256xf32>,
    %c0_487 = arith.constant 0 : index
    %c0_488 = arith.constant 0 : index
    %676 = vector.load %arg11[%c0_487, %c0_488] : memref<8x72xf32, #tpu.memory_space<vmem>>, vector<8x72xf32>
    %c0_489 = arith.constant 0 : index
    %c0_490 = arith.constant 0 : index
    %677 = vector.load %arg28[%c0_489, %c0_490] : memref<72x256xf32, #tpu.memory_space<vmem>>, vector<72x256xf32>
    %cst_491 = arith.constant dense<0.000000e+00> : vector<8x256xf32>
    %678 = tpu.matmul %676, %677, %cst_491 {dimension_numbers = #tpu.dot_dimension_numbers<[1], [0], [0], [1], [0, 0, 1, 1], [], []>} : vector<8x72xf32>, vector<72x256xf32>, vector<8x256xf32> -> vector<8x256xf32>
    %c0_492 = arith.constant 0 : index
    %c0_493 = arith.constant 0 : index
    %679 = vector.load %arg12[%c0_492, %c0_493] : memref<8x1xf32, #tpu.memory_space<vmem>>, vector<8x1xf32>
    %680 = vector.broadcast %679 : vector<8x1xf32> to vector<8x256xf32>
    %681 = arith.addf %678, %680 : vector<8x256xf32>
    %c0_494 = arith.constant 0 : index
    %c0_495 = arith.constant 0 : index
    %682 = vector.load %arg13[%c0_494, %c0_495] : memref<8x4xf32, #tpu.memory_space<vmem>>, vector<8x4xf32>
    %cst_496 = arith.constant dense<0.000000e+00> : vector<8x256xf32>
    %683 = tpu.matmul %682, %493, %cst_496 {dimension_numbers = #tpu.dot_dimension_numbers<[1], [0], [0], [1], [0, 0, 1, 1], [], []>} : vector<8x4xf32>, vector<4x256xf32>, vector<8x256xf32> -> vector<8x256xf32>
    %c0_497 = arith.constant 0 : index
    %c0_498 = arith.constant 0 : index
    %684 = vector.load %arg14[%c0_497, %c0_498] : memref<8x1xf32, #tpu.memory_space<vmem>>, vector<8x1xf32>
    %685 = vector.broadcast %684 : vector<8x1xf32> to vector<8x256xf32>
    %686 = arith.addf %683, %685 : vector<8x256xf32>
    %687 = arith.addf %686, %681 : vector<8x256xf32>
    %c1_499 = arith.constant 1 : index
    %c0_500 = arith.constant 0 : index
    %c0_501 = arith.constant 0 : index
    %688 = vector.load %arg25[%c1_499, %c0_500, %c0_501] : memref<2x8x256xf32, #tpu.memory_space<vmem>>, vector<1x8x256xf32>
    %689 = vector.shape_cast %688 : vector<1x8x256xf32> to vector<8x256xf32>
    %690 = vector.shape_cast %687 : vector<8x256xf32> to vector<1x8x256xf32>
    tpu.vector_store %arg25[%c1_499, %c0_500, %c0_501], %690 {strides = array<i32>} : memref<2x8x256xf32, #tpu.memory_space<vmem>>, vector<1x8x256xf32>,
    %c7_i32_502 = arith.constant 7 : i32
    %691 = tpu.dynamic_rotate %687 by %c7_i32_502 dim 0 : vector<8x256xf32>, i32 -> vector<8x256xf32>
    %692 = vector.broadcast %20 : vector<8x1xf32> to vector<8x256xf32>
    %693 = arith.mulf %692, %691 : vector<8x256xf32>
    %cst_503 = arith.constant 1.000000e+00 : f32
    %694 = vector.broadcast %cst_503 : f32 to vector<8x1xf32>
    %695 = arith.subf %694, %20 : vector<8x1xf32>
    %c1_i32_504 = arith.constant 1 : i32
    %696 = tpu.dynamic_rotate %687 by %c1_i32_504 dim 0 : vector<8x256xf32>, i32 -> vector<8x256xf32>
    %697 = vector.broadcast %695 : vector<8x1xf32> to vector<8x256xf32>
    %698 = arith.mulf %697, %696 : vector<8x256xf32>
    %699 = arith.addf %693, %698 : vector<8x256xf32>
    %700 = arith.addf %687, %699 : vector<8x256xf32>
    %cst_505 = arith.constant dense<0.000000e+00> : vector<8xf32>
    %701 = vector.multi_reduction <add>, %700, %cst_505 [1] : vector<8x256xf32> to vector<8xf32>
    %702 = vector.shape_cast %701 : vector<8xf32> to vector<8x1xf32>
    %cst_506 = arith.constant 0.001953125 : f32
    %703 = vector.broadcast %cst_506 : f32 to vector<8x1xf32>
    %704 = arith.mulf %702, %703 : vector<8x1xf32>
    %705 = vector.broadcast %704 : vector<8x1xf32> to vector<8x256xf32>
    %706 = arith.subf %687, %705 : vector<8x256xf32>
    %707 = arith.mulf %706, %706 : vector<8x256xf32>
    %c7_i32_507 = arith.constant 7 : i32
    %708 = tpu.dynamic_rotate %707 by %c7_i32_507 dim 0 : vector<8x256xf32>, i32 -> vector<8x256xf32>
    %709 = vector.broadcast %20 : vector<8x1xf32> to vector<8x256xf32>
    %710 = arith.mulf %709, %708 : vector<8x256xf32>
    %cst_508 = arith.constant 1.000000e+00 : f32
    %711 = vector.broadcast %cst_508 : f32 to vector<8x1xf32>
    %712 = arith.subf %711, %20 : vector<8x1xf32>
    %c1_i32_509 = arith.constant 1 : i32
    %713 = tpu.dynamic_rotate %707 by %c1_i32_509 dim 0 : vector<8x256xf32>, i32 -> vector<8x256xf32>
    %714 = vector.broadcast %712 : vector<8x1xf32> to vector<8x256xf32>
    %715 = arith.mulf %714, %713 : vector<8x256xf32>
    %716 = arith.addf %710, %715 : vector<8x256xf32>
    %717 = arith.addf %707, %716 : vector<8x256xf32>
    %cst_510 = arith.constant dense<0.000000e+00> : vector<8xf32>
    %718 = vector.multi_reduction <add>, %717, %cst_510 [1] : vector<8x256xf32> to vector<8xf32>
    %719 = vector.shape_cast %718 : vector<8xf32> to vector<8x1xf32>
    %cst_511 = arith.constant 0.001953125 : f32
    %720 = vector.broadcast %cst_511 : f32 to vector<8x1xf32>
    %721 = arith.mulf %719, %720 : vector<8x1xf32>
    %cst_512 = arith.constant 9.99999997E-7 : f32
    %722 = vector.broadcast %cst_512 : f32 to vector<8x1xf32>
    %723 = arith.addf %721, %722 : vector<8x1xf32>
    %724 = math.rsqrt %723 : vector<8x1xf32>
    %c0_513 = arith.constant 0 : index
    %c0_514 = arith.constant 0 : index
    %725 = vector.load %arg15[%c0_513, %c0_514] : memref<8x1xf32, #tpu.memory_space<vmem>>, vector<8x1xf32>
    %726 = arith.mulf %724, %725 : vector<8x1xf32>
    %727 = vector.broadcast %726 : vector<8x1xf32> to vector<8x256xf32>
    %728 = arith.mulf %706, %727 : vector<8x256xf32>
    %c0_515 = arith.constant 0 : index
    %c0_516 = arith.constant 0 : index
    %729 = vector.load %arg16[%c0_515, %c0_516] : memref<8x1xf32, #tpu.memory_space<vmem>>, vector<8x1xf32>
    %730 = vector.broadcast %729 : vector<8x1xf32> to vector<8x256xf32>
    %731 = arith.addf %728, %730 : vector<8x256xf32>
    %732 = arith.negf %731 : vector<8x256xf32>
    %733 = math.exp %732 : vector<8x256xf32>
    %cst_517 = arith.constant 1.000000e+00 : f32
    %734 = vector.broadcast %cst_517 : f32 to vector<8x256xf32>
    %735 = arith.addf %734, %733 : vector<8x256xf32>
    %736 = arith.divf %734, %735 : vector<8x256xf32>
    %737 = arith.mulf %731, %736 : vector<8x256xf32>
    %c17_i32_518 = arith.constant 17 : i32
    %738 = tpu.dynamic_rotate %737 by %c17_i32_518 dim 1 : vector<8x256xf32>, i32 -> vector<8x256xf32>
    %c0_519 = arith.constant 0 : index
    %c0_520 = arith.constant 0 : index
    %c0_521 = arith.constant 0 : index
    %739 = vector.load %arg3[%c0_519, %c0_520, %c0_521] : memref<9x1x256xf32, #tpu.memory_space<vmem>>, vector<1x1x256xf32>
    %740 = vector.shape_cast %739 : vector<1x1x256xf32> to vector<1x256xf32>
    %741 = vector.broadcast %740 : vector<1x256xf32> to vector<8x256xf32>
    %742 = arith.mulf %738, %741 : vector<8x256xf32>
    %c0_522 = arith.constant 0 : index
    %c0_523 = arith.constant 0 : index
    %743 = vector.load %arg28[%c0_522, %c0_523] : memref<72x256xf32, #tpu.memory_space<vmem>>, vector<8x256xf32>
    tpu.vector_store %arg28[%c0_522, %c0_523], %742 {strides = array<i32>} : memref<72x256xf32, #tpu.memory_space<vmem>>, vector<8x256xf32>,
    %c16_i32_524 = arith.constant 16 : i32
    %744 = tpu.dynamic_rotate %737 by %c16_i32_524 dim 1 : vector<8x256xf32>, i32 -> vector<8x256xf32>
    %c1_525 = arith.constant 1 : index
    %c0_526 = arith.constant 0 : index
    %c0_527 = arith.constant 0 : index
    %745 = vector.load %arg3[%c1_525, %c0_526, %c0_527] : memref<9x1x256xf32, #tpu.memory_space<vmem>>, vector<1x1x256xf32>
    %746 = vector.shape_cast %745 : vector<1x1x256xf32> to vector<1x256xf32>
    %747 = vector.broadcast %746 : vector<1x256xf32> to vector<8x256xf32>
    %748 = arith.mulf %744, %747 : vector<8x256xf32>
    %c8_528 = arith.constant 8 : index
    %c0_529 = arith.constant 0 : index
    %749 = vector.load %arg28[%c8_528, %c0_529] : memref<72x256xf32, #tpu.memory_space<vmem>>, vector<8x256xf32>
    tpu.vector_store %arg28[%c8_528, %c0_529], %748 {strides = array<i32>} : memref<72x256xf32, #tpu.memory_space<vmem>>, vector<8x256xf32>,
    %c15_i32_530 = arith.constant 15 : i32
    %750 = tpu.dynamic_rotate %737 by %c15_i32_530 dim 1 : vector<8x256xf32>, i32 -> vector<8x256xf32>
    %c2_531 = arith.constant 2 : index
    %c0_532 = arith.constant 0 : index
    %c0_533 = arith.constant 0 : index
    %751 = vector.load %arg3[%c2_531, %c0_532, %c0_533] : memref<9x1x256xf32, #tpu.memory_space<vmem>>, vector<1x1x256xf32>
    %752 = vector.shape_cast %751 : vector<1x1x256xf32> to vector<1x256xf32>
    %753 = vector.broadcast %752 : vector<1x256xf32> to vector<8x256xf32>
    %754 = arith.mulf %750, %753 : vector<8x256xf32>
    %c16_534 = arith.constant 16 : index
    %c0_535 = arith.constant 0 : index
    %755 = vector.load %arg28[%c16_534, %c0_535] : memref<72x256xf32, #tpu.memory_space<vmem>>, vector<8x256xf32>
    tpu.vector_store %arg28[%c16_534, %c0_535], %754 {strides = array<i32>} : memref<72x256xf32, #tpu.memory_space<vmem>>, vector<8x256xf32>,
    %c1_i32_536 = arith.constant 1 : i32
    %756 = tpu.dynamic_rotate %737 by %c1_i32_536 dim 1 : vector<8x256xf32>, i32 -> vector<8x256xf32>
    %c3_537 = arith.constant 3 : index
    %c0_538 = arith.constant 0 : index
    %c0_539 = arith.constant 0 : index
    %757 = vector.load %arg3[%c3_537, %c0_538, %c0_539] : memref<9x1x256xf32, #tpu.memory_space<vmem>>, vector<1x1x256xf32>
    %758 = vector.shape_cast %757 : vector<1x1x256xf32> to vector<1x256xf32>
    %759 = vector.broadcast %758 : vector<1x256xf32> to vector<8x256xf32>
    %760 = arith.mulf %756, %759 : vector<8x256xf32>
    %c24_540 = arith.constant 24 : index
    %c0_541 = arith.constant 0 : index
    %761 = vector.load %arg28[%c24_540, %c0_541] : memref<72x256xf32, #tpu.memory_space<vmem>>, vector<8x256xf32>
    tpu.vector_store %arg28[%c24_540, %c0_541], %760 {strides = array<i32>} : memref<72x256xf32, #tpu.memory_space<vmem>>, vector<8x256xf32>,
    %c32_542 = arith.constant 32 : index
    %c0_543 = arith.constant 0 : index
    %762 = vector.load %arg28[%c32_542, %c0_543] : memref<72x256xf32, #tpu.memory_space<vmem>>, vector<8x256xf32>
    tpu.vector_store %arg28[%c32_542, %c0_543], %737 {strides = array<i32>} : memref<72x256xf32, #tpu.memory_space<vmem>>, vector<8x256xf32>,
    %c255_i32_544 = arith.constant 255 : i32
    %763 = tpu.dynamic_rotate %737 by %c255_i32_544 dim 1 : vector<8x256xf32>, i32 -> vector<8x256xf32>
    %c5_545 = arith.constant 5 : index
    %c0_546 = arith.constant 0 : index
    %c0_547 = arith.constant 0 : index
    %764 = vector.load %arg3[%c5_545, %c0_546, %c0_547] : memref<9x1x256xf32, #tpu.memory_space<vmem>>, vector<1x1x256xf32>
    %765 = vector.shape_cast %764 : vector<1x1x256xf32> to vector<1x256xf32>
    %766 = vector.broadcast %765 : vector<1x256xf32> to vector<8x256xf32>
    %767 = arith.mulf %763, %766 : vector<8x256xf32>
    %c40_548 = arith.constant 40 : index
    %c0_549 = arith.constant 0 : index
    %768 = vector.load %arg28[%c40_548, %c0_549] : memref<72x256xf32, #tpu.memory_space<vmem>>, vector<8x256xf32>
    tpu.vector_store %arg28[%c40_548, %c0_549], %767 {strides = array<i32>} : memref<72x256xf32, #tpu.memory_space<vmem>>, vector<8x256xf32>,
    %c241_i32_550 = arith.constant 241 : i32
    %769 = tpu.dynamic_rotate %737 by %c241_i32_550 dim 1 : vector<8x256xf32>, i32 -> vector<8x256xf32>
    %c6_551 = arith.constant 6 : index
    %c0_552 = arith.constant 0 : index
    %c0_553 = arith.constant 0 : index
    %770 = vector.load %arg3[%c6_551, %c0_552, %c0_553] : memref<9x1x256xf32, #tpu.memory_space<vmem>>, vector<1x1x256xf32>
    %771 = vector.shape_cast %770 : vector<1x1x256xf32> to vector<1x256xf32>
    %772 = vector.broadcast %771 : vector<1x256xf32> to vector<8x256xf32>
    %773 = arith.mulf %769, %772 : vector<8x256xf32>
    %c48_554 = arith.constant 48 : index
    %c0_555 = arith.constant 0 : index
    %774 = vector.load %arg28[%c48_554, %c0_555] : memref<72x256xf32, #tpu.memory_space<vmem>>, vector<8x256xf32>
    tpu.vector_store %arg28[%c48_554, %c0_555], %773 {strides = array<i32>} : memref<72x256xf32, #tpu.memory_space<vmem>>, vector<8x256xf32>,
    %c240_i32_556 = arith.constant 240 : i32
    %775 = tpu.dynamic_rotate %737 by %c240_i32_556 dim 1 : vector<8x256xf32>, i32 -> vector<8x256xf32>
    %c7_557 = arith.constant 7 : index
    %c0_558 = arith.constant 0 : index
    %c0_559 = arith.constant 0 : index
    %776 = vector.load %arg3[%c7_557, %c0_558, %c0_559] : memref<9x1x256xf32, #tpu.memory_space<vmem>>, vector<1x1x256xf32>
    %777 = vector.shape_cast %776 : vector<1x1x256xf32> to vector<1x256xf32>
    %778 = vector.broadcast %777 : vector<1x256xf32> to vector<8x256xf32>
    %779 = arith.mulf %775, %778 : vector<8x256xf32>
    %c56_560 = arith.constant 56 : index
    %c0_561 = arith.constant 0 : index
    %780 = vector.load %arg28[%c56_560, %c0_561] : memref<72x256xf32, #tpu.memory_space<vmem>>, vector<8x256xf32>
    tpu.vector_store %arg28[%c56_560, %c0_561], %779 {strides = array<i32>} : memref<72x256xf32, #tpu.memory_space<vmem>>, vector<8x256xf32>,
    %c239_i32_562 = arith.constant 239 : i32
    %781 = tpu.dynamic_rotate %737 by %c239_i32_562 dim 1 : vector<8x256xf32>, i32 -> vector<8x256xf32>
    %c8_563 = arith.constant 8 : index
    %c0_564 = arith.constant 0 : index
    %c0_565 = arith.constant 0 : index
    %782 = vector.load %arg3[%c8_563, %c0_564, %c0_565] : memref<9x1x256xf32, #tpu.memory_space<vmem>>, vector<1x1x256xf32>
    %783 = vector.shape_cast %782 : vector<1x1x256xf32> to vector<1x256xf32>
    %784 = vector.broadcast %783 : vector<1x256xf32> to vector<8x256xf32>
    %785 = arith.mulf %781, %784 : vector<8x256xf32>
    %c64_566 = arith.constant 64 : index
    %c0_567 = arith.constant 0 : index
    %786 = vector.load %arg28[%c64_566, %c0_567] : memref<72x256xf32, #tpu.memory_space<vmem>>, vector<8x256xf32>
    tpu.vector_store %arg28[%c64_566, %c0_567], %785 {strides = array<i32>} : memref<72x256xf32, #tpu.memory_space<vmem>>, vector<8x256xf32>,
    %c0_568 = arith.constant 0 : index
    %c0_569 = arith.constant 0 : index
    %787 = vector.load %arg17[%c0_568, %c0_569] : memref<8x72xf32, #tpu.memory_space<vmem>>, vector<8x72xf32>
    %c0_570 = arith.constant 0 : index
    %c0_571 = arith.constant 0 : index
    %788 = vector.load %arg28[%c0_570, %c0_571] : memref<72x256xf32, #tpu.memory_space<vmem>>, vector<72x256xf32>
    %cst_572 = arith.constant dense<0.000000e+00> : vector<8x256xf32>
    %789 = tpu.matmul %787, %788, %cst_572 {dimension_numbers = #tpu.dot_dimension_numbers<[1], [0], [0], [1], [0, 0, 1, 1], [], []>} : vector<8x72xf32>, vector<72x256xf32>, vector<8x256xf32> -> vector<8x256xf32>
    %c0_573 = arith.constant 0 : index
    %c0_574 = arith.constant 0 : index
    %790 = vector.load %arg18[%c0_573, %c0_574] : memref<8x1xf32, #tpu.memory_space<vmem>>, vector<8x1xf32>
    %791 = vector.broadcast %790 : vector<8x1xf32> to vector<8x256xf32>
    %792 = arith.addf %789, %791 : vector<8x256xf32>
    %c1_575 = arith.constant 1 : index
    %c1_576 = arith.constant 1 : index
    %c0_577 = arith.constant 0 : index
    %c0_578 = arith.constant 0 : index
    %793 = vector.load %arg2[%c1_575, %c1_576, %c0_577, %c0_578] : memref<2x2x8x1xf32, #tpu.memory_space<vmem>>, vector<1x1x8x1xf32>
    %794 = vector.shape_cast %793 : vector<1x1x8x1xf32> to vector<8x1xf32>
    %795 = vector.broadcast %794 : vector<8x1xf32> to vector<8x256xf32>
    %796 = arith.addf %792, %795 : vector<8x256xf32>
    %c7_i32_579 = arith.constant 7 : i32
    %797 = tpu.dynamic_rotate %796 by %c7_i32_579 dim 0 : vector<8x256xf32>, i32 -> vector<8x256xf32>
    %798 = vector.broadcast %20 : vector<8x1xf32> to vector<8x256xf32>
    %799 = arith.mulf %798, %797 : vector<8x256xf32>
    %cst_580 = arith.constant 1.000000e+00 : f32
    %800 = vector.broadcast %cst_580 : f32 to vector<8x1xf32>
    %801 = arith.subf %800, %20 : vector<8x1xf32>
    %c1_i32_581 = arith.constant 1 : i32
    %802 = tpu.dynamic_rotate %796 by %c1_i32_581 dim 0 : vector<8x256xf32>, i32 -> vector<8x256xf32>
    %803 = vector.broadcast %801 : vector<8x1xf32> to vector<8x256xf32>
    %804 = arith.mulf %803, %802 : vector<8x256xf32>
    %805 = arith.addf %799, %804 : vector<8x256xf32>
    %806 = arith.addf %796, %805 : vector<8x256xf32>
    %cst_582 = arith.constant dense<0.000000e+00> : vector<8xf32>
    %807 = vector.multi_reduction <add>, %806, %cst_582 [1] : vector<8x256xf32> to vector<8xf32>
    %808 = vector.shape_cast %807 : vector<8xf32> to vector<8x1xf32>
    %cst_583 = arith.constant 0.001953125 : f32
    %809 = vector.broadcast %cst_583 : f32 to vector<8x1xf32>
    %810 = arith.mulf %808, %809 : vector<8x1xf32>
    %811 = vector.broadcast %810 : vector<8x1xf32> to vector<8x256xf32>
    %812 = arith.subf %796, %811 : vector<8x256xf32>
    %813 = arith.mulf %812, %812 : vector<8x256xf32>
    %c7_i32_584 = arith.constant 7 : i32
    %814 = tpu.dynamic_rotate %813 by %c7_i32_584 dim 0 : vector<8x256xf32>, i32 -> vector<8x256xf32>
    %815 = vector.broadcast %20 : vector<8x1xf32> to vector<8x256xf32>
    %816 = arith.mulf %815, %814 : vector<8x256xf32>
    %cst_585 = arith.constant 1.000000e+00 : f32
    %817 = vector.broadcast %cst_585 : f32 to vector<8x1xf32>
    %818 = arith.subf %817, %20 : vector<8x1xf32>
    %c1_i32_586 = arith.constant 1 : i32
    %819 = tpu.dynamic_rotate %813 by %c1_i32_586 dim 0 : vector<8x256xf32>, i32 -> vector<8x256xf32>
    %820 = vector.broadcast %818 : vector<8x1xf32> to vector<8x256xf32>
    %821 = arith.mulf %820, %819 : vector<8x256xf32>
    %822 = arith.addf %816, %821 : vector<8x256xf32>
    %823 = arith.addf %813, %822 : vector<8x256xf32>
    %cst_587 = arith.constant dense<0.000000e+00> : vector<8xf32>
    %824 = vector.multi_reduction <add>, %823, %cst_587 [1] : vector<8x256xf32> to vector<8xf32>
    %825 = vector.shape_cast %824 : vector<8xf32> to vector<8x1xf32>
    %cst_588 = arith.constant 0.001953125 : f32
    %826 = vector.broadcast %cst_588 : f32 to vector<8x1xf32>
    %827 = arith.mulf %825, %826 : vector<8x1xf32>
    %cst_589 = arith.constant 9.99999997E-7 : f32
    %828 = vector.broadcast %cst_589 : f32 to vector<8x1xf32>
    %829 = arith.addf %827, %828 : vector<8x1xf32>
    %830 = math.rsqrt %829 : vector<8x1xf32>
    %c0_590 = arith.constant 0 : index
    %c0_591 = arith.constant 0 : index
    %831 = vector.load %arg19[%c0_590, %c0_591] : memref<8x1xf32, #tpu.memory_space<vmem>>, vector<8x1xf32>
    %832 = arith.mulf %830, %831 : vector<8x1xf32>
    %833 = vector.broadcast %832 : vector<8x1xf32> to vector<8x256xf32>
    %834 = arith.mulf %812, %833 : vector<8x256xf32>
    %c0_592 = arith.constant 0 : index
    %c0_593 = arith.constant 0 : index
    %835 = vector.load %arg20[%c0_592, %c0_593] : memref<8x1xf32, #tpu.memory_space<vmem>>, vector<8x1xf32>
    %836 = vector.broadcast %835 : vector<8x1xf32> to vector<8x256xf32>
    %837 = arith.addf %834, %836 : vector<8x256xf32>
    %838 = arith.negf %837 : vector<8x256xf32>
    %839 = math.exp %838 : vector<8x256xf32>
    %cst_594 = arith.constant 1.000000e+00 : f32
    %840 = vector.broadcast %cst_594 : f32 to vector<8x256xf32>
    %841 = arith.addf %840, %839 : vector<8x256xf32>
    %842 = arith.divf %840, %841 : vector<8x256xf32>
    %843 = arith.mulf %837, %842 : vector<8x256xf32>
    %c17_i32_595 = arith.constant 17 : i32
    %844 = tpu.dynamic_rotate %843 by %c17_i32_595 dim 1 : vector<8x256xf32>, i32 -> vector<8x256xf32>
    %c0_596 = arith.constant 0 : index
    %c0_597 = arith.constant 0 : index
    %c0_598 = arith.constant 0 : index
    %845 = vector.load %arg3[%c0_596, %c0_597, %c0_598] : memref<9x1x256xf32, #tpu.memory_space<vmem>>, vector<1x1x256xf32>
    %846 = vector.shape_cast %845 : vector<1x1x256xf32> to vector<1x256xf32>
    %847 = vector.broadcast %846 : vector<1x256xf32> to vector<8x256xf32>
    %848 = arith.mulf %844, %847 : vector<8x256xf32>
    %c0_599 = arith.constant 0 : index
    %c0_600 = arith.constant 0 : index
    %849 = vector.load %arg28[%c0_599, %c0_600] : memref<72x256xf32, #tpu.memory_space<vmem>>, vector<8x256xf32>
    tpu.vector_store %arg28[%c0_599, %c0_600], %848 {strides = array<i32>} : memref<72x256xf32, #tpu.memory_space<vmem>>, vector<8x256xf32>,
    %c16_i32_601 = arith.constant 16 : i32
    %850 = tpu.dynamic_rotate %843 by %c16_i32_601 dim 1 : vector<8x256xf32>, i32 -> vector<8x256xf32>
    %c1_602 = arith.constant 1 : index
    %c0_603 = arith.constant 0 : index
    %c0_604 = arith.constant 0 : index
    %851 = vector.load %arg3[%c1_602, %c0_603, %c0_604] : memref<9x1x256xf32, #tpu.memory_space<vmem>>, vector<1x1x256xf32>
    %852 = vector.shape_cast %851 : vector<1x1x256xf32> to vector<1x256xf32>
    %853 = vector.broadcast %852 : vector<1x256xf32> to vector<8x256xf32>
    %854 = arith.mulf %850, %853 : vector<8x256xf32>
    %c8_605 = arith.constant 8 : index
    %c0_606 = arith.constant 0 : index
    %855 = vector.load %arg28[%c8_605, %c0_606] : memref<72x256xf32, #tpu.memory_space<vmem>>, vector<8x256xf32>
    tpu.vector_store %arg28[%c8_605, %c0_606], %854 {strides = array<i32>} : memref<72x256xf32, #tpu.memory_space<vmem>>, vector<8x256xf32>,
    %c15_i32_607 = arith.constant 15 : i32
    %856 = tpu.dynamic_rotate %843 by %c15_i32_607 dim 1 : vector<8x256xf32>, i32 -> vector<8x256xf32>
    %c2_608 = arith.constant 2 : index
    %c0_609 = arith.constant 0 : index
    %c0_610 = arith.constant 0 : index
    %857 = vector.load %arg3[%c2_608, %c0_609, %c0_610] : memref<9x1x256xf32, #tpu.memory_space<vmem>>, vector<1x1x256xf32>
    %858 = vector.shape_cast %857 : vector<1x1x256xf32> to vector<1x256xf32>
    %859 = vector.broadcast %858 : vector<1x256xf32> to vector<8x256xf32>
    %860 = arith.mulf %856, %859 : vector<8x256xf32>
    %c16_611 = arith.constant 16 : index
    %c0_612 = arith.constant 0 : index
    %861 = vector.load %arg28[%c16_611, %c0_612] : memref<72x256xf32, #tpu.memory_space<vmem>>, vector<8x256xf32>
    tpu.vector_store %arg28[%c16_611, %c0_612], %860 {strides = array<i32>} : memref<72x256xf32, #tpu.memory_space<vmem>>, vector<8x256xf32>,
    %c1_i32_613 = arith.constant 1 : i32
    %862 = tpu.dynamic_rotate %843 by %c1_i32_613 dim 1 : vector<8x256xf32>, i32 -> vector<8x256xf32>
    %c3_614 = arith.constant 3 : index
    %c0_615 = arith.constant 0 : index
    %c0_616 = arith.constant 0 : index
    %863 = vector.load %arg3[%c3_614, %c0_615, %c0_616] : memref<9x1x256xf32, #tpu.memory_space<vmem>>, vector<1x1x256xf32>
    %864 = vector.shape_cast %863 : vector<1x1x256xf32> to vector<1x256xf32>
    %865 = vector.broadcast %864 : vector<1x256xf32> to vector<8x256xf32>
    %866 = arith.mulf %862, %865 : vector<8x256xf32>
    %c24_617 = arith.constant 24 : index
    %c0_618 = arith.constant 0 : index
    %867 = vector.load %arg28[%c24_617, %c0_618] : memref<72x256xf32, #tpu.memory_space<vmem>>, vector<8x256xf32>
    tpu.vector_store %arg28[%c24_617, %c0_618], %866 {strides = array<i32>} : memref<72x256xf32, #tpu.memory_space<vmem>>, vector<8x256xf32>,
    %c32_619 = arith.constant 32 : index
    %c0_620 = arith.constant 0 : index
    %868 = vector.load %arg28[%c32_619, %c0_620] : memref<72x256xf32, #tpu.memory_space<vmem>>, vector<8x256xf32>
    tpu.vector_store %arg28[%c32_619, %c0_620], %843 {strides = array<i32>} : memref<72x256xf32, #tpu.memory_space<vmem>>, vector<8x256xf32>,
    %c255_i32_621 = arith.constant 255 : i32
    %869 = tpu.dynamic_rotate %843 by %c255_i32_621 dim 1 : vector<8x256xf32>, i32 -> vector<8x256xf32>
    %c5_622 = arith.constant 5 : index
    %c0_623 = arith.constant 0 : index
    %c0_624 = arith.constant 0 : index
    %870 = vector.load %arg3[%c5_622, %c0_623, %c0_624] : memref<9x1x256xf32, #tpu.memory_space<vmem>>, vector<1x1x256xf32>
    %871 = vector.shape_cast %870 : vector<1x1x256xf32> to vector<1x256xf32>
    %872 = vector.broadcast %871 : vector<1x256xf32> to vector<8x256xf32>
    %873 = arith.mulf %869, %872 : vector<8x256xf32>
    %c40_625 = arith.constant 40 : index
    %c0_626 = arith.constant 0 : index
    %874 = vector.load %arg28[%c40_625, %c0_626] : memref<72x256xf32, #tpu.memory_space<vmem>>, vector<8x256xf32>
    tpu.vector_store %arg28[%c40_625, %c0_626], %873 {strides = array<i32>} : memref<72x256xf32, #tpu.memory_space<vmem>>, vector<8x256xf32>,
    %c241_i32_627 = arith.constant 241 : i32
    %875 = tpu.dynamic_rotate %843 by %c241_i32_627 dim 1 : vector<8x256xf32>, i32 -> vector<8x256xf32>
    %c6_628 = arith.constant 6 : index
    %c0_629 = arith.constant 0 : index
    %c0_630 = arith.constant 0 : index
    %876 = vector.load %arg3[%c6_628, %c0_629, %c0_630] : memref<9x1x256xf32, #tpu.memory_space<vmem>>, vector<1x1x256xf32>
    %877 = vector.shape_cast %876 : vector<1x1x256xf32> to vector<1x256xf32>
    %878 = vector.broadcast %877 : vector<1x256xf32> to vector<8x256xf32>
    %879 = arith.mulf %875, %878 : vector<8x256xf32>
    %c48_631 = arith.constant 48 : index
    %c0_632 = arith.constant 0 : index
    %880 = vector.load %arg28[%c48_631, %c0_632] : memref<72x256xf32, #tpu.memory_space<vmem>>, vector<8x256xf32>
    tpu.vector_store %arg28[%c48_631, %c0_632], %879 {strides = array<i32>} : memref<72x256xf32, #tpu.memory_space<vmem>>, vector<8x256xf32>,
    %c240_i32_633 = arith.constant 240 : i32
    %881 = tpu.dynamic_rotate %843 by %c240_i32_633 dim 1 : vector<8x256xf32>, i32 -> vector<8x256xf32>
    %c7_634 = arith.constant 7 : index
    %c0_635 = arith.constant 0 : index
    %c0_636 = arith.constant 0 : index
    %882 = vector.load %arg3[%c7_634, %c0_635, %c0_636] : memref<9x1x256xf32, #tpu.memory_space<vmem>>, vector<1x1x256xf32>
    %883 = vector.shape_cast %882 : vector<1x1x256xf32> to vector<1x256xf32>
    %884 = vector.broadcast %883 : vector<1x256xf32> to vector<8x256xf32>
    %885 = arith.mulf %881, %884 : vector<8x256xf32>
    %c56_637 = arith.constant 56 : index
    %c0_638 = arith.constant 0 : index
    %886 = vector.load %arg28[%c56_637, %c0_638] : memref<72x256xf32, #tpu.memory_space<vmem>>, vector<8x256xf32>
    tpu.vector_store %arg28[%c56_637, %c0_638], %885 {strides = array<i32>} : memref<72x256xf32, #tpu.memory_space<vmem>>, vector<8x256xf32>,
    %c239_i32_639 = arith.constant 239 : i32
    %887 = tpu.dynamic_rotate %843 by %c239_i32_639 dim 1 : vector<8x256xf32>, i32 -> vector<8x256xf32>
    %c8_640 = arith.constant 8 : index
    %c0_641 = arith.constant 0 : index
    %c0_642 = arith.constant 0 : index
    %888 = vector.load %arg3[%c8_640, %c0_641, %c0_642] : memref<9x1x256xf32, #tpu.memory_space<vmem>>, vector<1x1x256xf32>
    %889 = vector.shape_cast %888 : vector<1x1x256xf32> to vector<1x256xf32>
    %890 = vector.broadcast %889 : vector<1x256xf32> to vector<8x256xf32>
    %891 = arith.mulf %887, %890 : vector<8x256xf32>
    %c64_643 = arith.constant 64 : index
    %c0_644 = arith.constant 0 : index
    %892 = vector.load %arg28[%c64_643, %c0_644] : memref<72x256xf32, #tpu.memory_space<vmem>>, vector<8x256xf32>
    tpu.vector_store %arg28[%c64_643, %c0_644], %891 {strides = array<i32>} : memref<72x256xf32, #tpu.memory_space<vmem>>, vector<8x256xf32>,
    %c0_645 = arith.constant 0 : index
    %c0_646 = arith.constant 0 : index
    %893 = vector.load %arg21[%c0_645, %c0_646] : memref<8x72xf32, #tpu.memory_space<vmem>>, vector<8x72xf32>
    %c0_647 = arith.constant 0 : index
    %c0_648 = arith.constant 0 : index
    %894 = vector.load %arg28[%c0_647, %c0_648] : memref<72x256xf32, #tpu.memory_space<vmem>>, vector<72x256xf32>
    %cst_649 = arith.constant dense<0.000000e+00> : vector<8x256xf32>
    %895 = tpu.matmul %893, %894, %cst_649 {dimension_numbers = #tpu.dot_dimension_numbers<[1], [0], [0], [1], [0, 0, 1, 1], [], []>} : vector<8x72xf32>, vector<72x256xf32>, vector<8x256xf32> -> vector<8x256xf32>
    %c0_650 = arith.constant 0 : index
    %c0_651 = arith.constant 0 : index
    %896 = vector.load %arg22[%c0_650, %c0_651] : memref<8x1xf32, #tpu.memory_space<vmem>>, vector<8x1xf32>
    %897 = vector.broadcast %896 : vector<8x1xf32> to vector<8x256xf32>
    %898 = arith.addf %895, %897 : vector<8x256xf32>
    %899 = arith.addf %687, %898 : vector<8x256xf32>
    %c1_652 = arith.constant 1 : index
    %c0_653 = arith.constant 0 : index
    %c0_654 = arith.constant 0 : index
    %900 = vector.load %arg26[%c1_652, %c0_653, %c0_654] : memref<2x8x256xf32, #tpu.memory_space<vmem>>, vector<1x8x256xf32>
    %901 = vector.shape_cast %900 : vector<1x8x256xf32> to vector<8x256xf32>
    %902 = vector.shape_cast %899 : vector<8x256xf32> to vector<1x8x256xf32>
    tpu.vector_store %arg26[%c1_652, %c0_653, %c0_654], %902 {strides = array<i32>} : memref<2x8x256xf32, #tpu.memory_space<vmem>>, vector<1x8x256xf32>,
    %c17_i32_655 = arith.constant 17 : i32
    %903 = tpu.dynamic_rotate %899 by %c17_i32_655 dim 1 : vector<8x256xf32>, i32 -> vector<8x256xf32>
    %c0_656 = arith.constant 0 : index
    %c0_657 = arith.constant 0 : index
    %c0_658 = arith.constant 0 : index
    %904 = vector.load %arg3[%c0_656, %c0_657, %c0_658] : memref<9x1x256xf32, #tpu.memory_space<vmem>>, vector<1x1x256xf32>
    %905 = vector.shape_cast %904 : vector<1x1x256xf32> to vector<1x256xf32>
    %906 = vector.broadcast %905 : vector<1x256xf32> to vector<8x256xf32>
    %907 = arith.mulf %903, %906 : vector<8x256xf32>
    %c0_659 = arith.constant 0 : index
    %c0_660 = arith.constant 0 : index
    %908 = vector.load %arg28[%c0_659, %c0_660] : memref<72x256xf32, #tpu.memory_space<vmem>>, vector<8x256xf32>
    tpu.vector_store %arg28[%c0_659, %c0_660], %907 {strides = array<i32>} : memref<72x256xf32, #tpu.memory_space<vmem>>, vector<8x256xf32>,
    %c16_i32_661 = arith.constant 16 : i32
    %909 = tpu.dynamic_rotate %899 by %c16_i32_661 dim 1 : vector<8x256xf32>, i32 -> vector<8x256xf32>
    %c1_662 = arith.constant 1 : index
    %c0_663 = arith.constant 0 : index
    %c0_664 = arith.constant 0 : index
    %910 = vector.load %arg3[%c1_662, %c0_663, %c0_664] : memref<9x1x256xf32, #tpu.memory_space<vmem>>, vector<1x1x256xf32>
    %911 = vector.shape_cast %910 : vector<1x1x256xf32> to vector<1x256xf32>
    %912 = vector.broadcast %911 : vector<1x256xf32> to vector<8x256xf32>
    %913 = arith.mulf %909, %912 : vector<8x256xf32>
    %c8_665 = arith.constant 8 : index
    %c0_666 = arith.constant 0 : index
    %914 = vector.load %arg28[%c8_665, %c0_666] : memref<72x256xf32, #tpu.memory_space<vmem>>, vector<8x256xf32>
    tpu.vector_store %arg28[%c8_665, %c0_666], %913 {strides = array<i32>} : memref<72x256xf32, #tpu.memory_space<vmem>>, vector<8x256xf32>,
    %c15_i32_667 = arith.constant 15 : i32
    %915 = tpu.dynamic_rotate %899 by %c15_i32_667 dim 1 : vector<8x256xf32>, i32 -> vector<8x256xf32>
    %c2_668 = arith.constant 2 : index
    %c0_669 = arith.constant 0 : index
    %c0_670 = arith.constant 0 : index
    %916 = vector.load %arg3[%c2_668, %c0_669, %c0_670] : memref<9x1x256xf32, #tpu.memory_space<vmem>>, vector<1x1x256xf32>
    %917 = vector.shape_cast %916 : vector<1x1x256xf32> to vector<1x256xf32>
    %918 = vector.broadcast %917 : vector<1x256xf32> to vector<8x256xf32>
    %919 = arith.mulf %915, %918 : vector<8x256xf32>
    %c16_671 = arith.constant 16 : index
    %c0_672 = arith.constant 0 : index
    %920 = vector.load %arg28[%c16_671, %c0_672] : memref<72x256xf32, #tpu.memory_space<vmem>>, vector<8x256xf32>
    tpu.vector_store %arg28[%c16_671, %c0_672], %919 {strides = array<i32>} : memref<72x256xf32, #tpu.memory_space<vmem>>, vector<8x256xf32>,
    %c1_i32_673 = arith.constant 1 : i32
    %921 = tpu.dynamic_rotate %899 by %c1_i32_673 dim 1 : vector<8x256xf32>, i32 -> vector<8x256xf32>
    %c3_674 = arith.constant 3 : index
    %c0_675 = arith.constant 0 : index
    %c0_676 = arith.constant 0 : index
    %922 = vector.load %arg3[%c3_674, %c0_675, %c0_676] : memref<9x1x256xf32, #tpu.memory_space<vmem>>, vector<1x1x256xf32>
    %923 = vector.shape_cast %922 : vector<1x1x256xf32> to vector<1x256xf32>
    %924 = vector.broadcast %923 : vector<1x256xf32> to vector<8x256xf32>
    %925 = arith.mulf %921, %924 : vector<8x256xf32>
    %c24_677 = arith.constant 24 : index
    %c0_678 = arith.constant 0 : index
    %926 = vector.load %arg28[%c24_677, %c0_678] : memref<72x256xf32, #tpu.memory_space<vmem>>, vector<8x256xf32>
    tpu.vector_store %arg28[%c24_677, %c0_678], %925 {strides = array<i32>} : memref<72x256xf32, #tpu.memory_space<vmem>>, vector<8x256xf32>,
    %c32_679 = arith.constant 32 : index
    %c0_680 = arith.constant 0 : index
    %927 = vector.load %arg28[%c32_679, %c0_680] : memref<72x256xf32, #tpu.memory_space<vmem>>, vector<8x256xf32>
    tpu.vector_store %arg28[%c32_679, %c0_680], %899 {strides = array<i32>} : memref<72x256xf32, #tpu.memory_space<vmem>>, vector<8x256xf32>,
    %c255_i32_681 = arith.constant 255 : i32
    %928 = tpu.dynamic_rotate %899 by %c255_i32_681 dim 1 : vector<8x256xf32>, i32 -> vector<8x256xf32>
    %c5_682 = arith.constant 5 : index
    %c0_683 = arith.constant 0 : index
    %c0_684 = arith.constant 0 : index
    %929 = vector.load %arg3[%c5_682, %c0_683, %c0_684] : memref<9x1x256xf32, #tpu.memory_space<vmem>>, vector<1x1x256xf32>
    %930 = vector.shape_cast %929 : vector<1x1x256xf32> to vector<1x256xf32>
    %931 = vector.broadcast %930 : vector<1x256xf32> to vector<8x256xf32>
    %932 = arith.mulf %928, %931 : vector<8x256xf32>
    %c40_685 = arith.constant 40 : index
    %c0_686 = arith.constant 0 : index
    %933 = vector.load %arg28[%c40_685, %c0_686] : memref<72x256xf32, #tpu.memory_space<vmem>>, vector<8x256xf32>
    tpu.vector_store %arg28[%c40_685, %c0_686], %932 {strides = array<i32>} : memref<72x256xf32, #tpu.memory_space<vmem>>, vector<8x256xf32>,
    %c241_i32_687 = arith.constant 241 : i32
    %934 = tpu.dynamic_rotate %899 by %c241_i32_687 dim 1 : vector<8x256xf32>, i32 -> vector<8x256xf32>
    %c6_688 = arith.constant 6 : index
    %c0_689 = arith.constant 0 : index
    %c0_690 = arith.constant 0 : index
    %935 = vector.load %arg3[%c6_688, %c0_689, %c0_690] : memref<9x1x256xf32, #tpu.memory_space<vmem>>, vector<1x1x256xf32>
    %936 = vector.shape_cast %935 : vector<1x1x256xf32> to vector<1x256xf32>
    %937 = vector.broadcast %936 : vector<1x256xf32> to vector<8x256xf32>
    %938 = arith.mulf %934, %937 : vector<8x256xf32>
    %c48_691 = arith.constant 48 : index
    %c0_692 = arith.constant 0 : index
    %939 = vector.load %arg28[%c48_691, %c0_692] : memref<72x256xf32, #tpu.memory_space<vmem>>, vector<8x256xf32>
    tpu.vector_store %arg28[%c48_691, %c0_692], %938 {strides = array<i32>} : memref<72x256xf32, #tpu.memory_space<vmem>>, vector<8x256xf32>,
    %c240_i32_693 = arith.constant 240 : i32
    %940 = tpu.dynamic_rotate %899 by %c240_i32_693 dim 1 : vector<8x256xf32>, i32 -> vector<8x256xf32>
    %c7_694 = arith.constant 7 : index
    %c0_695 = arith.constant 0 : index
    %c0_696 = arith.constant 0 : index
    %941 = vector.load %arg3[%c7_694, %c0_695, %c0_696] : memref<9x1x256xf32, #tpu.memory_space<vmem>>, vector<1x1x256xf32>
    %942 = vector.shape_cast %941 : vector<1x1x256xf32> to vector<1x256xf32>
    %943 = vector.broadcast %942 : vector<1x256xf32> to vector<8x256xf32>
    %944 = arith.mulf %940, %943 : vector<8x256xf32>
    %c56_697 = arith.constant 56 : index
    %c0_698 = arith.constant 0 : index
    %945 = vector.load %arg28[%c56_697, %c0_698] : memref<72x256xf32, #tpu.memory_space<vmem>>, vector<8x256xf32>
    tpu.vector_store %arg28[%c56_697, %c0_698], %944 {strides = array<i32>} : memref<72x256xf32, #tpu.memory_space<vmem>>, vector<8x256xf32>,
    %c239_i32_699 = arith.constant 239 : i32
    %946 = tpu.dynamic_rotate %899 by %c239_i32_699 dim 1 : vector<8x256xf32>, i32 -> vector<8x256xf32>
    %c8_700 = arith.constant 8 : index
    %c0_701 = arith.constant 0 : index
    %c0_702 = arith.constant 0 : index
    %947 = vector.load %arg3[%c8_700, %c0_701, %c0_702] : memref<9x1x256xf32, #tpu.memory_space<vmem>>, vector<1x1x256xf32>
    %948 = vector.shape_cast %947 : vector<1x1x256xf32> to vector<1x256xf32>
    %949 = vector.broadcast %948 : vector<1x256xf32> to vector<8x256xf32>
    %950 = arith.mulf %946, %949 : vector<8x256xf32>
    %c64_703 = arith.constant 64 : index
    %c0_704 = arith.constant 0 : index
    %951 = vector.load %arg28[%c64_703, %c0_704] : memref<72x256xf32, #tpu.memory_space<vmem>>, vector<8x256xf32>
    tpu.vector_store %arg28[%c64_703, %c0_704], %950 {strides = array<i32>} : memref<72x256xf32, #tpu.memory_space<vmem>>, vector<8x256xf32>,
    %c0_705 = arith.constant 0 : index
    %c0_706 = arith.constant 0 : index
    %952 = vector.load %arg23[%c0_705, %c0_706] : memref<8x72xf32, #tpu.memory_space<vmem>>, vector<8x72xf32>
    %c0_707 = arith.constant 0 : index
    %c0_708 = arith.constant 0 : index
    %953 = vector.load %arg28[%c0_707, %c0_708] : memref<72x256xf32, #tpu.memory_space<vmem>>, vector<72x256xf32>
    %cst_709 = arith.constant dense<0.000000e+00> : vector<8x256xf32>
    %954 = tpu.matmul %952, %953, %cst_709 {dimension_numbers = #tpu.dot_dimension_numbers<[1], [0], [0], [1], [0, 0, 1, 1], [], []>} : vector<8x72xf32>, vector<72x256xf32>, vector<8x256xf32> -> vector<8x256xf32>
    %c0_710 = arith.constant 0 : index
    %c0_711 = arith.constant 0 : index
    %955 = vector.load %arg24[%c0_710, %c0_711] : memref<8x1xf32, #tpu.memory_space<vmem>>, vector<8x1xf32>
    %956 = vector.broadcast %955 : vector<8x1xf32> to vector<8x256xf32>
    %957 = arith.addf %954, %956 : vector<8x256xf32>
    %c0_712 = arith.constant 0 : index
    %c0_713 = arith.constant 0 : index
    %958 = vector.load %arg4[%c0_712, %c0_713] : memref<256x64xf32, #tpu.memory_space<vmem>>, vector<256x64xf32>
    %cst_714 = arith.constant dense<0.000000e+00> : vector<8x64xf32>
    %959 = tpu.matmul %957, %958, %cst_714 {dimension_numbers = #tpu.dot_dimension_numbers<[1], [0], [0], [1], [0, 0, 1, 1], [], []>} : vector<8x256xf32>, vector<256x64xf32>, vector<8x64xf32> -> vector<8x64xf32>
    %c1_715 = arith.constant 1 : index
    %c0_716 = arith.constant 0 : index
    %c0_717 = arith.constant 0 : index
    %960 = vector.load %arg27[%c1_715, %c0_716, %c0_717] : memref<2x8x64xf32, #tpu.memory_space<vmem>>, vector<1x8x64xf32>
    %961 = vector.shape_cast %960 : vector<1x8x64xf32> to vector<8x64xf32>
    %962 = vector.shape_cast %959 : vector<8x64xf32> to vector<1x8x64xf32>
    tpu.vector_store %arg27[%c1_715, %c0_716, %c0_717], %962 {strides = array<i32>} : memref<2x8x64xf32, #tpu.memory_space<vmem>>, vector<1x8x64xf32>,
    return
  }
  func.func @transform_0(%arg0: i32) -> (i32, i32, i32) {
    %c0_i32 = arith.constant 0 : i32
    %c0_i32_0 = arith.constant 0 : i32
    %c0_i32_1 = arith.constant 0 : i32
    return %arg0, %c0_i32, %c0_i32_0 : i32, i32, i32
  }
  func.func @transform_1(%arg0: i32) -> (i32, i32, i32, i32) {
    %c0_i32 = arith.constant 0 : i32
    %c0_i32_0 = arith.constant 0 : i32
    %c0_i32_1 = arith.constant 0 : i32
    %c0_i32_2 = arith.constant 0 : i32
    return %arg0, %c0_i32, %c0_i32_0, %c0_i32_1 : i32, i32, i32, i32
  }
  func.func @transform_2(%arg0: i32) -> (i32, i32, i32) {
    %c0_i32 = arith.constant 0 : i32
    %c0_i32_0 = arith.constant 0 : i32
    %c0_i32_1 = arith.constant 0 : i32
    %c0_i32_2 = arith.constant 0 : i32
    return %c0_i32, %c0_i32_0, %c0_i32_1 : i32, i32, i32
  }
  func.func @transform_3(%arg0: i32) -> (i32, i32) {
    %c0_i32 = arith.constant 0 : i32
    %c0_i32_0 = arith.constant 0 : i32
    %c0_i32_1 = arith.constant 0 : i32
    return %c0_i32, %c0_i32_0 : i32, i32
  }
  func.func @transform_4(%arg0: i32) -> (i32, i32) {
    %c0_i32 = arith.constant 0 : i32
    %c0_i32_0 = arith.constant 0 : i32
    %c0_i32_1 = arith.constant 0 : i32
    return %c0_i32, %c0_i32_0 : i32, i32
  }
  func.func @transform_5(%arg0: i32) -> (i32, i32) {
    %c0_i32 = arith.constant 0 : i32
    %c0_i32_0 = arith.constant 0 : i32
    %c0_i32_1 = arith.constant 0 : i32
    return %c0_i32, %c0_i32_0 : i32, i32
  }
  func.func @transform_6(%arg0: i32) -> (i32, i32) {
    %c0_i32 = arith.constant 0 : i32
    %c0_i32_0 = arith.constant 0 : i32
    %c0_i32_1 = arith.constant 0 : i32
    return %c0_i32, %c0_i32_0 : i32, i32
  }
  func.func @transform_7(%arg0: i32) -> (i32, i32) {
    %c0_i32 = arith.constant 0 : i32
    %c0_i32_0 = arith.constant 0 : i32
    %c0_i32_1 = arith.constant 0 : i32
    return %c0_i32, %c0_i32_0 : i32, i32
  }
  func.func @transform_8(%arg0: i32) -> (i32, i32) {
    %c0_i32 = arith.constant 0 : i32
    %c0_i32_0 = arith.constant 0 : i32
    %c0_i32_1 = arith.constant 0 : i32
    return %c0_i32, %c0_i32_0 : i32, i32
  }
  func.func @transform_9(%arg0: i32) -> (i32, i32) {
    %c0_i32 = arith.constant 0 : i32
    %c0_i32_0 = arith.constant 0 : i32
    %c0_i32_1 = arith.constant 0 : i32
    return %c0_i32, %c0_i32_0 : i32, i32
  }
  func.func @transform_10(%arg0: i32) -> (i32, i32) {
    %c0_i32 = arith.constant 0 : i32
    %c0_i32_0 = arith.constant 0 : i32
    %c0_i32_1 = arith.constant 0 : i32
    return %c0_i32, %c0_i32_0 : i32, i32
  }
  func.func @transform_11(%arg0: i32) -> (i32, i32) {
    %c0_i32 = arith.constant 0 : i32
    %c0_i32_0 = arith.constant 0 : i32
    %c0_i32_1 = arith.constant 0 : i32
    return %c0_i32, %c0_i32_0 : i32, i32
  }
  func.func @transform_12(%arg0: i32) -> (i32, i32) {
    %c0_i32 = arith.constant 0 : i32
    %c0_i32_0 = arith.constant 0 : i32
    %c0_i32_1 = arith.constant 0 : i32
    return %c0_i32, %c0_i32_0 : i32, i32
  }
  func.func @transform_13(%arg0: i32) -> (i32, i32) {
    %c0_i32 = arith.constant 0 : i32
    %c0_i32_0 = arith.constant 0 : i32
    %c0_i32_1 = arith.constant 0 : i32
    return %c0_i32, %c0_i32_0 : i32, i32
  }
  func.func @transform_14(%arg0: i32) -> (i32, i32) {
    %c0_i32 = arith.constant 0 : i32
    %c0_i32_0 = arith.constant 0 : i32
    %c0_i32_1 = arith.constant 0 : i32
    return %c0_i32, %c0_i32_0 : i32, i32
  }
  func.func @transform_15(%arg0: i32) -> (i32, i32) {
    %c0_i32 = arith.constant 0 : i32
    %c0_i32_0 = arith.constant 0 : i32
    %c0_i32_1 = arith.constant 0 : i32
    return %c0_i32, %c0_i32_0 : i32, i32
  }
  func.func @transform_16(%arg0: i32) -> (i32, i32) {
    %c0_i32 = arith.constant 0 : i32
    %c0_i32_0 = arith.constant 0 : i32
    %c0_i32_1 = arith.constant 0 : i32
    return %c0_i32, %c0_i32_0 : i32, i32
  }
  func.func @transform_17(%arg0: i32) -> (i32, i32) {
    %c0_i32 = arith.constant 0 : i32
    %c0_i32_0 = arith.constant 0 : i32
    %c0_i32_1 = arith.constant 0 : i32
    return %c0_i32, %c0_i32_0 : i32, i32
  }
  func.func @transform_18(%arg0: i32) -> (i32, i32) {
    %c0_i32 = arith.constant 0 : i32
    %c0_i32_0 = arith.constant 0 : i32
    %c0_i32_1 = arith.constant 0 : i32
    return %c0_i32, %c0_i32_0 : i32, i32
  }
  func.func @transform_19(%arg0: i32) -> (i32, i32) {
    %c0_i32 = arith.constant 0 : i32
    %c0_i32_0 = arith.constant 0 : i32
    %c0_i32_1 = arith.constant 0 : i32
    return %c0_i32, %c0_i32_0 : i32, i32
  }
  func.func @transform_20(%arg0: i32) -> (i32, i32) {
    %c0_i32 = arith.constant 0 : i32
    %c0_i32_0 = arith.constant 0 : i32
    %c0_i32_1 = arith.constant 0 : i32
    return %c0_i32, %c0_i32_0 : i32, i32
  }
  func.func @transform_21(%arg0: i32) -> (i32, i32) {
    %c0_i32 = arith.constant 0 : i32
    %c0_i32_0 = arith.constant 0 : i32
    %c0_i32_1 = arith.constant 0 : i32
    return %c0_i32, %c0_i32_0 : i32, i32
  }
  func.func @transform_22(%arg0: i32) -> (i32, i32) {
    %c0_i32 = arith.constant 0 : i32
    %c0_i32_0 = arith.constant 0 : i32
    %c0_i32_1 = arith.constant 0 : i32
    return %c0_i32, %c0_i32_0 : i32, i32
  }
  func.func @transform_23(%arg0: i32) -> (i32, i32) {
    %c0_i32 = arith.constant 0 : i32
    %c0_i32_0 = arith.constant 0 : i32
    %c0_i32_1 = arith.constant 0 : i32
    return %c0_i32, %c0_i32_0 : i32, i32
  }
  func.func @transform_24(%arg0: i32) -> (i32, i32, i32) {
    %c0_i32 = arith.constant 0 : i32
    %c0_i32_0 = arith.constant 0 : i32
    %c0_i32_1 = arith.constant 0 : i32
    return %arg0, %c0_i32, %c0_i32_0 : i32, i32, i32
  }
  func.func @transform_25(%arg0: i32) -> (i32, i32, i32) {
    %c0_i32 = arith.constant 0 : i32
    %c0_i32_0 = arith.constant 0 : i32
    %c0_i32_1 = arith.constant 0 : i32
    return %arg0, %c0_i32, %c0_i32_0 : i32, i32, i32
  }
  func.func @transform_26(%arg0: i32) -> (i32, i32, i32) {
    %c0_i32 = arith.constant 0 : i32
    %c0_i32_0 = arith.constant 0 : i32
    %c0_i32_1 = arith.constant 0 : i32
    return %arg0, %c0_i32, %c0_i32_0 : i32, i32, i32
  }
}

</mosaic_0001>

<bundles_post_ra>
// kernel: tpu_custom_call.1
= control target key start
LH: loop header
LB: loop body
LE: loop exit
PB: predicated region body
PF: predicated region fallthrough
CT: control target
= control target key end

     0   :  { %s5326_s0 = inlined_call_operand.vmem [shape: f32[2,4,256], index: 0, kind: input, shape index: {}]   ;;  %s5327_s1 = inlined_call_operand.vmem [shape: f32[2,2,8,1], index: 1, kind: input, shape index: {}]   ;;  %s5328_s2 = inlined_call_operand.vmem [shape: f32[9,1,256], index: 2, kind: input, shape index: {}]   ;;  %s5329_s3 = inlined_call_operand.vmem [shape: f32[256,64], index: 3, kind: input, shape index: {}]   ;;  %s5330_s4 = inlined_call_operand.vmem [shape: f32[4,1], index: 4, kind: input, shape index: {}]   ;;  %s5331_s5 = inlined_call_operand.vmem [shape: f32[4,1], index: 5, kind: input, shape index: {}]   ;;  %s5332_s6 = inlined_call_operand.vmem [shape: f32[8,36], index: 6, kind: input, shape index: {}]   ;;  %s5333_s7 = inlined_call_operand.vmem [shape: f32[8,1], index: 7, kind: input, shape index: {}]   ;;  %s5334_s8 = inlined_call_operand.vmem [shape: f32[8,1], index: 8, kind: input, shape index: {}]   ;;  %s5335_s9 = inlined_call_operand.vmem [shape: f32[8,1], index: 9, kind: input, shape index: {}]   ;;  %s5336_s10 = inlined_call_operand.vmem [shape: f32[8,72], index: 10, kind: input, shape index: {}]   ;;  %s5337_s11 = inlined_call_operand.vmem [shape: f32[8,1], index: 11, kind: input, shape index: {}]   ;;  %s5338_s12 = inlined_call_operand.vmem [shape: f32[8,4], index: 12, kind: input, shape index: {}]   ;;  %s5339_s13 = inlined_call_operand.vmem [shape: f32[8,1], index: 13, kind: input, shape index: {}]   ;;  %s5340_s14 = inlined_call_operand.vmem [shape: f32[8,1], index: 14, kind: input, shape index: {}]   ;;  %s5341_s15 = inlined_call_operand.vmem [shape: f32[8,1], index: 15, kind: input, shape index: {}]   ;;  %s5342_s16 = inlined_call_operand.vmem [shape: f32[8,72], index: 16, kind: input, shape index: {}]   ;;  %s5343_s17 = inlined_call_operand.vmem [shape: f32[8,1], index: 17, kind: input, shape index: {}]   ;;  %s5344_s18 = inlined_call_operand.vmem [shape: f32[8,1], index: 18, kind: input, shape index: {}]   ;;  %s5345_s19 = inlined_call_operand.vmem [shape: f32[8,1], index: 19, kind: input, shape index: {}]   ;;  %s5346_s20 = inlined_call_operand.vmem [shape: f32[8,72], index: 20, kind: input, shape index: {}]   ;;  %s5347_s21 = inlined_call_operand.vmem [shape: f32[8,1], index: 21, kind: input, shape index: {}]   ;;  %s5348_s22 = inlined_call_operand.vmem [shape: f32[8,72], index: 22, kind: input, shape index: {}]   ;;  %s5349_s23 = inlined_call_operand.vmem [shape: f32[8,1], index: 23, kind: input, shape index: {}]   ;;  %s5350_s24 = inlined_call_operand.hbm [shape: f32[2,8,256], index: 24, kind: output, shape index: {0}]   ;;  %s5351_s25 = inlined_call_operand.hbm [shape: f32[2,8,256], index: 25, kind: output, shape index: {1}]   ;;  %s5352_s26 = inlined_call_operand.hbm [shape: f32[2,8,64], index: 26, kind: output, shape index: {2}]  }
   0x1   :  { %5391 = sst [smem:[#allocation10_spill]] %s5326_s0 }
   0x2   :  { %5392 = sst [smem:[#allocation11_spill]] %s5327_s1 }
   0x3   :  { %5393 = sst [smem:[#allocation12_spill]] %s5328_s2 }
   0x4   :  { %5394 = sst [smem:[#allocation13_spill]] %s5329_s3 }
   0x5   :  { %5395 = sst [smem:[#allocation14_spill]] %s5330_s4 }
   0x6   :  { %5396 = sst [smem:[#allocation15_spill]] %s5331_s5 }
   0x7   :  { %5397 = sst [smem:[#allocation16_spill]] %s5332_s6 }
   0x8   :  { %5398 = sst [smem:[#allocation17_spill]] %s5333_s7 }
   0x9   :  { %5399 = sst [smem:[#allocation18_spill]] %s5334_s8 }
   0xa   :  { %5400 = sst [smem:[#allocation19_spill]] %s5335_s9 }
   0xb   :  { %5401 = sst [smem:[#allocation20_spill]] %s5336_s10 }
   0xc   :  { %5402 = sst [smem:[#allocation21_spill]] %s5338_s12 }
   0xd   :  { %5403 = sst [smem:[#allocation22_spill]] %s5339_s13 }
   0xe   :  { %5404 = sst [smem:[#allocation23_spill]] %s5340_s14 }
   0xf   :  { %5405 = sst [smem:[#allocation24_spill]] %s5341_s15 }
  0x10   :  { %5406 = sst [smem:[#allocation25_spill]] %s5343_s17 }
  0x11   :  { %5407 = sst [smem:[#allocation26_spill]] %s5349_s23 }
  0x12   :  { %5408 = sst [smem:[#allocation27_spill]] %s5350_s24 }
  0x13   :  { %5409 = sst [smem:[#allocation28_spill]] %s5351_s25 }
  0x14   :  { %5410 = sst [smem:[#allocation29_spill]] %s5352_s26 }
  0x15   :  { %32 = vsyncpa [#allocation4], 0  ;;  %s5411_s7 = sld [smem:[#allocation10_spill]] }
  0x1b   :  { %v3848_v0 = vld [vmem:[%s5411_s7] sm:$0xff] }
  0x1c   :  { %33 = vsyncpa [#allocation6], 0  ;;  %101 = vst [vmem:[#allocation1] ss:$2 sm:$0xff] %v3848_v0  ;;  %vm5378_vm0 = vcmask 1043456   ;;  %v3694_v19 = vmov 0  }
  0x1d   :  { %v3693_v6 = vmov 839922192   ;;  %3542 = vset.pattern.permute.xlu1 %v3694_v19  ;;  %3543 = vset.pattern.permute.xlu2 %v3694_v19  ;;  %s5412_s4 = sld [smem:[#allocation14_spill]]  ;;  %s5366_s30 = smov 16  }
  0x1e   :  { %v115_v7 = vunpack.c.l.s4 %v3693_v6  ;;  %3544 = vset.pattern.permute.xlu0 %v3694_v19  ;;  %s5413_s9 = sld [smem:[#allocation15_spill]]  ;;  %s5372_s2 = smov 15  }
  0x1f   :  { %s5370_s5 = smov 1   ;;  %s5364_s10 = smov 127  }
  0x20   :  { %v3853_v8 = vunpack.c.0.s8 %v115_v7  ;;  %s5379_s6 = smov 113   ;;  %s5374_s1 = smov 112  }
  0x21   :  { %s5381_s27 = smov 111   ;;  %s5368_s3 = smov 17  }
  0x22   :  { %s5414_s29 = sld [smem:[#allocation17_spill]]  ;;  %s5420_s0 = smov 112  }
  0x23   :  { %v102_v1 = vld.sshfl [vmem:[#allocation1] sm:$0xff pattern:$0x75316420]  ;;  %v103_v2 = vld.sshfl [vmem:[#allocation1 + $0x8] sm:$0xff pattern:$0x75316420] }
  0x24   :  { %v107_v3 = vsel %vm5378_vm0, %v102_v1, 0.0  ;;  %v108_v4 = vsel %vm5378_vm0, %v103_v2, 0.0  ;;  %v144_v29 = vld [vmem:[%s5412_s4] sm:$0xf]  ;;  %s5416_s8 = sld [smem:[#allocation11_spill]]  ;;  %s5425_s24 = smov 16  }
  0x25   :  { %v109_v5 = vadd.f32 %v108_v4, %v107_v3  ;;  %v156_v32 = vld [vmem:[%s5413_s9] sm:$0xf]  ;;  %s5418_s28 = sld [smem:[#allocation18_spill]]  ;;  %s5426_s25 = smov 127  }
  0x26   :  { %s5444_s23 = sld [smem:[#allocation21_spill]]  ;;  %s3708_s26 = smov 128  }
  0x27   :  { %110 = vadd.xlane.f32.xlu0 %v109_v5 }
  0x9a   :  { %v111_v9 = vpop.xlane.xlu0 %110 }
  0x9b   :  { %v112_v10 = vmul.f32 0.00390625, %v111_v9  ;;  %v415_v9 = vld [vmem:[%s5414_s29] sm:$0xff] }
  0x9d   :  { %v117_v11 = vperm.slane %v112_v10, %v3853_v8  ;;  %v82_v10 = vlaneseq }
  0x9f   :  { %v119_v12 = vsub.f32 %v3848_v0, %v117_v11 }
  0xa1   :  { %v120_v13 = vmul.f32 %v119_v12, %v119_v12 }
  0xa3   :  { %122 = vst [vmem:[#allocation1] ss:$2 sm:$0xff] %v120_v13 }
  0xaa   :  { %v123_v14 = vld.sshfl [vmem:[#allocation1] sm:$0xff pattern:$0x75316420]  ;;  %v124_v15 = vld.sshfl [vmem:[#allocation1 + $0x8] sm:$0xff pattern:$0x75316420] }
  0xab   :  { %v127_v16 = vsel %vm5378_vm0, %v123_v14, 0.0  ;;  %v128_v17 = vsel %vm5378_vm0, %v124_v15, 0.0 }
  0xac   :  { %v129_v18 = vadd.f32 %v128_v17, %v127_v16 }
  0xae   :  { %130 = vadd.xlane.f32.xlu0 %v129_v18 }
 0x121   :  { %v131_v20 = vpop.xlane.xlu0 %130 }
 0x122   :  { %v132_v21 = vmul.f32 0.00390625, %v131_v20 }
 0x124   :  { %v133_v22 = vadd.f32 1e-06, %v132_v21 }
 0x126   :  { %3545 = vrsqrt.f32 %v133_v22  ;;  %vm140_vm2 = vweird.f32 %v133_v22 }
 0x12c   :  { %v3546_v23 = vpop.eup %3545 }
 0x12d   :  { %v135_v24 = vmul.f32 %v3546_v23, %v133_v22  ;;  %vm141_vm1 = vweird.f32 %v3546_v23 }
 0x12e   :  { %vm142_vm3 = vmor %vm140_vm2, %vm141_vm1  ;;  %vm5377_vm1 = vcmask 293888  }
 0x12f   :  { %v136_v25 = vmul.f32 %v3546_v23, %v135_v24 }
 0x131   :  { %v137_v26 = vmul.f32 0.5, %v136_v25 }
 0x133   :  { %v138_v27 = vsub.f32 1.5, %v137_v26 }
 0x135   :  { %v139_v28 = vmul.f32 %v3546_v23, %v138_v27 }
 0x137   :  { %v143_v30 = vsel %vm142_vm3, %v3546_v23, %v139_v28 }
 0x138   :  { %v145_v31 = vmul.f32 %v144_v29, %v143_v30 }
 0x13a   :  { %148 = vperm.xlu1 %3542, %v145_v31  }
 0x142   :  { %159 = vperm.xlu1 %3542, %v156_v32  }
 0x1ac   :  { %v149_v33 = vpop.permute.xlu1 %148 }
 0x1ad   :  { %v153_v34 = vperm.slane %v149_v33, %v3853_v8 }
 0x1af   :  { %v155_v36 = vmul.f32 %v153_v34, %v119_v12  ;;  %v3888_v12 = vand.u32 127, %v82_v10 }
 0x1b1   :  { %vm221_vm8 = vcmp.lt.s32.totalorder %v3888_v12, 16  ;;  %vm273_vm9 = vcmp.lt.s32.totalorder %v3888_v12, 1  ;;  %vm309_vm10 = vcmp.lt.s32.totalorder %v3888_v12, 127  ;;  %vm361_vm11 = vcmp.lt.s32.totalorder %v3888_v12, 112 }
 0x1b2   :  { %vm338_vm12 = vcmp.lt.s32.totalorder %v3888_v12, 113  ;;  %vm390_vm13 = vcmp.lt.s32.totalorder %v3888_v12, 111  ;;  %vm250_vm14 = vcmp.lt.s32.totalorder %v3888_v12, 15  ;;  %vm199_vm15 = vcmp.lt.s32.totalorder %v3888_v12, 17  ;;  %v3209_v12 = vld [vmem:[%s5348_s22] sm:$0xff] }
 0x1b4   :  { %v160_v35 = vpop.permute.xlu1 %159 }
 0x1b5   :  { %v164_v37 = vperm.slane %v160_v35, %v3853_v8 }
 0x1b7   :  { %v166_v38 = vadd.f32 %v164_v37, %v155_v36 }
 0x1b9   :  { %v3405_v39 = vmul.f32 -1.442695, %v166_v38 }
 0x1bb   :  { %3547 = vpow2.f32 %v3405_v39 }
 0x1c1   :  { %v3548_v40 = vpop.eup %3547 }
 0x1c2   :  { %v170_v41 = vadd.f32 1.0, %v3548_v40 }
 0x1c4   :  { %3549 = vrcp.f32 %v170_v41  ;;  %v182_v45 = vand.u32 2147483648, %v170_v41  ;;  %v180_v47 = vand.u32 2147483647, %v170_v41  ;;  %vm176_vm5 = vweird.f32 %v170_v41 }
 0x1c6   :  { %v183_v49 = vor.u32 1.1754944e-38, %v182_v45  ;;  %vm181_vm7 = vcmp.eq.f32.partialorder %v180_v47, 8.507059e+37 }
 0x1ca   :  { %v3550_v42 = vpop.eup %3549 }
 0x1cb   :  { %v172_v43 = vmul.f32 %v3550_v42, %v170_v41  ;;  %vm177_vm4 = vweird.f32 %v3550_v42 }
 0x1cc   :  { %vm178_vm6 = vmor %vm176_vm5, %vm177_vm4 }
 0x1cd   :  { %v173_v44 = vsub.f32 1.0, %v172_v43 }
 0x1cf   :  { %v174_v46 = vmul.f32 %v3550_v42, %v173_v44 }
 0x1d1   :  { %v175_v48 = vadd.f32 %v3550_v42, %v174_v46 }
 0x1d3   :  { %v179_v50 = vsel %vm178_vm6, %v3550_v42, %v175_v48  ;;  %vm5376_vm6 = vcmask 31744  }
 0x1d4   :  { %v184_v51 = vsel %vm181_vm7, %v183_v49, %v179_v50 }
 0x1d5   :  { %v186_v52 = vmul.f32 %v184_v51, %v166_v38 }
 0x1d7   :  { %188 = vst [vmem:[#allocation1] ss:$2 sm:$0xff] %v186_v52 }
 0x1de   :  { %v189_v53 = vld.sshfl [vmem:[#allocation1] sm:$0xff pattern:$0x75316420]  ;;  %v190_v54 = vld.sshfl [vmem:[#allocation1 + $0x8] sm:$0xff pattern:$0x75316420] }
 0x1df   :  { %212 = vst [vmem:[#allocation1] ss:$2 sm:$0xff] %v186_v52 }
 0x1e6   :  { %v213_v55 = vld.sshfl [vmem:[#allocation1] sm:$0xff pattern:$0x75316420]  ;;  %v214_v56 = vld.sshfl [vmem:[#allocation1 + $0x8] sm:$0xff pattern:$0x75316420] }
 0x1e7   :  { %241 = vst [vmem:[#allocation1] ss:$2 sm:$0xff] %v186_v52  ;;  %219 = vrot.lane.b32.xlu2 %v214_v56, %s5366_s30  ;;  %217 = vrot.lane.b32.xlu1 %v213_v55, %s5366_s30  ;;  %s5415_s30 = sld [smem:[#allocation12_spill]] }
 0x1ed   :  { %v3408_v25 = vld [vmem:[%s5415_s30 + $0x6] sm:$0x3]  ;;  %v3409_v37 = vld [vmem:[%s5415_s30 + $0xa] sm:$0x3]  ;;  %v3411_v38 = vld [vmem:[%s5415_s30 + $0xe] sm:$0x3] }
 0x1ee   :  { %v242_v57 = vld.sshfl [vmem:[#allocation1] sm:$0xff pattern:$0x75316420]  ;;  %v243_v58 = vld.sshfl [vmem:[#allocation1 + $0x8] sm:$0xff pattern:$0x75316420] }
 0x1ef   :  { %264 = vst [vmem:[#allocation1] ss:$2 sm:$0xff] %v186_v52  ;;  %246 = vrot.lane.b32.xlu0 %v242_v57, %s5372_s2  ;;  %v279_v26 = vperm.slane %v3408_v25, 0  ;;  %v280_v27 = vperm.slane %v3408_v25, 1  ;;  %v315_v39 = vperm.slane %v3409_v37, 0  ;;  %v316_v40 = vperm.slane %v3409_v37, 1 }
 0x1f0   :  { %v367_v41 = vperm.slane %v3411_v38, 0  ;;  %v368_v42 = vperm.slane %v3411_v38, 1 }
 0x1f6   :  { %v266_v59 = vld.sshfl [vmem:[#allocation1 + $0x8] sm:$0xff pattern:$0x75316420]  ;;  %v265_v60 = vld.sshfl [vmem:[#allocation1] sm:$0xff pattern:$0x75316420] }
 0x1f7   :  { %271 = vrot.lane.b32.xlu0 %v266_v59, %s5370_s5  ;;  %269 = vrot.lane.b32.xlu2 %v265_v60, %s5370_s5  ;;  %293 = vst [vmem:[#allocation1] ss:$2 sm:$0xff] %v186_v52  ;;  %s5423_s5 = smov 17  }
 0x1fe   :  { %v294_v61 = vld.sshfl [vmem:[#allocation1] sm:$0xff pattern:$0x75316420]  ;;  %v295_v62 = vld.sshfl [vmem:[#allocation1 + $0x8] sm:$0xff pattern:$0x75316420] }
 0x1ff   :  { %300 = vst [vmem:[#allocation1] ss:$2 sm:$0xff] %v186_v52 }
 0x200   :  { %298 = vst [vmem:[#allocation2 + $0x20] sm:$0xf] %v294_v61 }
 0x201   :  { %299 = vst [vmem:[#allocation2 + $0x8] sm:$0xf] %v295_v62 }
 0x206   :  { %v302_v63 = vld.sshfl [vmem:[#allocation1 + $0x8] sm:$0xff pattern:$0x75316420]  ;;  %v301_v1 = vld.sshfl [vmem:[#allocation1] sm:$0xff pattern:$0x75316420] }
 0x207   :  { %307 = vrot.lane.b32.xlu1 %v302_v63, %s5364_s10  ;;  %305 = vrot.lane.b32.xlu2 %v301_v1, %s5364_s10  ;;  %329 = vst [vmem:[#allocation1] ss:$2 sm:$0xff] %v186_v52  ;;  %s5421_s10 = smov 15  }
 0x20e   :  { %v331_v2 = vld.sshfl [vmem:[#allocation1 + $0x8] sm:$0xff pattern:$0x75316420]  ;;  %v330_v3 = vld.sshfl [vmem:[#allocation1] sm:$0xff pattern:$0x75316420] }
 0x20f   :  { %336 = vrot.lane.b32.xlu1 %v331_v2, %s5379_s6  ;;  %334 = vrot.lane.b32.xlu2 %v330_v3, %s5379_s6  ;;  %352 = vst [vmem:[#allocation1] ss:$2 sm:$0xff] %v186_v52  ;;  %v471_v2 = vld [vmem:[%s5416_s8] sm:$0xff]  ;;  %v3412_v3 = vld [vmem:[%s5415_s30 + $0x10] sm:$0x3] }
 0x216   :  { %v353_v4 = vld.sshfl [vmem:[#allocation1] sm:$0xff pattern:$0x75316420]  ;;  %v354_v5 = vld.sshfl [vmem:[#allocation1 + $0x8] sm:$0xff pattern:$0x75316420] }
 0x217   :  { %357 = vrot.lane.b32.xlu2 %v353_v4, %s5374_s1  ;;  %381 = vst [vmem:[#allocation1] ss:$2 sm:$0xff] %v186_v52  ;;  %v396_v4 = vperm.slane %v3412_v3, 0 }
 0x21e   :  { %v383_v6 = vld.sshfl [vmem:[#allocation1 + $0x8] sm:$0xff pattern:$0x75316420]  ;;  %v382_v7 = vld.sshfl [vmem:[#allocation1] sm:$0xff pattern:$0x75316420] }
 0x21f   :  { %359 = vrot.lane.b32.xlu2 %v354_v5, %s5374_s1  ;;  %388 = vrot.lane.b32.xlu1 %v383_v6, %s5381_s27  ;;  %790 = vst [vmem:[#allocation1] ss:$2 sm:$0xff] %v3848_v0  ;;  %v3406_v0 = vld [vmem:[%s5415_s30 + $0x2] sm:$0x3]  ;;  %v397_v5 = vperm.slane %v3412_v3, 1  ;;  %s5419_s1 = sld [smem:[#allocation19_spill]] }
 0x220   :  { %386 = vrot.lane.b32.xlu0 %v382_v7, %s5381_s27  ;;  %v227_v13 = vperm.slane %v3406_v0, 0  ;;  %v228_v14 = vperm.slane %v3406_v0, 1 }
 0x227   :  { %193 = vrot.lane.b32.xlu2 %v189_v53, %s5368_s3  ;;  %248 = vrot.lane.b32.xlu1 %v243_v58, %s5372_s2  ;;  %v3410_v53 = vld [vmem:[%s5415_s30 + $0xc] sm:$0x3]  ;;  %s5422_s2 = smov 1  }
 0x228   :  { %195 = vrot.lane.b32.xlu0 %v190_v54, %s5368_s3  ;;  %v344_v58 = vperm.slane %v3410_v53, 0  ;;  %v345_v59 = vperm.slane %v3410_v53, 1  ;;  %s5417_s3 = sld [smem:[#allocation16_spill]] }
 0x22f   :  { %418 = vperm.xlu1 %3542, %v415_v9   ;;  %474 = vperm.xlu2 %3543, %v471_v2  }
 0x241   :  { %v220_v11 = vpop.permute.xlu2 %219 }
 0x251   :  { %v270_v15 = vpop.permute.xlu2 %269 }
 0x259   :  { %v218_v16 = vpop.permute.xlu1 %217 }
 0x25a   :  { %v222_v17 = vsel %vm221_vm8, %v218_v16, %v220_v11  ;;  %v223_v18 = vsel %vm221_vm8, %v220_v11, %v218_v16 }
 0x25b   :  { %v231_v19 = vmul.f32 %v227_v13, %v223_v18  ;;  %v232_v20 = vmul.f32 %v228_v14, %v222_v17  ;;  %v3407_v14 = vld [vmem:[%s5415_s30 + $0x4] sm:$0x3] }
 0x25c   :  { %v256_v16 = vperm.slane %v3407_v14, 0  ;;  %v257_v17 = vperm.slane %v3407_v14, 1 }
 0x25d   :  { %v235_v21 = vrot.slane %v231_v19, 4  ;;  %v236_v22 = vrot.slane %v232_v20, 4 }
 0x25f   :  { %239 = vst [vmem:[#allocation2] sm:$0xf0] %v235_v21 }
 0x260   :  { %240 = vst [vmem:[#allocation2 + $0x38] sm:$0xf0] %v236_v22 }
 0x261   :  { %v3898_v23 = vpop.permute.xlu0 %246  ;;  %v306_v24 = vpop.permute.xlu2 %305 }
 0x269   :  { %v272_v28 = vpop.permute.xlu0 %271  ;;  %v335_v29 = vpop.permute.xlu2 %334 }
 0x26a   :  { %v274_v30 = vsel %vm273_vm9, %v270_v15, %v272_v28  ;;  %v275_v31 = vsel %vm273_vm9, %v272_v28, %v270_v15  ;;  %v202_v15 = vld [vmem:[%s5415_s30] sm:$0x3] }
 0x26b   :  { %v283_v32 = vmul.f32 %v279_v26, %v275_v31  ;;  %v284_v33 = vmul.f32 %v280_v27, %v274_v30  ;;  %v204_v18 = vperm.slane %v202_v15, 0  ;;  %v205_v19 = vperm.slane %v202_v15, 1 }
 0x26d   :  { %v287_v34 = vrot.slane %v283_v32, 4  ;;  %v288_v35 = vrot.slane %v284_v33, 4 }
 0x26f   :  { %291 = vst [vmem:[#allocation2 + $0x78] sm:$0xf0] %v287_v34 }
 0x270   :  { %292 = vst [vmem:[#allocation2 + $0x58] sm:$0xf0] %v288_v35 }
 0x271   :  { %v358_v36 = vpop.permute.xlu2 %357 }
 0x279   :  { %v308_v43 = vpop.permute.xlu1 %307  ;;  %v360_v44 = vpop.permute.xlu2 %359 }
 0x27a   :  { %v310_v45 = vsel %vm309_vm10, %v306_v24, %v308_v43  ;;  %v311_v46 = vsel %vm309_vm10, %v308_v43, %v306_v24  ;;  %v362_v47 = vsel %vm361_vm11, %v358_v36, %v360_v44  ;;  %v363_v48 = vsel %vm361_vm11, %v360_v44, %v358_v36 }
 0x27b   :  { %v319_v49 = vmul.f32 %v315_v39, %v310_v45  ;;  %v320_v50 = vmul.f32 %v316_v40, %v311_v46  ;;  %v371_v51 = vmul.f32 %v367_v41, %v362_v47  ;;  %v372_v52 = vmul.f32 %v368_v42, %v363_v48  ;;  %v404_v39 = vld [vmem:[%s5417_s3] sm:$0xff] }
 0x27c   :  { %v83_v42 = vshrl.u32 %v82_v10, 7  ;;  %v3703_v47 = vmov 0.0  }
 0x27d   :  { %v323_v54 = vrot.slane %v319_v49, 4  ;;  %v324_v55 = vrot.slane %v320_v50, 4  ;;  %v375_v56 = vrot.slane %v371_v51, 4  ;;  %v376_v57 = vrot.slane %v372_v52, 4 }
 0x27e   :  { %v88_v43 = vand.u32 1, %v83_v42 }
 0x27f   :  { %327 = vst [vmem:[#allocation2 + $0x20] sm:$0xf0] %v323_v54 }
 0x280   :  { %328 = vst [vmem:[#allocation2 + $0x8] sm:$0xf0] %v324_v55  ;;  %vm96_vm2 = vcmp.eq.s32.totalorder %v88_v43, 0 }
 0x281   :  { %379 = vst [vmem:[#allocation2 + $0x70] sm:$0xf0] %v375_v56  ;;  %v337_v60 = vpop.permute.xlu1 %336  ;;  %v194_v21 = vpop.permute.xlu2 %193  ;;  %v3969_v48 = vsel %vm96_vm2, 1.0, %v3703_v47  ;;  %v792_v47 = vld.sshfl [vmem:[#allocation1 + $0x8] sm:$0xff pattern:$0x75316420] }
 0x282   :  { %380 = vst [vmem:[#allocation2 + $0x80] sm:$0xf0] %v376_v57  ;;  %v339_v61 = vsel %vm338_vm12, %v335_v29, %v337_v60  ;;  %v340_v62 = vsel %vm338_vm12, %v337_v60, %v335_v29  ;;  %v3972_v53 = vsub.f32 1.0, %v3969_v48  ;;  %3430 = vmatpush.msk.msra.mxu1 %vm5378_vm0, %v792_v47 }
 0x283   :  { %v348_v63 = vmul.f32 %v344_v58, %v339_v61  ;;  %v349_v1 = vmul.f32 %v345_v59, %v340_v62 }
 0x285   :  { %350 = vst [vmem:[#allocation2 + $0x70] sm:$0xf] %v348_v63 }
 0x286   :  { %351 = vst [vmem:[#allocation2 + $0x80] sm:$0xf] %v349_v1  ;;  %v409_v35 = vld [vmem:[#allocation2 + $0x20] sm:$0xff] }
 0x287   :  { %v410_v36 = vld [vmem:[#allocation2 + $0x8] sm:$0xff] }
 0x289   :  { %v475_v46 = vpop.permute.xlu2 %474 }
 0x28d   :  { %v412_v34 = vld [vmem:[#allocation2 + $0x80] sm:$0xff] }
 0x291   :  { %v389_v6 = vpop.permute.xlu1 %388 }
 0x292   :  { %v387_v7 = vpop.permute.xlu0 %386 }
 0x293   :  { %v391_v9 = vsel %vm390_vm13, %v387_v7, %v389_v6  ;;  %v392_v11 = vsel %vm390_vm13, %v389_v6, %v387_v7 }
 0x294   :  { %v400_v0 = vmul.f32 %v396_v4, %v391_v9  ;;  %v401_v13 = vmul.f32 %v397_v5, %v392_v11 }
 0x296   :  { %402 = vst [vmem:[#allocation2 + $0x88] sm:$0xf] %v400_v0 }
 0x297   :  { %403 = vst [vmem:[#allocation2 + $0x40] sm:$0xf] %v401_v13 }
 0x299   :  { %v249_v20 = vpop.permute.xlu1 %248 }
 0x29a   :  { %v251_v22 = vsel %vm250_vm14, %v3898_v23, %v249_v20  ;;  %v252_v24 = vsel %vm250_vm14, %v249_v20, %v3898_v23  ;;  %v196_v25 = vpop.permute.xlu0 %195  ;;  %v411_v23 = vld [vmem:[#allocation2 + $0x70] sm:$0xff] }
 0x29b   :  { %v260_v26 = vmul.f32 %v256_v16, %v252_v24  ;;  %v261_v27 = vmul.f32 %v257_v17, %v251_v22  ;;  %v200_v28 = vsel %vm199_vm15, %v194_v21, %v196_v25  ;;  %v201_v29 = vsel %vm199_vm15, %v196_v25, %v194_v21 }
 0x29c   :  { %v208_v30 = vmul.f32 %v204_v18, %v201_v29  ;;  %v209_v31 = vmul.f32 %v205_v19, %v200_v28 }
 0x29d   :  { %262 = vst [vmem:[#allocation2 + $0x78] sm:$0xf] %v260_v26  ;;  %v413_v32 = vld [vmem:[#allocation2 + $0x88] sm:$0xf] }
 0x29e   :  { %263 = vst [vmem:[#allocation2 + $0x58] sm:$0xf] %v261_v27  ;;  %3413 = vmatpush.msk.msra.mxu2 %vm5378_vm0, %v413_v32  ;;  %v414_v33 = vld [vmem:[#allocation2 + $0x40] sm:$0xf] }
 0x29f   :  { %210 = vst [vmem:[#allocation2] sm:$0xf] %v208_v30  ;;  %3415 = vmatpush.msk.msra.mxu3 %vm5378_vm0, %v414_v33 }
 0x2a0   :  { %211 = vst [vmem:[#allocation2 + $0x38] sm:$0xf] %v209_v31  ;;  %443 = vmatpush.msra.mxu2 %v411_v23 }
 0x2a1   :  { %463 = vmatpush.msra.mxu3 %v412_v34  ;;  %v419_v44 = vpop.permute.xlu1 %418  ;;  %v527_v34 = vld [vmem:[%s5418_s28] sm:$0xff] }
 0x2a2   :  { %444 = vmatpush.msra.mxu2 %v409_v35 }
 0x2a3   :  { %464 = vmatpush.msra.mxu3 %v410_v36 }
 0x2a4   :  { %v407_v37 = vld [vmem:[#allocation2 + $0x78] sm:$0xff] }
 0x2a5   :  { %445 = vmatpush.msra.mxu2 %v407_v37  ;;  %v408_v38 = vld [vmem:[#allocation2 + $0x58] sm:$0xff] }
 0x2a6   :  { %465 = vmatpush.msra.mxu3 %v408_v38  ;;  %v405_v40 = vld [vmem:[#allocation2] sm:$0xff]  ;;  %v536_v37 = vld [vmem:[%s5419_s1] sm:$0xff] }
 0x2a7   :  { %446 = vmatpush.msra.mxu2 %v405_v40  ;;  %v406_v41 = vld [vmem:[#allocation2 + $0x38] sm:$0xff] }
 0x2a8   :  { %466 = vmatpush.msra.mxu3 %v406_v41  ;;  %3414 = vmatmul.msk.f32.vlgmr.msra.gmra.mxu2 %vm5377_vm1, %v404_v39 }
 0x2a9   :  { %3416 = vmatmul.msk.f32.vlgmr.msra.gmra.mxu3 %vm5377_vm1, %v404_v39 }
 0x32b   :  { %v448_v45 = vpop.f32.mrf.mxu2 }
 0x32c   :  { %v449_v49 = vadd.f32 %v448_v45, %v419_v44  ;;  %v468_v50 = vpop.f32.mrf.mxu3 }
 0x32d   :  { %v469_v51 = vadd.f32 %v468_v50, %v419_v44  ;;  %v783_v50 = vld [vmem:[%s5338_s12] sm:$0xff]  ;;  %s5428_s12 = smov 111  }
 0x32e   :  { %v477_v52 = vadd.f32 %v475_v46, %v449_v49  ;;  %3431 = vmatmul.msk.f32.vlgmr.msra.gmra.mxu1 %vm5376_vm6, %v783_v50 }
 0x32f   :  { %v478_v54 = vadd.f32 %v475_v46, %v469_v51  ;;  %v791_v46 = vld.sshfl [vmem:[#allocation1] sm:$0xff pattern:$0x75316420] }
 0x330   :  { %v479_v55 = vrot.slane %v477_v52, 1  ;;  %v484_v56 = vrot.slane %v477_v52, 7  ;;  %3428 = vmatpush.msk.msra.mxu0 %vm5378_vm0, %v791_v46  ;;  %v733_v46 = vld [vmem:[%s5337_s11] sm:$0xff] }
 0x331   :  { %v480_v57 = vrot.slane %v478_v54, 1  ;;  %v485_v10 = vrot.slane %v478_v54, 7  ;;  %3429 = vmatmul.msk.f32.vlgmr.msra.gmra.mxu0 %vm5376_vm6, %v783_v50 }
 0x332   :  { %v481_v58 = vmul.f32 %v3969_v48, %v479_v55  ;;  %v486_v59 = vmul.f32 %v484_v56, %v3972_v53 }
 0x333   :  { %v482_v60 = vmul.f32 %v3969_v48, %v480_v57  ;;  %v487_v61 = vmul.f32 %v485_v10, %v3972_v53 }
 0x334   :  { %v488_v62 = vadd.f32 %v486_v59, %v481_v58 }
 0x335   :  { %v489_v63 = vadd.f32 %v487_v61, %v482_v60 }
 0x336   :  { %v490_v1 = vadd.f32 %v488_v62, %v477_v52 }
 0x337   :  { %v491_v2 = vadd.f32 %v489_v63, %v478_v54 }
 0x339   :  { %v492_v3 = vadd.f32 %v491_v2, %v490_v1 }
 0x33b   :  { %493 = vadd.xlane.f32.xlu0 %v492_v3 }
 0x3ae   :  { %v494_v4 = vpop.xlane.xlu0 %493 }
 0x3af   :  { %v495_v5 = vmul.f32 0.001953125, %v494_v4 }
 0x3b1   :  { %v496_v6 = vsub.f32 %v477_v52, %v495_v5  ;;  %v497_v7 = vsub.f32 %v478_v54, %v495_v5 }
 0x3b3   :  { %v498_v9 = vmul.f32 %v496_v6, %v496_v6  ;;  %v499_v11 = vmul.f32 %v497_v7, %v497_v7 }
 0x3b5   :  { %v500_v0 = vrot.slane %v498_v9, 1  ;;  %v501_v13 = vrot.slane %v499_v11, 1  ;;  %v504_v14 = vrot.slane %v498_v9, 7  ;;  %v505_v15 = vrot.slane %v499_v11, 7 }
 0x3b7   :  { %v502_v16 = vmul.f32 %v3969_v48, %v500_v0  ;;  %v503_v17 = vmul.f32 %v3969_v48, %v501_v13  ;;  %v506_v18 = vmul.f32 %v504_v14, %v3972_v53  ;;  %v507_v19 = vmul.f32 %v505_v15, %v3972_v53  ;;  %v784_v15 = vld [vmem:[%s5339_s13] sm:$0xff]  ;;  %s5442_s13 = sld [smem:[#allocation26_spill]] }
 0x3b9   :  { %v508_v20 = vadd.f32 %v506_v18, %v502_v16  ;;  %v509_v21 = vadd.f32 %v507_v19, %v503_v17  ;;  %v3425_v17 = vld [vmem:[%s5415_s30 + $0x10] sm:$0x3] }
 0x3ba   :  { %v706_v18 = vperm.slane %v3425_v17, 0  ;;  %v707_v19 = vperm.slane %v3425_v17, 1 }
 0x3bb   :  { %v510_v22 = vadd.f32 %v508_v20, %v498_v9  ;;  %v511_v24 = vadd.f32 %v509_v21, %v499_v11 }
 0x3bd   :  { %v512_v25 = vadd.f32 %v511_v24, %v510_v22 }
 0x3bf   :  { %513 = vadd.xlane.f32.xlu1 %v512_v25 }
 0x432   :  { %v514_v26 = vpop.xlane.xlu1 %513 }
 0x433   :  { %v515_v27 = vmul.f32 0.001953125, %v514_v26 }
 0x435   :  { %v516_v28 = vadd.f32 1e-06, %v515_v27  ;;  %v3424_v27 = vld [vmem:[%s5415_s30 + $0xe] sm:$0x3] }
 0x437   :  { %3551 = vrsqrt.f32 %v516_v28  ;;  %vm523_vm4 = vweird.f32 %v516_v28 }
 0x43d   :  { %v3552_v29 = vpop.eup %3551 }
 0x43e   :  { %v518_v30 = vmul.f32 %v3552_v29, %v516_v28  ;;  %vm524_vm3 = vweird.f32 %v3552_v29  ;;  %v3423_v28 = vld [vmem:[%s5415_s30 + $0xc] sm:$0x3] }
 0x43f   :  { %vm525_vm5 = vmor %vm523_vm4, %vm524_vm3 }
 0x440   :  { %v519_v31 = vmul.f32 %v3552_v29, %v518_v30  ;;  %v691_v30 = vperm.slane %v3424_v27, 1 }
 0x442   :  { %v520_v32 = vmul.f32 0.5, %v519_v31 }
 0x444   :  { %v521_v33 = vsub.f32 1.5, %v520_v32 }
 0x446   :  { %v522_v23 = vmul.f32 %v3552_v29, %v521_v33 }
 0x448   :  { %v526_v35 = vsel %vm525_vm5, %v3552_v29, %v522_v23  ;;  %v690_v29 = vperm.slane %v3424_v27, 0  ;;  %v674_v23 = vperm.slane %v3423_v28, 0 }
 0x449   :  { %v528_v36 = vmul.f32 %v527_v34, %v526_v35  ;;  %v675_v34 = vperm.slane %v3423_v28, 1 }
 0x44b   :  { %531 = vperm.xlu2 %3543, %v528_v36  }
 0x453   :  { %539 = vperm.xlu2 %3543, %v536_v37  }
 0x4a5   :  { %v532_v38 = vpop.permute.xlu2 %531 }
 0x4a6   :  { %v534_v39 = vmul.f32 %v532_v38, %v496_v6  ;;  %v535_v40 = vmul.f32 %v532_v38, %v497_v7 }
 0x4ad   :  { %v540_v41 = vpop.permute.xlu2 %539 }
 0x4ae   :  { %v542_v42 = vadd.f32 %v540_v41, %v534_v39  ;;  %v543_v43 = vadd.f32 %v540_v41, %v535_v40 }
 0x4b0   :  { %v3417_v44 = vmul.f32 -1.442695, %v542_v42  ;;  %v3418_v45 = vmul.f32 -1.442695, %v543_v43 }
 0x4b2   :  { %3553 = vpow2.f32 %v3417_v44  ;;  %v3422_v44 = vld [vmem:[%s5415_s30 + $0xa] sm:$0x3] }
 0x4b3   :  { %3555 = vpow2.f32 %v3418_v45  ;;  %v658_v47 = vperm.slane %v3422_v44, 0 }
 0x4b8   :  { %v3554_v49 = vpop.eup %3553 }
 0x4b9   :  { %v3556_v51 = vpop.eup %3555  ;;  %v550_v52 = vadd.f32 1.0, %v3554_v49  ;;  %v659_v49 = vperm.slane %v3422_v44, 1 }
 0x4ba   :  { %v551_v54 = vadd.f32 1.0, %v3556_v51 }
 0x4bb   :  { %3557 = vrcp.f32 %v550_v52  ;;  %v563_v59 = vand.u32 2147483648, %v550_v52  ;;  %v561_v62 = vand.u32 2147483647, %v550_v52  ;;  %vm557_vm3 = vweird.f32 %v550_v52 }
 0x4bc   :  { %3559 = vrcp.f32 %v551_v54  ;;  %v578_v63 = vand.u32 2147483648, %v551_v54  ;;  %v576_v2 = vand.u32 2147483647, %v551_v54  ;;  %vm572_vm5 = vweird.f32 %v551_v54 }
 0x4bd   :  { %v564_v4 = vor.u32 1.1754944e-38, %v563_v59  ;;  %vm562_vm6 = vcmp.eq.f32.partialorder %v561_v62, 8.507059e+37 }
 0x4be   :  { %v579_v7 = vor.u32 1.1754944e-38, %v578_v63  ;;  %vm577_vm0 = vcmp.eq.f32.partialorder %v576_v2, 8.507059e+37 }
 0x4c1   :  { %v3558_v55 = vpop.eup %3557 }
 0x4c2   :  { %v3560_v56 = vpop.eup %3559  ;;  %v553_v57 = vmul.f32 %v3558_v55, %v550_v52  ;;  %vm558_vm7 = vweird.f32 %v3558_v55 }
 0x4c3   :  { %v568_v10 = vmul.f32 %v3560_v56, %v551_v54  ;;  %vm573_vm2 = vweird.f32 %v3560_v56  ;;  %vm559_vm4 = vmor %vm557_vm3, %vm558_vm7 }
 0x4c4   :  { %v554_v58 = vsub.f32 1.0, %v553_v57  ;;  %vm574_vm1 = vmor %vm572_vm5, %vm573_vm2  ;;  %v3420_v57 = vld [vmem:[%s5415_s30 + $0x4] sm:$0x3] }
 0x4c5   :  { %v569_v60 = vsub.f32 1.0, %v568_v10  ;;  %v625_v62 = vperm.slane %v3420_v57, 1 }
 0x4c6   :  { %v555_v61 = vmul.f32 %v3558_v55, %v554_v58 }
 0x4c7   :  { %v570_v1 = vmul.f32 %v3560_v56, %v569_v60 }
 0x4c8   :  { %v556_v3 = vadd.f32 %v3558_v55, %v555_v61  ;;  %v624_v61 = vperm.slane %v3420_v57, 0 }
 0x4c9   :  { %v571_v5 = vadd.f32 %v3560_v56, %v570_v1 }
 0x4ca   :  { %v560_v6 = vsel %vm559_vm4, %v3558_v55, %v556_v3 }
 0x4cb   :  { %v565_v9 = vsel %vm562_vm6, %v564_v4, %v560_v6  ;;  %v575_v11 = vsel %vm574_vm1, %v3560_v56, %v571_v5  ;;  %v3421_v56 = vld [vmem:[%s5415_s30 + $0x6] sm:$0x3] }
 0x4cc   :  { %v580_v0 = vsel %vm577_vm0, %v579_v7, %v575_v11  ;;  %v3995_v13 = vmul.f32 %v565_v9, %v542_v42  ;;  %v640_v58 = vperm.slane %v3421_v56, 0  ;;  %v641_v59 = vperm.slane %v3421_v56, 1  ;;  %v3419_v7 = vld [vmem:[%s5415_s30 + $0x2] sm:$0x3] }
 0x4cd   :  { %v3997_v14 = vmul.f32 %v580_v0, %v543_v43  ;;  %v608_v0 = vperm.slane %v3419_v7, 0  ;;  %vm5389_vm0 = vcmask 588800  }
 0x4ce   :  { %698 = vrot.lane.b32.xlu2 %v3995_v13, %s5381_s27 }
 0x4cf   :  { %668 = vrot.lane.b32.xlu1 %v3997_v14, %s5379_s6  ;;  %684 = vrot.lane.b32.xlu0 %v3997_v14, %s5420_s0  ;;  %s5427_s6 = sld [smem:[#allocation20_spill]] }
 0x4d6   :  { %700 = vrot.lane.b32.xlu2 %v3997_v14, %s5381_s27  ;;  %s5424_s27 = smov 113  }
 0x4d7   :  { %618 = vrot.lane.b32.xlu1 %v3997_v14, %s5421_s10  ;;  %632 = vrot.lane.b32.xlu0 %v3995_v13, %s5422_s2 }
 0x4de   :  { %682 = vrot.lane.b32.xlu2 %v3995_v13, %s5420_s0 }
 0x4df   :  { %584 = vrot.lane.b32.xlu1 %v3995_v13, %s5423_s5  ;;  %616 = vrot.lane.b32.xlu0 %v3995_v13, %s5421_s10 }
 0x4e6   :  { %666 = vrot.lane.b32.xlu2 %v3995_v13, %s5424_s27 }
 0x4e7   :  { %787 = vperm.xlu1 %3542, %v784_v15   ;;  %602 = vrot.lane.b32.xlu0 %v3997_v14, %s5425_s24 }
 0x4ee   :  { %650 = vrot.lane.b32.xlu2 %v3995_v13, %s5426_s25 }
 0x4ef   :  { %736 = vperm.xlu0 %3544, %v733_v46  }
 0x4f6   :  { %652 = vrot.lane.b32.xlu2 %v3997_v14, %s5426_s25 }
 0x4fe   :  { %634 = vrot.lane.b32.xlu2 %v3997_v14, %s5422_s2 }
 0x506   :  { %600 = vrot.lane.b32.xlu2 %v3995_v13, %s5425_s24 }
 0x50e   :  { %586 = vrot.lane.b32.xlu2 %v3997_v14, %s5423_s5 }
 0x528   :  { %v699_v16 = vpop.permute.xlu2 %698 }
 0x530   :  { %v701_v20 = vpop.permute.xlu2 %700 }
 0x531   :  { %v702_v21 = vsel %vm390_vm13, %v699_v16, %v701_v20  ;;  %v703_v22 = vsel %vm390_vm13, %v701_v20, %v699_v16  ;;  %v590_v20 = vld [vmem:[%s5415_s30] sm:$0x3] }
 0x532   :  { %v710_v24 = vmul.f32 %v706_v18, %v702_v21  ;;  %v711_v25 = vmul.f32 %v707_v19, %v703_v22  ;;  %v592_v21 = vperm.slane %v590_v20, 0  ;;  %v593_v22 = vperm.slane %v590_v20, 1 }
 0x534   :  { %750 = vmatpush.msrb.mxu2 %v710_v24  ;;  %770 = vmatpush.msrb.mxu3 %v711_v25 }
 0x538   :  { %v683_v26 = vpop.permute.xlu2 %682 }
 0x540   :  { %v667_v31 = vpop.permute.xlu2 %666 }
 0x541   :  { %v669_v32 = vpop.permute.xlu1 %668  ;;  %v685_v33 = vpop.permute.xlu0 %684 }
 0x542   :  { %v686_v35 = vsel %vm361_vm11, %v683_v26, %v685_v33  ;;  %v687_v36 = vsel %vm361_vm11, %v685_v33, %v683_v26  ;;  %v670_v37 = vsel %vm338_vm12, %v667_v31, %v669_v32  ;;  %v671_v38 = vsel %vm338_vm12, %v669_v32, %v667_v31  ;;  %v818_v31 = vpop.f32.mrf.mxu0  ;;  %v838_v32 = vpop.f32.mrf.mxu1 }
 0x543   :  { %v694_v39 = vmul.f32 %v690_v29, %v686_v35  ;;  %v695_v40 = vmul.f32 %v691_v30, %v687_v36  ;;  %v678_v41 = vmul.f32 %v674_v23, %v670_v37  ;;  %v679_v42 = vmul.f32 %v675_v34, %v671_v38  ;;  %v714_v30 = vld [vmem:[%s5427_s6] sm:$0xff] }
 0x545   :  { %751 = vmatpush.msrb.mxu2 %v694_v39  ;;  %771 = vmatpush.msrb.mxu3 %v695_v40 }
 0x547   :  { %752 = vmatpush.msrb.mxu2 %v678_v41  ;;  %772 = vmatpush.msrb.mxu3 %v679_v42 }
 0x548   :  { %v651_v43 = vpop.permute.xlu2 %650 }
 0x549   :  { %v633_v45 = vpop.permute.xlu0 %632  ;;  %v619_v60 = vpop.permute.xlu1 %618 }
 0x550   :  { %v653_v50 = vpop.permute.xlu2 %652 }
 0x551   :  { %v654_v51 = vsel %vm309_vm10, %v651_v43, %v653_v50  ;;  %v655_v52 = vsel %vm309_vm10, %v653_v50, %v651_v43  ;;  %v617_v10 = vpop.permute.xlu0 %616  ;;  %v585_v24 = vpop.permute.xlu1 %584 }
 0x552   :  { %v662_v54 = vmul.f32 %v658_v47, %v654_v51  ;;  %v663_v55 = vmul.f32 %v659_v49, %v655_v52  ;;  %v620_v1 = vsel %vm250_vm14, %v617_v10, %v619_v60  ;;  %v621_v2 = vsel %vm250_vm14, %v619_v60, %v617_v10 }
 0x553   :  { %v628_v9 = vmul.f32 %v624_v61, %v621_v2  ;;  %v629_v11 = vmul.f32 %v625_v62, %v620_v1 }
 0x554   :  { %753 = vmatpush.msrb.mxu2 %v662_v54  ;;  %773 = vmatpush.msrb.mxu3 %v663_v55 }
 0x556   :  { %754 = vmatpush.msrb.mxu2 %v3995_v13  ;;  %774 = vmatpush.msrb.mxu3 %v3997_v14  ;;  %v609_v13 = vperm.slane %v3419_v7, 1 }
 0x558   :  { %v635_v63 = vpop.permute.xlu2 %634 }
 0x559   :  { %v636_v3 = vsel %vm273_vm9, %v633_v45, %v635_v63  ;;  %v637_v4 = vsel %vm273_vm9, %v635_v63, %v633_v45  ;;  %v603_v14 = vpop.permute.xlu0 %602  ;;  %v788_v33 = vpop.permute.xlu1 %787 }
 0x55a   :  { %v644_v5 = vmul.f32 %v640_v58, %v637_v4  ;;  %v645_v6 = vmul.f32 %v641_v59, %v636_v3  ;;  %v819_v36 = vadd.f32 %v818_v31, %v788_v33  ;;  %v839_v37 = vadd.f32 %v838_v32, %v788_v33 }
 0x55c   :  { %755 = vmatpush.msrb.mxu2 %v644_v5  ;;  %775 = vmatpush.msrb.mxu3 %v645_v6 }
 0x55e   :  { %756 = vmatpush.msrb.mxu2 %v628_v9  ;;  %776 = vmatpush.msrb.mxu3 %v629_v11 }
 0x560   :  { %v601_v15 = vpop.permute.xlu2 %600 }
 0x561   :  { %v604_v16 = vsel %vm221_vm8, %v601_v15, %v603_v14  ;;  %v605_v17 = vsel %vm221_vm8, %v603_v14, %v601_v15  ;;  %v737_v23 = vpop.permute.xlu0 %736 }
 0x562   :  { %v612_v18 = vmul.f32 %v608_v0, %v605_v17  ;;  %v613_v19 = vmul.f32 %v609_v13, %v604_v16 }
 0x564   :  { %757 = vmatpush.msrb.mxu2 %v612_v18  ;;  %777 = vmatpush.msrb.mxu3 %v613_v19 }
 0x568   :  { %v587_v25 = vpop.permute.xlu2 %586 }
 0x569   :  { %v588_v26 = vsel %vm199_vm15, %v585_v24, %v587_v25  ;;  %v589_v27 = vsel %vm199_vm15, %v587_v25, %v585_v24  ;;  %v892_v24 = vld [vmem:[%s5340_s14] sm:$0xff]  ;;  %s5451_s14 = sld [smem:[#allocation24_spill]] }
 0x56a   :  { %v596_v28 = vmul.f32 %v592_v21, %v589_v27  ;;  %v597_v29 = vmul.f32 %v593_v22, %v588_v26  ;;  %v901_v27 = vld [vmem:[%s5341_s15] sm:$0xff]  ;;  %s3709_s15 = smov 8  }
 0x56c   :  { %758 = vmatpush.msrb.mxu2 %v596_v28  ;;  %778 = vmatpush.msrb.mxu3 %v597_v29 }
 0x56d   :  { %3426 = vmatmul.msk.f32.vlgmr.msrb.gmra.mxu2 %vm5389_vm0, %v714_v30  ;;  %3427 = vmatmul.msk.f32.vlgmr.msrb.gmra.mxu3 %vm5389_vm0, %v714_v30 }
 0x5f0   :  { %v760_v34 = vpop.f32.mrf.mxu2  ;;  %v780_v35 = vpop.f32.mrf.mxu3 }
 0x5f1   :  { %v761_v38 = vadd.f32 %v760_v34, %v737_v23  ;;  %v781_v39 = vadd.f32 %v780_v35, %v737_v23 }
 0x5f3   :  { %v4100_v40 = vadd.f32 %v819_v36, %v761_v38  ;;  %v4102_v41 = vadd.f32 %v839_v37, %v781_v39 }
 0x5f5   :  { %843 = vst [vmem:[#allocation3] sm:$0xff] %v4100_v40  ;;  %v845_v42 = vrot.slane %v4100_v40, 1  ;;  %v846_v43 = vrot.slane %v4102_v41, 1  ;;  %v849_v44 = vrot.slane %v4100_v40, 7  ;;  %v850_v45 = vrot.slane %v4102_v41, 7 }
 0x5f6   :  { %844 = vst [vmem:[#allocation3 + $0x8] sm:$0xff] %v4102_v41 }
 0x5f7   :  { %v847_v46 = vmul.f32 %v3969_v48, %v845_v42  ;;  %v848_v47 = vmul.f32 %v3969_v48, %v846_v43  ;;  %v851_v49 = vmul.f32 %v849_v44, %v3972_v53  ;;  %v852_v50 = vmul.f32 %v850_v45, %v3972_v53 }
 0x5f9   :  { %v853_v51 = vadd.f32 %v851_v49, %v847_v46  ;;  %v854_v52 = vadd.f32 %v852_v50, %v848_v47 }
 0x5fb   :  { %v855_v54 = vadd.f32 %v853_v51, %v4100_v40  ;;  %v856_v55 = vadd.f32 %v854_v52, %v4102_v41 }
 0x5fd   :  { %v857_v56 = vadd.f32 %v856_v55, %v855_v54 }
 0x5ff   :  { %858 = vadd.xlane.f32.xlu2 %v857_v56 }
 0x672   :  { %v859_v57 = vpop.xlane.xlu2 %858 }
 0x673   :  { %v860_v10 = vmul.f32 0.001953125, %v859_v57 }
 0x675   :  { %v861_v58 = vsub.f32 %v4100_v40, %v860_v10  ;;  %v862_v59 = vsub.f32 %v4102_v41, %v860_v10 }
 0x677   :  { %v863_v60 = vmul.f32 %v861_v58, %v861_v58  ;;  %v864_v61 = vmul.f32 %v862_v59, %v862_v59 }
 0x679   :  { %v865_v62 = vrot.slane %v863_v60, 1  ;;  %v866_v63 = vrot.slane %v864_v61, 1  ;;  %v869_v1 = vrot.slane %v863_v60, 7  ;;  %v870_v2 = vrot.slane %v864_v61, 7 }
 0x67b   :  { %v867_v3 = vmul.f32 %v3969_v48, %v865_v62  ;;  %v868_v4 = vmul.f32 %v3969_v48, %v866_v63  ;;  %v871_v5 = vmul.f32 %v869_v1, %v3972_v53  ;;  %v872_v6 = vmul.f32 %v870_v2, %v3972_v53  ;;  %v1098_v1 = vld [vmem:[%s5343_s17] sm:$0xff]  ;;  %v3443_v2 = vld [vmem:[%s5416_s8 + $0x8] sm:$0xff]  ;;  %s5447_s17 = sld [smem:[#allocation22_spill]] }
 0x67d   :  { %v873_v7 = vadd.f32 %v871_v5, %v867_v3  ;;  %v874_v9 = vadd.f32 %v872_v6, %v868_v4  ;;  %v1212_v3 = vld [vmem:[%s5345_s19] sm:$0xff]  ;;  %v3440_v5 = vld [vmem:[%s5415_s30 + $0x10] sm:$0x3] }
 0x67e   :  { %v1071_v6 = vperm.slane %v3440_v5, 0 }
 0x67f   :  { %v875_v11 = vadd.f32 %v873_v7, %v863_v60  ;;  %v876_v0 = vadd.f32 %v874_v9, %v864_v61  ;;  %v1072_v7 = vperm.slane %v3440_v5, 1 }
 0x681   :  { %v877_v13 = vadd.f32 %v876_v0, %v875_v11 }
 0x683   :  { %878 = vadd.xlane.f32.xlu1 %v877_v13 }
 0x6f6   :  { %v879_v14 = vpop.xlane.xlu1 %878 }
 0x6f7   :  { %v880_v15 = vmul.f32 0.001953125, %v879_v14 }
 0x6f9   :  { %v881_v16 = vadd.f32 1e-06, %v880_v15  ;;  %v3439_v15 = vld [vmem:[%s5415_s30 + $0xe] sm:$0x3] }
 0x6fb   :  { %3561 = vrsqrt.f32 %v881_v16  ;;  %vm888_vm6 = vweird.f32 %v881_v16 }
 0x701   :  { %v3562_v17 = vpop.eup %3561 }
 0x702   :  { %v883_v18 = vmul.f32 %v3562_v17, %v881_v16  ;;  %vm889_vm1 = vweird.f32 %v3562_v17  ;;  %v1055_v16 = vperm.slane %v3439_v15, 0 }
 0x703   :  { %vm890_vm7 = vmor %vm888_vm6, %vm889_vm1 }
 0x704   :  { %v884_v19 = vmul.f32 %v3562_v17, %v883_v18 }
 0x706   :  { %v885_v20 = vmul.f32 0.5, %v884_v19 }
 0x708   :  { %v886_v21 = vsub.f32 1.5, %v885_v20 }
 0x70a   :  { %v887_v22 = vmul.f32 %v3562_v17, %v886_v21 }
 0x70c   :  { %v891_v25 = vsel %vm890_vm7, %v3562_v17, %v887_v22  ;;  %v1056_v17 = vperm.slane %v3439_v15, 1 }
 0x70d   :  { %v893_v26 = vmul.f32 %v892_v24, %v891_v25  ;;  %v3438_v25 = vld [vmem:[%s5415_s30 + $0xc] sm:$0x3] }
 0x70f   :  { %896 = vperm.xlu0 %3544, %v893_v26   ;;  %v1039_v26 = vperm.slane %v3438_v25, 0 }
 0x717   :  { %904 = vperm.xlu0 %3544, %v901_v27   ;;  %v1040_v27 = vperm.slane %v3438_v25, 1 }
 0x781   :  { %v897_v28 = vpop.permute.xlu0 %896 }
 0x782   :  { %v899_v29 = vmul.f32 %v897_v28, %v861_v58  ;;  %v900_v30 = vmul.f32 %v897_v28, %v862_v59 }
 0x789   :  { %v905_v31 = vpop.permute.xlu0 %904 }
 0x78a   :  { %v907_v32 = vadd.f32 %v905_v31, %v899_v29  ;;  %v908_v33 = vadd.f32 %v905_v31, %v900_v30 }
 0x78c   :  { %v3432_v23 = vmul.f32 -1.442695, %v907_v32  ;;  %v3433_v34 = vmul.f32 -1.442695, %v908_v33 }
 0x78e   :  { %3563 = vpow2.f32 %v3432_v23  ;;  %v3437_v23 = vld [vmem:[%s5415_s30 + $0xa] sm:$0x3] }
 0x78f   :  { %3565 = vpow2.f32 %v3433_v34 }
 0x794   :  { %v3564_v35 = vpop.eup %3563 }
 0x795   :  { %v3566_v36 = vpop.eup %3565  ;;  %v915_v37 = vadd.f32 1.0, %v3564_v35  ;;  %v1023_v35 = vperm.slane %v3437_v23, 0 }
 0x796   :  { %v916_v38 = vadd.f32 1.0, %v3566_v36  ;;  %v1024_v36 = vperm.slane %v3437_v23, 1 }
 0x797   :  { %3567 = vrcp.f32 %v915_v37  ;;  %v928_v46 = vand.u32 2147483648, %v915_v37  ;;  %v926_v50 = vand.u32 2147483647, %v915_v37  ;;  %vm922_vm3 = vweird.f32 %v915_v37 }
 0x798   :  { %3569 = vrcp.f32 %v916_v38  ;;  %v943_v10 = vand.u32 2147483648, %v916_v38  ;;  %vm937_vm6 = vweird.f32 %v916_v38  ;;  %v941_v58 = vand.u32 2147483647, %v916_v38 }
 0x799   :  { %v929_v54 = vor.u32 1.1754944e-38, %v928_v46  ;;  %vm927_vm5 = vcmp.eq.f32.partialorder %v926_v50, 8.507059e+37 }
 0x79a   :  { %v944_v61 = vor.u32 1.1754944e-38, %v943_v10 }
 0x79d   :  { %v3568_v39 = vpop.eup %3567 }
 0x79e   :  { %v3570_v42 = vpop.eup %3569  ;;  %v918_v43 = vmul.f32 %v3568_v39, %v915_v37  ;;  %vm923_vm2 = vweird.f32 %v3568_v39 }
 0x79f   :  { %v933_v44 = vmul.f32 %v3570_v42, %v916_v38  ;;  %vm924_vm4 = vmor %vm922_vm3, %vm923_vm2  ;;  %vm938_vm1 = vweird.f32 %v3570_v42  ;;  %vm942_vm2 = vcmp.eq.f32.partialorder %v941_v58, 8.507059e+37 }
 0x7a0   :  { %v919_v45 = vsub.f32 1.0, %v918_v43  ;;  %vm939_vm7 = vmor %vm937_vm6, %vm938_vm1  ;;  %vm5429_vm1 = vcmask 1043456  }
 0x7a1   :  { %v934_v47 = vsub.f32 1.0, %v933_v44  ;;  %v3436_v44 = vld [vmem:[%s5415_s30 + $0x6] sm:$0x3]  ;;  %vm5430_vm6 = vmmov %vm5429_vm1 }
 0x7a2   :  { %v920_v49 = vmul.f32 %v3568_v39, %v919_v45 }
 0x7a3   :  { %v935_v51 = vmul.f32 %v3570_v42, %v934_v47  ;;  %v1005_v47 = vperm.slane %v3436_v44, 0 }
 0x7a4   :  { %v921_v52 = vadd.f32 %v3568_v39, %v920_v49  ;;  %v1006_v49 = vperm.slane %v3436_v44, 1 }
 0x7a5   :  { %v936_v56 = vadd.f32 %v3570_v42, %v935_v51 }
 0x7a6   :  { %v925_v55 = vsel %vm924_vm4, %v3568_v39, %v921_v52 }
 0x7a7   :  { %v930_v57 = vsel %vm927_vm5, %v929_v54, %v925_v55  ;;  %v940_v60 = vsel %vm939_vm7, %v3570_v42, %v936_v56  ;;  %v3435_v56 = vld [vmem:[%s5415_s30 + $0x4] sm:$0x3] }
 0x7a8   :  { %v4128_v59 = vmul.f32 %v930_v57, %v907_v32  ;;  %v945_v62 = vsel %vm942_vm2, %v944_v61, %v940_v60  ;;  %v3434_v57 = vld [vmem:[%s5415_s30 + $0x2] sm:$0x3]  ;;  %v989_v58 = vperm.slane %v3435_v56, 0 }
 0x7a9   :  { %v4136_v63 = vmul.f32 %v945_v62, %v908_v33  ;;  %v973_v61 = vperm.slane %v3434_v57, 0  ;;  %v974_v62 = vperm.slane %v3434_v57, 1 }
 0x7aa   :  { %1031 = vrot.lane.b32.xlu1 %v4128_v59, %s5424_s27  ;;  %1047 = vrot.lane.b32.xlu2 %v4128_v59, %s5420_s0 }
 0x7ab   :  { %1063 = vrot.lane.b32.xlu0 %v4128_v59, %s5428_s12 }
 0x7b2   :  { %999 = vrot.lane.b32.xlu1 %v4136_v63, %s5422_s2  ;;  %1017 = vrot.lane.b32.xlu2 %v4136_v63, %s5426_s25 }
 0x7b3   :  { %1065 = vrot.lane.b32.xlu0 %v4136_v63, %s5428_s12 }
 0x7ba   :  { %965 = vrot.lane.b32.xlu1 %v4128_v59, %s5425_s24  ;;  %981 = vrot.lane.b32.xlu2 %v4128_v59, %s5421_s10 }
 0x7bb   :  { %1049 = vrot.lane.b32.xlu0 %v4136_v63, %s5420_s0 }
 0x7c2   :  { %951 = vrot.lane.b32.xlu1 %v4136_v63, %s5423_s5  ;;  %967 = vrot.lane.b32.xlu2 %v4136_v63, %s5425_s24 }
 0x7c3   :  { %1033 = vrot.lane.b32.xlu0 %v4136_v63, %s5424_s27 }
 0x7ca   :  { %1101 = vperm.xlu2 %3543, %v1098_v1  }
 0x7cb   :  { %1015 = vrot.lane.b32.xlu0 %v4128_v59, %s5426_s25 }
 0x7d3   :  { %997 = vrot.lane.b32.xlu0 %v4128_v59, %s5422_s2 }
 0x7db   :  { %983 = vrot.lane.b32.xlu0 %v4136_v63, %s5421_s10 }
 0x7e3   :  { %949 = vrot.lane.b32.xlu0 %v4128_v59, %s5423_s5 }
 0x7eb   :  { %1151 = vperm.xlu0 %3544, %v3443_v2  }
 0x7f3   :  { %1215 = vperm.xlu0 %3544, %v1212_v3  }
 0x804   :  { %v1048_v18 = vpop.permute.xlu2 %1047 }
 0x80c   :  { %v1018_v34 = vpop.permute.xlu2 %1017 }
 0x814   :  { %v982_v46 = vpop.permute.xlu2 %981 }
 0x81c   :  { %v1032_v28 = vpop.permute.xlu1 %1031  ;;  %v968_v60 = vpop.permute.xlu2 %967 }
 0x81d   :  { %v1064_v4 = vpop.permute.xlu0 %1063 }
 0x824   :  { %v1000_v45 = vpop.permute.xlu1 %999 }
 0x825   :  { %v1066_v9 = vpop.permute.xlu0 %1065 }
 0x826   :  { %v1067_v11 = vsel %vm390_vm13, %v1064_v4, %v1066_v9  ;;  %v1068_v0 = vsel %vm390_vm13, %v1066_v9, %v1064_v4 }
 0x827   :  { %v1075_v13 = vmul.f32 %v1071_v6, %v1067_v11  ;;  %v1076_v14 = vmul.f32 %v1072_v7, %v1068_v0  ;;  %v955_v7 = vld [vmem:[%s5415_s30] sm:$0x3] }
 0x828   :  { %v957_v0 = vperm.slane %v955_v7, 0 }
 0x829   :  { %1114 = vmatpush.msrb.mxu0 %v1075_v13  ;;  %1134 = vmatpush.msrb.mxu1 %v1076_v14  ;;  %v958_v13 = vperm.slane %v955_v7, 1 }
 0x82c   :  { %v966_v10 = vpop.permute.xlu1 %965 }
 0x82d   :  { %v1050_v19 = vpop.permute.xlu0 %1049  ;;  %v969_v1 = vsel %vm221_vm8, %v966_v10, %v968_v60  ;;  %v970_v2 = vsel %vm221_vm8, %v968_v60, %v966_v10 }
 0x82e   :  { %v1051_v20 = vsel %vm361_vm11, %v1048_v18, %v1050_v19  ;;  %v1052_v21 = vsel %vm361_vm11, %v1050_v19, %v1048_v18  ;;  %v977_v9 = vmul.f32 %v973_v61, %v970_v2  ;;  %v978_v11 = vmul.f32 %v974_v62, %v969_v1  ;;  %v4247_v1 = vld [vmem:[%s5411_s7 + $0x8] sm:$0xff]  ;;  %s5441_s7 = sld [smem:[#allocation13_spill]] }
 0x82f   :  { %v1059_v22 = vmul.f32 %v1055_v16, %v1051_v20  ;;  %v1060_v24 = vmul.f32 %v1056_v17, %v1052_v21  ;;  %v1079_v20 = vld [vmem:[%s5342_s16] sm:$0xff]  ;;  %v1102_v21 = vpop.permute.xlu2 %1101  ;;  %1737 = vst [vmem:[#allocation1] ss:$2 sm:$0xff] %v4247_v1 }
 0x831   :  { %1115 = vmatpush.msrb.mxu0 %v1059_v22  ;;  %1135 = vmatpush.msrb.mxu1 %v1060_v24 }
 0x834   :  { %v952_v14 = vpop.permute.xlu1 %951 }
 0x835   :  { %v1034_v29 = vpop.permute.xlu0 %1033 }
 0x836   :  { %v1035_v30 = vsel %vm338_vm12, %v1032_v28, %v1034_v29  ;;  %v1036_v31 = vsel %vm338_vm12, %v1034_v29, %v1032_v28 }
 0x837   :  { %v1043_v32 = vmul.f32 %v1039_v26, %v1035_v30  ;;  %v1044_v33 = vmul.f32 %v1040_v27, %v1036_v31 }
 0x839   :  { %1116 = vmatpush.msrb.mxu0 %v1043_v32  ;;  %1136 = vmatpush.msrb.mxu1 %v1044_v33 }
 0x83d   :  { %v1016_v37 = vpop.permute.xlu0 %1015 }
 0x83e   :  { %v1019_v38 = vsel %vm309_vm10, %v1016_v37, %v1018_v34  ;;  %v1020_v39 = vsel %vm309_vm10, %v1018_v34, %v1016_v37 }
 0x83f   :  { %v1027_v42 = vmul.f32 %v1023_v35, %v1019_v38  ;;  %v1028_v43 = vmul.f32 %v1024_v36, %v1020_v39 }
 0x841   :  { %1117 = vmatpush.msrb.mxu0 %v1027_v42  ;;  %1137 = vmatpush.msrb.mxu1 %v1028_v43 }
 0x843   :  { %1118 = vmatpush.msrb.mxu0 %v4128_v59  ;;  %1138 = vmatpush.msrb.mxu1 %v4136_v63  ;;  %v990_v59 = vperm.slane %v3435_v56, 1 }
 0x845   :  { %v998_v50 = vpop.permute.xlu0 %997 }
 0x846   :  { %v1001_v51 = vsel %vm273_vm9, %v998_v50, %v1000_v45  ;;  %v1002_v52 = vsel %vm273_vm9, %v1000_v45, %v998_v50 }
 0x847   :  { %v1009_v54 = vmul.f32 %v1005_v47, %v1002_v52  ;;  %v1010_v55 = vmul.f32 %v1006_v49, %v1001_v51 }
 0x849   :  { %1119 = vmatpush.msrb.mxu0 %v1009_v54  ;;  %1139 = vmatpush.msrb.mxu1 %v1010_v55 }
 0x84d   :  { %v984_v63 = vpop.permute.xlu0 %983 }
 0x84e   :  { %v985_v3 = vsel %vm250_vm14, %v982_v46, %v984_v63  ;;  %v986_v4 = vsel %vm250_vm14, %v984_v63, %v982_v46 }
 0x84f   :  { %v993_v5 = vmul.f32 %v989_v58, %v986_v4  ;;  %v994_v6 = vmul.f32 %v990_v59, %v985_v3 }
 0x851   :  { %1120 = vmatpush.msrb.mxu0 %v993_v5  ;;  %1140 = vmatpush.msrb.mxu1 %v994_v6 }
 0x853   :  { %1121 = vmatpush.msrb.mxu0 %v977_v9  ;;  %1141 = vmatpush.msrb.mxu1 %v978_v11 }
 0x855   :  { %v950_v15 = vpop.permute.xlu0 %949 }
 0x856   :  { %v953_v16 = vsel %vm199_vm15, %v950_v15, %v952_v14  ;;  %v954_v17 = vsel %vm199_vm15, %v952_v14, %v950_v15 }
 0x857   :  { %v961_v18 = vmul.f32 %v957_v0, %v954_v17  ;;  %v962_v19 = vmul.f32 %v958_v13, %v953_v16  ;;  %v1203_v13 = vld [vmem:[%s5344_s18] sm:$0xff]  ;;  %v1739_v17 = vld.sshfl [vmem:[#allocation1 + $0x8] sm:$0xff pattern:$0x75316420] }
 0x858   :  { %v1738_v16 = vld.sshfl [vmem:[#allocation1] sm:$0xff pattern:$0x75316420] }
 0x859   :  { %1122 = vmatpush.msrb.mxu0 %v961_v18  ;;  %1142 = vmatpush.msrb.mxu1 %v962_v19  ;;  %v1742_v18 = vsel %vm5429_vm1, %v1738_v16, 0.0  ;;  %v1743_v19 = vsel %vm5430_vm6, %v1739_v17, 0.0 }
 0x85a   :  { %3441 = vmatmul.msk.f32.vlgmr.msrb.gmra.mxu0 %vm5389_vm0, %v1079_v20  ;;  %3442 = vmatmul.msk.f32.vlgmr.msrb.gmra.mxu1 %vm5389_vm0, %v1079_v20  ;;  %v1744_v20 = vadd.f32 %v1743_v19, %v1742_v18 }
 0x85d   :  { %v1152_v27 = vpop.permute.xlu0 %1151 }
 0x8d7   :  { %v1124_v22 = vpop.f32.mrf.mxu0  ;;  %v1144_v24 = vpop.f32.mrf.mxu1 }
 0x8d8   :  { %v1125_v25 = vadd.f32 %v1124_v22, %v1102_v21  ;;  %v1145_v26 = vadd.f32 %v1144_v24, %v1102_v21  ;;  %v1216_v21 = vpop.permute.xlu0 %1215 }
 0x8da   :  { %v1154_v28 = vadd.f32 %v1152_v27, %v1125_v25  ;;  %v1155_v29 = vadd.f32 %v1152_v27, %v1145_v26 }
 0x8dc   :  { %v1156_v30 = vrot.slane %v1154_v28, 1  ;;  %v1157_v31 = vrot.slane %v1155_v29, 1  ;;  %v1160_v32 = vrot.slane %v1154_v28, 7  ;;  %v1161_v33 = vrot.slane %v1155_v29, 7 }
 0x8de   :  { %v1158_v23 = vmul.f32 %v3969_v48, %v1156_v30  ;;  %v1159_v34 = vmul.f32 %v3969_v48, %v1157_v31  ;;  %v1162_v35 = vmul.f32 %v1160_v32, %v3972_v53  ;;  %v1163_v36 = vmul.f32 %v1161_v33, %v3972_v53 }
 0x8e0   :  { %v1164_v37 = vadd.f32 %v1162_v35, %v1158_v23  ;;  %v1165_v38 = vadd.f32 %v1163_v36, %v1159_v34 }
 0x8e2   :  { %v1166_v39 = vadd.f32 %v1164_v37, %v1154_v28  ;;  %v1167_v42 = vadd.f32 %v1165_v38, %v1155_v29 }
 0x8e4   :  { %v1168_v43 = vadd.f32 %v1167_v42, %v1166_v39 }
 0x8e6   :  { %1169 = vadd.xlane.f32.xlu1 %v1168_v43 }
 0x959   :  { %v1170_v44 = vpop.xlane.xlu1 %1169 }
 0x95a   :  { %v1171_v45 = vmul.f32 0.001953125, %v1170_v44 }
 0x95c   :  { %v1172_v46 = vsub.f32 %v1154_v28, %v1171_v45  ;;  %v1173_v47 = vsub.f32 %v1155_v29, %v1171_v45 }
 0x95e   :  { %v1174_v49 = vmul.f32 %v1172_v46, %v1172_v46  ;;  %v1175_v50 = vmul.f32 %v1173_v47, %v1173_v47 }
 0x960   :  { %v1176_v51 = vrot.slane %v1174_v49, 1  ;;  %v1177_v52 = vrot.slane %v1175_v50, 1  ;;  %v1180_v54 = vrot.slane %v1174_v49, 7  ;;  %v1181_v55 = vrot.slane %v1175_v50, 7 }
 0x962   :  { %v1178_v56 = vmul.f32 %v3969_v48, %v1176_v51  ;;  %v1179_v57 = vmul.f32 %v3969_v48, %v1177_v52  ;;  %v1182_v10 = vmul.f32 %v1180_v54, %v3972_v53  ;;  %v1183_v58 = vmul.f32 %v1181_v55, %v3972_v53 }
 0x964   :  { %v1184_v59 = vadd.f32 %v1182_v10, %v1178_v56  ;;  %v1185_v60 = vadd.f32 %v1183_v58, %v1179_v57 }
 0x966   :  { %v1186_v61 = vadd.f32 %v1184_v59, %v1174_v49  ;;  %v1187_v62 = vadd.f32 %v1185_v60, %v1175_v50 }
 0x968   :  { %v1188_v63 = vadd.f32 %v1187_v62, %v1186_v61 }
 0x96a   :  { %1189 = vadd.xlane.f32.xlu2 %v1188_v63  ;;  %v1791_v63 = vld [vmem:[%s5413_s9] sm:$0xf] }
 0x9dd   :  { %v1190_v2 = vpop.xlane.xlu2 %1189 }
 0x9de   :  { %v1191_v3 = vmul.f32 0.001953125, %v1190_v2 }
 0x9e0   :  { %v1192_v4 = vadd.f32 1e-06, %v1191_v3 }
 0x9e2   :  { %3571 = vrsqrt.f32 %v1192_v4  ;;  %vm1199_vm4 = vweird.f32 %v1192_v4 }
 0x9e8   :  { %v3572_v5 = vpop.eup %3571 }
 0x9e9   :  { %v1194_v6 = vmul.f32 %v3572_v5, %v1192_v4  ;;  %vm1200_vm3 = vweird.f32 %v3572_v5 }
 0x9ea   :  { %vm1201_vm5 = vmor %vm1199_vm4, %vm1200_vm3 }
 0x9eb   :  { %v1195_v7 = vmul.f32 %v3572_v5, %v1194_v6 }
 0x9ed   :  { %v1196_v9 = vmul.f32 0.5, %v1195_v7 }
 0x9ef   :  { %v1197_v11 = vsub.f32 1.5, %v1196_v9 }
 0x9f1   :  { %v1198_v0 = vmul.f32 %v3572_v5, %v1197_v11  ;;  %v3452_v11 = vld [vmem:[%s5415_s30 + $0x10] sm:$0x3] }
 0x9f3   :  { %v1202_v14 = vsel %vm1201_vm5, %v3572_v5, %v1198_v0  ;;  %v1382_v0 = vperm.slane %v3452_v11, 0 }
 0x9f4   :  { %v1204_v15 = vmul.f32 %v1203_v13, %v1202_v14  ;;  %v1383_v13 = vperm.slane %v3452_v11, 1 }
 0x9f6   :  { %1207 = vperm.xlu0 %3544, %v1204_v15  }
 0xa20   :  { %1745 = vadd.xlane.f32.xlu0 %v1744_v20 }
 0xa68   :  { %v1208_v22 = vpop.permute.xlu0 %1207 }
 0xa69   :  { %v1210_v24 = vmul.f32 %v1208_v22, %v1172_v46  ;;  %v1211_v25 = vmul.f32 %v1208_v22, %v1173_v47 }
 0xa6b   :  { %v1218_v26 = vadd.f32 %v1216_v21, %v1210_v24  ;;  %v1219_v27 = vadd.f32 %v1216_v21, %v1211_v25  ;;  %v3451_v21 = vld [vmem:[%s5415_s30 + $0xe] sm:$0x3] }
 0xa6c   :  { %v1366_v22 = vperm.slane %v3451_v21, 0  ;;  %v1367_v24 = vperm.slane %v3451_v21, 1 }
 0xa6d   :  { %v3444_v28 = vmul.f32 -1.442695, %v1218_v26  ;;  %v3445_v29 = vmul.f32 -1.442695, %v1219_v27 }
 0xa6f   :  { %3573 = vpow2.f32 %v3444_v28 }
 0xa70   :  { %3575 = vpow2.f32 %v3445_v29 }
 0xa75   :  { %v3574_v30 = vpop.eup %3573 }
 0xa76   :  { %v3576_v31 = vpop.eup %3575  ;;  %v1226_v32 = vadd.f32 1.0, %v3574_v30 }
 0xa77   :  { %v1227_v33 = vadd.f32 1.0, %v3576_v31 }
 0xa78   :  { %3577 = vrcp.f32 %v1226_v32  ;;  %v1239_v38 = vand.u32 2147483648, %v1226_v32  ;;  %v1237_v43 = vand.u32 2147483647, %v1226_v32  ;;  %vm1233_vm3 = vweird.f32 %v1226_v32 }
 0xa79   :  { %3579 = vrcp.f32 %v1227_v33  ;;  %v1254_v44 = vand.u32 2147483648, %v1227_v33  ;;  %v1252_v46 = vand.u32 2147483647, %v1227_v33  ;;  %vm1248_vm5 = vweird.f32 %v1227_v33 }
 0xa7a   :  { %v1240_v49 = vor.u32 1.1754944e-38, %v1239_v38  ;;  %vm1238_vm1 = vcmp.eq.f32.partialorder %v1237_v43, 8.507059e+37 }
 0xa7b   :  { %v1255_v52 = vor.u32 1.1754944e-38, %v1254_v44  ;;  %vm1253_vm0 = vcmp.eq.f32.partialorder %v1252_v46, 8.507059e+37 }
 0xa7e   :  { %v3578_v23 = vpop.eup %3577 }
 0xa7f   :  { %v3580_v34 = vpop.eup %3579  ;;  %v1229_v35 = vmul.f32 %v3578_v23, %v1226_v32  ;;  %vm1234_vm7 = vweird.f32 %v3578_v23  ;;  %v3450_v32 = vld [vmem:[%s5415_s30 + $0xc] sm:$0x3] }
 0xa80   :  { %v1244_v36 = vmul.f32 %v3580_v34, %v1227_v33  ;;  %vm1249_vm2 = vweird.f32 %v3580_v34  ;;  %vm1235_vm4 = vmor %vm1233_vm3, %vm1234_vm7  ;;  %v3449_v33 = vld [vmem:[%s5415_s30 + $0xa] sm:$0x3] }
 0xa81   :  { %v1230_v37 = vsub.f32 1.0, %v1229_v35  ;;  %vm1250_vm6 = vmor %vm1248_vm5, %vm1249_vm2  ;;  %v1334_v35 = vperm.slane %v3449_v33, 0  ;;  %vm5433_vm2 = vcmask 588800  }
 0xa82   :  { %v1245_v39 = vsub.f32 1.0, %v1244_v36  ;;  %v1335_v36 = vperm.slane %v3449_v33, 1  ;;  %vm5434_vm3 = vmmov %vm5433_vm2 }
 0xa83   :  { %v1231_v42 = vmul.f32 %v3578_v23, %v1230_v37 }
 0xa84   :  { %v1246_v45 = vmul.f32 %v3580_v34, %v1245_v39 }
 0xa85   :  { %v1232_v47 = vadd.f32 %v3578_v23, %v1231_v42 }
 0xa86   :  { %v1247_v50 = vadd.f32 %v3580_v34, %v1246_v45  ;;  %v3448_v45 = vld [vmem:[%s5415_s30 + $0x6] sm:$0x3] }
 0xa87   :  { %v1236_v51 = vsel %vm1235_vm4, %v3578_v23, %v1232_v47  ;;  %v1350_v23 = vperm.slane %v3450_v32, 0 }
 0xa88   :  { %v1241_v54 = vsel %vm1238_vm1, %v1240_v49, %v1236_v51  ;;  %v1251_v55 = vsel %vm1250_vm6, %v3580_v34, %v1247_v50  ;;  %v1351_v34 = vperm.slane %v3450_v32, 1  ;;  %v3447_v49 = vld [vmem:[%s5415_s30 + $0x4] sm:$0x3] }
 0xa89   :  { %v1256_v56 = vsel %vm1253_vm0, %v1255_v52, %v1251_v55  ;;  %v4255_v57 = vmul.f32 %v1241_v54, %v1218_v26  ;;  %vm5431_vm0 = vcmask 1043456   ;;  %v1316_v54 = vperm.slane %v3448_v45, 0 }
 0xa8a   :  { %v4257_v10 = vmul.f32 %v1256_v56, %v1219_v27  ;;  %vm5432_vm7 = vmmov %vm5431_vm0  ;;  %v1317_v55 = vperm.slane %v3448_v45, 1 }
 0xa8b   :  { %1358 = vrot.lane.b32.xlu0 %v4255_v57, %s5420_s0  ;;  %1374 = vrot.lane.b32.xlu1 %v4255_v57, %s5428_s12 }
 0xa8c   :  { %1376 = vrot.lane.b32.xlu2 %v4257_v10, %s5428_s12 }
 0xa93   :  { %1328 = vrot.lane.b32.xlu0 %v4257_v10, %s5426_s25  ;;  %1360 = vrot.lane.b32.xlu1 %v4257_v10, %s5420_s0  ;;  %v1746_v58 = vpop.xlane.xlu0 %1745 }
 0xa94   :  { %1342 = vrot.lane.b32.xlu2 %v4255_v57, %s5424_s27  ;;  %v1747_v59 = vmul.f32 0.00390625, %v1746_v58 }
 0xa96   :  { %v1752_v60 = vperm.slane %v1747_v59, %v3853_v8  ;;  %v1300_v59 = vperm.slane %v3447_v49, 0 }
 0xa98   :  { %v4273_v61 = vsub.f32 %v4247_v1, %v1752_v60  ;;  %v1301_v60 = vperm.slane %v3447_v49, 1 }
 0xa9a   :  { %v1755_v62 = vmul.f32 %v4273_v61, %v4273_v61 }
 0xa9b   :  { %1310 = vrot.lane.b32.xlu0 %v4257_v10, %s5422_s2  ;;  %1344 = vrot.lane.b32.xlu1 %v4257_v10, %s5424_s27 }
 0xa9c   :  { %1326 = vrot.lane.b32.xlu2 %v4255_v57, %s5426_s25  ;;  %1757 = vst [vmem:[#allocation1] ss:$2 sm:$0xff] %v1755_v62 }
 0xaa3   :  { %1294 = vrot.lane.b32.xlu0 %v4257_v10, %s5421_s10  ;;  %v1758_v2 = vld.sshfl [vmem:[#allocation1] sm:$0xff pattern:$0x75316420]  ;;  %v1759_v3 = vld.sshfl [vmem:[#allocation1 + $0x8] sm:$0xff pattern:$0x75316420] }
 0xaa4   :  { %1308 = vrot.lane.b32.xlu2 %v4255_v57, %s5422_s2  ;;  %v1762_v4 = vsel %vm5431_vm0, %v1758_v2, 0.0  ;;  %v1763_v5 = vsel %vm5432_vm7, %v1759_v3, 0.0 }
 0xaa5   :  { %v1764_v6 = vadd.f32 %v1763_v5, %v1762_v4 }
 0xaab   :  { %1278 = vrot.lane.b32.xlu0 %v4257_v10, %s5425_s24 }
 0xaac   :  { %1292 = vrot.lane.b32.xlu2 %v4255_v57, %s5421_s10 }
 0xab3   :  { %1262 = vrot.lane.b32.xlu0 %v4257_v10, %s5423_s5 }
 0xab4   :  { %1276 = vrot.lane.b32.xlu2 %v4255_v57, %s5425_s24 }
 0xabb   :  { %1794 = vperm.xlu0 %3544, %v1791_v63  }
 0xabc   :  { %1260 = vrot.lane.b32.xlu2 %v4255_v57, %s5423_s5 }
 0xac5   :  { %1765 = vadd.xlane.f32.xlu1 %v1764_v6 }
 0xae6   :  { %v1377_v7 = vpop.permute.xlu2 %1376 }
 0xaee   :  { %v1343_v9 = vpop.permute.xlu2 %1342 }
 0xaf6   :  { %v1327_v14 = vpop.permute.xlu2 %1326 }
 0xafd   :  { %v1375_v15 = vpop.permute.xlu1 %1374  ;;  %v1359_v16 = vpop.permute.xlu0 %1358 }
 0xafe   :  { %v1378_v17 = vsel %vm390_vm13, %v1375_v15, %v1377_v7  ;;  %v1379_v18 = vsel %vm390_vm13, %v1377_v7, %v1375_v15  ;;  %v1309_v29 = vpop.permute.xlu2 %1308  ;;  %v3446_v7 = vld [vmem:[%s5415_s30 + $0x2] sm:$0x3] }
 0xaff   :  { %v1386_v19 = vmul.f32 %v1382_v0, %v1378_v17  ;;  %v1387_v20 = vmul.f32 %v1383_v13, %v1379_v18  ;;  %v1285_v11 = vperm.slane %v3446_v7, 1 }
 0xb01   :  { %1425 = vmatpush.msra.mxu2 %v1386_v19  ;;  %1445 = vmatpush.msra.mxu3 %v1387_v20 }
 0xb05   :  { %v1361_v25 = vpop.permute.xlu1 %1360  ;;  %v1329_v26 = vpop.permute.xlu0 %1328 }
 0xb06   :  { %v1362_v27 = vsel %vm361_vm11, %v1359_v16, %v1361_v25  ;;  %v1363_v28 = vsel %vm361_vm11, %v1361_v25, %v1359_v16  ;;  %v1330_v39 = vsel %vm309_vm10, %v1327_v14, %v1329_v26  ;;  %v1331_v42 = vsel %vm309_vm10, %v1329_v26, %v1327_v14  ;;  %v1293_v50 = vpop.permute.xlu2 %1292  ;;  %v1266_v16 = vld [vmem:[%s5415_s30] sm:$0x3] }
 0xb07   :  { %v1370_v30 = vmul.f32 %v1366_v22, %v1362_v27  ;;  %v1371_v31 = vmul.f32 %v1367_v24, %v1363_v28  ;;  %v1338_v51 = vmul.f32 %v1334_v35, %v1330_v39  ;;  %v1339_v52 = vmul.f32 %v1335_v36, %v1331_v42  ;;  %v1390_v26 = vld [vmem:[%s5346_s20] sm:$0xff] }
 0xb08   :  { %v1268_v17 = vperm.slane %v1266_v16, 0  ;;  %v1269_v18 = vperm.slane %v1266_v16, 1  ;;  %v1779_v35 = vld [vmem:[%s5412_s4] sm:$0xf]  ;;  %s3706_s4 = smov [#allocation3]  }
 0xb09   :  { %1426 = vmatpush.msra.mxu2 %v1370_v30  ;;  %1446 = vmatpush.msra.mxu3 %v1371_v31 }
 0xb0d   :  { %v1345_v37 = vpop.permute.xlu1 %1344  ;;  %v1311_v38 = vpop.permute.xlu0 %1310 }
 0xb0e   :  { %v1346_v43 = vsel %vm338_vm12, %v1343_v9, %v1345_v37  ;;  %v1347_v44 = vsel %vm338_vm12, %v1345_v37, %v1343_v9  ;;  %v1312_v56 = vsel %vm273_vm9, %v1309_v29, %v1311_v38  ;;  %v1313_v58 = vsel %vm273_vm9, %v1311_v38, %v1309_v29  ;;  %v1277_v9 = vpop.permute.xlu2 %1276  ;;  %v1409_v38 = vld [vmem:[%s5347_s21] sm:$0xff] }
 0xb0f   :  { %v1354_v46 = vmul.f32 %v1350_v23, %v1346_v43  ;;  %v1355_v47 = vmul.f32 %v1351_v34, %v1347_v44  ;;  %v1320_v62 = vmul.f32 %v1316_v54, %v1313_v58  ;;  %v1321_v63 = vmul.f32 %v1317_v55, %v1312_v56 }
 0xb11   :  { %1427 = vmatpush.msra.mxu2 %v1354_v46  ;;  %1447 = vmatpush.msra.mxu3 %v1355_v47 }
 0xb13   :  { %1428 = vmatpush.msra.mxu2 %v1338_v51  ;;  %1448 = vmatpush.msra.mxu3 %v1339_v52 }
 0xb15   :  { %v1295_v2 = vpop.permute.xlu0 %1294  ;;  %1429 = vmatpush.msra.mxu2 %v4255_v57  ;;  %1449 = vmatpush.msra.mxu3 %v4257_v10  ;;  %v1284_v57 = vperm.slane %v3446_v7, 0 }
 0xb16   :  { %v1296_v3 = vsel %vm250_vm14, %v1293_v50, %v1295_v2  ;;  %v1297_v4 = vsel %vm250_vm14, %v1295_v2, %v1293_v50  ;;  %v1261_v19 = vpop.permute.xlu2 %1260 }
 0xb17   :  { %v1304_v5 = vmul.f32 %v1300_v59, %v1297_v4  ;;  %v1305_v6 = vmul.f32 %v1301_v60, %v1296_v3  ;;  %1430 = vmatpush.msra.mxu2 %v1320_v62  ;;  %1450 = vmatpush.msra.mxu3 %v1321_v63 }
 0xb19   :  { %1431 = vmatpush.msra.mxu2 %v1304_v5  ;;  %1451 = vmatpush.msra.mxu3 %v1305_v6 }
 0xb1d   :  { %v1279_v10 = vpop.permute.xlu0 %1278 }
 0xb1e   :  { %v1280_v0 = vsel %vm221_vm8, %v1277_v9, %v1279_v10  ;;  %v1281_v13 = vsel %vm221_vm8, %v1279_v10, %v1277_v9 }
 0xb1f   :  { %v1288_v14 = vmul.f32 %v1284_v57, %v1281_v13  ;;  %v1289_v15 = vmul.f32 %v1285_v11, %v1280_v0 }
 0xb21   :  { %1432 = vmatpush.msra.mxu2 %v1288_v14  ;;  %1452 = vmatpush.msra.mxu3 %v1289_v15 }
 0xb25   :  { %v1263_v20 = vpop.permute.xlu0 %1262 }
 0xb26   :  { %v1264_v21 = vsel %vm199_vm15, %v1261_v19, %v1263_v20  ;;  %v1265_v22 = vsel %vm199_vm15, %v1263_v20, %v1261_v19 }
 0xb27   :  { %v1272_v24 = vmul.f32 %v1268_v17, %v1265_v22  ;;  %v1273_v25 = vmul.f32 %v1269_v18, %v1264_v21 }
 0xb29   :  { %1433 = vmatpush.msra.mxu2 %v1272_v24  ;;  %1453 = vmatpush.msra.mxu3 %v1273_v25  ;;  %v3477_v25 = vld [vmem:[%s5416_s8 + $0x10] sm:$0xff] }
 0xb2a   :  { %3453 = vmatmul.msk.f32.vlgmr.msra.gmra.mxu2 %vm5433_vm2, %v1390_v26  ;;  %3454 = vmatmul.msk.f32.vlgmr.msra.gmra.mxu3 %vm5434_vm3, %v1390_v26  ;;  %vm5435_vm3 = vcmask 1043456  }
 0xb2d   :  { %v1795_v39 = vpop.permute.xlu0 %1794 }
 0xb2e   :  { %v1799_v44 = vperm.slane %v1795_v39, %v3853_v8 }
 0xb38   :  { %v1766_v27 = vpop.xlane.xlu1 %1765 }
 0xb39   :  { %v1767_v28 = vmul.f32 0.00390625, %v1766_v27 }
 0xb3b   :  { %v1768_v29 = vadd.f32 1e-06, %v1767_v28 }
 0xb3d   :  { %3581 = vrsqrt.f32 %v1768_v29  ;;  %vm1775_vm5 = vweird.f32 %v1768_v29 }
 0xb43   :  { %v3582_v30 = vpop.eup %3581 }
 0xb44   :  { %v1770_v31 = vmul.f32 %v3582_v30, %v1768_v29  ;;  %vm1776_vm4 = vweird.f32 %v3582_v30 }
 0xb45   :  { %vm1777_vm1 = vmor %vm1775_vm5, %vm1776_vm4  ;;  %vm5437_vm5 = vcmask 588800  }
 0xb46   :  { %v1771_v32 = vmul.f32 %v3582_v30, %v1770_v31  ;;  %v3472_v31 = vld [vmem:[%s5415_s30 + $0x10] sm:$0x3]  ;;  %vm5436_vm4 = vmmov %vm5435_vm3 }
 0xb48   :  { %v1772_v33 = vmul.f32 0.5, %v1771_v32  ;;  %v2014_v32 = vperm.slane %v3472_v31, 0 }
 0xb4a   :  { %v1773_v23 = vsub.f32 1.5, %v1772_v33  ;;  %v2015_v33 = vperm.slane %v3472_v31, 1  ;;  %v3471_v31 = vld [vmem:[%s5415_s30 + $0xe] sm:$0x3] }
 0xb4c   :  { %v1774_v34 = vmul.f32 %v3582_v30, %v1773_v23 }
 0xb4e   :  { %v1778_v36 = vsel %vm1777_vm1, %v3582_v30, %v1774_v34  ;;  %vm5438_vm1 = vmmov %vm5437_vm5 }
 0xb4f   :  { %v1780_v37 = vmul.f32 %v1779_v35, %v1778_v36 }
 0xb51   :  { %1783 = vperm.xlu2 %3543, %v1780_v37  }
 0xb59   :  { %1412 = vperm.xlu2 %3543, %v1409_v38  }
 0xbab   :  { %v1784_v42 = vpop.permute.xlu2 %1783 }
 0xbac   :  { %v1788_v43 = vperm.slane %v1784_v42, %v3853_v8 }
 0xbad   :  { %v1435_v47 = vpop.f32.mrf.mxu2  ;;  %v1455_v49 = vpop.f32.mrf.mxu3 }
 0xbae   :  { %v1790_v45 = vmul.f32 %v1788_v43, %v4273_v61 }
 0xbb0   :  { %v1801_v46 = vadd.f32 %v1799_v44, %v1790_v45 }
 0xbb2   :  { %v3465_v50 = vmul.f32 -1.442695, %v1801_v46 }
 0xbb3   :  { %v1413_v51 = vpop.permute.xlu2 %1412 }
 0xbb4   :  { %3583 = vpow2.f32 %v3465_v50  ;;  %v1436_v52 = vadd.f32 %v1435_v47, %v1413_v51  ;;  %v1456_v54 = vadd.f32 %v1455_v49, %v1413_v51  ;;  %v3461_v49 = vld [vmem:[%s5415_s30 + $0x10] sm:$0x3] }
 0xbb5   :  { %v1584_v50 = vperm.slane %v3461_v49, 0  ;;  %v1585_v51 = vperm.slane %v3461_v49, 1 }
 0xbb6   :  { %v4375_v55 = vadd.f32 %v1436_v52, %v4100_v40  ;;  %v4378_v56 = vadd.f32 %v1456_v54, %v4102_v41 }
 0xbb8   :  { %1460 = vst [vmem:[#allocation5] sm:$0xff] %v4375_v55 }
 0xbb9   :  { %1526 = vst [vmem:[#allocation2 + $0x88] sm:$0xff] %v4375_v55 }
 0xbba   :  { %v3584_v8 = vpop.eup %3583  ;;  %1461 = vst [vmem:[#allocation5 + $0x8] sm:$0xff] %v4378_v56 }
 0xbbb   :  { %v1805_v61 = vadd.f32 1.0, %v3584_v8  ;;  %1527 = vst [vmem:[#allocation2 + $0x40] sm:$0xff] %v4378_v56 }
 0xbbd   :  { %3585 = vrcp.f32 %v1805_v61  ;;  %v1817_v62 = vand.u32 2147483648, %v1805_v61  ;;  %v1815_v63 = vand.u32 2147483647, %v1805_v61  ;;  %vm1811_vm0 = vweird.f32 %v1805_v61 }
 0xbbf   :  { %v1818_v2 = vor.u32 1.1754944e-38, %v1817_v62  ;;  %vm1816_vm2 = vcmp.eq.f32.partialorder %v1815_v63, 8.507059e+37  ;;  %v3460_v62 = vld [vmem:[%s5415_s30 + $0xe] sm:$0x3] }
 0xbc0   :  { %v1569_v63 = vperm.slane %v3460_v62, 1 }
 0xbc3   :  { %v3586_v58 = vpop.eup %3585 }
 0xbc4   :  { %v1807_v59 = vmul.f32 %v3586_v58, %v1805_v61  ;;  %vm1812_vm6 = vweird.f32 %v3586_v58 }
 0xbc5   :  { %vm1813_vm7 = vmor %vm1811_vm0, %vm1812_vm6  ;;  %vm5439_vm6 = vcmask 293888  }
 0xbc6   :  { %v1808_v60 = vsub.f32 1.0, %v1807_v59  ;;  %vm5440_vm0 = vmmov %vm5439_vm6 }
 0xbc8   :  { %v1809_v40 = vmul.f32 %v3586_v58, %v1808_v60 }
 0xbca   :  { %v1810_v41 = vadd.f32 %v3586_v58, %v1809_v40  ;;  %v1568_v40 = vperm.slane %v3460_v62, 0 }
 0xbcc   :  { %v1814_v3 = vsel %vm1813_vm7, %v3586_v58, %v1810_v41 }
 0xbcd   :  { %v1819_v4 = vsel %vm1816_vm2, %v1818_v2, %v1814_v3 }
 0xbce   :  { %v1821_v5 = vmul.f32 %v1819_v4, %v1801_v46 }
 0xbd0   :  { %1823 = vst [vmem:[#allocation1] ss:$2 sm:$0xff] %v1821_v5 }
 0xbd7   :  { %v1824_v6 = vld.sshfl [vmem:[#allocation1] sm:$0xff pattern:$0x75316420]  ;;  %v1825_v7 = vld.sshfl [vmem:[#allocation1 + $0x8] sm:$0xff pattern:$0x75316420] }
 0xbd8   :  { %1844 = vst [vmem:[#allocation1] ss:$2 sm:$0xff] %v1821_v5 }
 0xbdf   :  { %v1845_v9 = vld.sshfl [vmem:[#allocation1] sm:$0xff pattern:$0x75316420]  ;;  %v1846_v57 = vld.sshfl [vmem:[#allocation1 + $0x8] sm:$0xff pattern:$0x75316420] }
 0xbe0   :  { %1871 = vst [vmem:[#allocation1] ss:$2 sm:$0xff] %v1821_v5 }
 0xbe7   :  { %v1872_v11 = vld.sshfl [vmem:[#allocation1] sm:$0xff pattern:$0x75316420]  ;;  %v1873_v10 = vld.sshfl [vmem:[#allocation1 + $0x8] sm:$0xff pattern:$0x75316420] }
 0xbe8   :  { %1892 = vst [vmem:[#allocation1] ss:$2 sm:$0xff] %v1821_v5 }
 0xbef   :  { %v1893_v0 = vld.sshfl [vmem:[#allocation1] sm:$0xff pattern:$0x75316420]  ;;  %v1894_v13 = vld.sshfl [vmem:[#allocation1 + $0x8] sm:$0xff pattern:$0x75316420] }
 0xbf0   :  { %1919 = vst [vmem:[#allocation1] ss:$2 sm:$0xff] %v1821_v5 }
 0xbf7   :  { %v4384_v14 = vld.sshfl [vmem:[#allocation1] sm:$0xff pattern:$0x75316420]  ;;  %v4386_v15 = vld.sshfl [vmem:[#allocation1 + $0x8] sm:$0xff pattern:$0x75316420] }
 0xbf8   :  { %1926 = vst [vmem:[#allocation1] ss:$2 sm:$0xff] %v1821_v5 }
 0xbff   :  { %v1927_v16 = vld.sshfl [vmem:[#allocation1] sm:$0xff pattern:$0x75316420]  ;;  %v1928_v17 = vld.sshfl [vmem:[#allocation1 + $0x8] sm:$0xff pattern:$0x75316420] }
 0xc00   :  { %1953 = vst [vmem:[#allocation1] ss:$2 sm:$0xff] %v1821_v5 }
 0xc07   :  { %v1954_v18 = vld.sshfl [vmem:[#allocation1] sm:$0xff pattern:$0x75316420]  ;;  %v1955_v19 = vld.sshfl [vmem:[#allocation1 + $0x8] sm:$0xff pattern:$0x75316420] }
 0xc08   :  { %1974 = vst [vmem:[#allocation1] ss:$2 sm:$0xff] %v1821_v5 }
 0xc0f   :  { %v1976_v20 = vld.sshfl [vmem:[#allocation1 + $0x8] sm:$0xff pattern:$0x75316420]  ;;  %v1975_v21 = vld.sshfl [vmem:[#allocation1] sm:$0xff pattern:$0x75316420] }
 0xc10   :  { %1981 = vrot.lane.b32.xlu0 %v1976_v20, %s5420_s0  ;;  %1979 = vrot.lane.b32.xlu1 %v1975_v21, %s5420_s0  ;;  %2001 = vst [vmem:[#allocation1] ss:$2 sm:$0xff] %v1821_v5 }
 0xc17   :  { %v2003_v22 = vld.sshfl [vmem:[#allocation1 + $0x8] sm:$0xff pattern:$0x75316420]  ;;  %v2002_v24 = vld.sshfl [vmem:[#allocation1] sm:$0xff pattern:$0x75316420] }
 0xc18   :  { %1931 = vrot.lane.b32.xlu0 %v1927_v16, %s5426_s25  ;;  %2008 = vrot.lane.b32.xlu1 %v2003_v22, %s5428_s12  ;;  %2406 = vst [vmem:[#allocation1] ss:$2 sm:$0xff] %v4247_v1  ;;  %v2033_v1 = vld [vmem:[%s5414_s29] sm:$0xff]  ;;  %s5452_s29 = sld [smem:[#allocation25_spill]] }
 0xc19   :  { %2006 = vrot.lane.b32.xlu2 %v2002_v24, %s5428_s12 }
 0xc20   :  { %1960 = vrot.lane.b32.xlu0 %v1955_v19, %s5424_s27  ;;  %1958 = vrot.lane.b32.xlu1 %v1954_v18, %s5424_s27 }
 0xc21   :  { %1933 = vrot.lane.b32.xlu2 %v1928_v17, %s5426_s25 }
 0xc28   :  { %1849 = vrot.lane.b32.xlu0 %v1845_v9, %s5425_s24  ;;  %1899 = vrot.lane.b32.xlu1 %v1894_v13, %s5422_s2  ;;  %v3459_v9 = vld [vmem:[%s5415_s30 + $0xc] sm:$0x3] }
 0xc29   :  { %1897 = vrot.lane.b32.xlu2 %v1893_v0, %s5422_s2 }
 0xc30   :  { %1578 = vrot.lane.b32.xlu0 %v4378_v56, %s5428_s12  ;;  %1576 = vrot.lane.b32.xlu1 %v4375_v55, %s5428_s12 }
 0xc31   :  { %1851 = vrot.lane.b32.xlu2 %v1846_v57, %s5425_s24  ;;  %v3458_v57 = vld [vmem:[%s5415_s30 + $0xa] sm:$0x3] }
 0xc32   :  { %v1536_v0 = vperm.slane %v3458_v57, 0  ;;  %v1537_v13 = vperm.slane %v3458_v57, 1 }
 0xc38   :  { %1562 = vrot.lane.b32.xlu0 %v4378_v56, %s5420_s0  ;;  %1530 = vrot.lane.b32.xlu1 %v4378_v56, %s5426_s25 }
 0xc39   :  { %1560 = vrot.lane.b32.xlu2 %v4375_v55, %s5420_s0 }
 0xc40   :  { %1546 = vrot.lane.b32.xlu0 %v4378_v56, %s5424_s27  ;;  %1494 = vrot.lane.b32.xlu1 %v4375_v55, %s5421_s10 }
 0xc41   :  { %1544 = vrot.lane.b32.xlu2 %v4375_v55, %s5424_s27 }
 0xc48   :  { %1510 = vrot.lane.b32.xlu0 %v4375_v55, %s5422_s2  ;;  %1480 = vrot.lane.b32.xlu1 %v4378_v56, %s5425_s24 }
 0xc49   :  { %1528 = vrot.lane.b32.xlu2 %v4375_v55, %s5426_s25 }
 0xc50   :  { %1496 = vrot.lane.b32.xlu0 %v4378_v56, %s5421_s10  ;;  %1876 = vrot.lane.b32.xlu1 %v1872_v11, %s5421_s10  ;;  %v1552_v11 = vperm.slane %v3459_v9, 0 }
 0xc51   :  { %1512 = vrot.lane.b32.xlu2 %v4378_v56, %s5422_s2 }
 0xc58   :  { %1462 = vrot.lane.b32.xlu0 %v4375_v55, %s5423_s5  ;;  %1830 = vrot.lane.b32.xlu1 %v1825_v7, %s5423_s5 }
 0xc59   :  { %1478 = vrot.lane.b32.xlu2 %v4375_v55, %s5425_s24 }
 0xc60   :  { %1878 = vrot.lane.b32.xlu0 %v1873_v10, %s5421_s10  ;;  %v1553_v10 = vperm.slane %v3459_v9, 1 }
 0xc61   :  { %1464 = vrot.lane.b32.xlu2 %v4378_v56, %s5423_s5 }
 0xc68   :  { %2036 = vperm.xlu0 %3544, %v2033_v1  }
 0xc69   :  { %1828 = vrot.lane.b32.xlu2 %v1824_v6, %s5423_s5 }
 0xc71   :  { %2092 = vperm.xlu2 %3543, %v3477_v25   ;;  %v3457_v25 = vld [vmem:[%s5415_s30 + $0x6] sm:$0x3] }
 0xc73   :  { %v2007_v26 = vpop.permute.xlu2 %2006 }
 0xc7b   :  { %v4443_v27 = vpop.permute.xlu2 %1933 }
 0xc82   :  { %v4445_v28 = vpop.permute.xlu0 %1981  ;;  %v4447_v29 = vpop.permute.xlu1 %1979 }
 0xc83   :  { %v4449_v30 = vpop.permute.xlu2 %1897  ;;  %v1983_v49 = vsel %vm361_vm11, %v4447_v29, %v4445_v28 }
 0xc8a   :  { %v4454_v23 = vpop.permute.xlu0 %1931  ;;  %v2009_v34 = vpop.permute.xlu1 %2008 }
 0xc8b   :  { %v2010_v35 = vsel %vm390_vm13, %v2007_v26, %v2009_v34  ;;  %v2011_v36 = vsel %vm390_vm13, %v2009_v34, %v2007_v26  ;;  %v4460_v37 = vpop.permute.xlu2 %1851  ;;  %v3455_v26 = vld [vmem:[%s5415_s30 + $0x2] sm:$0x3]  ;;  %v1518_v34 = vperm.slane %v3457_v25, 0 }
 0xc8c   :  { %v2018_v38 = vmul.f32 %v2014_v32, %v2010_v35  ;;  %v2019_v39 = vmul.f32 %v2015_v33, %v2011_v36  ;;  %v1519_v35 = vperm.slane %v3457_v25, 1  ;;  %v1486_v36 = vperm.slane %v3455_v26, 0 }
 0xc8e   :  { %2020 = vst [vmem:[#allocation2 + $0x88] sm:$0xf] %v2018_v38  ;;  %v1987_v38 = vperm.slane %v3471_v31, 0 }
 0xc8f   :  { %2021 = vst [vmem:[#allocation2 + $0x40] sm:$0xf] %v2019_v39  ;;  %v3470_v39 = vld [vmem:[%s5415_s30 + $0xc] sm:$0x3] }
 0xc92   :  { %v4462_v42 = vpop.permute.xlu0 %1960  ;;  %v4464_v43 = vpop.permute.xlu1 %1958 }
 0xc93   :  { %v1561_v44 = vpop.permute.xlu2 %1560  ;;  %v1962_v62 = vsel %vm338_vm12, %v4464_v43, %v4462_v42 }
 0xc9a   :  { %v4466_v45 = vpop.permute.xlu0 %1849  ;;  %v4468_v46 = vpop.permute.xlu1 %1899 }
 0xc9b   :  { %v1545_v47 = vpop.permute.xlu2 %1544 }
 0xca2   :  { %v1579_v52 = vpop.permute.xlu0 %1578  ;;  %v1577_v54 = vpop.permute.xlu1 %1576 }
 0xca3   :  { %v1580_v8 = vsel %vm390_vm13, %v1577_v54, %v1579_v52  ;;  %v1581_v61 = vsel %vm390_vm13, %v1579_v52, %v1577_v54  ;;  %v1529_v58 = vpop.permute.xlu2 %1528  ;;  %v3469_v54 = vld [vmem:[%s5415_s30 + $0xa] sm:$0x3] }
 0xca4   :  { %v1588_v59 = vmul.f32 %v1584_v50, %v1580_v8  ;;  %v1589_v60 = vmul.f32 %v1585_v51, %v1581_v61  ;;  %v1984_v50 = vsel %vm361_vm11, %v4445_v28, %v4447_v29  ;;  %v1966_v29 = vperm.slane %v3470_v39, 0 }
 0xca6   :  { %1627 = vmatpush.msra.mxu0 %v1588_v59  ;;  %1647 = vmatpush.msra.mxu1 %v1589_v60  ;;  %v1991_v60 = vmul.f32 %v1987_v38, %v1983_v49  ;;  %v1970_v9 = vmul.f32 %v1966_v29, %v1962_v62  ;;  %v1853_v49 = vsel %vm221_vm8, %v4466_v45, %v4460_v37 }
 0xcaa   :  { %v1563_v41 = vpop.permute.xlu0 %1562  ;;  %v1531_v2 = vpop.permute.xlu1 %1530 }
 0xcab   :  { %v1564_v3 = vsel %vm361_vm11, %v1561_v44, %v1563_v41  ;;  %v1565_v4 = vsel %vm361_vm11, %v1563_v41, %v1561_v44  ;;  %v1513_v5 = vpop.permute.xlu2 %1512  ;;  %v1532_v18 = vsel %vm309_vm10, %v1529_v58, %v1531_v2  ;;  %v1533_v19 = vsel %vm309_vm10, %v1531_v2, %v1529_v58 }
 0xcac   :  { %v1572_v6 = vmul.f32 %v1568_v40, %v1564_v3  ;;  %v1573_v7 = vmul.f32 %v1569_v63, %v1565_v4  ;;  %v1540_v32 = vmul.f32 %v1536_v0, %v1532_v18  ;;  %v1541_v33 = vmul.f32 %v1537_v13, %v1533_v19  ;;  %v3456_v63 = vld [vmem:[%s5415_s30 + $0x4] sm:$0x3]  ;;  %v3468_v4 = vld [vmem:[%s5415_s30 + $0x6] sm:$0x3] }
 0xcad   :  { %v1487_v44 = vperm.slane %v3455_v26, 1  ;;  %v1939_v2 = vperm.slane %v3469_v54, 0  ;;  %v1967_v3 = vperm.slane %v3470_v39, 1  ;;  %v1502_v57 = vperm.slane %v3456_v63, 0 }
 0xcae   :  { %1628 = vmatpush.msra.mxu0 %v1572_v6  ;;  %1648 = vmatpush.msra.mxu1 %v1573_v7  ;;  %v1963_v6 = vsel %vm338_vm12, %v4462_v42, %v4464_v43  ;;  %v1940_v0 = vperm.slane %v3469_v54, 1  ;;  %v1905_v13 = vperm.slane %v3468_v4, 0  ;;  %v1936_v19 = vsel %vm309_vm10, %v4443_v27, %v4454_v23 }
 0xcb2   :  { %v1547_v16 = vpop.permute.xlu0 %1546  ;;  %v4490_v17 = vpop.permute.xlu1 %1494 }
 0xcb3   :  { %v1548_v20 = vsel %vm338_vm12, %v1545_v47, %v1547_v16  ;;  %v1549_v21 = vsel %vm338_vm12, %v1547_v16, %v1545_v47  ;;  %v1479_v1 = vpop.permute.xlu2 %1478  ;;  %v1988_v47 = vperm.slane %v3471_v31, 1  ;;  %v1906_v16 = vperm.slane %v3468_v4, 1 }
 0xcb4   :  { %v1556_v22 = vmul.f32 %v1552_v11, %v1548_v20  ;;  %v1557_v24 = vmul.f32 %v1553_v10, %v1549_v21  ;;  %v1503_v11 = vperm.slane %v3456_v63, 1  ;;  %v1995_v10 = vrot.slane %v1991_v60, 4  ;;  %v1592_v60 = vld [vmem:[%s5348_s22] sm:$0xff]  ;;  %v2032_v63 = vld [vmem:[#allocation2 + $0x40] sm:$0xf] }
 0xcb5   :  { %v1992_v41 = vmul.f32 %v1988_v47, %v1984_v50  ;;  %v1971_v21 = vmul.f32 %v1967_v3, %v1963_v6  ;;  %v1944_v31 = vmul.f32 %v1940_v0, %v1936_v19  ;;  %v2022_v19 = vld [vmem:[%s5417_s3] sm:$0xff] }
 0xcb6   :  { %1629 = vmatpush.msra.mxu0 %v1556_v22  ;;  %1649 = vmatpush.msra.mxu1 %v1557_v24  ;;  %v3466_v22 = vld [vmem:[%s5415_s30 + $0x2] sm:$0x3]  ;;  %v1901_v24 = vsel %vm273_vm9, %v4449_v30, %v4468_v46 }
 0xcb7   :  { %v1996_v18 = vrot.slane %v1992_v41, 4  ;;  %v1858_v47 = vperm.slane %v3466_v22, 1 }
 0xcb8   :  { %1630 = vmatpush.msra.mxu0 %v1540_v32  ;;  %1650 = vmatpush.msra.mxu1 %v1541_v33  ;;  %v1468_v32 = vld [vmem:[%s5415_s30] sm:$0x3] }
 0xcb9   :  { %v1471_v38 = vperm.slane %v1468_v32, 1 }
 0xcba   :  { %v1511_v51 = vpop.permute.xlu0 %1510  ;;  %v1481_v52 = vpop.permute.xlu1 %1480  ;;  %1631 = vmatpush.msra.mxu0 %v4375_v55  ;;  %1651 = vmatpush.msra.mxu1 %v4378_v56 }
 0xcbb   :  { %v1514_v8 = vsel %vm273_vm9, %v1511_v51, %v1513_v5  ;;  %v1515_v61 = vsel %vm273_vm9, %v1513_v5, %v1511_v51  ;;  %v1482_v58 = vsel %vm221_vm8, %v1479_v1, %v1481_v52  ;;  %v1483_v28 = vsel %vm221_vm8, %v1481_v52, %v1479_v1  ;;  %v1465_v7 = vpop.permute.xlu2 %1464 }
 0xcbc   :  { %v1522_v55 = vmul.f32 %v1518_v34, %v1515_v61  ;;  %v1523_v59 = vmul.f32 %v1519_v35, %v1514_v8  ;;  %v1490_v56 = vmul.f32 %v1486_v36, %v1483_v28  ;;  %v1491_v40 = vmul.f32 %v1487_v44, %v1482_v58 }
 0xcbd   :  { %v1935_v5 = vsel %vm309_vm10, %v4454_v23, %v4443_v27  ;;  %v1902_v27 = vsel %vm273_vm9, %v4468_v46, %v4449_v30  ;;  %v1834_v30 = vld [vmem:[%s5415_s30] sm:$0x3]  ;;  %v1857_v46 = vperm.slane %v3466_v22, 0  ;;  %v1910_v34 = vmul.f32 %v1906_v16, %v1901_v24 }
 0xcbe   :  { %1524 = vst [vmem:[#allocation2 + $0x70] sm:$0xff] %v1522_v55  ;;  %1632 = vmatpush.msra.mxu0 %v1522_v55  ;;  %1652 = vmatpush.msra.mxu1 %v1523_v59  ;;  %v1943_v20 = vmul.f32 %v1939_v2, %v1935_v5  ;;  %v1909_v33 = vmul.f32 %v1905_v13, %v1902_v27  ;;  %v1470_v36 = vperm.slane %v1468_v32, 0  ;;  %v1836_v39 = vperm.slane %v1834_v30, 0 }
 0xcbf   :  { %1525 = vst [vmem:[#allocation2 + $0x80] sm:$0xff] %v1523_v59  ;;  %v1854_v35 = vsel %vm221_vm8, %v4460_v37, %v4466_v45  ;;  %v1948_v44 = vrot.slane %v1944_v31, 4  ;;  %v1914_v54 = vrot.slane %v1910_v34, 4  ;;  %v1837_v61 = vperm.slane %v1834_v30, 1 }
 0xcc0   :  { %1492 = vst [vmem:[#allocation2 + $0x78] sm:$0xff] %v1490_v56  ;;  %v1861_v51 = vmul.f32 %v1857_v46, %v1854_v35  ;;  %v1913_v52 = vrot.slane %v1909_v33, 4 }
 0xcc1   :  { %1493 = vst [vmem:[#allocation2 + $0x58] sm:$0xff] %v1491_v40 }
 0xcc2   :  { %v1497_v42 = vpop.permute.xlu0 %1496  ;;  %v4555_v43 = vpop.permute.xlu1 %1876  ;;  %1972 = vst [vmem:[#allocation2 + $0x70] sm:$0xf] %v1970_v9  ;;  %v1865_v41 = vrot.slane %v1861_v51, 4 }
 0xcc3   :  { %v1498_v23 = vsel %vm250_vm14, %v4490_v17, %v1497_v42  ;;  %v1499_v1 = vsel %vm250_vm14, %v1497_v42, %v4490_v17  ;;  %1999 = vst [vmem:[#allocation2 + $0x70] sm:$0xf0] %v1995_v10  ;;  %v1947_v17 = vrot.slane %v1943_v20, 4  ;;  %v1829_v50 = vpop.permute.xlu2 %1828 }
 0xcc4   :  { %v1506_v25 = vmul.f32 %v1502_v57, %v1499_v1  ;;  %v1507_v26 = vmul.f32 %v1503_v11, %v1498_v23  ;;  %1973 = vst [vmem:[#allocation2 + $0x80] sm:$0xf] %v1971_v21 }
 0xcc5   :  { %2000 = vst [vmem:[#allocation2 + $0x80] sm:$0xf0] %v1996_v18 }
 0xcc6   :  { %1508 = vst [vmem:[#allocation2 + $0x20] sm:$0xff] %v1506_v25  ;;  %1633 = vmatpush.msra.mxu0 %v1506_v25  ;;  %1653 = vmatpush.msra.mxu1 %v1507_v26 }
 0xcc7   :  { %1509 = vst [vmem:[#allocation2 + $0x8] sm:$0xff] %v1507_v26 }
 0xcc8   :  { %1924 = vst [vmem:[#allocation2 + $0x20] sm:$0xf] %v4384_v14  ;;  %1634 = vmatpush.msra.mxu0 %v1490_v56  ;;  %1654 = vmatpush.msra.mxu1 %v1491_v40  ;;  %v1862_v56 = vmul.f32 %v1858_v47, %v1853_v49  ;;  %v2031_v40 = vld [vmem:[#allocation2 + $0x88] sm:$0xf] }
 0xcc9   :  { %1951 = vst [vmem:[#allocation2 + $0x20] sm:$0xf0] %v1947_v17 }
 0xcca   :  { %v1463_v8 = vpop.permute.xlu0 %1462  ;;  %v1831_v58 = vpop.permute.xlu1 %1830  ;;  %1925 = vst [vmem:[#allocation2 + $0x8] sm:$0xf] %v4386_v15  ;;  %v3467_v15 = vld [vmem:[%s5415_s30 + $0x4] sm:$0x3]  ;;  %v2029_v4 = vld [vmem:[#allocation2 + $0x70] sm:$0xff]  ;;  %v1866_v6 = vrot.slane %v1862_v56, 4 }
 0xccb   :  { %v1466_v14 = vsel %vm199_vm15, %v1463_v8, %v1465_v7  ;;  %v1467_v28 = vsel %vm199_vm15, %v1465_v7, %v1463_v8  ;;  %v1832_v29 = vsel %vm199_vm15, %v1829_v50, %v1831_v58  ;;  %v1833_v37 = vsel %vm199_vm15, %v1831_v58, %v1829_v50  ;;  %1952 = vst [vmem:[#allocation2 + $0x8] sm:$0xf0] %v1948_v44  ;;  %v2093_v1 = vpop.permute.xlu2 %2092 }
 0xccc   :  { %v1474_v45 = vmul.f32 %v1470_v36, %v1467_v28  ;;  %v1475_v55 = vmul.f32 %v1471_v38, %v1466_v14  ;;  %v1840_v59 = vmul.f32 %v1836_v39, %v1833_v37  ;;  %1917 = vst [vmem:[#allocation2 + $0x78] sm:$0xf0] %v1913_v52  ;;  %v1841_v62 = vmul.f32 %v1837_v61, %v1832_v29  ;;  %v2030_v5 = vld [vmem:[#allocation2 + $0x80] sm:$0xff] }
 0xccd   :  { %1918 = vst [vmem:[#allocation2 + $0x58] sm:$0xf0] %v1914_v54  ;;  %v1884_v2 = vperm.slane %v3467_v15, 0  ;;  %v1885_v3 = vperm.slane %v3467_v15, 1 }
 0xcce   :  { %1476 = vst [vmem:[#allocation2] sm:$0xff] %v1474_v45  ;;  %1635 = vmatpush.msra.mxu0 %v1474_v45  ;;  %1655 = vmatpush.msra.mxu1 %v1475_v55 }
 0xccf   :  { %1477 = vst [vmem:[#allocation2 + $0x38] sm:$0xff] %v1475_v55  ;;  %3462 = vmatmul.msk.f32.vlgmr.msra.gmra.mxu0 %vm5437_vm5, %v1592_v60  ;;  %3463 = vmatmul.msk.f32.vlgmr.msra.gmra.mxu1 %vm5438_vm1, %v1592_v60  ;;  %vm5443_vm5 = vmmov %vm5436_vm4  ;;  %vm5445_vm1 = vcmask 31744  }
 0xcd0   :  { %3473 = vmatpush.msk.msrb.mxu0 %vm5435_vm3, %v2031_v40  ;;  %3475 = vmatpush.msk.msrb.mxu1 %vm5436_vm4, %v2032_v63  ;;  %1842 = vst [vmem:[#allocation2] sm:$0xf] %v1840_v59  ;;  %v2027_v9 = vld [vmem:[#allocation2 + $0x20] sm:$0xff] }
 0xcd1   :  { %1869 = vst [vmem:[#allocation2] sm:$0xf0] %v1865_v41 }
 0xcd2   :  { %2060 = vmatpush.msrb.mxu0 %v2029_v4  ;;  %2080 = vmatpush.msrb.mxu1 %v2030_v5  ;;  %v1879_v7 = vpop.permute.xlu0 %1878  ;;  %1843 = vst [vmem:[#allocation2 + $0x38] sm:$0xf] %v1841_v62  ;;  %v2028_v57 = vld [vmem:[#allocation2 + $0x8] sm:$0xff]  ;;  %v1691_v4 = vld [vmem:[%s5441_s7 + $0xf8] sm:$0xff] }
 0xcd3   :  { %v1880_v11 = vsel %vm250_vm14, %v4555_v43, %v1879_v7  ;;  %v1881_v10 = vsel %vm250_vm14, %v1879_v7, %v4555_v43  ;;  %1870 = vst [vmem:[#allocation2 + $0x38] sm:$0xf0] %v1866_v6  ;;  %v1674_v5 = vld [vmem:[%s5441_s7 + $0x70] sm:$0xff]  ;;  %1712 = vmatpush.msrb.mxu3 %v1691_v4 }
 0xcd4   :  { %2061 = vmatpush.msrb.mxu0 %v2027_v9  ;;  %2081 = vmatpush.msrb.mxu1 %v2028_v57  ;;  %v1888_v0 = vmul.f32 %v1884_v2, %v1881_v10  ;;  %v1889_v13 = vmul.f32 %v1885_v3, %v1880_v11  ;;  %v1675_v3 = vld [vmem:[%s5441_s7 + $0x78] sm:$0xff]  ;;  %v1690_v6 = vld [vmem:[%s5441_s7 + $0xf0] sm:$0xff]  ;;  %v1673_v9 = vld [vmem:[%s5441_s7 + $0x68] sm:$0xff] }
 0xcd5   :  { %1692 = vmatpush.msrb.mxu2 %v1675_v3  ;;  %v1689_v57 = vld [vmem:[%s5441_s7 + $0xe8] sm:$0xff]  ;;  %1713 = vmatpush.msrb.mxu3 %v1690_v6  ;;  %v1672_v10 = vld [vmem:[%s5441_s7 + $0x60] sm:$0xff] }
 0xcd6   :  { %1890 = vst [vmem:[#allocation2 + $0x78] sm:$0xf] %v1888_v0  ;;  %v1688_v0 = vld [vmem:[%s5441_s7 + $0xe0] sm:$0xff] }
 0xcd7   :  { %1891 = vst [vmem:[#allocation2 + $0x58] sm:$0xf] %v1889_v13  ;;  %1693 = vmatpush.msrb.mxu2 %v1674_v5  ;;  %1714 = vmatpush.msrb.mxu3 %v1689_v57 }
 0xcd8   :  { %v2023_v20 = vld [vmem:[#allocation2] sm:$0xff] }
 0xcd9   :  { %1694 = vmatpush.msrb.mxu2 %v1673_v9  ;;  %1715 = vmatpush.msrb.mxu3 %v1688_v0 }
 0xcda   :  { %v2024_v21 = vld [vmem:[#allocation2 + $0x38] sm:$0xff]  ;;  %v2037_v22 = vpop.permute.xlu0 %2036 }
 0xcdb   :  { %1695 = vmatpush.msrb.mxu2 %v1672_v10 }
 0xcdd   :  { %v2025_v16 = vld [vmem:[#allocation2 + $0x78] sm:$0xff] }
 0xcde   :  { %2062 = vmatpush.msrb.mxu0 %v2025_v16  ;;  %v2026_v18 = vld [vmem:[#allocation2 + $0x58] sm:$0xff]  ;;  %v1671_v16 = vld [vmem:[%s5441_s7 + $0x58] sm:$0xff] }
 0xcdf   :  { %2082 = vmatpush.msrb.mxu1 %v2026_v18  ;;  %v1687_v18 = vld [vmem:[%s5441_s7 + $0xd8] sm:$0xff]  ;;  %1696 = vmatpush.msrb.mxu2 %v1671_v16 }
 0xce0   :  { %2063 = vmatpush.msrb.mxu0 %v2023_v20  ;;  %v1670_v20 = vld [vmem:[%s5441_s7 + $0x50] sm:$0xff]  ;;  %1716 = vmatpush.msrb.mxu3 %v1687_v18 }
 0xce1   :  { %2083 = vmatpush.msrb.mxu1 %v2024_v21  ;;  %3474 = vmatmul.msk.f32.vlgmr.msrb.gmra.mxu0 %vm5439_vm6, %v2022_v19  ;;  %v1686_v21 = vld [vmem:[%s5441_s7 + $0xd0] sm:$0xff]  ;;  %vm5446_vm6 = vmmov %vm5445_vm1 }
 0xce2   :  { %3476 = vmatmul.msk.f32.vlgmr.msrb.gmra.mxu1 %vm5440_vm0, %v2022_v19  ;;  %1697 = vmatpush.msrb.mxu2 %v1670_v20 }
 0xce3   :  { %1717 = vmatpush.msrb.mxu3 %v1686_v21 }
 0xd4c   :  { %v4619_v42 = vpop.f32.mrf.mxu0  ;;  %v4621_v43 = vpop.f32.mrf.mxu1 }
 0xd5e   :  { %v2065_v24 = vpop.f32.mrf.mxu0 }
 0xd5f   :  { %v2066_v27 = vadd.f32 %v2065_v24, %v2037_v22  ;;  %v2085_v23 = vpop.f32.mrf.mxu1  ;;  %v1669_v24 = vld [vmem:[%s5441_s7 + $0x48] sm:$0xff] }
 0xd60   :  { %v2086_v25 = vadd.f32 %v2085_v23, %v2037_v22  ;;  %1698 = vmatpush.msrb.mxu2 %v1669_v24 }
 0xd61   :  { %v2095_v26 = vadd.f32 %v2093_v1, %v2066_v27  ;;  %v1685_v27 = vld [vmem:[%s5441_s7 + $0xc8] sm:$0xff] }
 0xd62   :  { %v2096_v31 = vadd.f32 %v2093_v1, %v2086_v25  ;;  %v2144_v1 = vld [vmem:[%s5418_s28] sm:$0xff]  ;;  %1718 = vmatpush.msrb.mxu3 %v1685_v27 }
 0xd63   :  { %v2097_v32 = vrot.slane %v2095_v26, 1  ;;  %v2101_v30 = vrot.slane %v2095_v26, 7 }
 0xd64   :  { %v2098_v46 = vrot.slane %v2096_v31, 1  ;;  %v2102_v33 = vrot.slane %v2096_v31, 7 }
 0xd65   :  { %v2099_v34 = vmul.f32 %v3969_v48, %v2097_v32  ;;  %v2103_v17 = vmul.f32 %v2101_v30, %v3972_v53  ;;  %v1611_v32 = vld [vmem:[%s5442_s13] sm:$0xff] }
 0xd66   :  { %v2100_v35 = vmul.f32 %v3969_v48, %v2098_v46  ;;  %v2104_v36 = vmul.f32 %v2102_v33, %v3972_v53  ;;  %v1668_v30 = vld [vmem:[%s5441_s7 + $0x40] sm:$0xff]  ;;  %v1667_v33 = vld [vmem:[%s5441_s7 + $0x38] sm:$0xff] }
 0xd67   :  { %v2105_v38 = vadd.f32 %v2103_v17, %v2099_v34  ;;  %v1684_v46 = vld [vmem:[%s5441_s7 + $0xc0] sm:$0xff]  ;;  %1699 = vmatpush.msrb.mxu2 %v1668_v30  ;;  %v1683_v34 = vld [vmem:[%s5441_s7 + $0xb8] sm:$0xff]  ;;  %v1666_v17 = vld [vmem:[%s5441_s7 + $0x30] sm:$0xff] }
 0xd68   :  { %v2106_v39 = vadd.f32 %v2104_v36, %v2100_v35  ;;  %1719 = vmatpush.msrb.mxu3 %v1684_v46  ;;  %v1682_v35 = vld [vmem:[%s5441_s7 + $0xb0] sm:$0xff]  ;;  %v1665_v36 = vld [vmem:[%s5441_s7 + $0x28] sm:$0xff] }
 0xd69   :  { %v2107_v44 = vadd.f32 %v2105_v38, %v2095_v26  ;;  %1700 = vmatpush.msrb.mxu2 %v1667_v33  ;;  %v1681_v38 = vld [vmem:[%s5441_s7 + $0xa8] sm:$0xff]  ;;  %v3486_v30 = vld [vmem:[%s5415_s30 + $0x10] sm:$0x3] }
 0xd6a   :  { %v2108_v47 = vadd.f32 %v2106_v39, %v2096_v31  ;;  %1720 = vmatpush.msrb.mxu3 %v1683_v34  ;;  %v1664_v39 = vld [vmem:[%s5441_s7 + $0x20] sm:$0xff]  ;;  %v2323_v46 = vperm.slane %v3486_v30, 0  ;;  %v2324_v33 = vperm.slane %v3486_v30, 1 }
 0xd6b   :  { %1701 = vmatpush.msrb.mxu2 %v1666_v17 }
 0xd6c   :  { %v2109_v49 = vadd.f32 %v2108_v47, %v2107_v44  ;;  %1721 = vmatpush.msrb.mxu3 %v1682_v35  ;;  %v1680_v44 = vld [vmem:[%s5441_s7 + $0xa0] sm:$0xff]  ;;  %v1663_v47 = vld [vmem:[%s5441_s7 + $0x18] sm:$0xff] }
 0xd6d   :  { %1702 = vmatpush.msrb.mxu2 %v1665_v36 }
 0xd6e   :  { %2110 = vadd.xlane.f32.xlu1 %v2109_v49  ;;  %1722 = vmatpush.msrb.mxu3 %v1681_v38  ;;  %v1679_v49 = vld [vmem:[%s5441_s7 + $0x98] sm:$0xff] }
 0xd6f   :  { %1703 = vmatpush.msrb.mxu2 %v1664_v39 }
 0xd70   :  { %1723 = vmatpush.msrb.mxu3 %v1680_v44 }
 0xd71   :  { %1704 = vmatpush.msrb.mxu2 %v1663_v47 }
 0xd72   :  { %1724 = vmatpush.msrb.mxu3 %v1679_v49 }
 0xde1   :  { %v2111_v50 = vpop.xlane.xlu1 %2110 }
 0xde2   :  { %v2112_v51 = vmul.f32 0.001953125, %v2111_v50  ;;  %v1662_v50 = vld [vmem:[%s5441_s7 + $0x10] sm:$0xff] }
 0xde3   :  { %1705 = vmatpush.msrb.mxu2 %v1662_v50  ;;  %v3485_v50 = vld [vmem:[%s5415_s30 + $0xe] sm:$0x3] }
 0xde4   :  { %v4627_v52 = vsub.f32 %v2095_v26, %v2112_v51  ;;  %v4629_v54 = vsub.f32 %v2096_v31, %v2112_v51  ;;  %v2153_v31 = vld [vmem:[%s5419_s1] sm:$0xff]  ;;  %v1678_v51 = vld [vmem:[%s5441_s7 + $0x90] sm:$0xff]  ;;  %s5450_s1 = sld [smem:[#allocation23_spill]] }
 0xde5   :  { %1725 = vmatpush.msrb.mxu3 %v1678_v51  ;;  %v3484_v51 = vld [vmem:[%s5415_s30 + $0xc] sm:$0x3] }
 0xde6   :  { %v2115_v8 = vmul.f32 %v4627_v52, %v4627_v52  ;;  %v2116_v61 = vmul.f32 %v4629_v54, %v4629_v54 }
 0xde8   :  { %v2117_v58 = vrot.slane %v2115_v8, 1  ;;  %v2118_v14 = vrot.slane %v2116_v61, 1  ;;  %v2121_v28 = vrot.slane %v2115_v8, 7  ;;  %v2122_v29 = vrot.slane %v2116_v61, 7 }
 0xdea   :  { %v2119_v37 = vmul.f32 %v3969_v48, %v2117_v58  ;;  %v2120_v45 = vmul.f32 %v3969_v48, %v2118_v14  ;;  %v2123_v55 = vmul.f32 %v2121_v28, %v3972_v53  ;;  %v2124_v59 = vmul.f32 %v2122_v29, %v3972_v53  ;;  %v1660_v58 = vld [vmem:[%s5441_s7] sm:$0xff] }
 0xdeb   :  { %v1676_v14 = vld [vmem:[%s5441_s7 + $0x80] sm:$0xff] }
 0xdec   :  { %v2125_v56 = vadd.f32 %v2123_v55, %v2119_v37  ;;  %v2126_v15 = vadd.f32 %v2124_v59, %v2120_v45 }
 0xdee   :  { %v2127_v60 = vadd.f32 %v2125_v56, %v2115_v8  ;;  %v2128_v62 = vadd.f32 %v2126_v15, %v2116_v61  ;;  %v1661_v8 = vld [vmem:[%s5441_s7 + $0x8] sm:$0xff] }
 0xdef   :  { %v1677_v61 = vld [vmem:[%s5441_s7 + $0x88] sm:$0xff]  ;;  %1706 = vmatpush.msrb.mxu2 %v1661_v8  ;;  %v2307_v8 = vperm.slane %v3485_v50, 0 }
 0xdf0   :  { %v2129_v40 = vadd.f32 %v2128_v62, %v2127_v60  ;;  %1726 = vmatpush.msrb.mxu3 %v1677_v61  ;;  %v2308_v61 = vperm.slane %v3485_v50, 1 }
 0xdf1   :  { %1707 = vmatpush.msrb.mxu2 %v1660_v58 }
 0xdf2   :  { %2130 = vadd.xlane.f32.xlu0 %v2129_v40  ;;  %1727 = vmatpush.msrb.mxu3 %v1676_v14 }
 0xe65   :  { %v2131_v63 = vpop.xlane.xlu0 %2130 }
 0xe66   :  { %v2132_v41 = vmul.f32 0.001953125, %v2131_v63  ;;  %v2407_v63 = vld.sshfl [vmem:[#allocation1] sm:$0xff pattern:$0x75316420] }
 0xe67   :  { %3489 = vmatpush.msk.msra.mxu2 %vm5436_vm4, %v2407_v63 }
 0xe68   :  { %v2133_v2 = vadd.f32 1e-06, %v2132_v41  ;;  %v2408_v41 = vld.sshfl [vmem:[#allocation1 + $0x8] sm:$0xff pattern:$0x75316420] }
 0xe69   :  { %3491 = vmatpush.msk.msra.mxu3 %vm5443_vm5, %v2408_v41 }
 0xe6a   :  { %3587 = vrsqrt.f32 %v2133_v2  ;;  %vm2140_vm2 = vweird.f32 %v2133_v2 }
 0xe70   :  { %v3588_v7 = vpop.eup %3587 }
 0xe71   :  { %v2135_v11 = vmul.f32 %v3588_v7, %v2133_v2  ;;  %vm2141_vm7 = vweird.f32 %v3588_v7 }
 0xe72   :  { %vm2142_vm3 = vmor %vm2140_vm2, %vm2141_vm7 }
 0xe73   :  { %v2136_v13 = vmul.f32 %v3588_v7, %v2135_v11 }
 0xe75   :  { %v2137_v19 = vmul.f32 0.5, %v2136_v13 }
 0xe77   :  { %v2138_v22 = vsub.f32 1.5, %v2137_v19 }
 0xe79   :  { %v2139_v23 = vmul.f32 %v3588_v7, %v2138_v22 }
 0xe7b   :  { %v2143_v25 = vsel %vm2142_vm3, %v3588_v7, %v2139_v23 }
 0xe7c   :  { %v2145_v26 = vmul.f32 %v2144_v1, %v2143_v25 }
 0xe7e   :  { %2148 = vperm.xlu2 %3543, %v2145_v26   ;;  %v2350_v26 = vld [vmem:[%s5337_s11] sm:$0xff] }
 0xe86   :  { %2156 = vperm.xlu2 %3543, %v2153_v31   ;;  %v2400_v31 = vld [vmem:[%s5447_s17] sm:$0xff]  ;;  %s3707_s17 = smov [#allocation7]  }
 0xe87   :  { %s3381_s11 = sshll.u32 %s3707_s17, 4  ;;  %s3382_s11 = int_to_ptr.vmem [resolvable:$true] %s3381_s11 }
 0xe8e   :  { %1614 = vperm.xlu2 %3543, %v1611_v32  }
 0xed8   :  { %v2149_v28 = vpop.permute.xlu2 %2148 }
 0xed9   :  { %v2151_v29 = vmul.f32 %v2149_v28, %v4627_v52  ;;  %v2152_v37 = vmul.f32 %v2149_v28, %v4629_v54 }
 0xee0   :  { %v2157_v45 = vpop.permute.xlu2 %2156 }
 0xee1   :  { %v2159_v55 = vadd.f32 %v2157_v45, %v2151_v29  ;;  %v2160_v59 = vadd.f32 %v2157_v45, %v2152_v37  ;;  %v2291_v29 = vperm.slane %v3484_v51, 0  ;;  %v2292_v37 = vperm.slane %v3484_v51, 1  ;;  %v2331_v51 = vld [vmem:[%s5427_s6] sm:$0xff] }
 0xee3   :  { %v3478_v56 = vmul.f32 -1.442695, %v2159_v55  ;;  %v3479_v15 = vmul.f32 -1.442695, %v2160_v59 }
 0xee5   :  { %3589 = vpow2.f32 %v3478_v56 }
 0xee6   :  { %3591 = vpow2.f32 %v3479_v15 }
 0xee8   :  { %v1615_v60 = vpop.permute.xlu2 %1614 }
 0xee9   :  { %v1638_v62 = vadd.f32 %v4619_v42, %v1615_v60  ;;  %v1658_v40 = vadd.f32 %v4621_v43, %v1615_v60  ;;  %v2399_v42 = vld [vmem:[%s5444_s23] sm:$0xff] }
 0xeeb   :  { %v3590_v2 = vpop.eup %3589  ;;  %1708 = vmatmul.f32.vlgmr.msrb.gmra.mxu2 %v1638_v62  ;;  %1728 = vmatmul.f32.vlgmr.msrb.gmra.mxu3 %v1658_v40 }
 0xeec   :  { %v3592_v52 = vpop.eup %3591  ;;  %v2167_v3 = vadd.f32 1.0, %v3590_v2 }
 0xeed   :  { %v2168_v54 = vadd.f32 1.0, %v3592_v52  ;;  %v3483_v52 = vld [vmem:[%s5415_s30 + $0xa] sm:$0x3] }
 0xeee   :  { %3593 = vrcp.f32 %v2167_v3  ;;  %v2180_v9 = vand.u32 2147483648, %v2167_v3  ;;  %v2178_v10 = vand.u32 2147483647, %v2167_v3  ;;  %vm2174_vm2 = vweird.f32 %v2167_v3 }
 0xeef   :  { %3595 = vrcp.f32 %v2168_v54  ;;  %v2195_v0 = vand.u32 2147483648, %v2168_v54  ;;  %v2193_v16 = vand.u32 2147483647, %v2168_v54  ;;  %vm2189_vm4 = vweird.f32 %v2168_v54 }
 0xef0   :  { %v2181_v19 = vor.u32 1.1754944e-38, %v2180_v9  ;;  %vm2179_vm5 = vcmp.eq.f32.partialorder %v2178_v10, 8.507059e+37 }
 0xef1   :  { %v2196_v22 = vor.u32 1.1754944e-38, %v2195_v0 }
 0xef3   :  { %3490 = vmatmul.msk.f32.vlgmr.msra.gmra.mxu2 %vm5445_vm1, %v2399_v42  ;;  %3492 = vmatmul.msk.f32.vlgmr.msra.gmra.mxu3 %vm5446_vm6, %v2399_v42  ;;  %vm2194_vm6 = vcmp.eq.f32.partialorder %v2193_v16, 8.507059e+37  ;;  %v3482_v42 = vld [vmem:[%s5415_s30 + $0x6] sm:$0x3] }
 0xef4   :  { %v3594_v43 = vpop.eup %3593  ;;  %v2257_v9 = vperm.slane %v3482_v42, 0 }
 0xef5   :  { %v3596_v4 = vpop.eup %3595  ;;  %v2170_v5 = vmul.f32 %v3594_v43, %v2167_v3  ;;  %vm2175_vm0 = vweird.f32 %v3594_v43  ;;  %v2275_v3 = vperm.slane %v3483_v52, 0 }
 0xef6   :  { %v2185_v6 = vmul.f32 %v3596_v4, %v2168_v54  ;;  %vm2190_vm7 = vweird.f32 %v3596_v4  ;;  %vm2176_vm3 = vmor %vm2174_vm2, %vm2175_vm0  ;;  %vm5390_vm0 = vcmask 523264   ;;  %v2276_v54 = vperm.slane %v3483_v52, 1 }
 0xef7   :  { %v2171_v7 = vsub.f32 1.0, %v2170_v5  ;;  %vm2191_vm1 = vmor %vm2189_vm4, %vm2190_vm7  ;;  %v3481_v5 = vld [vmem:[%s5415_s30 + $0x4] sm:$0x3]  ;;  %vm5448_vm7 = vcmask 588800  }
 0xef8   :  { %v2186_v57 = vsub.f32 1.0, %v2185_v6  ;;  %vm5449_vm2 = vmmov %vm5448_vm7 }
 0xef9   :  { %v2172_v11 = vmul.f32 %v3594_v43, %v2171_v7 }
 0xefa   :  { %v2187_v13 = vmul.f32 %v3596_v4, %v2186_v57  ;;  %v2258_v57 = vperm.slane %v3482_v42, 1 }
 0xefb   :  { %v2173_v18 = vadd.f32 %v3594_v43, %v2172_v11 }
 0xefc   :  { %v2188_v20 = vadd.f32 %v3596_v4, %v2187_v13 }
 0xefd   :  { %v2177_v21 = vsel %vm2176_vm3, %v3594_v43, %v2173_v18  ;;  %v3480_v18 = vld [vmem:[%s5415_s30 + $0x2] sm:$0x3] }
 0xefe   :  { %v2182_v24 = vsel %vm2179_vm5, %v2181_v19, %v2177_v21  ;;  %v2192_v27 = vsel %vm2191_vm1, %v3596_v4, %v2188_v20  ;;  %v2241_v19 = vperm.slane %v3481_v5, 0  ;;  %v2242_v20 = vperm.slane %v3481_v5, 1 }
 0xeff   :  { %v2197_v23 = vsel %vm2194_vm6, %v2196_v22, %v2192_v27  ;;  %v4755_v1 = vmul.f32 %v2182_v24, %v2159_v55 }
 0xf00   :  { %v4757_v25 = vmul.f32 %v2197_v23, %v2160_v59  ;;  %v2225_v23 = vperm.slane %v3480_v18, 0 }
 0xf01   :  { %2283 = vrot.lane.b32.xlu0 %v4755_v1, %s5424_s27  ;;  %2315 = vrot.lane.b32.xlu2 %v4755_v1, %s5428_s12 }
 0xf02   :  { %2301 = vrot.lane.b32.xlu1 %v4757_v25, %s5420_s0 }
 0xf09   :  { %2249 = vrot.lane.b32.xlu0 %v4755_v1, %s5422_s2  ;;  %2317 = vrot.lane.b32.xlu2 %v4757_v25, %s5428_s12 }
 0xf0a   :  { %2251 = vrot.lane.b32.xlu1 %v4757_v25, %s5422_s2 }
 0xf11   :  { %2233 = vrot.lane.b32.xlu0 %v4755_v1, %s5421_s10  ;;  %2299 = vrot.lane.b32.xlu2 %v4755_v1, %s5420_s0 }
 0xf12   :  { %2235 = vrot.lane.b32.xlu1 %v4757_v25, %s5421_s10 }
 0xf19   :  { %2219 = vrot.lane.b32.xlu0 %v4757_v25, %s5425_s24  ;;  %2285 = vrot.lane.b32.xlu2 %v4757_v25, %s5424_s27 }
 0xf1a   :  { %2201 = vrot.lane.b32.xlu1 %v4755_v1, %s5423_s5 }
 0xf21   :  { %2353 = vperm.xlu0 %3544, %v2350_v26   ;;  %2267 = vrot.lane.b32.xlu2 %v4755_v1, %s5426_s25  ;;  %v2226_v26 = vperm.slane %v3480_v18, 1 }
 0xf22   :  { %2403 = vperm.xlu1 %3542, %v2400_v31  }
 0xf29   :  { %2269 = vrot.lane.b32.xlu2 %v4757_v25, %s5426_s25 }
 0xf31   :  { %2217 = vrot.lane.b32.xlu2 %v4755_v1, %s5425_s24 }
 0xf39   :  { %2203 = vrot.lane.b32.xlu2 %v4757_v25, %s5423_s5 }
 0xf5b   :  { %v2316_v32 = vpop.permute.xlu2 %2315 }
 0xf63   :  { %v2318_v34 = vpop.permute.xlu2 %2317 }
 0xf64   :  { %v2319_v17 = vsel %vm390_vm13, %v2316_v32, %v2318_v34  ;;  %v2320_v35 = vsel %vm390_vm13, %v2318_v34, %v2316_v32 }
 0xf65   :  { %v2327_v36 = vmul.f32 %v2323_v46, %v2319_v17  ;;  %v2328_v38 = vmul.f32 %v2324_v33, %v2320_v35 }
 0xf67   :  { %2366 = vmatpush.msra.mxu0 %v2327_v36  ;;  %2386 = vmatpush.msra.mxu1 %v2328_v38 }
 0xf6b   :  { %v2300_v39 = vpop.permute.xlu2 %2299 }
 0xf6e   :  { %v1709_v44 = vpop.f32.mrf.mxu2  ;;  %v1729_v47 = vpop.f32.mrf.mxu3 }
 0xf6f   :  { %v1730_v49 = vadd.f32 %v1729_v47, %v1709_v44 }
 0xf71   :  { %1733 = vst.msk [vmem:[#allocation7] sm:$0xff] %vm5390_vm0, %v1730_v49 }
 0xf73   :  { %v2284_v58 = vpop.permute.xlu0 %2283  ;;  %v2286_v14 = vpop.permute.xlu2 %2285 }
 0xf74   :  { %v2302_v28 = vpop.permute.xlu1 %2301  ;;  %v2287_v59 = vsel %vm338_vm12, %v2284_v58, %v2286_v14  ;;  %v2288_v56 = vsel %vm338_vm12, %v2286_v14, %v2284_v58 }
 0xf75   :  { %v2303_v45 = vsel %vm361_vm11, %v2300_v39, %v2302_v28  ;;  %v2304_v55 = vsel %vm361_vm11, %v2302_v28, %v2300_v39  ;;  %v2295_v62 = vmul.f32 %v2291_v29, %v2287_v59  ;;  %v2296_v40 = vmul.f32 %v2292_v37, %v2288_v56 }
 0xf76   :  { %v2311_v15 = vmul.f32 %v2307_v8, %v2303_v45  ;;  %v2312_v60 = vmul.f32 %v2308_v61, %v2304_v55  ;;  %v2433_v8 = vpop.f32.mrf.mxu2  ;;  %v2453_v58 = vpop.f32.mrf.mxu3 }
 0xf78   :  { %2367 = vmatpush.msra.mxu0 %v2311_v15  ;;  %2387 = vmatpush.msra.mxu1 %v2312_v60 }
 0xf7a   :  { %2368 = vmatpush.msra.mxu0 %v2295_v62  ;;  %2388 = vmatpush.msra.mxu1 %v2296_v40 }
 0xf7b   :  { %v2250_v63 = vpop.permute.xlu0 %2249  ;;  %v2268_v41 = vpop.permute.xlu2 %2267 }
 0xf7c   :  { %v2252_v2 = vpop.permute.xlu1 %2251 }
 0xf7d   :  { %v2253_v13 = vsel %vm273_vm9, %v2250_v63, %v2252_v2  ;;  %v2254_v16 = vsel %vm273_vm9, %v2252_v2, %v2250_v63 }
 0xf7e   :  { %v2261_v24 = vmul.f32 %v2257_v9, %v2254_v16  ;;  %v2262_v27 = vmul.f32 %v2258_v57, %v2253_v13 }
 0xf83   :  { %v2234_v43 = vpop.permute.xlu0 %2233  ;;  %v2270_v4 = vpop.permute.xlu2 %2269 }
 0xf84   :  { %v2271_v6 = vsel %vm309_vm10, %v2268_v41, %v2270_v4  ;;  %v2272_v7 = vsel %vm309_vm10, %v2270_v4, %v2268_v41  ;;  %v2236_v11 = vpop.permute.xlu1 %2235 }
 0xf85   :  { %v2279_v10 = vmul.f32 %v2275_v3, %v2271_v6  ;;  %v2280_v0 = vmul.f32 %v2276_v54, %v2272_v7  ;;  %v2237_v21 = vsel %vm250_vm14, %v2234_v43, %v2236_v11  ;;  %v2238_v22 = vsel %vm250_vm14, %v2236_v11, %v2234_v43 }
 0xf86   :  { %v2245_v31 = vmul.f32 %v2241_v19, %v2238_v22  ;;  %v2246_v32 = vmul.f32 %v2242_v20, %v2237_v21 }
 0xf87   :  { %2369 = vmatpush.msra.mxu0 %v2279_v10  ;;  %2389 = vmatpush.msra.mxu1 %v2280_v0 }
 0xf89   :  { %2370 = vmatpush.msra.mxu0 %v4755_v1  ;;  %2390 = vmatpush.msra.mxu1 %v4757_v25  ;;  %v2207_v1 = vld [vmem:[%s5415_s30] sm:$0x3] }
 0xf8a   :  { %v2209_v25 = vperm.slane %v2207_v1, 0  ;;  %v2210_v36 = vperm.slane %v2207_v1, 1 }
 0xf8b   :  { %v2220_v30 = vpop.permute.xlu0 %2219  ;;  %v2218_v46 = vpop.permute.xlu2 %2217  ;;  %2371 = vmatpush.msra.mxu0 %v2261_v24  ;;  %2391 = vmatpush.msra.mxu1 %v2262_v27 }
 0xf8c   :  { %v2221_v33 = vsel %vm221_vm8, %v2218_v46, %v2220_v30  ;;  %v2222_v34 = vsel %vm221_vm8, %v2220_v30, %v2218_v46  ;;  %v2202_v38 = vpop.permute.xlu1 %2201 }
 0xf8d   :  { %v2229_v17 = vmul.f32 %v2225_v23, %v2222_v34  ;;  %v2230_v35 = vmul.f32 %v2226_v26, %v2221_v33  ;;  %2372 = vmatpush.msra.mxu0 %v2245_v31  ;;  %2392 = vmatpush.msra.mxu1 %v2246_v32 }
 0xf8f   :  { %2373 = vmatpush.msra.mxu0 %v2229_v17  ;;  %2393 = vmatpush.msra.mxu1 %v2230_v35 }
 0xf93   :  { %v2204_v39 = vpop.permute.xlu2 %2203  ;;  %v2354_v14 = vpop.permute.xlu0 %2353 }
 0xf94   :  { %v2205_v44 = vsel %vm199_vm15, %v2202_v38, %v2204_v39  ;;  %v2206_v47 = vsel %vm199_vm15, %v2204_v39, %v2202_v38  ;;  %v2404_v61 = vpop.permute.xlu1 %2403 }
 0xf95   :  { %v2213_v49 = vmul.f32 %v2209_v25, %v2206_v47  ;;  %v2214_v50 = vmul.f32 %v2210_v36, %v2205_v44  ;;  %v2434_v37 = vadd.f32 %v2433_v8, %v2404_v61  ;;  %v2454_v45 = vadd.f32 %v2453_v58, %v2404_v61  ;;  %v2508_v36 = vld [vmem:[%s5450_s1] sm:$0xff] }
 0xf96   :  { %v2517_v44 = vld [vmem:[%s5451_s14] sm:$0xff]  ;;  %s3355_s14 = sshll.u32 %s3706_s4, 4  ;;  %s3356_s14 = int_to_ptr.vmem [resolvable:$true] %s3355_s14 }
 0xf97   :  { %2374 = vmatpush.msra.mxu0 %v2213_v49  ;;  %2394 = vmatpush.msra.mxu1 %v2214_v50 }
 0xf98   :  { %3487 = vmatmul.msk.f32.vlgmr.msra.gmra.mxu0 %vm5448_vm7, %v2331_v51  ;;  %3488 = vmatmul.msk.f32.vlgmr.msra.gmra.mxu1 %vm5449_vm2, %v2331_v51 }
0x1015   :  { %v2376_v28 = vpop.f32.mrf.mxu0  ;;  %v2396_v29 = vpop.f32.mrf.mxu1 }
0x1016   :  { %v2377_v55 = vadd.f32 %v2376_v28, %v2354_v14  ;;  %v2397_v59 = vadd.f32 %v2396_v29, %v2354_v14 }
0x1018   :  { %v4861_v56 = vadd.f32 %v2434_v37, %v2377_v55  ;;  %v4863_v15 = vadd.f32 %v2454_v45, %v2397_v59 }
0x101a   :  { %2459 = vst [vmem:[#allocation3 + $0x10] sm:$0xff] %v4861_v56  ;;  %v2461_v60 = vrot.slane %v4861_v56, 1  ;;  %v2462_v62 = vrot.slane %v4863_v15, 1  ;;  %v2465_v40 = vrot.slane %v4861_v56, 7  ;;  %v2466_v63 = vrot.slane %v4863_v15, 7 }
0x101b   :  { %2460 = vst [vmem:[#allocation3 + $0x18] sm:$0xff] %v4863_v15 }
0x101c   :  { %v2463_v41 = vmul.f32 %v3969_v48, %v2461_v60  ;;  %v2464_v2 = vmul.f32 %v3969_v48, %v2462_v62  ;;  %v2467_v52 = vmul.f32 %v2465_v40, %v3972_v53  ;;  %v2468_v3 = vmul.f32 %v2466_v63, %v3972_v53 }
0x101e   :  { %v2469_v54 = vadd.f32 %v2467_v52, %v2463_v41  ;;  %v2470_v42 = vadd.f32 %v2468_v3, %v2464_v2 }
0x1020   :  { %v2471_v43 = vadd.f32 %v2469_v54, %v4861_v56  ;;  %v2472_v4 = vadd.f32 %v2470_v42, %v4863_v15 }
0x1022   :  { %v2473_v5 = vadd.f32 %v2472_v4, %v2471_v43 }
0x1024   :  { %2474 = vadd.xlane.f32.xlu2 %v2473_v5 }
0x1097   :  { %v2475_v6 = vpop.xlane.xlu2 %2474 }
0x1098   :  { %v2476_v7 = vmul.f32 0.001953125, %v2475_v6 }
0x109a   :  { %v2477_v9 = vsub.f32 %v4861_v56, %v2476_v7  ;;  %v2478_v57 = vsub.f32 %v4863_v15, %v2476_v7 }
0x109c   :  { %v2479_v11 = vmul.f32 %v2477_v9, %v2477_v9  ;;  %v2480_v10 = vmul.f32 %v2478_v57, %v2478_v57 }
0x109e   :  { %v2481_v0 = vrot.slane %v2479_v11, 1  ;;  %v2482_v13 = vrot.slane %v2480_v10, 1  ;;  %v2485_v16 = vrot.slane %v2479_v11, 7  ;;  %v2486_v18 = vrot.slane %v2480_v10, 7 }
0x10a0   :  { %v2483_v19 = vmul.f32 %v3969_v48, %v2481_v0  ;;  %v2484_v20 = vmul.f32 %v3969_v48, %v2482_v13  ;;  %v2487_v21 = vmul.f32 %v2485_v16, %v3972_v53  ;;  %v2488_v22 = vmul.f32 %v2486_v18, %v3972_v53  ;;  %v3504_v13 = vld [vmem:[%s5416_s8 + $0x18] sm:$0xff]  ;;  %v2714_v16 = vld [vmem:[%s5452_s29] sm:$0xff]  ;;  %s5461_s29 = sld [smem:[#allocation29_spill]] }
0x10a2   :  { %v2489_v24 = vadd.f32 %v2487_v21, %v2483_v19  ;;  %v2490_v27 = vadd.f32 %v2488_v22, %v2484_v20  ;;  %v3501_v19 = vld [vmem:[%s5415_s30 + $0x10] sm:$0x3] }
0x10a3   :  { %v2687_v20 = vperm.slane %v3501_v19, 0  ;;  %v2688_v21 = vperm.slane %v3501_v19, 1 }
0x10a4   :  { %v2491_v23 = vadd.f32 %v2489_v24, %v2479_v11  ;;  %v2492_v26 = vadd.f32 %v2490_v27, %v2480_v10 }
0x10a6   :  { %v2493_v31 = vadd.f32 %v2492_v26, %v2491_v23  ;;  %s3383_s8 = sshll.u32 %s5461_s29, 4  ;;  %s3384_s8 = int_to_ptr.hbm [resolvable:$true] %s3383_s8 }
0x10a8   :  { %2494 = vadd.xlane.f32.xlu0 %v2493_v31  ;;  %v3500_v31 = vld [vmem:[%s5415_s30 + $0xe] sm:$0x3] }
0x111b   :  { %v2495_v32 = vpop.xlane.xlu0 %2494 }
0x111c   :  { %v2496_v30 = vmul.f32 0.001953125, %v2495_v32  ;;  %v2671_v32 = vperm.slane %v3500_v31, 0 }
0x111e   :  { %v2497_v46 = vadd.f32 1e-06, %v2496_v30  ;;  %v2672_v30 = vperm.slane %v3500_v31, 1 }
0x1120   :  { %3597 = vrsqrt.f32 %v2497_v46  ;;  %vm2504_vm4 = vweird.f32 %v2497_v46 }
0x1126   :  { %v3598_v33 = vpop.eup %3597 }
0x1127   :  { %v2499_v34 = vmul.f32 %v3598_v33, %v2497_v46  ;;  %vm2505_vm3 = vweird.f32 %v3598_v33 }
0x1128   :  { %vm2506_vm5 = vmor %vm2504_vm4, %vm2505_vm3 }
0x1129   :  { %v2500_v17 = vmul.f32 %v3598_v33, %v2499_v34 }
0x112b   :  { %v2501_v35 = vmul.f32 0.5, %v2500_v17 }
0x112d   :  { %v2502_v1 = vsub.f32 1.5, %v2501_v35 }
0x112f   :  { %v2503_v25 = vmul.f32 %v3598_v33, %v2502_v1 }
0x1131   :  { %v2507_v38 = vsel %vm2506_vm5, %v3598_v33, %v2503_v25  ;;  %v3499_v25 = vld [vmem:[%s5415_s30 + $0xc] sm:$0x3] }
0x1132   :  { %v2509_v39 = vmul.f32 %v2508_v36, %v2507_v38  ;;  %v2655_v36 = vperm.slane %v3499_v25, 0  ;;  %v2656_v38 = vperm.slane %v3499_v25, 1 }
0x1134   :  { %2512 = vperm.xlu1 %3542, %v2509_v39  }
0x113c   :  { %2520 = vperm.xlu1 %3542, %v2517_v44  }
0x11a6   :  { %v2513_v47 = vpop.permute.xlu1 %2512 }
0x11a7   :  { %v2515_v49 = vmul.f32 %v2513_v47, %v2477_v9  ;;  %v2516_v50 = vmul.f32 %v2513_v47, %v2478_v57 }
0x11ae   :  { %v2521_v51 = vpop.permute.xlu1 %2520 }
0x11af   :  { %v2523_v8 = vadd.f32 %v2521_v51, %v2515_v49  ;;  %v2524_v61 = vadd.f32 %v2521_v51, %v2516_v50 }
0x11b1   :  { %v3493_v58 = vmul.f32 -1.442695, %v2523_v8  ;;  %v3494_v14 = vmul.f32 -1.442695, %v2524_v61 }
0x11b3   :  { %3599 = vpow2.f32 %v3493_v58  ;;  %v3498_v58 = vld [vmem:[%s5415_s30 + $0xa] sm:$0x3] }
0x11b4   :  { %3601 = vpow2.f32 %v3494_v14 }
0x11b9   :  { %v3600_v28 = vpop.eup %3599 }
0x11ba   :  { %v3602_v29 = vpop.eup %3601  ;;  %v2531_v37 = vadd.f32 1.0, %v3600_v28  ;;  %v2639_v28 = vperm.slane %v3498_v58, 0 }
0x11bb   :  { %v2532_v45 = vadd.f32 1.0, %v3602_v29  ;;  %v2640_v29 = vperm.slane %v3498_v58, 1 }
0x11bc   :  { %3603 = vrcp.f32 %v2531_v37  ;;  %v2544_v63 = vand.u32 2147483648, %v2531_v37  ;;  %v2542_v52 = vand.u32 2147483647, %v2531_v37  ;;  %vm2538_vm7 = vweird.f32 %v2531_v37 }
0x11bd   :  { %3605 = vrcp.f32 %v2532_v45  ;;  %v2559_v3 = vand.u32 2147483648, %v2532_v45  ;;  %v2557_v42 = vand.u32 2147483647, %v2532_v45  ;;  %vm2553_vm3 = vweird.f32 %v2532_v45 }
0x11be   :  { %v2545_v4 = vor.u32 1.1754944e-38, %v2544_v63  ;;  %vm2543_vm4 = vcmp.eq.f32.partialorder %v2542_v52, 8.507059e+37  ;;  %v3496_v52 = vld [vmem:[%s5415_s30 + $0x4] sm:$0x3] }
0x11bf   :  { %v2560_v7 = vor.u32 1.1754944e-38, %v2559_v3  ;;  %vm2558_vm0 = vcmp.eq.f32.partialorder %v2557_v42, 8.507059e+37 }
0x11c2   :  { %v3604_v55 = vpop.eup %3603 }
0x11c3   :  { %v3606_v59 = vpop.eup %3605  ;;  %v2534_v60 = vmul.f32 %v3604_v55, %v2531_v37  ;;  %vm2539_vm1 = vweird.f32 %v3604_v55  ;;  %v3497_v37 = vld [vmem:[%s5415_s30 + $0x6] sm:$0x3] }
0x11c4   :  { %v2549_v62 = vmul.f32 %v3606_v59, %v2532_v45  ;;  %vm2554_vm6 = vweird.f32 %v3606_v59  ;;  %vm2540_vm2 = vmor %vm2538_vm7, %vm2539_vm1 }
0x11c5   :  { %v2535_v40 = vsub.f32 1.0, %v2534_v60  ;;  %vm2555_vm5 = vmor %vm2553_vm3, %vm2554_vm6  ;;  %v2621_v60 = vperm.slane %v3497_v37, 0 }
0x11c6   :  { %v2550_v41 = vsub.f32 1.0, %v2549_v62  ;;  %v2622_v62 = vperm.slane %v3497_v37, 1 }
0x11c7   :  { %v2536_v2 = vmul.f32 %v3604_v55, %v2535_v40 }
0x11c8   :  { %v2551_v54 = vmul.f32 %v3606_v59, %v2550_v41 }
0x11c9   :  { %v2537_v43 = vadd.f32 %v3604_v55, %v2536_v2 }
0x11ca   :  { %v2552_v5 = vadd.f32 %v3606_v59, %v2551_v54 }
0x11cb   :  { %v2541_v6 = vsel %vm2540_vm2, %v3604_v55, %v2537_v43 }
0x11cc   :  { %v2546_v9 = vsel %vm2543_vm4, %v2545_v4, %v2541_v6  ;;  %v2556_v57 = vsel %vm2555_vm5, %v3606_v59, %v2552_v5  ;;  %v2605_v4 = vperm.slane %v3496_v52, 0  ;;  %v2606_v5 = vperm.slane %v3496_v52, 1 }
0x11cd   :  { %v2561_v11 = vsel %vm2558_vm0, %v2560_v7, %v2556_v57  ;;  %v4889_v10 = vmul.f32 %v2546_v9, %v2523_v8  ;;  %vm5453_vm0 = vcmask 588800  }
0x11ce   :  { %v4891_v0 = vmul.f32 %v2561_v11, %v2524_v61  ;;  %vm5454_vm1 = vmmov %vm5453_vm0 }
0x11cf   :  { %2679 = vrot.lane.b32.xlu1 %v4889_v10, %s5428_s12 }
0x11d0   :  { %2649 = vrot.lane.b32.xlu0 %v4891_v0, %s5424_s27  ;;  %2665 = vrot.lane.b32.xlu2 %v4891_v0, %s5420_s0 }
0x11d7   :  { %2681 = vrot.lane.b32.xlu1 %v4891_v0, %s5428_s12 }
0x11d8   :  { %2615 = vrot.lane.b32.xlu0 %v4891_v0, %s5422_s2  ;;  %2613 = vrot.lane.b32.xlu2 %v4889_v10, %s5422_s2 }
0x11df   :  { %2663 = vrot.lane.b32.xlu1 %v4889_v10, %s5420_s0 }
0x11e0   :  { %2581 = vrot.lane.b32.xlu0 %v4889_v10, %s5425_s24  ;;  %2599 = vrot.lane.b32.xlu2 %v4891_v0, %s5421_s10 }
0x11e7   :  { %2647 = vrot.lane.b32.xlu1 %v4889_v10, %s5424_s27 }
0x11e8   :  { %2567 = vrot.lane.b32.xlu0 %v4891_v0, %s5423_s5  ;;  %2565 = vrot.lane.b32.xlu2 %v4889_v10, %s5423_s5 }
0x11ef   :  { %2631 = vrot.lane.b32.xlu1 %v4889_v10, %s5426_s25 }
0x11f0   :  { %2767 = vperm.xlu2 %3543, %v3504_v13   ;;  %v3495_v13 = vld [vmem:[%s5415_s30 + $0x2] sm:$0x3] }
0x11f7   :  { %2633 = vrot.lane.b32.xlu1 %v4891_v0, %s5426_s25 }
0x11ff   :  { %2597 = vrot.lane.b32.xlu1 %v4889_v10, %s5421_s10 }
0x1207   :  { %2583 = vrot.lane.b32.xlu1 %v4891_v0, %s5425_s24 }
0x120f   :  { %2717 = vperm.xlu1 %3542, %v2714_v16   ;;  %v2589_v16 = vperm.slane %v3495_v13, 0 }
0x122a   :  { %v2666_v46 = vpop.permute.xlu2 %2665 }
0x1232   :  { %v2614_v14 = vpop.permute.xlu2 %2613 }
0x123a   :  { %v2600_v54 = vpop.permute.xlu2 %2599 }
0x1241   :  { %v2680_v18 = vpop.permute.xlu1 %2679 }
0x1242   :  { %v2650_v39 = vpop.permute.xlu0 %2649  ;;  %v2566_v19 = vpop.permute.xlu2 %2565 }
0x1249   :  { %v2682_v22 = vpop.permute.xlu1 %2681 }
0x124a   :  { %v2683_v24 = vsel %vm390_vm13, %v2680_v18, %v2682_v22  ;;  %v2684_v27 = vsel %vm390_vm13, %v2682_v22, %v2680_v18  ;;  %v2616_v61 = vpop.permute.xlu0 %2615  ;;  %v2590_v18 = vperm.slane %v3495_v13, 1 }
0x124b   :  { %v2691_v23 = vmul.f32 %v2687_v20, %v2683_v24  ;;  %v2692_v26 = vmul.f32 %v2688_v21, %v2684_v27  ;;  %v2617_v41 = vsel %vm273_vm9, %v2614_v14, %v2616_v61  ;;  %v2618_v2 = vsel %vm273_vm9, %v2616_v61, %v2614_v14 }
0x124c   :  { %v2625_v42 = vmul.f32 %v2621_v60, %v2618_v2  ;;  %v2626_v43 = vmul.f32 %v2622_v62, %v2617_v41 }
0x124d   :  { %2730 = vmatpush.msrb.mxu2 %v2691_v23  ;;  %2750 = vmatpush.msrb.mxu3 %v2692_v26 }
0x1251   :  { %v2664_v33 = vpop.permute.xlu1 %2663 }
0x1252   :  { %v2667_v34 = vsel %vm361_vm11, %v2664_v33, %v2666_v46  ;;  %v2668_v17 = vsel %vm361_vm11, %v2666_v46, %v2664_v33  ;;  %v2582_v3 = vpop.permute.xlu0 %2581  ;;  %v2695_v33 = vld [vmem:[%s5342_s16] sm:$0xff] }
0x1253   :  { %v2675_v35 = vmul.f32 %v2671_v32, %v2667_v34  ;;  %v2676_v1 = vmul.f32 %v2672_v30, %v2668_v17 }
0x1255   :  { %2731 = vmatpush.msrb.mxu2 %v2675_v35  ;;  %2751 = vmatpush.msrb.mxu3 %v2676_v1 }
0x1259   :  { %v2648_v44 = vpop.permute.xlu1 %2647 }
0x125a   :  { %v2651_v47 = vsel %vm338_vm12, %v2648_v44, %v2650_v39  ;;  %v2652_v49 = vsel %vm338_vm12, %v2650_v39, %v2648_v44 }
0x125b   :  { %v2659_v50 = vmul.f32 %v2655_v36, %v2651_v47  ;;  %v2660_v51 = vmul.f32 %v2656_v38, %v2652_v49  ;;  %v2768_v36 = vpop.permute.xlu2 %2767 }
0x125d   :  { %2732 = vmatpush.msrb.mxu2 %v2659_v50  ;;  %2752 = vmatpush.msrb.mxu3 %v2660_v51 }
0x1261   :  { %v2632_v8 = vpop.permute.xlu1 %2631 }
0x1269   :  { %v2634_v45 = vpop.permute.xlu1 %2633 }
0x126a   :  { %v2635_v55 = vsel %vm309_vm10, %v2632_v8, %v2634_v45  ;;  %v2636_v59 = vsel %vm309_vm10, %v2634_v45, %v2632_v8 }
0x126b   :  { %v2643_v40 = vmul.f32 %v2639_v28, %v2635_v55  ;;  %v2644_v63 = vmul.f32 %v2640_v29, %v2636_v59 }
0x126d   :  { %2733 = vmatpush.msrb.mxu2 %v2643_v40  ;;  %2753 = vmatpush.msrb.mxu3 %v2644_v63 }
0x126f   :  { %2734 = vmatpush.msrb.mxu2 %v4889_v10  ;;  %2754 = vmatpush.msrb.mxu3 %v4891_v0  ;;  %v2571_v10 = vld [vmem:[%s5415_s30] sm:$0x3]  ;;  %v2568_v0 = vpop.permute.xlu0 %2567 }
0x1270   :  { %v2573_v20 = vperm.slane %v2571_v10, 0  ;;  %v2574_v21 = vperm.slane %v2571_v10, 1  ;;  %v2569_v24 = vsel %vm199_vm15, %v2566_v19, %v2568_v0  ;;  %v2570_v27 = vsel %vm199_vm15, %v2568_v0, %v2566_v19 }
0x1271   :  { %v2598_v6 = vpop.permute.xlu1 %2597  ;;  %2755 = vmatpush.msrb.mxu3 %v2626_v43  ;;  %2735 = vmatpush.msrb.mxu2 %v2625_v42 }
0x1272   :  { %v2601_v7 = vsel %vm250_vm14, %v2598_v6, %v2600_v54  ;;  %v2602_v9 = vsel %vm250_vm14, %v2600_v54, %v2598_v6  ;;  %v2577_v30 = vmul.f32 %v2573_v20, %v2570_v27  ;;  %v2578_v46 = vmul.f32 %v2574_v21, %v2569_v24  ;;  %v2828_v24 = vld [vmem:[%s5345_s19] sm:$0xff] }
0x1273   :  { %v2609_v57 = vmul.f32 %v2605_v4, %v2602_v9  ;;  %v2610_v11 = vmul.f32 %v2606_v5, %v2601_v7 }
0x1275   :  { %2736 = vmatpush.msrb.mxu2 %v2609_v57  ;;  %2756 = vmatpush.msrb.mxu3 %v2610_v11 }
0x1279   :  { %v2584_v22 = vpop.permute.xlu1 %2583 }
0x127a   :  { %v2585_v23 = vsel %vm221_vm8, %v2582_v3, %v2584_v22  ;;  %v2586_v26 = vsel %vm221_vm8, %v2584_v22, %v2582_v3 }
0x127b   :  { %v2593_v31 = vmul.f32 %v2589_v16, %v2586_v26  ;;  %v2594_v32 = vmul.f32 %v2590_v18, %v2585_v23 }
0x127d   :  { %2737 = vmatpush.msrb.mxu2 %v2593_v31  ;;  %2757 = vmatpush.msrb.mxu3 %v2594_v32 }
0x127f   :  { %2738 = vmatpush.msrb.mxu2 %v2577_v30  ;;  %2758 = vmatpush.msrb.mxu3 %v2578_v46 }
0x1280   :  { %3502 = vmatmul.msk.f32.vlgmr.msrb.gmra.mxu2 %vm5453_vm0, %v2695_v33  ;;  %3503 = vmatmul.msk.f32.vlgmr.msrb.gmra.mxu3 %vm5454_vm1, %v2695_v33 }
0x1281   :  { %v2718_v34 = vpop.permute.xlu1 %2717 }
0x1303   :  { %v2740_v17 = vpop.f32.mrf.mxu2  ;;  %v2760_v35 = vpop.f32.mrf.mxu3 }
0x1304   :  { %v2741_v1 = vadd.f32 %v2740_v17, %v2718_v34  ;;  %v2761_v25 = vadd.f32 %v2760_v35, %v2718_v34 }
0x1306   :  { %v2770_v38 = vadd.f32 %v2768_v36, %v2741_v1  ;;  %v2771_v39 = vadd.f32 %v2768_v36, %v2761_v25 }
0x1308   :  { %v2772_v44 = vrot.slane %v2770_v38, 1  ;;  %v2776_v47 = vrot.slane %v2770_v38, 7  ;;  %v2773_v49 = vrot.slane %v2771_v39, 1  ;;  %v2777_v50 = vrot.slane %v2771_v39, 7 }
0x130a   :  { %v2774_v51 = vmul.f32 %v3969_v48, %v2772_v44  ;;  %v2775_v8 = vmul.f32 %v3969_v48, %v2773_v49  ;;  %v2778_v61 = vmul.f32 %v2776_v47, %v3972_v53  ;;  %v2779_v58 = vmul.f32 %v2777_v50, %v3972_v53 }
0x130c   :  { %v2780_v14 = vadd.f32 %v2778_v61, %v2774_v51  ;;  %v2781_v28 = vadd.f32 %v2779_v58, %v2775_v8 }
0x130e   :  { %v2782_v29 = vadd.f32 %v2780_v14, %v2770_v38  ;;  %v2783_v37 = vadd.f32 %v2781_v28, %v2771_v39 }
0x1310   :  { %v2784_v45 = vadd.f32 %v2783_v37, %v2782_v29 }
0x1312   :  { %2785 = vadd.xlane.f32.xlu0 %v2784_v45 }
0x1385   :  { %v2786_v55 = vpop.xlane.xlu0 %2785 }
0x1386   :  { %v2787_v59 = vmul.f32 0.001953125, %v2786_v55 }
0x1388   :  { %v2788_v60 = vsub.f32 %v2770_v38, %v2787_v59  ;;  %v2789_v62 = vsub.f32 %v2771_v39, %v2787_v59 }
0x138a   :  { %v2790_v40 = vmul.f32 %v2788_v60, %v2788_v60  ;;  %v2791_v63 = vmul.f32 %v2789_v62, %v2789_v62 }
0x138c   :  { %v2792_v41 = vrot.slane %v2790_v40, 1  ;;  %v2793_v2 = vrot.slane %v2791_v63, 1  ;;  %v2796_v52 = vrot.slane %v2790_v40, 7  ;;  %v2797_v3 = vrot.slane %v2791_v63, 7 }
0x138e   :  { %v2794_v54 = vmul.f32 %v3969_v48, %v2792_v41  ;;  %v2795_v42 = vmul.f32 %v3969_v48, %v2793_v2  ;;  %v2798_v43 = vmul.f32 %v2796_v52, %v3972_v53  ;;  %v2799_v4 = vmul.f32 %v2797_v3, %v3972_v53  ;;  %v2819_v53 = vld [vmem:[%s5344_s18] sm:$0xff]  ;;  %v3513_v2 = vld [vmem:[%s5415_s30 + $0x10] sm:$0x3] }
0x138f   :  { %v2998_v52 = vperm.slane %v3513_v2, 0  ;;  %v2999_v3 = vperm.slane %v3513_v2, 1 }
0x1390   :  { %v2800_v5 = vadd.f32 %v2798_v43, %v2794_v54  ;;  %v2801_v6 = vadd.f32 %v2799_v4, %v2795_v42 }
0x1392   :  { %v2802_v7 = vadd.f32 %v2800_v5, %v2790_v40  ;;  %v2803_v9 = vadd.f32 %v2801_v6, %v2791_v63  ;;  %v3025_v63 = vld [vmem:[%s5347_s21] sm:$0xff]  ;;  %s5460_s21 = sld [smem:[#allocation27_spill]] }
0x1394   :  { %v2804_v57 = vadd.f32 %v2803_v9, %v2802_v7  ;;  %v3512_v7 = vld [vmem:[%s5415_s30 + $0xe] sm:$0x3]  ;;  %v3511_v9 = vld [vmem:[%s5415_s30 + $0xc] sm:$0x3] }
0x1396   :  { %2805 = vadd.xlane.f32.xlu1 %v2804_v57  ;;  %v2982_v57 = vperm.slane %v3512_v7, 0 }
0x1409   :  { %v2806_v11 = vpop.xlane.xlu1 %2805 }
0x140a   :  { %v2807_v13 = vmul.f32 0.001953125, %v2806_v11  ;;  %v2983_v11 = vperm.slane %v3512_v7, 1 }
0x140c   :  { %v2808_v10 = vadd.f32 1e-06, %v2807_v13 }
0x140e   :  { %3607 = vrsqrt.f32 %v2808_v10  ;;  %vm2815_vm7 = vweird.f32 %v2808_v10 }
0x1414   :  { %v3608_v0 = vpop.eup %3607 }
0x1415   :  { %v2810_v16 = vmul.f32 %v3608_v0, %v2808_v10  ;;  %vm2816_vm6 = vweird.f32 %v3608_v0 }
0x1416   :  { %vm2817_vm2 = vmor %vm2815_vm7, %vm2816_vm6 }
0x1417   :  { %v2811_v18 = vmul.f32 %v3608_v0, %v2810_v16  ;;  %v2966_v16 = vperm.slane %v3511_v9, 0 }
0x1419   :  { %v2812_v19 = vmul.f32 0.5, %v2811_v18  ;;  %v2967_v18 = vperm.slane %v3511_v9, 1  ;;  %v3006_v9 = vld [vmem:[%s5346_s20] sm:$0xff] }
0x141b   :  { %v2813_v20 = vsub.f32 1.5, %v2812_v19 }
0x141d   :  { %v2814_v48 = vmul.f32 %v3608_v0, %v2813_v20 }
0x141f   :  { %v2818_v21 = vsel %vm2817_vm2, %v3608_v0, %v2814_v48 }
0x1420   :  { %v2820_v22 = vmul.f32 %v2819_v53, %v2818_v21 }
0x1422   :  { %2823 = vperm.xlu2 %3543, %v2820_v22  }
0x142a   :  { %2831 = vperm.xlu2 %3543, %v2828_v24   ;;  %v3510_v24 = vld [vmem:[%s5415_s30 + $0xa] sm:$0x3] }
0x147c   :  { %v2824_v27 = vpop.permute.xlu2 %2823 }
0x147d   :  { %v2826_v23 = vmul.f32 %v2824_v27, %v2788_v60  ;;  %v2827_v26 = vmul.f32 %v2824_v27, %v2789_v62 }
0x1484   :  { %v2832_v31 = vpop.permute.xlu2 %2831 }
0x1485   :  { %v2834_v32 = vadd.f32 %v2832_v31, %v2826_v23  ;;  %v2835_v30 = vadd.f32 %v2832_v31, %v2827_v26  ;;  %v2950_v26 = vperm.slane %v3510_v24, 0  ;;  %v2951_v31 = vperm.slane %v3510_v24, 1 }
0x1487   :  { %v3505_v46 = vmul.f32 -1.442695, %v2834_v32  ;;  %v3506_v33 = vmul.f32 -1.442695, %v2835_v30 }
0x1489   :  { %3609 = vpow2.f32 %v3505_v46 }
0x148a   :  { %3611 = vpow2.f32 %v3506_v33 }
0x148f   :  { %v3610_v34 = vpop.eup %3609 }
0x1490   :  { %v3612_v17 = vpop.eup %3611  ;;  %v2842_v35 = vadd.f32 1.0, %v3610_v34 }
0x1491   :  { %v2843_v1 = vadd.f32 1.0, %v3612_v17 }
0x1492   :  { %3613 = vrcp.f32 %v2842_v35  ;;  %v2855_v47 = vand.u32 2147483648, %v2842_v35  ;;  %v2853_v51 = vand.u32 2147483647, %v2842_v35  ;;  %vm2849_vm5 = vweird.f32 %v2842_v35 }
0x1493   :  { %3615 = vrcp.f32 %v2843_v1  ;;  %v2870_v8 = vand.u32 2147483648, %v2843_v1  ;;  %v2868_v58 = vand.u32 2147483647, %v2843_v1  ;;  %vm2864_vm1 = vweird.f32 %v2843_v1 }
0x1494   :  { %v2856_v28 = vor.u32 1.1754944e-38, %v2855_v47  ;;  %vm2854_vm6 = vcmp.eq.f32.partialorder %v2853_v51, 8.507059e+37  ;;  %v3508_v51 = vld [vmem:[%s5415_s30 + $0x4] sm:$0x3] }
0x1495   :  { %v2871_v45 = vor.u32 1.1754944e-38, %v2870_v8  ;;  %vm2869_vm2 = vcmp.eq.f32.partialorder %v2868_v58, 8.507059e+37  ;;  %v3507_v8 = vld [vmem:[%s5415_s30 + $0x2] sm:$0x3]  ;;  %v2917_v58 = vperm.slane %v3508_v51, 1 }
0x1498   :  { %v3614_v25 = vpop.eup %3613 }
0x1499   :  { %v3616_v36 = vpop.eup %3615  ;;  %v2845_v38 = vmul.f32 %v3614_v25, %v2842_v35  ;;  %vm2850_vm3 = vweird.f32 %v3614_v25  ;;  %v3509_v35 = vld [vmem:[%s5415_s30 + $0x6] sm:$0x3] }
0x149a   :  { %v2860_v39 = vmul.f32 %v3616_v36, %v2843_v1  ;;  %vm2865_vm4 = vweird.f32 %v3616_v36  ;;  %vm2851_vm0 = vmor %vm2849_vm5, %vm2850_vm3  ;;  %vm5455_vm3 = vcmask 588800  }
0x149b   :  { %v2846_v44 = vsub.f32 1.0, %v2845_v38  ;;  %vm2866_vm7 = vmor %vm2864_vm1, %vm2865_vm4 }
0x149c   :  { %v2861_v49 = vsub.f32 1.0, %v2860_v39  ;;  %vm5456_vm4 = vmmov %vm5455_vm3 }
0x149d   :  { %v2847_v50 = vmul.f32 %v3614_v25, %v2846_v44 }
0x149e   :  { %v2862_v61 = vmul.f32 %v3616_v36, %v2861_v49 }
0x149f   :  { %v2848_v14 = vadd.f32 %v3614_v25, %v2847_v50 }
0x14a0   :  { %v2863_v29 = vadd.f32 %v3616_v36, %v2862_v61  ;;  %v2916_v61 = vperm.slane %v3508_v51, 0  ;;  %v3291_v51 = vld [vmem:[%s5441_s7 + $0x70] sm:$0xff] }
0x14a1   :  { %v2852_v37 = vsel %vm2851_vm0, %v3614_v25, %v2848_v14  ;;  %v2932_v25 = vperm.slane %v3509_v35, 0  ;;  %v2900_v14 = vperm.slane %v3507_v8, 0 }
0x14a2   :  { %v2857_v55 = vsel %vm2854_vm6, %v2856_v28, %v2852_v37  ;;  %v2867_v59 = vsel %vm2866_vm7, %v3616_v36, %v2863_v29  ;;  %v2933_v36 = vperm.slane %v3509_v35, 1  ;;  %v2901_v28 = vperm.slane %v3507_v8, 1  ;;  %v3307_v8 = vld [vmem:[%s5441_s7 + $0xf0] sm:$0xff] }
0x14a3   :  { %v2872_v60 = vsel %vm2869_vm2, %v2871_v45, %v2867_v59  ;;  %v5008_v62 = vmul.f32 %v2857_v55, %v2834_v32 }
0x14a4   :  { %v5010_v40 = vmul.f32 %v2872_v60, %v2835_v30 }
0x14a5   :  { %2958 = vrot.lane.b32.xlu1 %v5008_v62, %s5424_s27  ;;  %2990 = vrot.lane.b32.xlu2 %v5008_v62, %s5428_s12 }
0x14a6   :  { %2976 = vrot.lane.b32.xlu0 %v5010_v40, %s5420_s0 }
0x14ad   :  { %2908 = vrot.lane.b32.xlu1 %v5008_v62, %s5421_s10  ;;  %2992 = vrot.lane.b32.xlu2 %v5010_v40, %s5428_s12 }
0x14ae   :  { %2944 = vrot.lane.b32.xlu0 %v5010_v40, %s5426_s25 }
0x14b5   :  { %2894 = vrot.lane.b32.xlu1 %v5010_v40, %s5425_s24  ;;  %2974 = vrot.lane.b32.xlu2 %v5008_v62, %s5420_s0 }
0x14b6   :  { %2926 = vrot.lane.b32.xlu0 %v5010_v40, %s5422_s2 }
0x14bd   :  { %3028 = vperm.xlu1 %3542, %v3025_v63   ;;  %2960 = vrot.lane.b32.xlu2 %v5010_v40, %s5424_s27 }
0x14be   :  { %2892 = vrot.lane.b32.xlu0 %v5008_v62, %s5425_s24 }
0x14c5   :  { %2942 = vrot.lane.b32.xlu2 %v5008_v62, %s5426_s25 }
0x14c6   :  { %2878 = vrot.lane.b32.xlu0 %v5010_v40, %s5423_s5 }
0x14cd   :  { %2924 = vrot.lane.b32.xlu2 %v5008_v62, %s5422_s2 }
0x14d5   :  { %2910 = vrot.lane.b32.xlu2 %v5010_v40, %s5421_s10 }
0x14dd   :  { %2876 = vrot.lane.b32.xlu2 %v5008_v62, %s5423_s5 }
0x14ff   :  { %v2991_v41 = vpop.permute.xlu2 %2990 }
0x1507   :  { %v2993_v54 = vpop.permute.xlu2 %2992 }
0x1508   :  { %v2994_v42 = vsel %vm390_vm13, %v2991_v41, %v2993_v54  ;;  %v2995_v43 = vsel %vm390_vm13, %v2993_v54, %v2991_v41 }
0x1509   :  { %v3002_v4 = vmul.f32 %v2998_v52, %v2994_v42  ;;  %v3003_v5 = vmul.f32 %v2999_v3, %v2995_v43  ;;  %v2882_v52 = vld [vmem:[%s5415_s30] sm:$0x3] }
0x150a   :  { %v2884_v3 = vperm.slane %v2882_v52, 0  ;;  %v2885_v54 = vperm.slane %v2882_v52, 1 }
0x150b   :  { %3041 = vmatpush.msrb.mxu0 %v3002_v4  ;;  %3061 = vmatpush.msrb.mxu1 %v3003_v5 }
0x150f   :  { %v2975_v6 = vpop.permute.xlu2 %2974 }
0x1517   :  { %v2959_v13 = vpop.permute.xlu1 %2958  ;;  %v2961_v10 = vpop.permute.xlu2 %2960 }
0x1518   :  { %v2977_v0 = vpop.permute.xlu0 %2976  ;;  %v2962_v48 = vsel %vm338_vm12, %v2959_v13, %v2961_v10  ;;  %v2963_v53 = vsel %vm338_vm12, %v2961_v10, %v2959_v13 }
0x1519   :  { %v2978_v19 = vsel %vm361_vm11, %v2975_v6, %v2977_v0  ;;  %v2979_v20 = vsel %vm361_vm11, %v2977_v0, %v2975_v6  ;;  %v2970_v27 = vmul.f32 %v2966_v16, %v2962_v48  ;;  %v2971_v23 = vmul.f32 %v2967_v18, %v2963_v53  ;;  %v3521_v48 = vld [vmem:[%s5415_s30 + $0xe] sm:$0x3] }
0x151a   :  { %v2986_v21 = vmul.f32 %v2982_v57, %v2978_v19  ;;  %v2987_v22 = vmul.f32 %v2983_v11, %v2979_v20  ;;  %v3522_v20 = vld [vmem:[%s5415_s30 + $0x10] sm:$0x3]  ;;  %v3186_v24 = vperm.slane %v3521_v48, 1 }
0x151b   :  { %v3201_v53 = vperm.slane %v3522_v20, 0 }
0x151c   :  { %3042 = vmatpush.msrb.mxu0 %v2986_v21  ;;  %3062 = vmatpush.msrb.mxu1 %v2987_v22  ;;  %v3202_v21 = vperm.slane %v3522_v20, 1  ;;  %v3185_v22 = vperm.slane %v3521_v48, 0  ;;  %v3301_v48 = vld [vmem:[%s5441_s7 + $0xc0] sm:$0xff] }
0x151e   :  { %3043 = vmatpush.msrb.mxu0 %v2970_v27  ;;  %3063 = vmatpush.msrb.mxu1 %v2971_v23 }
0x151f   :  { %v2943_v32 = vpop.permute.xlu2 %2942  ;;  %v2909_v1 = vpop.permute.xlu1 %2908 }
0x1520   :  { %v2945_v30 = vpop.permute.xlu0 %2944 }
0x1521   :  { %v2946_v46 = vsel %vm309_vm10, %v2943_v32, %v2945_v30  ;;  %v2947_v33 = vsel %vm309_vm10, %v2945_v30, %v2943_v32 }
0x1522   :  { %v2954_v34 = vmul.f32 %v2950_v26, %v2946_v46  ;;  %v2955_v17 = vmul.f32 %v2951_v31, %v2947_v33 }
0x1524   :  { %3044 = vmatpush.msrb.mxu0 %v2954_v34  ;;  %3064 = vmatpush.msrb.mxu1 %v2955_v17 }
0x1526   :  { %3045 = vmatpush.msrb.mxu0 %v5008_v62  ;;  %3065 = vmatpush.msrb.mxu1 %v5010_v40 }
0x1527   :  { %v2925_v38 = vpop.permute.xlu2 %2924  ;;  %v2895_v37 = vpop.permute.xlu1 %2894 }
0x1528   :  { %v2927_v39 = vpop.permute.xlu0 %2926 }
0x1529   :  { %v2928_v44 = vsel %vm273_vm9, %v2925_v38, %v2927_v39  ;;  %v2929_v47 = vsel %vm273_vm9, %v2927_v39, %v2925_v38 }
0x152a   :  { %v2936_v49 = vmul.f32 %v2932_v25, %v2929_v47  ;;  %v2937_v50 = vmul.f32 %v2933_v36, %v2928_v44  ;;  %v3292_v44 = vld [vmem:[%s5441_s7 + $0x78] sm:$0xff] }
0x152b   :  { %v3308_v47 = vld [vmem:[%s5441_s7 + $0xf8] sm:$0xff] }
0x152c   :  { %3046 = vmatpush.msrb.mxu0 %v2936_v49  ;;  %3066 = vmatpush.msrb.mxu1 %v2937_v50 }
0x152f   :  { %v2911_v29 = vpop.permute.xlu2 %2910  ;;  %v3029_v57 = vpop.permute.xlu1 %3028 }
0x1530   :  { %v2893_v45 = vpop.permute.xlu0 %2892  ;;  %v2912_v55 = vsel %vm250_vm14, %v2909_v1, %v2911_v29  ;;  %v2913_v59 = vsel %vm250_vm14, %v2911_v29, %v2909_v1  ;;  %v3520_v1 = vld [vmem:[%s5415_s30 + $0xc] sm:$0x3] }
0x1531   :  { %v2896_v60 = vsel %vm221_vm8, %v2893_v45, %v2895_v37  ;;  %v2897_v62 = vsel %vm221_vm8, %v2895_v37, %v2893_v45  ;;  %v2920_v40 = vmul.f32 %v2916_v61, %v2913_v59  ;;  %v2921_v63 = vmul.f32 %v2917_v58, %v2912_v55  ;;  %v3519_v37 = vld [vmem:[%s5415_s30 + $0xa] sm:$0x3]  ;;  %v3518_v45 = vld [vmem:[%s5415_s30 + $0x6] sm:$0x3] }
0x1532   :  { %v2904_v41 = vmul.f32 %v2900_v14, %v2897_v62  ;;  %v2905_v2 = vmul.f32 %v2901_v28, %v2896_v60  ;;  %v3169_v25 = vperm.slane %v3520_v1, 0  ;;  %v3170_v36 = vperm.slane %v3520_v1, 1  ;;  %v3290_v14 = vld [vmem:[%s5441_s7 + $0x68] sm:$0xff]  ;;  %v3289_v55 = vld [vmem:[%s5441_s7 + $0x60] sm:$0xff] }
0x1533   :  { %3047 = vmatpush.msrb.mxu0 %v2920_v40  ;;  %3067 = vmatpush.msrb.mxu1 %v2921_v63  ;;  %v3306_v28 = vld [vmem:[%s5441_s7 + $0xe8] sm:$0xff]  ;;  %v3305_v59 = vld [vmem:[%s5441_s7 + $0xe0] sm:$0xff]  ;;  %v3153_v60 = vperm.slane %v3519_v37, 0  ;;  %v3154_v62 = vperm.slane %v3519_v37, 1  ;;  %v3135_v40 = vperm.slane %v3518_v45, 0  ;;  %v3288_v63 = vld [vmem:[%s5441_s7 + $0x58] sm:$0xff] }
0x1534   :  { %v3295_v37 = vld [vmem:[%s5441_s7 + $0x90] sm:$0xff] }
0x1535   :  { %3048 = vmatpush.msrb.mxu0 %v2904_v41  ;;  %3068 = vmatpush.msrb.mxu1 %v2905_v2  ;;  %v3136_v41 = vperm.slane %v3518_v45, 1  ;;  %v3304_v2 = vld [vmem:[%s5441_s7 + $0xd8] sm:$0xff] }
0x1537   :  { %v2877_v42 = vpop.permute.xlu2 %2876 }
0x1538   :  { %v2879_v43 = vpop.permute.xlu0 %2878 }
0x1539   :  { %v2880_v4 = vsel %vm199_vm15, %v2877_v42, %v2879_v43  ;;  %v2881_v5 = vsel %vm199_vm15, %v2879_v43, %v2877_v42 }
0x153a   :  { %v2888_v6 = vmul.f32 %v2884_v3, %v2881_v5  ;;  %v2889_v7 = vmul.f32 %v2885_v54, %v2880_v4  ;;  %v3287_v54 = vld [vmem:[%s5441_s7 + $0x50] sm:$0xff] }
0x153c   :  { %3049 = vmatpush.msrb.mxu0 %v2888_v6  ;;  %3069 = vmatpush.msrb.mxu1 %v2889_v7 }
0x153d   :  { %3514 = vmatmul.msk.f32.vlgmr.msrb.gmra.mxu0 %vm5455_vm3, %v3006_v9  ;;  %3515 = vmatmul.msk.f32.vlgmr.msrb.gmra.mxu1 %vm5456_vm4, %v3006_v9 }
0x153e   :  { %3309 = vmatpush.msra.mxu0 %v3292_v44  ;;  %3329 = vmatpush.msra.mxu1 %v3308_v47 }
0x1540   :  { %3310 = vmatpush.msra.mxu0 %v3291_v51  ;;  %3330 = vmatpush.msra.mxu1 %v3307_v8 }
0x1542   :  { %3311 = vmatpush.msra.mxu0 %v3290_v14  ;;  %3331 = vmatpush.msra.mxu1 %v3306_v28 }
0x1544   :  { %3312 = vmatpush.msra.mxu0 %v3289_v55  ;;  %3332 = vmatpush.msra.mxu1 %v3305_v59  ;;  %v3278_v55 = vld [vmem:[%s5441_s7 + $0x8] sm:$0xff] }
0x1545   :  { %v3294_v59 = vld [vmem:[%s5441_s7 + $0x88] sm:$0xff] }
0x1546   :  { %3313 = vmatpush.msra.mxu0 %v3288_v63  ;;  %3333 = vmatpush.msra.mxu1 %v3304_v2 }
0x1548   :  { %3314 = vmatpush.msra.mxu0 %v3287_v54 }
0x15ba   :  { %v3051_v11 = vpop.f32.mrf.mxu0  ;;  %v3071_v13 = vpop.f32.mrf.mxu1 }
0x15bb   :  { %v3052_v10 = vadd.f32 %v3051_v11, %v3029_v57  ;;  %v3072_v0 = vadd.f32 %v3071_v13, %v3029_v57  ;;  %v3303_v57 = vld [vmem:[%s5441_s7 + $0xd0] sm:$0xff]  ;;  %v3286_v11 = vld [vmem:[%s5441_s7 + $0x48] sm:$0xff] }
0x15bc   :  { %3334 = vmatpush.msra.mxu1 %v3303_v57  ;;  %3315 = vmatpush.msra.mxu0 %v3286_v11 }
0x15bd   :  { %v5111_v16 = vadd.f32 %v3052_v10, %v4861_v56  ;;  %v5114_v18 = vadd.f32 %v3072_v0, %v4863_v15  ;;  %v3228_v56 = vld [vmem:[%s5442_s13] sm:$0xff]  ;;  %v3302_v0 = vld [vmem:[%s5441_s7 + $0xc8] sm:$0xff] }
0x15be   :  { %v3517_v10 = vld [vmem:[%s5415_s30 + $0x4] sm:$0x3]  ;;  %3335 = vmatpush.msra.mxu1 %v3302_v0 }
0x15bf   :  { %3077 = vst [vmem:[#allocation5 + $0x10] sm:$0xff] %v5111_v16  ;;  %3195 = vrot.lane.b32.xlu0 %v5114_v18, %s5428_s12  ;;  %3177 = vrot.lane.b32.xlu1 %v5111_v16, %s5420_s0  ;;  %v3120_v20 = vperm.slane %v3517_v10, 1 }
0x15c0   :  { %3143 = vst [vmem:[#allocation2 + $0x88] sm:$0xff] %v5111_v16  ;;  %3193 = vrot.lane.b32.xlu2 %v5111_v16, %s5428_s12  ;;  %3336 = vmatpush.msra.mxu1 %v3301_v48  ;;  %s3705_s12 = smov 256  }
0x15c1   :  { %3078 = vst [vmem:[#allocation5 + $0x18] sm:$0xff] %v5114_v18 }
0x15c2   :  { %3144 = vst [vmem:[#allocation2 + $0x40] sm:$0xff] %v5114_v18 }
0x15c7   :  { %3161 = vrot.lane.b32.xlu0 %v5111_v16, %s5424_s27  ;;  %3163 = vrot.lane.b32.xlu1 %v5114_v18, %s5424_s27 }
0x15c8   :  { %3179 = vrot.lane.b32.xlu2 %v5114_v18, %s5420_s0 }
0x15cf   :  { %3147 = vrot.lane.b32.xlu0 %v5114_v18, %s5426_s25  ;;  %3127 = vrot.lane.b32.xlu1 %v5111_v16, %s5422_s2 }
0x15d0   :  { %3145 = vrot.lane.b32.xlu2 %v5111_v16, %s5426_s25  ;;  %s3704_s25 = smov [#allocation5]  }
0x15d1   :  { %s3368_s27 = sshll.u32 %s3704_s25, 4  ;;  %s3369_s27 = int_to_ptr.vmem [resolvable:$true] %s3368_s27 }
0x15d7   :  { %3111 = vrot.lane.b32.xlu0 %v5111_v16, %s5421_s10  ;;  %3113 = vrot.lane.b32.xlu1 %v5114_v18, %s5421_s10 }
0x15d8   :  { %3129 = vrot.lane.b32.xlu2 %v5114_v18, %s5422_s2  ;;  %s5459_s2 = sld [smem:[#allocation28_spill]] }
0x15df   :  { %3097 = vrot.lane.b32.xlu0 %v5114_v18, %s5425_s24  ;;  %3079 = vrot.lane.b32.xlu1 %v5111_v16, %s5423_s5 }
0x15e0   :  { %3095 = vrot.lane.b32.xlu2 %v5111_v16, %s5425_s24 }
0x15e7   :  { %3231 = vperm.xlu0 %3544, %v3228_v56   ;;  %v3285_v56 = vld [vmem:[%s5441_s7 + $0x40] sm:$0xff] }
0x15e8   :  { %3081 = vrot.lane.b32.xlu2 %v5114_v18, %s5423_s5  ;;  %3316 = vmatpush.msra.mxu0 %v3285_v56  ;;  %s3370_s5 = sshll.u32 %s5459_s2, 4  ;;  %s3371_s5 = int_to_ptr.hbm [resolvable:$true] %s3370_s5 }
0x15e9   :  { %3376 = dma.vmem_to_hbm [thread:$0]  %s3369_s27, 512, %s3371_s5, [#allocation6], %s3705_s12, %s3705_s12, %s5425_s24  }
0x161a   :  { %v3194_v15 = vpop.permute.xlu2 %3193 }
0x1622   :  { %v3180_v19 = vpop.permute.xlu2 %3179 }
0x162a   :  { %v3146_v26 = vpop.permute.xlu2 %3145 }
0x1631   :  { %v3196_v27 = vpop.permute.xlu0 %3195  ;;  %v3178_v23 = vpop.permute.xlu1 %3177 }
0x1632   :  { %v3197_v31 = vsel %vm390_vm13, %v3194_v15, %v3196_v27  ;;  %v3198_v32 = vsel %vm390_vm13, %v3196_v27, %v3194_v15  ;;  %v3181_v30 = vsel %vm361_vm11, %v3178_v23, %v3180_v19  ;;  %v3182_v46 = vsel %vm361_vm11, %v3180_v19, %v3178_v23  ;;  %v3130_v29 = vpop.permute.xlu2 %3129 }
0x1633   :  { %v3205_v33 = vmul.f32 %v3201_v53, %v3197_v31  ;;  %v3206_v34 = vmul.f32 %v3202_v21, %v3198_v32  ;;  %v3189_v17 = vmul.f32 %v3185_v22, %v3181_v30  ;;  %v3190_v35 = vmul.f32 %v3186_v24, %v3182_v46  ;;  %v3284_v53 = vld [vmem:[%s5441_s7 + $0x38] sm:$0xff]  ;;  %v3299_v31 = vld [vmem:[%s5441_s7 + $0xb0] sm:$0xff]  ;;  %v3282_v32 = vld [vmem:[%s5441_s7 + $0x28] sm:$0xff] }
0x1634   :  { %v3119_v19 = vperm.slane %v3517_v10, 0  ;;  %3317 = vmatpush.msra.mxu0 %v3284_v53  ;;  %v3516_v30 = vld [vmem:[%s5415_s30 + $0x2] sm:$0x3]  ;;  %v3085_v46 = vld [vmem:[%s5415_s30] sm:$0x3]  ;;  %s3357_s30 = sshll.u32 %s5460_s21, 4  ;;  %s3358_s30 = int_to_ptr.hbm [resolvable:$true] %s3357_s30 }
0x1635   :  { %3244 = vmatpush.msra.mxu2 %v3205_v33  ;;  %3264 = vmatpush.msra.mxu3 %v3206_v34  ;;  %v3298_v33 = vld [vmem:[%s5441_s7 + $0xa8] sm:$0xff]  ;;  %v3281_v34 = vld [vmem:[%s5441_s7 + $0x20] sm:$0xff]  ;;  %v3087_v1 = vperm.slane %v3085_v46, 0 }
0x1636   :  { %3363 = dma.vmem_to_hbm [thread:$0]  %s3356_s14, 512, %s3358_s30, [#allocation4], %s3705_s12, %s3705_s12, %s5425_s24  }
0x1637   :  { %3245 = vmatpush.msra.mxu2 %v3189_v17  ;;  %3265 = vmatpush.msra.mxu3 %v3190_v35  ;;  %v3103_v17 = vperm.slane %v3516_v30, 0  ;;  %v3104_v35 = vperm.slane %v3516_v30, 1 }
0x1639   :  { %v3162_v38 = vpop.permute.xlu0 %3161  ;;  %v3164_v39 = vpop.permute.xlu1 %3163 }
0x163a   :  { %v3165_v49 = vsel %vm338_vm12, %v3162_v38, %v3164_v39  ;;  %v3166_v50 = vsel %vm338_vm12, %v3164_v39, %v3162_v38  ;;  %v3096_v15 = vpop.permute.xlu2 %3095  ;;  %v3088_v38 = vperm.slane %v3085_v46, 1  ;;  %v3280_v39 = vld [vmem:[%s5441_s7 + $0x18] sm:$0xff] }
0x163b   :  { %v3173_v61 = vmul.f32 %v3169_v25, %v3165_v49  ;;  %v3174_v58 = vmul.f32 %v3170_v36, %v3166_v50  ;;  %v3297_v25 = vld [vmem:[%s5441_s7 + $0xa0] sm:$0xff]  ;;  %v3296_v49 = vld [vmem:[%s5441_s7 + $0x98] sm:$0xff] }
0x163d   :  { %3246 = vmatpush.msra.mxu2 %v3173_v61  ;;  %3266 = vmatpush.msra.mxu3 %v3174_v58 }
0x1641   :  { %v3148_v52 = vpop.permute.xlu0 %3147  ;;  %v3128_v3 = vpop.permute.xlu1 %3127 }
0x1642   :  { %v3149_v42 = vsel %vm309_vm10, %v3146_v26, %v3148_v52  ;;  %v3150_v43 = vsel %vm309_vm10, %v3148_v52, %v3146_v26  ;;  %v3131_v4 = vsel %vm273_vm9, %v3128_v3, %v3130_v29  ;;  %v3132_v5 = vsel %vm273_vm9, %v3130_v29, %v3128_v3  ;;  %v3082_v36 = vpop.permute.xlu2 %3081  ;;  %v3279_v29 = vld [vmem:[%s5441_s7 + $0x10] sm:$0xff]  ;;  %vm5458_vm9 = vmmov %vm5455_vm3 }
0x1643   :  { %v3157_v6 = vmul.f32 %v3153_v60, %v3149_v42  ;;  %v3158_v7 = vmul.f32 %v3154_v62, %v3150_v43  ;;  %v3139_v9 = vmul.f32 %v3135_v40, %v3132_v5  ;;  %v3140_v13 = vmul.f32 %v3136_v41, %v3131_v4  ;;  %v3277_v60 = vld [vmem:[%s5441_s7] sm:$0xff] }
0x1644   :  { %v3293_v62 = vld [vmem:[%s5441_s7 + $0x80] sm:$0xff]  ;;  %vm5462_vm10 = vcmask 523264  }
0x1645   :  { %3247 = vmatpush.msra.mxu2 %v3157_v6  ;;  %3267 = vmatpush.msra.mxu3 %v3158_v7  ;;  %3141 = vst [vmem:[#allocation2 + $0x70] sm:$0xff] %v3139_v9 }
0x1646   :  { %3142 = vst [vmem:[#allocation2 + $0x80] sm:$0xff] %v3140_v13 }
0x1647   :  { %3248 = vmatpush.msra.mxu2 %v5111_v16  ;;  %3268 = vmatpush.msra.mxu3 %v5114_v18  ;;  %v3300_v16 = vld [vmem:[%s5441_s7 + $0xb8] sm:$0xff]  ;;  %v3283_v18 = vld [vmem:[%s5441_s7 + $0x30] sm:$0xff] }
0x1648   :  { %3337 = vmatpush.msra.mxu1 %v3300_v16  ;;  %3318 = vmatpush.msra.mxu0 %v3283_v18 }
0x1649   :  { %v3112_v21 = vpop.permute.xlu0 %3111  ;;  %v3114_v22 = vpop.permute.xlu1 %3113  ;;  %3249 = vmatpush.msra.mxu2 %v3139_v9  ;;  %3269 = vmatpush.msra.mxu3 %v3140_v13 }
0x164a   :  { %v3115_v24 = vsel %vm250_vm14, %v3112_v21, %v3114_v22  ;;  %v3116_v27 = vsel %vm250_vm14, %v3114_v22, %v3112_v21  ;;  %3338 = vmatpush.msra.mxu1 %v3299_v31  ;;  %3319 = vmatpush.msra.mxu0 %v3282_v32 }
0x164b   :  { %v3123_v23 = vmul.f32 %v3119_v19, %v3116_v27  ;;  %v3124_v26 = vmul.f32 %v3120_v20, %v3115_v24 }
0x164c   :  { %3339 = vmatpush.msra.mxu1 %v3298_v33  ;;  %3320 = vmatpush.msra.mxu0 %v3281_v34 }
0x164d   :  { %3125 = vst [vmem:[#allocation2 + $0x20] sm:$0xff] %v3123_v23  ;;  %3250 = vmatpush.msra.mxu2 %v3123_v23  ;;  %3270 = vmatpush.msra.mxu3 %v3124_v26 }
0x164e   :  { %3126 = vst [vmem:[#allocation2 + $0x8] sm:$0xff] %v3124_v26  ;;  %3340 = vmatpush.msra.mxu1 %v3297_v25  ;;  %3321 = vmatpush.msra.mxu0 %v3280_v39 }
0x1650   :  { %3341 = vmatpush.msra.mxu1 %v3296_v49  ;;  %3322 = vmatpush.msra.mxu0 %v3279_v29 }
0x1651   :  { %v3098_v44 = vpop.permute.xlu0 %3097  ;;  %v3080_v47 = vpop.permute.xlu1 %3079 }
0x1652   :  { %v3099_v50 = vsel %vm221_vm8, %v3096_v15, %v3098_v44  ;;  %v3100_v51 = vsel %vm221_vm8, %v3098_v44, %v3096_v15  ;;  %v3083_v8 = vsel %vm199_vm15, %v3080_v47, %v3082_v36  ;;  %v3084_v61 = vsel %vm199_vm15, %v3082_v36, %v3080_v47  ;;  %3342 = vmatpush.msra.mxu1 %v3295_v37  ;;  %vm5457_vm8 = vmmov %vm5455_vm3 }
0x1653   :  { %v3107_v58 = vmul.f32 %v3103_v17, %v3100_v51  ;;  %v3108_v14 = vmul.f32 %v3104_v35, %v3099_v50  ;;  %v3091_v28 = vmul.f32 %v3087_v1, %v3084_v61  ;;  %v3092_v45 = vmul.f32 %v3088_v38, %v3083_v8  ;;  %3323 = vmatpush.msra.mxu0 %v3278_v55 }
0x1654   :  { %3343 = vmatpush.msra.mxu1 %v3294_v59 }
0x1655   :  { %3109 = vst [vmem:[#allocation2 + $0x78] sm:$0xff] %v3107_v58  ;;  %3251 = vmatpush.msra.mxu2 %v3107_v58  ;;  %3271 = vmatpush.msra.mxu3 %v3108_v14 }
0x1656   :  { %3110 = vst [vmem:[#allocation2 + $0x58] sm:$0xff] %v3108_v14  ;;  %3324 = vmatpush.msra.mxu0 %v3277_v60  ;;  %3344 = vmatpush.msra.mxu1 %v3293_v62 }
0x1657   :  { %3093 = vst [vmem:[#allocation2] sm:$0xff] %v3091_v28  ;;  %3252 = vmatpush.msra.mxu2 %v3091_v28  ;;  %3272 = vmatpush.msra.mxu3 %v3092_v45 }
0x1658   :  { %3094 = vst [vmem:[#allocation2 + $0x38] sm:$0xff] %v3092_v45  ;;  %3523 = vmatmul.msk.f32.vlgmr.msra.gmra.mxu2 %vm5457_vm8, %v3209_v12  ;;  %3524 = vmatmul.msk.f32.vlgmr.msra.gmra.mxu3 %vm5458_vm9, %v3209_v12 }
0x1659   :  { %v3232_v40 = vpop.permute.xlu0 %3231 }
0x16db   :  { %v3254_v63 = vpop.f32.mrf.mxu2  ;;  %v3274_v41 = vpop.f32.mrf.mxu3 }
0x16dc   :  { %v3255_v2 = vadd.f32 %v3254_v63, %v3232_v40  ;;  %v3275_v52 = vadd.f32 %v3274_v41, %v3232_v40 }
0x16de   :  { %3325 = vmatmul.f32.vlgmr.msra.gmra.mxu0 %v3255_v2  ;;  %3345 = vmatmul.f32.vlgmr.msra.gmra.mxu1 %v3275_v52 }
0x175b   :  { %v3326_v3 = vpop.f32.mrf.mxu0  ;;  %v3346_v54 = vpop.f32.mrf.mxu1 }
0x175c   :  { %v3347_v42 = vadd.f32 %v3346_v54, %v3326_v3 }
0x175e   :  { %3350 = vst.msk [vmem:[#allocation7 + $0x8] sm:$0xff] %vm5462_vm10, %v3347_v42 }
0x175f   :  { %3389 = dma.vmem_to_hbm [thread:$0]  %s3382_s11, 256, %s3384_s8, [#allocation6], %s3708_s26, %s3708_s26, %s3709_s15  }
0x1760   :  { %3689 = dma.done.wait [#allocation4], 512  }
0x1761   :  { %3690 = vsyncadd [#allocation4], 4294966784 }
0x1762   :  { %3691 = dma.done.wait [#allocation6], 768  }
0x1763   :  { %3692 = vsyncadd [#allocation6], 4294966528 }
0x1764   :  { %3402 = vsyncpa [#allocation4], 1 }
0x1765   :  { %3403 = vsyncpa [#allocation6], 1 }

</bundles_post_ra>
